<compile_context>
chip_gen: v6e
topology: v6e:2x2x1
jax: 0.10.0
libtpu: 0.0.40
codegen_flags: <defaults>
</compile_context>

<pallas_src>
import math
import jax
import jax.numpy as jnp
from jax.experimental import pallas as pl
from jax.experimental.pallas import tpu as pltpu

# ----------------------------- config (stand-in for `args`) -----------------------------
D_MODEL    = 256          # encoder_layer.d_model
FEAT_DIM   = 256          # args.feat_dim
NUM_MLP    = 3            # args.num_mlp
NUM_LAYERS = 3            # <=3 so the skipcn/record_out branches never fire
NUM_HEADS  = 2
HEAD_DIM   = D_MODEL // NUM_HEADS
DIM_FF     = 512
PRED_HID   = 1024
PRED_MID   = 512
PRED_PAD   = 128          # lane-dense padded predictor output; first 7 cols are valid
LN_EPS     = 1e-5         # torch.nn.LayerNorm default


# ------------------------------------ kernel helpers ------------------------------------
def _bf(a):
    return a.astype(jnp.bfloat16)


def _layernorm(z, g, b):
    mu = jnp.mean(z, axis=-1, keepdims=True)
    var = jnp.mean(jnp.square(z - mu), axis=-1, keepdims=True)
    return (z - mu) * jax.lax.rsqrt(var + LN_EPS) * g + b


# ---------------------------------- fused forward kernel --------------------------------
def _fused_encoder_kernel(
    x_ref, pos_ref,                                   # (B, S, D) f32 activations
    wqk_ref, wv_ref, wo_ref, wf1_ref, wf2_ref,        # bf16, per-layer stacked (L, ...)
    lb512_ref, lvec_ref,                              # f32 packed per-layer biases / LN
    mlpw_ref, mlpv_ref,                               # bf16 (3,256,256) / f32 (3,3,256)
    pw1_ref, pwm_ref, pwo_ref, pvec_ref,              # predictor bf16 weights / f32 biases
    out_ref, pred_ref,                                # (B,S,D) f32 / (B,S,128) f32
):
    B, S, D = x_ref.shape
    f32 = jnp.float32
    scale = 1.0 / math.sqrt(HEAD_DIM)

    # Fold batch into the row (M) dimension: rows b*S .. (b+1)*S-1 belong to batch b.
    x = jnp.concatenate([x_ref[b] for b in range(B)], axis=0)       # (B*S, D) f32
    pos = jnp.concatenate([pos_ref[b] for b in range(B)], axis=0)

    # ----------------------- encoder layers, activations stay in vregs/VMEM -------------
    for l in range(NUM_LAYERS):
        b512 = lb512_ref[l]                         # (2, 512): row0 = bq|bk, row1 = bf1
        vec = lvec_ref[l]                           # (8, 256): bv,bo,bf2,g1,be1,g2,be2,pad
        bqk = b512[0:1, :]
        bff1 = b512[1:2, :]
        bv, bo, bff2 = vec[0:1, :], vec[1:2, :], vec[2:3, :]
        g1, be1 = vec[3:4, :], vec[4:5, :]
        g2, be2 = vec[5:6, :], vec[6:7, :]

        # fused Q|K projection on (x + pos); V on x; bf16 weights, f32 accumulation
        qk_in = _bf(x + pos)
        qk = jnp.dot(qk_in, wqk_ref[l], preferred_element_type=f32) + bqk     # (BS, 2D)
        v = jnp.dot(_bf(x), wv_ref[l], preferred_element_type=f32) + bv       # (BS, D)
        q = qk[:, 0:D]
        k = qk[:, D:2 * D]

        # Attention: static per-(batch, head) score/AV matmuls (tokens of different batch
        # elements must not attend to each other).  Output projection is folded per head
        # (attn_h @ Wo[h]) so no VMEM scratch round-trip is needed.
        attn = bo
        for h in range(NUM_HEADS):
            lo = h * HEAD_DIM
            rows = []
            for b in range(B):
                r0 = b * S
                qh = q[r0:r0 + S, lo:lo + HEAD_DIM]
                kh = k[r0:r0 + S, lo:lo + HEAD_DIM]
                vh = v[r0:r0 + S, lo:lo + HEAD_DIM]
                s = jax.lax.dot_general(qh, kh, (((1,), (1,)), ((), ())),
                                        preferred_element_type=f32) * scale
                s = s - jnp.max(s, axis=-1, keepdims=True)
                p = jnp.exp(s)
                p = p * pl.reciprocal(jnp.sum(p, axis=-1, keepdims=True), approx=True)
                rows.append(jnp.dot(p, vh, preferred_element_type=f32))
            ah = _bf(jnp.concatenate(rows, axis=0))                 # (BS, HEAD_DIM)
            attn = attn + jnp.dot(ah, wo_ref[l, lo:lo + HEAD_DIM, :],
                                  preferred_element_type=f32)
        x = _layernorm(x + attn, g1, be1)

        ff = jnp.maximum(jnp.dot(_bf(x), wf1_ref[l],
                                 preferred_element_type=f32) + bff1, 0.0)
        ff = jnp.dot(_bf(ff), wf2_ref[l], preferred_element_type=f32) + bff2
        x = _layernorm(x + ff, g2, be2)

    # encoder output in native (B, S, D) layout
    for b in range(B):
        out_ref[b] = x[b * S:(b + 1) * S, :]

    # ------- MLP + Predictor, executed once (only the last layer's pred is returned) ----
    f = x
    for m in range(NUM_MLP):
        mv = mlpv_ref[m]                            # (3, FEAT_DIM): bias, gamma, beta
        y = jnp.dot(_bf(f), mlpw_ref[m], preferred_element_type=f32) + mv[0:1, :]
        f = jnp.maximum(_layernorm(y, mv[1:2, :], mv[2:3, :]), 0.0)

    feat = jnp.maximum(jnp.dot(_bf(f), pw1_ref[...], preferred_element_type=f32)
                       + pvec_ref[0:1, :], 0.0)                               # (BS, 1024)
    mid = jnp.dot(_bf(feat), pwm_ref[...], preferred_element_type=f32) + pvec_ref[1:2, :]
    out128 = (jnp.dot(_bf(mid), pwo_ref[...], preferred_element_type=f32)
              + pvec_ref[2:3, 0:PRED_PAD])                                    # (BS, 128)

    # cols 0..2 = trans (tanh); cols 3..6 = quat (+bias folded, L2-normalized);
    # cols >= 7 have exactly-zero weights/bias so they stay zero.
    col = jax.lax.broadcasted_iota(jnp.int32, out128.shape, 1)
    quat = jnp.where(col >= 3, out128, 0.0)
    inv = jax.lax.rsqrt(1e-12 + jnp.sum(quat * quat, axis=-1, keepdims=True))
    pred = jnp.where(col < 3, jnp.tanh(out128), out128 * inv)
    for b in range(B):
        pred_ref[b] = pred[b * S:(b + 1) * S, :]


# ---------------------------------- module composition ----------------------------------
def transformer_encoder_forward(prepped, match_codes, cross, src, init_pred, ins_codes,
                                pos):
    # mode='fixed', norm=None, return_intermediate=False, shared_pred=True, all cats off.
    # match_codes / cross / init_pred / ins_codes are unused in this configuration
    # (kept for signature fidelity).
    # TODO(synk): reference also builds torch-normal noise2 / GRU decoder_hidden on .cuda();
    # they are only consumed in the ('relative', model_version=='autoreg2') branch, off here.
    S, B, D = src.shape
    x3 = jnp.transpose(src, (1, 0, 2))          # (B, S, D) — only layout transform needed
    p3 = jnp.transpose(pos, (1, 0, 2))

    vmem = pl.BlockSpec(memory_space=pltpu.MemorySpace.VMEM)
    out3, pred3 = pl.pallas_call(
        _fused_encoder_kernel,
        out_shape=(jax.ShapeDtypeStruct((B, S, D), jnp.float32),
                   jax.ShapeDtypeStruct((B, S, PRED_PAD), jnp.float32)),
        in_specs=[vmem] * (2 + len(prepped)),
        out_specs=(vmem, vmem),
        compiler_params=pltpu.CompilerParams(vmem_limit_bytes=24 * 1024 * 1024),
    )(x3, p3, *prepped)

    output = jnp.transpose(out3, (1, 0, 2))                  # (S, B, D)
    pred = jnp.transpose(pred3[:, :, :7], (1, 0, 2))         # (S, B, 7)
    return pred[None], output                                # (1, S, B, 7), (S, B, D)


# ----------------------------- parameter init & one-time packing ------------------------
def _lin(key, d_in, d_out, scale=0.02):
    return (scale * jax.random.normal(key, (d_in, d_out), jnp.float32),
            jnp.zeros((d_out,), jnp.float32))


def init_params(key):
    keys = iter(jax.random.split(key, NUM_LAYERS * 6 + NUM_MLP + 5))
    # Per-layer distinct weights (torch deepcopy makes distinct modules; after training
    # each layer has its own weights — the kernel indexes a stacked layer axis).
    layers = []
    for _ in range(NUM_LAYERS):
        lay = {}
        lay["wq"], lay["bq"] = _lin(next(keys), D_MODEL, D_MODEL)
        lay["wk"], lay["bk"] = _lin(next(keys), D_MODEL, D_MODEL)
        lay["wv"], lay["bv"] = _lin(next(keys), D_MODEL, D_MODEL)
        lay["wo"], lay["bo"] = _lin(next(keys), D_MODEL, D_MODEL)
        lay["wf1"], lay["bf1"] = _lin(next(keys), D_MODEL, DIM_FF)
        lay["wf2"], lay["bf2"] = _lin(next(keys), DIM_FF, D_MODEL)
        lay["g1"] = jnp.ones((D_MODEL,), jnp.float32)
        lay["beta1"] = jnp.zeros((D_MODEL,), jnp.float32)
        lay["g2"] = jnp.ones((D_MODEL,), jnp.float32)
        lay["beta2"] = jnp.zeros((D_MODEL,), jnp.float32)
        layers.append(lay)

    mlp = []                                     # (Linear -> LayerNorm -> ReLU) x NUM_MLP
    for l in range(NUM_MLP):
        w, b = _lin(next(keys), D_MODEL if l == 0 else FEAT_DIM, FEAT_DIM)
        mlp.append((w, b, jnp.ones((FEAT_DIM,), jnp.float32),
                    jnp.zeros((FEAT_DIM,), jnp.float32)))

    pred = {}
    pred["w1"], pred["b1"] = _lin(next(keys), FEAT_DIM, PRED_HID)
    pred["wt1"], pred["bt1"] = _lin(next(keys), PRED_HID, PRED_MID)
    pred["wt2"], pred["bt2"] = _lin(next(keys), PRED_MID, 3)
    pred["wq1"], pred["bq1"] = _lin(next(keys), PRED_HID, PRED_MID)
    pred["wq2"], pred["bq2"] = _lin(next(keys), PRED_MID, 4)
    pred["qbias"] = jnp.array([1.0, 0.0, 0.0, 0.0], jnp.float32)
    return {"layers": layers, "mlp": mlp, "pred": pred}


def prepare_params(params):
    """One-time weight packing + bf16 cast (hoisted out of the per-call forward)."""
    layers = params["layers"]
    wqk = jnp.stack([jnp.concatenate([l["wq"], l["wk"]], axis=1)
                     for l in layers]).astype(jnp.bfloat16)              # (L, 256, 512)
    wv = jnp.stack([l["wv"] for l in layers]).astype(jnp.bfloat16)       # (L, 256, 256)
    wo = jnp.stack([l["wo"] for l in layers]).astype(jnp.bfloat16)       # (L, 256, 256)
    wf1 = jnp.stack([l["wf1"] for l in layers]).astype(jnp.bfloat16)     # (L, 256, 512)
    wf2 = jnp.stack([l["wf2"] for l in layers]).astype(jnp.bfloat16)     # (L, 512, 256)
    lb512 = jnp.stack([jnp.stack([jnp.concatenate([l["bq"], l["bk"]]), l["bf1"]])
                       for l in layers])                                 # (L, 2, 512) f32
    zero256 = jnp.zeros((D_MODEL,), jnp.float32)
    lvec = jnp.stack([jnp.stack([l["bv"], l["bo"], l["bf2"], l["g1"], l["beta1"],
                                 l["g2"], l["beta2"], zero256])
                      for l in layers])                                  # (L, 8, 256) f32

    mlpw = jnp.stack([m[0] for m in params["mlp"]]).astype(jnp.bfloat16)  # (3, 256, 256)
    mlpv = jnp.stack([jnp.stack([m[1], m[2], m[3]]) for m in params["mlp"]])  # (3,3,256)

    prd = params["pred"]
    pw1 = prd["w1"].astype(jnp.bfloat16)                                  # (256, 1024)
    pwm = jnp.concatenate([prd["wt1"], prd["wq1"]], axis=1).astype(jnp.bfloat16)  # (1024,1024)
    pwo = jnp.zeros((2 * PRED_MID, PRED_PAD), jnp.float32)
    pwo = pwo.at[:PRED_MID, 0:3].set(prd["wt2"]).at[PRED_MID:, 3:7].set(prd["wq2"])
    pwo = pwo.astype(jnp.bfloat16)                                        # (1024, 128)
    pbo = jnp.zeros((PRED_PAD,), jnp.float32)
    pbo = pbo.at[0:3].set(prd["bt2"]).at[3:7].set(prd["bq2"] + prd["qbias"])  # fold quat bias
    pvec = jnp.stack([prd["b1"],
                      jnp.concatenate([prd["bt1"], prd["bq1"]]),
                      jnp.pad(pbo, (0, PRED_HID - PRED_PAD))])            # (3, 1024) f32
    return (wqk, wv, wo, wf1, wf2, lb512, lvec, mlpw, mlpv, pw1, pwm, pwo, pvec)


# ---------------------------------------- main -------------------------------------------
if __name__ == "__main__":
    S, B = 8, 2                                   # num_part=8, batch_size=2
    key = jax.random.PRNGKey(0)
    k0, k1, k2, k3, k4, kp = jax.random.split(key, 6)

    src = 0.1 * jax.random.normal(k0, (S, B, D_MODEL), jnp.float32)
    pos = 0.1 * jax.random.normal(k1, (S, B, D_MODEL), jnp.float32)
    cross = 0.1 * jax.random.normal(k2, (S, B, D_MODEL), jnp.float32)
    match_codes = 0.1 * jax.random.normal(k3, (S, B, D_MODEL), jnp.float32)
    ins_codes = 0.1 * jax.random.normal(k4, (S, B, 40), jnp.float32)
    init_pred = jnp.tile(jnp.array([0., 0., 0., 1., 0., 0., 0.], jnp.float32), (S, B, 1))

    params = init_params(kp)
    prepped = prepare_params(params)              # one-time packing + bf16 cast

    fwd = jax.jit(transformer_encoder_forward)
    pred, output = fwd(prepped, match_codes, cross, src, init_pred, ins_codes, pos)
    jax.block_until_ready((pred, output))

    assert pred.shape == (1, S, B, 7)
    assert output.shape == (S, B, D_MODEL)
    assert bool(jnp.all(jnp.isfinite(pred))) and bool(jnp.all(jnp.isfinite(output)))
    print("KERNEL_OK")
</pallas_src>

<mosaic_0001>
module attributes {stable_mosaic.version = 11 : i64} {
  func.func @_fused_encoder_kernel(%arg0: memref<2x8x256xf32, #tpu.memory_space<vmem>>, %arg1: memref<2x8x256xf32, #tpu.memory_space<vmem>>, %arg2: memref<3x256x512xbf16, #tpu.memory_space<vmem>>, %arg3: memref<3x256x256xbf16, #tpu.memory_space<vmem>>, %arg4: memref<3x256x256xbf16, #tpu.memory_space<vmem>>, %arg5: memref<3x256x512xbf16, #tpu.memory_space<vmem>>, %arg6: memref<3x512x256xbf16, #tpu.memory_space<vmem>>, %arg7: memref<3x2x512xf32, #tpu.memory_space<vmem>>, %arg8: memref<3x8x256xf32, #tpu.memory_space<vmem>>, %arg9: memref<3x256x256xbf16, #tpu.memory_space<vmem>>, %arg10: memref<3x3x256xf32, #tpu.memory_space<vmem>>, %arg11: memref<256x1024xbf16, #tpu.memory_space<vmem>>, %arg12: memref<1024x1024xbf16, #tpu.memory_space<vmem>>, %arg13: memref<1024x128xbf16, #tpu.memory_space<vmem>>, %arg14: memref<3x1024xf32, #tpu.memory_space<vmem>>, %arg15: memref<2x8x256xf32, #tpu.memory_space<vmem>>, %arg16: memref<2x8x128xf32, #tpu.memory_space<vmem>>) attributes {dimension_semantics = [], scalar_prefetch = 0 : i64, scratch_operands = 0 : i64, tpu.core_type = #tpu.core_type<tc>} {
    %c0 = arith.constant 0 : index
    %c0_0 = arith.constant 0 : index
    %c0_1 = arith.constant 0 : index
    %0 = vector.load %arg0[%c0, %c0_0, %c0_1] : memref<2x8x256xf32, #tpu.memory_space<vmem>>, vector<1x8x256xf32>
    %1 = vector.shape_cast %0 : vector<1x8x256xf32> to vector<8x256xf32>
    %c1 = arith.constant 1 : index
    %c0_2 = arith.constant 0 : index
    %c0_3 = arith.constant 0 : index
    %2 = vector.load %arg0[%c1, %c0_2, %c0_3] : memref<2x8x256xf32, #tpu.memory_space<vmem>>, vector<1x8x256xf32>
    %3 = vector.shape_cast %2 : vector<1x8x256xf32> to vector<8x256xf32>
    %4 = tpu.concatenate %1, %3 in 0 : vector<8x256xf32>, vector<8x256xf32> -> vector<16x256xf32>
    %c0_4 = arith.constant 0 : index
    %c0_5 = arith.constant 0 : index
    %c0_6 = arith.constant 0 : index
    %5 = vector.load %arg1[%c0_4, %c0_5, %c0_6] : memref<2x8x256xf32, #tpu.memory_space<vmem>>, vector<1x8x256xf32>
    %6 = vector.shape_cast %5 : vector<1x8x256xf32> to vector<8x256xf32>
    %c1_7 = arith.constant 1 : index
    %c0_8 = arith.constant 0 : index
    %c0_9 = arith.constant 0 : index
    %7 = vector.load %arg1[%c1_7, %c0_8, %c0_9] : memref<2x8x256xf32, #tpu.memory_space<vmem>>, vector<1x8x256xf32>
    %8 = vector.shape_cast %7 : vector<1x8x256xf32> to vector<8x256xf32>
    %9 = tpu.concatenate %6, %8 in 0 : vector<8x256xf32>, vector<8x256xf32> -> vector<16x256xf32>
    %c0_10 = arith.constant 0 : index
    %c0_11 = arith.constant 0 : index
    %c0_12 = arith.constant 0 : index
    %10 = vector.load %arg7[%c0_10, %c0_11, %c0_12] : memref<3x2x512xf32, #tpu.memory_space<vmem>>, vector<1x2x512xf32>
    %11 = vector.shape_cast %10 : vector<1x2x512xf32> to vector<2x512xf32>
    %c0_13 = arith.constant 0 : index
    %c0_14 = arith.constant 0 : index
    %c0_15 = arith.constant 0 : index
    %12 = vector.load %arg8[%c0_13, %c0_14, %c0_15] : memref<3x8x256xf32, #tpu.memory_space<vmem>>, vector<1x8x256xf32>
    %13 = vector.shape_cast %12 : vector<1x8x256xf32> to vector<8x256xf32>
    %14 = vector.extract_strided_slice %11 {offsets = [0, 0], sizes = [1, 512], strides = [1, 1]} : vector<2x512xf32> to vector<1x512xf32>
    %15 = vector.extract_strided_slice %11 {offsets = [1, 0], sizes = [1, 512], strides = [1, 1]} : vector<2x512xf32> to vector<1x512xf32>
    %16 = vector.extract_strided_slice %13 {offsets = [0, 0], sizes = [1, 256], strides = [1, 1]} : vector<8x256xf32> to vector<1x256xf32>
    %17 = vector.extract_strided_slice %13 {offsets = [1, 0], sizes = [1, 256], strides = [1, 1]} : vector<8x256xf32> to vector<1x256xf32>
    %18 = vector.extract_strided_slice %13 {offsets = [2, 0], sizes = [1, 256], strides = [1, 1]} : vector<8x256xf32> to vector<1x256xf32>
    %19 = vector.extract_strided_slice %13 {offsets = [3, 0], sizes = [1, 256], strides = [1, 1]} : vector<8x256xf32> to vector<1x256xf32>
    %20 = vector.extract_strided_slice %13 {offsets = [4, 0], sizes = [1, 256], strides = [1, 1]} : vector<8x256xf32> to vector<1x256xf32>
    %21 = vector.extract_strided_slice %13 {offsets = [5, 0], sizes = [1, 256], strides = [1, 1]} : vector<8x256xf32> to vector<1x256xf32>
    %22 = vector.extract_strided_slice %13 {offsets = [6, 0], sizes = [1, 256], strides = [1, 1]} : vector<8x256xf32> to vector<1x256xf32>
    %23 = arith.addf %4, %9 : vector<16x256xf32>
    %24 = arith.truncf %23 : vector<16x256xf32> to vector<16x256xbf16>
    %c0_16 = arith.constant 0 : index
    %c0_17 = arith.constant 0 : index
    %c0_18 = arith.constant 0 : index
    %25 = vector.load %arg2[%c0_16, %c0_17, %c0_18] : memref<3x256x512xbf16, #tpu.memory_space<vmem>>, vector<1x256x512xbf16>
    %26 = vector.shape_cast %25 : vector<1x256x512xbf16> to vector<256x512xbf16>
    %cst = arith.constant dense<0.000000e+00> : vector<16x512xf32>
    %27 = tpu.matmul %24, %26, %cst {dimension_numbers = #tpu.dot_dimension_numbers<[1], [0], [0], [1], [0, 0, 1, 1], [], []>} : vector<16x256xbf16>, vector<256x512xbf16>, vector<16x512xf32> -> vector<16x512xf32>
    %28 = vector.broadcast %14 : vector<1x512xf32> to vector<16x512xf32>
    %29 = arith.addf %27, %28 : vector<16x512xf32>
    %30 = arith.truncf %4 : vector<16x256xf32> to vector<16x256xbf16>
    %c0_19 = arith.constant 0 : index
    %c0_20 = arith.constant 0 : index
    %c0_21 = arith.constant 0 : index
    %31 = vector.load %arg3[%c0_19, %c0_20, %c0_21] : memref<3x256x256xbf16, #tpu.memory_space<vmem>>, vector<1x256x256xbf16>
    %32 = vector.shape_cast %31 : vector<1x256x256xbf16> to vector<256x256xbf16>
    %cst_22 = arith.constant dense<0.000000e+00> : vector<16x256xf32>
    %33 = tpu.matmul %30, %32, %cst_22 {dimension_numbers = #tpu.dot_dimension_numbers<[1], [0], [0], [1], [0, 0, 1, 1], [], []>} : vector<16x256xbf16>, vector<256x256xbf16>, vector<16x256xf32> -> vector<16x256xf32>
    %34 = vector.broadcast %16 : vector<1x256xf32> to vector<16x256xf32>
    %35 = arith.addf %33, %34 : vector<16x256xf32>
    %36 = vector.extract_strided_slice %29 {offsets = [0, 0], sizes = [16, 256], strides = [1, 1]} : vector<16x512xf32> to vector<16x256xf32>
    %37 = vector.extract_strided_slice %29 {offsets = [0, 256], sizes = [16, 256], strides = [1, 1]} : vector<16x512xf32> to vector<16x256xf32>
    %38 = vector.extract_strided_slice %36 {offsets = [0, 0], sizes = [8, 128], strides = [1, 1]} : vector<16x256xf32> to vector<8x128xf32>
    %39 = vector.extract_strided_slice %37 {offsets = [0, 0], sizes = [8, 128], strides = [1, 1]} : vector<16x256xf32> to vector<8x128xf32>
    %40 = vector.extract_strided_slice %35 {offsets = [0, 0], sizes = [8, 128], strides = [1, 1]} : vector<16x256xf32> to vector<8x128xf32>
    %cst_23 = arith.constant dense<0.000000e+00> : vector<8x8xf32>
    %41 = tpu.matmul %38, %39, %cst_23 {dimension_numbers = #tpu.dot_dimension_numbers<[1], [1], [0], [0], [0, 0, 1, 0], [], []>} : vector<8x128xf32>, vector<8x128xf32>, vector<8x8xf32> -> vector<8x8xf32>
    %cst_24 = arith.constant 0.0883883461 : f32
    %42 = vector.broadcast %cst_24 : f32 to vector<8x8xf32>
    %43 = arith.mulf %41, %42 : vector<8x8xf32>
    %cst_25 = arith.constant dense<0xFF800000> : vector<8xf32>
    %44 = vector.multi_reduction <maximumf>, %43, %cst_25 [1] : vector<8x8xf32> to vector<8xf32>
    %45 = vector.shape_cast %44 : vector<8xf32> to vector<8x1xf32>
    %46 = vector.broadcast %45 : vector<8x1xf32> to vector<8x8xf32>
    %47 = arith.subf %43, %46 : vector<8x8xf32>
    %48 = math.exp %47 : vector<8x8xf32>
    %cst_26 = arith.constant dense<0.000000e+00> : vector<8xf32>
    %49 = vector.multi_reduction <add>, %48, %cst_26 [1] : vector<8x8xf32> to vector<8xf32>
    %50 = vector.shape_cast %49 : vector<8xf32> to vector<8x1xf32>
    %51 = tpu.reciprocal %50 {approx = true} : vector<8x1xf32> -> vector<8x1xf32>
    %52 = vector.broadcast %51 : vector<8x1xf32> to vector<8x8xf32>
    %53 = arith.mulf %48, %52 : vector<8x8xf32>
    %cst_27 = arith.constant dense<0.000000e+00> : vector<8x128xf32>
    %54 = tpu.matmul %53, %40, %cst_27 {dimension_numbers = #tpu.dot_dimension_numbers<[1], [0], [0], [1], [0, 0, 1, 1], [], []>} : vector<8x8xf32>, vector<8x128xf32>, vector<8x128xf32> -> vector<8x128xf32>
    %55 = vector.extract_strided_slice %36 {offsets = [8, 0], sizes = [8, 128], strides = [1, 1]} : vector<16x256xf32> to vector<8x128xf32>
    %56 = vector.extract_strided_slice %37 {offsets = [8, 0], sizes = [8, 128], strides = [1, 1]} : vector<16x256xf32> to vector<8x128xf32>
    %57 = vector.extract_strided_slice %35 {offsets = [8, 0], sizes = [8, 128], strides = [1, 1]} : vector<16x256xf32> to vector<8x128xf32>
    %cst_28 = arith.constant dense<0.000000e+00> : vector<8x8xf32>
    %58 = tpu.matmul %55, %56, %cst_28 {dimension_numbers = #tpu.dot_dimension_numbers<[1], [1], [0], [0], [0, 0, 1, 0], [], []>} : vector<8x128xf32>, vector<8x128xf32>, vector<8x8xf32> -> vector<8x8xf32>
    %cst_29 = arith.constant 0.0883883461 : f32
    %59 = vector.broadcast %cst_29 : f32 to vector<8x8xf32>
    %60 = arith.mulf %58, %59 : vector<8x8xf32>
    %cst_30 = arith.constant dense<0xFF800000> : vector<8xf32>
    %61 = vector.multi_reduction <maximumf>, %60, %cst_30 [1] : vector<8x8xf32> to vector<8xf32>
    %62 = vector.shape_cast %61 : vector<8xf32> to vector<8x1xf32>
    %63 = vector.broadcast %62 : vector<8x1xf32> to vector<8x8xf32>
    %64 = arith.subf %60, %63 : vector<8x8xf32>
    %65 = math.exp %64 : vector<8x8xf32>
    %cst_31 = arith.constant dense<0.000000e+00> : vector<8xf32>
    %66 = vector.multi_reduction <add>, %65, %cst_31 [1] : vector<8x8xf32> to vector<8xf32>
    %67 = vector.shape_cast %66 : vector<8xf32> to vector<8x1xf32>
    %68 = tpu.reciprocal %67 {approx = true} : vector<8x1xf32> -> vector<8x1xf32>
    %69 = vector.broadcast %68 : vector<8x1xf32> to vector<8x8xf32>
    %70 = arith.mulf %65, %69 : vector<8x8xf32>
    %cst_32 = arith.constant dense<0.000000e+00> : vector<8x128xf32>
    %71 = tpu.matmul %70, %57, %cst_32 {dimension_numbers = #tpu.dot_dimension_numbers<[1], [0], [0], [1], [0, 0, 1, 1], [], []>} : vector<8x8xf32>, vector<8x128xf32>, vector<8x128xf32> -> vector<8x128xf32>
    %72 = tpu.concatenate %54, %71 in 0 : vector<8x128xf32>, vector<8x128xf32> -> vector<16x128xf32>
    %73 = arith.truncf %72 : vector<16x128xf32> to vector<16x128xbf16>
    %c0_33 = arith.constant 0 : index
    %c0_34 = arith.constant 0 : index
    %c0_35 = arith.constant 0 : index
    %74 = vector.load %arg4[%c0_33, %c0_34, %c0_35] : memref<3x256x256xbf16, #tpu.memory_space<vmem>>, vector<1x128x256xbf16>
    %75 = vector.shape_cast %74 : vector<1x128x256xbf16> to vector<128x256xbf16>
    %cst_36 = arith.constant dense<0.000000e+00> : vector<16x256xf32>
    %76 = tpu.matmul %73, %75, %cst_36 {dimension_numbers = #tpu.dot_dimension_numbers<[1], [0], [0], [1], [0, 0, 1, 1], [], []>} : vector<16x128xbf16>, vector<128x256xbf16>, vector<16x256xf32> -> vector<16x256xf32>
    %77 = vector.broadcast %17 : vector<1x256xf32> to vector<16x256xf32>
    %78 = arith.addf %77, %76 : vector<16x256xf32>
    %79 = vector.extract_strided_slice %36 {offsets = [0, 128], sizes = [8, 128], strides = [1, 1]} : vector<16x256xf32> to vector<8x128xf32>
    %80 = vector.extract_strided_slice %37 {offsets = [0, 128], sizes = [8, 128], strides = [1, 1]} : vector<16x256xf32> to vector<8x128xf32>
    %81 = vector.extract_strided_slice %35 {offsets = [0, 128], sizes = [8, 128], strides = [1, 1]} : vector<16x256xf32> to vector<8x128xf32>
    %cst_37 = arith.constant dense<0.000000e+00> : vector<8x8xf32>
    %82 = tpu.matmul %79, %80, %cst_37 {dimension_numbers = #tpu.dot_dimension_numbers<[1], [1], [0], [0], [0, 0, 1, 0], [], []>} : vector<8x128xf32>, vector<8x128xf32>, vector<8x8xf32> -> vector<8x8xf32>
    %cst_38 = arith.constant 0.0883883461 : f32
    %83 = vector.broadcast %cst_38 : f32 to vector<8x8xf32>
    %84 = arith.mulf %82, %83 : vector<8x8xf32>
    %cst_39 = arith.constant dense<0xFF800000> : vector<8xf32>
    %85 = vector.multi_reduction <maximumf>, %84, %cst_39 [1] : vector<8x8xf32> to vector<8xf32>
    %86 = vector.shape_cast %85 : vector<8xf32> to vector<8x1xf32>
    %87 = vector.broadcast %86 : vector<8x1xf32> to vector<8x8xf32>
    %88 = arith.subf %84, %87 : vector<8x8xf32>
    %89 = math.exp %88 : vector<8x8xf32>
    %cst_40 = arith.constant dense<0.000000e+00> : vector<8xf32>
    %90 = vector.multi_reduction <add>, %89, %cst_40 [1] : vector<8x8xf32> to vector<8xf32>
    %91 = vector.shape_cast %90 : vector<8xf32> to vector<8x1xf32>
    %92 = tpu.reciprocal %91 {approx = true} : vector<8x1xf32> -> vector<8x1xf32>
    %93 = vector.broadcast %92 : vector<8x1xf32> to vector<8x8xf32>
    %94 = arith.mulf %89, %93 : vector<8x8xf32>
    %cst_41 = arith.constant dense<0.000000e+00> : vector<8x128xf32>
    %95 = tpu.matmul %94, %81, %cst_41 {dimension_numbers = #tpu.dot_dimension_numbers<[1], [0], [0], [1], [0, 0, 1, 1], [], []>} : vector<8x8xf32>, vector<8x128xf32>, vector<8x128xf32> -> vector<8x128xf32>
    %96 = vector.extract_strided_slice %36 {offsets = [8, 128], sizes = [8, 128], strides = [1, 1]} : vector<16x256xf32> to vector<8x128xf32>
    %97 = vector.extract_strided_slice %37 {offsets = [8, 128], sizes = [8, 128], strides = [1, 1]} : vector<16x256xf32> to vector<8x128xf32>
    %98 = vector.extract_strided_slice %35 {offsets = [8, 128], sizes = [8, 128], strides = [1, 1]} : vector<16x256xf32> to vector<8x128xf32>
    %cst_42 = arith.constant dense<0.000000e+00> : vector<8x8xf32>
    %99 = tpu.matmul %96, %97, %cst_42 {dimension_numbers = #tpu.dot_dimension_numbers<[1], [1], [0], [0], [0, 0, 1, 0], [], []>} : vector<8x128xf32>, vector<8x128xf32>, vector<8x8xf32> -> vector<8x8xf32>
    %cst_43 = arith.constant 0.0883883461 : f32
    %100 = vector.broadcast %cst_43 : f32 to vector<8x8xf32>
    %101 = arith.mulf %99, %100 : vector<8x8xf32>
    %cst_44 = arith.constant dense<0xFF800000> : vector<8xf32>
    %102 = vector.multi_reduction <maximumf>, %101, %cst_44 [1] : vector<8x8xf32> to vector<8xf32>
    %103 = vector.shape_cast %102 : vector<8xf32> to vector<8x1xf32>
    %104 = vector.broadcast %103 : vector<8x1xf32> to vector<8x8xf32>
    %105 = arith.subf %101, %104 : vector<8x8xf32>
    %106 = math.exp %105 : vector<8x8xf32>
    %cst_45 = arith.constant dense<0.000000e+00> : vector<8xf32>
    %107 = vector.multi_reduction <add>, %106, %cst_45 [1] : vector<8x8xf32> to vector<8xf32>
    %108 = vector.shape_cast %107 : vector<8xf32> to vector<8x1xf32>
    %109 = tpu.reciprocal %108 {approx = true} : vector<8x1xf32> -> vector<8x1xf32>
    %110 = vector.broadcast %109 : vector<8x1xf32> to vector<8x8xf32>
    %111 = arith.mulf %106, %110 : vector<8x8xf32>
    %cst_46 = arith.constant dense<0.000000e+00> : vector<8x128xf32>
    %112 = tpu.matmul %111, %98, %cst_46 {dimension_numbers = #tpu.dot_dimension_numbers<[1], [0], [0], [1], [0, 0, 1, 1], [], []>} : vector<8x8xf32>, vector<8x128xf32>, vector<8x128xf32> -> vector<8x128xf32>
    %113 = tpu.concatenate %95, %112 in 0 : vector<8x128xf32>, vector<8x128xf32> -> vector<16x128xf32>
    %114 = arith.truncf %113 : vector<16x128xf32> to vector<16x128xbf16>
    %c0_47 = arith.constant 0 : index
    %c128 = arith.constant 128 : index
    %c0_48 = arith.constant 0 : index
    %115 = vector.load %arg4[%c0_47, %c128, %c0_48] : memref<3x256x256xbf16, #tpu.memory_space<vmem>>, vector<1x128x256xbf16>
    %116 = vector.shape_cast %115 : vector<1x128x256xbf16> to vector<128x256xbf16>
    %cst_49 = arith.constant dense<0.000000e+00> : vector<16x256xf32>
    %117 = tpu.matmul %114, %116, %cst_49 {dimension_numbers = #tpu.dot_dimension_numbers<[1], [0], [0], [1], [0, 0, 1, 1], [], []>} : vector<16x128xbf16>, vector<128x256xbf16>, vector<16x256xf32> -> vector<16x256xf32>
    %118 = arith.addf %78, %117 : vector<16x256xf32>
    %119 = arith.addf %4, %118 : vector<16x256xf32>
    %cst_50 = arith.constant dense<0.000000e+00> : vector<16xf32>
    %120 = vector.multi_reduction <add>, %119, %cst_50 [1] : vector<16x256xf32> to vector<16xf32>
    %121 = vector.shape_cast %120 : vector<16xf32> to vector<16x1xf32>
    %cst_51 = arith.constant 2.560000e+02 : f32
    %122 = vector.broadcast %cst_51 : f32 to vector<16x1xf32>
    %123 = arith.divf %121, %122 : vector<16x1xf32>
    %124 = vector.broadcast %123 : vector<16x1xf32> to vector<16x256xf32>
    %125 = arith.subf %119, %124 : vector<16x256xf32>
    %126 = arith.mulf %125, %125 : vector<16x256xf32>
    %cst_52 = arith.constant dense<0.000000e+00> : vector<16xf32>
    %127 = vector.multi_reduction <add>, %126, %cst_52 [1] : vector<16x256xf32> to vector<16xf32>
    %128 = vector.shape_cast %127 : vector<16xf32> to vector<16x1xf32>
    %cst_53 = arith.constant 2.560000e+02 : f32
    %129 = vector.broadcast %cst_53 : f32 to vector<16x1xf32>
    %130 = arith.divf %128, %129 : vector<16x1xf32>
    %131 = vector.broadcast %123 : vector<16x1xf32> to vector<16x256xf32>
    %132 = arith.subf %119, %131 : vector<16x256xf32>
    %cst_54 = arith.constant 9.99999974E-6 : f32
    %133 = vector.broadcast %cst_54 : f32 to vector<16x1xf32>
    %134 = arith.addf %130, %133 : vector<16x1xf32>
    %135 = math.rsqrt %134 : vector<16x1xf32>
    %136 = vector.broadcast %135 : vector<16x1xf32> to vector<16x256xf32>
    %137 = arith.mulf %132, %136 : vector<16x256xf32>
    %138 = vector.broadcast %19 : vector<1x256xf32> to vector<16x256xf32>
    %139 = arith.mulf %137, %138 : vector<16x256xf32>
    %140 = vector.broadcast %20 : vector<1x256xf32> to vector<16x256xf32>
    %141 = arith.addf %139, %140 : vector<16x256xf32>
    %142 = arith.truncf %141 : vector<16x256xf32> to vector<16x256xbf16>
    %c0_55 = arith.constant 0 : index
    %c0_56 = arith.constant 0 : index
    %c0_57 = arith.constant 0 : index
    %143 = vector.load %arg5[%c0_55, %c0_56, %c0_57] : memref<3x256x512xbf16, #tpu.memory_space<vmem>>, vector<1x256x512xbf16>
    %144 = vector.shape_cast %143 : vector<1x256x512xbf16> to vector<256x512xbf16>
    %cst_58 = arith.constant dense<0.000000e+00> : vector<16x512xf32>
    %145 = tpu.matmul %142, %144, %cst_58 {dimension_numbers = #tpu.dot_dimension_numbers<[1], [0], [0], [1], [0, 0, 1, 1], [], []>} : vector<16x256xbf16>, vector<256x512xbf16>, vector<16x512xf32> -> vector<16x512xf32>
    %146 = vector.broadcast %15 : vector<1x512xf32> to vector<16x512xf32>
    %147 = arith.addf %145, %146 : vector<16x512xf32>
    %cst_59 = arith.constant 0.000000e+00 : f32
    %148 = vector.broadcast %cst_59 : f32 to vector<16x512xf32>
    %149 = arith.maximumf %147, %148 : vector<16x512xf32>
    %150 = arith.truncf %149 : vector<16x512xf32> to vector<16x512xbf16>
    %c0_60 = arith.constant 0 : index
    %c0_61 = arith.constant 0 : index
    %c0_62 = arith.constant 0 : index
    %151 = vector.load %arg6[%c0_60, %c0_61, %c0_62] : memref<3x512x256xbf16, #tpu.memory_space<vmem>>, vector<1x512x256xbf16>
    %152 = vector.shape_cast %151 : vector<1x512x256xbf16> to vector<512x256xbf16>
    %cst_63 = arith.constant dense<0.000000e+00> : vector<16x256xf32>
    %153 = tpu.matmul %150, %152, %cst_63 {dimension_numbers = #tpu.dot_dimension_numbers<[1], [0], [0], [1], [0, 0, 1, 1], [], []>} : vector<16x512xbf16>, vector<512x256xbf16>, vector<16x256xf32> -> vector<16x256xf32>
    %154 = vector.broadcast %18 : vector<1x256xf32> to vector<16x256xf32>
    %155 = arith.addf %153, %154 : vector<16x256xf32>
    %156 = arith.addf %141, %155 : vector<16x256xf32>
    %cst_64 = arith.constant dense<0.000000e+00> : vector<16xf32>
    %157 = vector.multi_reduction <add>, %156, %cst_64 [1] : vector<16x256xf32> to vector<16xf32>
    %158 = vector.shape_cast %157 : vector<16xf32> to vector<16x1xf32>
    %cst_65 = arith.constant 2.560000e+02 : f32
    %159 = vector.broadcast %cst_65 : f32 to vector<16x1xf32>
    %160 = arith.divf %158, %159 : vector<16x1xf32>
    %161 = vector.broadcast %160 : vector<16x1xf32> to vector<16x256xf32>
    %162 = arith.subf %156, %161 : vector<16x256xf32>
    %163 = arith.mulf %162, %162 : vector<16x256xf32>
    %cst_66 = arith.constant dense<0.000000e+00> : vector<16xf32>
    %164 = vector.multi_reduction <add>, %163, %cst_66 [1] : vector<16x256xf32> to vector<16xf32>
    %165 = vector.shape_cast %164 : vector<16xf32> to vector<16x1xf32>
    %cst_67 = arith.constant 2.560000e+02 : f32
    %166 = vector.broadcast %cst_67 : f32 to vector<16x1xf32>
    %167 = arith.divf %165, %166 : vector<16x1xf32>
    %168 = vector.broadcast %160 : vector<16x1xf32> to vector<16x256xf32>
    %169 = arith.subf %156, %168 : vector<16x256xf32>
    %cst_68 = arith.constant 9.99999974E-6 : f32
    %170 = vector.broadcast %cst_68 : f32 to vector<16x1xf32>
    %171 = arith.addf %167, %170 : vector<16x1xf32>
    %172 = math.rsqrt %171 : vector<16x1xf32>
    %173 = vector.broadcast %172 : vector<16x1xf32> to vector<16x256xf32>
    %174 = arith.mulf %169, %173 : vector<16x256xf32>
    %175 = vector.broadcast %21 : vector<1x256xf32> to vector<16x256xf32>
    %176 = arith.mulf %174, %175 : vector<16x256xf32>
    %177 = vector.broadcast %22 : vector<1x256xf32> to vector<16x256xf32>
    %178 = arith.addf %176, %177 : vector<16x256xf32>
    %c1_69 = arith.constant 1 : index
    %c0_70 = arith.constant 0 : index
    %c0_71 = arith.constant 0 : index
    %179 = vector.load %arg7[%c1_69, %c0_70, %c0_71] : memref<3x2x512xf32, #tpu.memory_space<vmem>>, vector<1x2x512xf32>
    %180 = vector.shape_cast %179 : vector<1x2x512xf32> to vector<2x512xf32>
    %c1_72 = arith.constant 1 : index
    %c0_73 = arith.constant 0 : index
    %c0_74 = arith.constant 0 : index
    %181 = vector.load %arg8[%c1_72, %c0_73, %c0_74] : memref<3x8x256xf32, #tpu.memory_space<vmem>>, vector<1x8x256xf32>
    %182 = vector.shape_cast %181 : vector<1x8x256xf32> to vector<8x256xf32>
    %183 = vector.extract_strided_slice %180 {offsets = [0, 0], sizes = [1, 512], strides = [1, 1]} : vector<2x512xf32> to vector<1x512xf32>
    %184 = vector.extract_strided_slice %180 {offsets = [1, 0], sizes = [1, 512], strides = [1, 1]} : vector<2x512xf32> to vector<1x512xf32>
    %185 = vector.extract_strided_slice %182 {offsets = [0, 0], sizes = [1, 256], strides = [1, 1]} : vector<8x256xf32> to vector<1x256xf32>
    %186 = vector.extract_strided_slice %182 {offsets = [1, 0], sizes = [1, 256], strides = [1, 1]} : vector<8x256xf32> to vector<1x256xf32>
    %187 = vector.extract_strided_slice %182 {offsets = [2, 0], sizes = [1, 256], strides = [1, 1]} : vector<8x256xf32> to vector<1x256xf32>
    %188 = vector.extract_strided_slice %182 {offsets = [3, 0], sizes = [1, 256], strides = [1, 1]} : vector<8x256xf32> to vector<1x256xf32>
    %189 = vector.extract_strided_slice %182 {offsets = [4, 0], sizes = [1, 256], strides = [1, 1]} : vector<8x256xf32> to vector<1x256xf32>
    %190 = vector.extract_strided_slice %182 {offsets = [5, 0], sizes = [1, 256], strides = [1, 1]} : vector<8x256xf32> to vector<1x256xf32>
    %191 = vector.extract_strided_slice %182 {offsets = [6, 0], sizes = [1, 256], strides = [1, 1]} : vector<8x256xf32> to vector<1x256xf32>
    %192 = arith.addf %178, %9 : vector<16x256xf32>
    %193 = arith.truncf %192 : vector<16x256xf32> to vector<16x256xbf16>
    %c1_75 = arith.constant 1 : index
    %c0_76 = arith.constant 0 : index
    %c0_77 = arith.constant 0 : index
    %194 = vector.load %arg2[%c1_75, %c0_76, %c0_77] : memref<3x256x512xbf16, #tpu.memory_space<vmem>>, vector<1x256x512xbf16>
    %195 = vector.shape_cast %194 : vector<1x256x512xbf16> to vector<256x512xbf16>
    %cst_78 = arith.constant dense<0.000000e+00> : vector<16x512xf32>
    %196 = tpu.matmul %193, %195, %cst_78 {dimension_numbers = #tpu.dot_dimension_numbers<[1], [0], [0], [1], [0, 0, 1, 1], [], []>} : vector<16x256xbf16>, vector<256x512xbf16>, vector<16x512xf32> -> vector<16x512xf32>
    %197 = vector.broadcast %183 : vector<1x512xf32> to vector<16x512xf32>
    %198 = arith.addf %196, %197 : vector<16x512xf32>
    %199 = arith.truncf %178 : vector<16x256xf32> to vector<16x256xbf16>
    %c1_79 = arith.constant 1 : index
    %c0_80 = arith.constant 0 : index
    %c0_81 = arith.constant 0 : index
    %200 = vector.load %arg3[%c1_79, %c0_80, %c0_81] : memref<3x256x256xbf16, #tpu.memory_space<vmem>>, vector<1x256x256xbf16>
    %201 = vector.shape_cast %200 : vector<1x256x256xbf16> to vector<256x256xbf16>
    %cst_82 = arith.constant dense<0.000000e+00> : vector<16x256xf32>
    %202 = tpu.matmul %199, %201, %cst_82 {dimension_numbers = #tpu.dot_dimension_numbers<[1], [0], [0], [1], [0, 0, 1, 1], [], []>} : vector<16x256xbf16>, vector<256x256xbf16>, vector<16x256xf32> -> vector<16x256xf32>
    %203 = vector.broadcast %185 : vector<1x256xf32> to vector<16x256xf32>
    %204 = arith.addf %202, %203 : vector<16x256xf32>
    %205 = vector.extract_strided_slice %198 {offsets = [0, 0], sizes = [16, 256], strides = [1, 1]} : vector<16x512xf32> to vector<16x256xf32>
    %206 = vector.extract_strided_slice %198 {offsets = [0, 256], sizes = [16, 256], strides = [1, 1]} : vector<16x512xf32> to vector<16x256xf32>
    %207 = vector.extract_strided_slice %205 {offsets = [0, 0], sizes = [8, 128], strides = [1, 1]} : vector<16x256xf32> to vector<8x128xf32>
    %208 = vector.extract_strided_slice %206 {offsets = [0, 0], sizes = [8, 128], strides = [1, 1]} : vector<16x256xf32> to vector<8x128xf32>
    %209 = vector.extract_strided_slice %204 {offsets = [0, 0], sizes = [8, 128], strides = [1, 1]} : vector<16x256xf32> to vector<8x128xf32>
    %cst_83 = arith.constant dense<0.000000e+00> : vector<8x8xf32>
    %210 = tpu.matmul %207, %208, %cst_83 {dimension_numbers = #tpu.dot_dimension_numbers<[1], [1], [0], [0], [0, 0, 1, 0], [], []>} : vector<8x128xf32>, vector<8x128xf32>, vector<8x8xf32> -> vector<8x8xf32>
    %cst_84 = arith.constant 0.0883883461 : f32
    %211 = vector.broadcast %cst_84 : f32 to vector<8x8xf32>
    %212 = arith.mulf %210, %211 : vector<8x8xf32>
    %cst_85 = arith.constant dense<0xFF800000> : vector<8xf32>
    %213 = vector.multi_reduction <maximumf>, %212, %cst_85 [1] : vector<8x8xf32> to vector<8xf32>
    %214 = vector.shape_cast %213 : vector<8xf32> to vector<8x1xf32>
    %215 = vector.broadcast %214 : vector<8x1xf32> to vector<8x8xf32>
    %216 = arith.subf %212, %215 : vector<8x8xf32>
    %217 = math.exp %216 : vector<8x8xf32>
    %cst_86 = arith.constant dense<0.000000e+00> : vector<8xf32>
    %218 = vector.multi_reduction <add>, %217, %cst_86 [1] : vector<8x8xf32> to vector<8xf32>
    %219 = vector.shape_cast %218 : vector<8xf32> to vector<8x1xf32>
    %220 = tpu.reciprocal %219 {approx = true} : vector<8x1xf32> -> vector<8x1xf32>
    %221 = vector.broadcast %220 : vector<8x1xf32> to vector<8x8xf32>
    %222 = arith.mulf %217, %221 : vector<8x8xf32>
    %cst_87 = arith.constant dense<0.000000e+00> : vector<8x128xf32>
    %223 = tpu.matmul %222, %209, %cst_87 {dimension_numbers = #tpu.dot_dimension_numbers<[1], [0], [0], [1], [0, 0, 1, 1], [], []>} : vector<8x8xf32>, vector<8x128xf32>, vector<8x128xf32> -> vector<8x128xf32>
    %224 = vector.extract_strided_slice %205 {offsets = [8, 0], sizes = [8, 128], strides = [1, 1]} : vector<16x256xf32> to vector<8x128xf32>
    %225 = vector.extract_strided_slice %206 {offsets = [8, 0], sizes = [8, 128], strides = [1, 1]} : vector<16x256xf32> to vector<8x128xf32>
    %226 = vector.extract_strided_slice %204 {offsets = [8, 0], sizes = [8, 128], strides = [1, 1]} : vector<16x256xf32> to vector<8x128xf32>
    %cst_88 = arith.constant dense<0.000000e+00> : vector<8x8xf32>
    %227 = tpu.matmul %224, %225, %cst_88 {dimension_numbers = #tpu.dot_dimension_numbers<[1], [1], [0], [0], [0, 0, 1, 0], [], []>} : vector<8x128xf32>, vector<8x128xf32>, vector<8x8xf32> -> vector<8x8xf32>
    %cst_89 = arith.constant 0.0883883461 : f32
    %228 = vector.broadcast %cst_89 : f32 to vector<8x8xf32>
    %229 = arith.mulf %227, %228 : vector<8x8xf32>
    %cst_90 = arith.constant dense<0xFF800000> : vector<8xf32>
    %230 = vector.multi_reduction <maximumf>, %229, %cst_90 [1] : vector<8x8xf32> to vector<8xf32>
    %231 = vector.shape_cast %230 : vector<8xf32> to vector<8x1xf32>
    %232 = vector.broadcast %231 : vector<8x1xf32> to vector<8x8xf32>
    %233 = arith.subf %229, %232 : vector<8x8xf32>
    %234 = math.exp %233 : vector<8x8xf32>
    %cst_91 = arith.constant dense<0.000000e+00> : vector<8xf32>
    %235 = vector.multi_reduction <add>, %234, %cst_91 [1] : vector<8x8xf32> to vector<8xf32>
    %236 = vector.shape_cast %235 : vector<8xf32> to vector<8x1xf32>
    %237 = tpu.reciprocal %236 {approx = true} : vector<8x1xf32> -> vector<8x1xf32>
    %238 = vector.broadcast %237 : vector<8x1xf32> to vector<8x8xf32>
    %239 = arith.mulf %234, %238 : vector<8x8xf32>
    %cst_92 = arith.constant dense<0.000000e+00> : vector<8x128xf32>
    %240 = tpu.matmul %239, %226, %cst_92 {dimension_numbers = #tpu.dot_dimension_numbers<[1], [0], [0], [1], [0, 0, 1, 1], [], []>} : vector<8x8xf32>, vector<8x128xf32>, vector<8x128xf32> -> vector<8x128xf32>
    %241 = tpu.concatenate %223, %240 in 0 : vector<8x128xf32>, vector<8x128xf32> -> vector<16x128xf32>
    %242 = arith.truncf %241 : vector<16x128xf32> to vector<16x128xbf16>
    %c1_93 = arith.constant 1 : index
    %c0_94 = arith.constant 0 : index
    %c0_95 = arith.constant 0 : index
    %243 = vector.load %arg4[%c1_93, %c0_94, %c0_95] : memref<3x256x256xbf16, #tpu.memory_space<vmem>>, vector<1x128x256xbf16>
    %244 = vector.shape_cast %243 : vector<1x128x256xbf16> to vector<128x256xbf16>
    %cst_96 = arith.constant dense<0.000000e+00> : vector<16x256xf32>
    %245 = tpu.matmul %242, %244, %cst_96 {dimension_numbers = #tpu.dot_dimension_numbers<[1], [0], [0], [1], [0, 0, 1, 1], [], []>} : vector<16x128xbf16>, vector<128x256xbf16>, vector<16x256xf32> -> vector<16x256xf32>
    %246 = vector.broadcast %186 : vector<1x256xf32> to vector<16x256xf32>
    %247 = arith.addf %246, %245 : vector<16x256xf32>
    %248 = vector.extract_strided_slice %205 {offsets = [0, 128], sizes = [8, 128], strides = [1, 1]} : vector<16x256xf32> to vector<8x128xf32>
    %249 = vector.extract_strided_slice %206 {offsets = [0, 128], sizes = [8, 128], strides = [1, 1]} : vector<16x256xf32> to vector<8x128xf32>
    %250 = vector.extract_strided_slice %204 {offsets = [0, 128], sizes = [8, 128], strides = [1, 1]} : vector<16x256xf32> to vector<8x128xf32>
    %cst_97 = arith.constant dense<0.000000e+00> : vector<8x8xf32>
    %251 = tpu.matmul %248, %249, %cst_97 {dimension_numbers = #tpu.dot_dimension_numbers<[1], [1], [0], [0], [0, 0, 1, 0], [], []>} : vector<8x128xf32>, vector<8x128xf32>, vector<8x8xf32> -> vector<8x8xf32>
    %cst_98 = arith.constant 0.0883883461 : f32
    %252 = vector.broadcast %cst_98 : f32 to vector<8x8xf32>
    %253 = arith.mulf %251, %252 : vector<8x8xf32>
    %cst_99 = arith.constant dense<0xFF800000> : vector<8xf32>
    %254 = vector.multi_reduction <maximumf>, %253, %cst_99 [1] : vector<8x8xf32> to vector<8xf32>
    %255 = vector.shape_cast %254 : vector<8xf32> to vector<8x1xf32>
    %256 = vector.broadcast %255 : vector<8x1xf32> to vector<8x8xf32>
    %257 = arith.subf %253, %256 : vector<8x8xf32>
    %258 = math.exp %257 : vector<8x8xf32>
    %cst_100 = arith.constant dense<0.000000e+00> : vector<8xf32>
    %259 = vector.multi_reduction <add>, %258, %cst_100 [1] : vector<8x8xf32> to vector<8xf32>
    %260 = vector.shape_cast %259 : vector<8xf32> to vector<8x1xf32>
    %261 = tpu.reciprocal %260 {approx = true} : vector<8x1xf32> -> vector<8x1xf32>
    %262 = vector.broadcast %261 : vector<8x1xf32> to vector<8x8xf32>
    %263 = arith.mulf %258, %262 : vector<8x8xf32>
    %cst_101 = arith.constant dense<0.000000e+00> : vector<8x128xf32>
    %264 = tpu.matmul %263, %250, %cst_101 {dimension_numbers = #tpu.dot_dimension_numbers<[1], [0], [0], [1], [0, 0, 1, 1], [], []>} : vector<8x8xf32>, vector<8x128xf32>, vector<8x128xf32> -> vector<8x128xf32>
    %265 = vector.extract_strided_slice %205 {offsets = [8, 128], sizes = [8, 128], strides = [1, 1]} : vector<16x256xf32> to vector<8x128xf32>
    %266 = vector.extract_strided_slice %206 {offsets = [8, 128], sizes = [8, 128], strides = [1, 1]} : vector<16x256xf32> to vector<8x128xf32>
    %267 = vector.extract_strided_slice %204 {offsets = [8, 128], sizes = [8, 128], strides = [1, 1]} : vector<16x256xf32> to vector<8x128xf32>
    %cst_102 = arith.constant dense<0.000000e+00> : vector<8x8xf32>
    %268 = tpu.matmul %265, %266, %cst_102 {dimension_numbers = #tpu.dot_dimension_numbers<[1], [1], [0], [0], [0, 0, 1, 0], [], []>} : vector<8x128xf32>, vector<8x128xf32>, vector<8x8xf32> -> vector<8x8xf32>
    %cst_103 = arith.constant 0.0883883461 : f32
    %269 = vector.broadcast %cst_103 : f32 to vector<8x8xf32>
    %270 = arith.mulf %268, %269 : vector<8x8xf32>
    %cst_104 = arith.constant dense<0xFF800000> : vector<8xf32>
    %271 = vector.multi_reduction <maximumf>, %270, %cst_104 [1] : vector<8x8xf32> to vector<8xf32>
    %272 = vector.shape_cast %271 : vector<8xf32> to vector<8x1xf32>
    %273 = vector.broadcast %272 : vector<8x1xf32> to vector<8x8xf32>
    %274 = arith.subf %270, %273 : vector<8x8xf32>
    %275 = math.exp %274 : vector<8x8xf32>
    %cst_105 = arith.constant dense<0.000000e+00> : vector<8xf32>
    %276 = vector.multi_reduction <add>, %275, %cst_105 [1] : vector<8x8xf32> to vector<8xf32>
    %277 = vector.shape_cast %276 : vector<8xf32> to vector<8x1xf32>
    %278 = tpu.reciprocal %277 {approx = true} : vector<8x1xf32> -> vector<8x1xf32>
    %279 = vector.broadcast %278 : vector<8x1xf32> to vector<8x8xf32>
    %280 = arith.mulf %275, %279 : vector<8x8xf32>
    %cst_106 = arith.constant dense<0.000000e+00> : vector<8x128xf32>
    %281 = tpu.matmul %280, %267, %cst_106 {dimension_numbers = #tpu.dot_dimension_numbers<[1], [0], [0], [1], [0, 0, 1, 1], [], []>} : vector<8x8xf32>, vector<8x128xf32>, vector<8x128xf32> -> vector<8x128xf32>
    %282 = tpu.concatenate %264, %281 in 0 : vector<8x128xf32>, vector<8x128xf32> -> vector<16x128xf32>
    %283 = arith.truncf %282 : vector<16x128xf32> to vector<16x128xbf16>
    %c1_107 = arith.constant 1 : index
    %c128_108 = arith.constant 128 : index
    %c0_109 = arith.constant 0 : index
    %284 = vector.load %arg4[%c1_107, %c128_108, %c0_109] : memref<3x256x256xbf16, #tpu.memory_space<vmem>>, vector<1x128x256xbf16>
    %285 = vector.shape_cast %284 : vector<1x128x256xbf16> to vector<128x256xbf16>
    %cst_110 = arith.constant dense<0.000000e+00> : vector<16x256xf32>
    %286 = tpu.matmul %283, %285, %cst_110 {dimension_numbers = #tpu.dot_dimension_numbers<[1], [0], [0], [1], [0, 0, 1, 1], [], []>} : vector<16x128xbf16>, vector<128x256xbf16>, vector<16x256xf32> -> vector<16x256xf32>
    %287 = arith.addf %247, %286 : vector<16x256xf32>
    %288 = arith.addf %178, %287 : vector<16x256xf32>
    %cst_111 = arith.constant dense<0.000000e+00> : vector<16xf32>
    %289 = vector.multi_reduction <add>, %288, %cst_111 [1] : vector<16x256xf32> to vector<16xf32>
    %290 = vector.shape_cast %289 : vector<16xf32> to vector<16x1xf32>
    %cst_112 = arith.constant 2.560000e+02 : f32
    %291 = vector.broadcast %cst_112 : f32 to vector<16x1xf32>
    %292 = arith.divf %290, %291 : vector<16x1xf32>
    %293 = vector.broadcast %292 : vector<16x1xf32> to vector<16x256xf32>
    %294 = arith.subf %288, %293 : vector<16x256xf32>
    %295 = arith.mulf %294, %294 : vector<16x256xf32>
    %cst_113 = arith.constant dense<0.000000e+00> : vector<16xf32>
    %296 = vector.multi_reduction <add>, %295, %cst_113 [1] : vector<16x256xf32> to vector<16xf32>
    %297 = vector.shape_cast %296 : vector<16xf32> to vector<16x1xf32>
    %cst_114 = arith.constant 2.560000e+02 : f32
    %298 = vector.broadcast %cst_114 : f32 to vector<16x1xf32>
    %299 = arith.divf %297, %298 : vector<16x1xf32>
    %300 = vector.broadcast %292 : vector<16x1xf32> to vector<16x256xf32>
    %301 = arith.subf %288, %300 : vector<16x256xf32>
    %cst_115 = arith.constant 9.99999974E-6 : f32
    %302 = vector.broadcast %cst_115 : f32 to vector<16x1xf32>
    %303 = arith.addf %299, %302 : vector<16x1xf32>
    %304 = math.rsqrt %303 : vector<16x1xf32>
    %305 = vector.broadcast %304 : vector<16x1xf32> to vector<16x256xf32>
    %306 = arith.mulf %301, %305 : vector<16x256xf32>
    %307 = vector.broadcast %188 : vector<1x256xf32> to vector<16x256xf32>
    %308 = arith.mulf %306, %307 : vector<16x256xf32>
    %309 = vector.broadcast %189 : vector<1x256xf32> to vector<16x256xf32>
    %310 = arith.addf %308, %309 : vector<16x256xf32>
    %311 = arith.truncf %310 : vector<16x256xf32> to vector<16x256xbf16>
    %c1_116 = arith.constant 1 : index
    %c0_117 = arith.constant 0 : index
    %c0_118 = arith.constant 0 : index
    %312 = vector.load %arg5[%c1_116, %c0_117, %c0_118] : memref<3x256x512xbf16, #tpu.memory_space<vmem>>, vector<1x256x512xbf16>
    %313 = vector.shape_cast %312 : vector<1x256x512xbf16> to vector<256x512xbf16>
    %cst_119 = arith.constant dense<0.000000e+00> : vector<16x512xf32>
    %314 = tpu.matmul %311, %313, %cst_119 {dimension_numbers = #tpu.dot_dimension_numbers<[1], [0], [0], [1], [0, 0, 1, 1], [], []>} : vector<16x256xbf16>, vector<256x512xbf16>, vector<16x512xf32> -> vector<16x512xf32>
    %315 = vector.broadcast %184 : vector<1x512xf32> to vector<16x512xf32>
    %316 = arith.addf %314, %315 : vector<16x512xf32>
    %cst_120 = arith.constant 0.000000e+00 : f32
    %317 = vector.broadcast %cst_120 : f32 to vector<16x512xf32>
    %318 = arith.maximumf %316, %317 : vector<16x512xf32>
    %319 = arith.truncf %318 : vector<16x512xf32> to vector<16x512xbf16>
    %c1_121 = arith.constant 1 : index
    %c0_122 = arith.constant 0 : index
    %c0_123 = arith.constant 0 : index
    %320 = vector.load %arg6[%c1_121, %c0_122, %c0_123] : memref<3x512x256xbf16, #tpu.memory_space<vmem>>, vector<1x512x256xbf16>
    %321 = vector.shape_cast %320 : vector<1x512x256xbf16> to vector<512x256xbf16>
    %cst_124 = arith.constant dense<0.000000e+00> : vector<16x256xf32>
    %322 = tpu.matmul %319, %321, %cst_124 {dimension_numbers = #tpu.dot_dimension_numbers<[1], [0], [0], [1], [0, 0, 1, 1], [], []>} : vector<16x512xbf16>, vector<512x256xbf16>, vector<16x256xf32> -> vector<16x256xf32>
    %323 = vector.broadcast %187 : vector<1x256xf32> to vector<16x256xf32>
    %324 = arith.addf %322, %323 : vector<16x256xf32>
    %325 = arith.addf %310, %324 : vector<16x256xf32>
    %cst_125 = arith.constant dense<0.000000e+00> : vector<16xf32>
    %326 = vector.multi_reduction <add>, %325, %cst_125 [1] : vector<16x256xf32> to vector<16xf32>
    %327 = vector.shape_cast %326 : vector<16xf32> to vector<16x1xf32>
    %cst_126 = arith.constant 2.560000e+02 : f32
    %328 = vector.broadcast %cst_126 : f32 to vector<16x1xf32>
    %329 = arith.divf %327, %328 : vector<16x1xf32>
    %330 = vector.broadcast %329 : vector<16x1xf32> to vector<16x256xf32>
    %331 = arith.subf %325, %330 : vector<16x256xf32>
    %332 = arith.mulf %331, %331 : vector<16x256xf32>
    %cst_127 = arith.constant dense<0.000000e+00> : vector<16xf32>
    %333 = vector.multi_reduction <add>, %332, %cst_127 [1] : vector<16x256xf32> to vector<16xf32>
    %334 = vector.shape_cast %333 : vector<16xf32> to vector<16x1xf32>
    %cst_128 = arith.constant 2.560000e+02 : f32
    %335 = vector.broadcast %cst_128 : f32 to vector<16x1xf32>
    %336 = arith.divf %334, %335 : vector<16x1xf32>
    %337 = vector.broadcast %329 : vector<16x1xf32> to vector<16x256xf32>
    %338 = arith.subf %325, %337 : vector<16x256xf32>
    %cst_129 = arith.constant 9.99999974E-6 : f32
    %339 = vector.broadcast %cst_129 : f32 to vector<16x1xf32>
    %340 = arith.addf %336, %339 : vector<16x1xf32>
    %341 = math.rsqrt %340 : vector<16x1xf32>
    %342 = vector.broadcast %341 : vector<16x1xf32> to vector<16x256xf32>
    %343 = arith.mulf %338, %342 : vector<16x256xf32>
    %344 = vector.broadcast %190 : vector<1x256xf32> to vector<16x256xf32>
    %345 = arith.mulf %343, %344 : vector<16x256xf32>
    %346 = vector.broadcast %191 : vector<1x256xf32> to vector<16x256xf32>
    %347 = arith.addf %345, %346 : vector<16x256xf32>
    %c2 = arith.constant 2 : index
    %c0_130 = arith.constant 0 : index
    %c0_131 = arith.constant 0 : index
    %348 = vector.load %arg7[%c2, %c0_130, %c0_131] : memref<3x2x512xf32, #tpu.memory_space<vmem>>, vector<1x2x512xf32>
    %349 = vector.shape_cast %348 : vector<1x2x512xf32> to vector<2x512xf32>
    %c2_132 = arith.constant 2 : index
    %c0_133 = arith.constant 0 : index
    %c0_134 = arith.constant 0 : index
    %350 = vector.load %arg8[%c2_132, %c0_133, %c0_134] : memref<3x8x256xf32, #tpu.memory_space<vmem>>, vector<1x8x256xf32>
    %351 = vector.shape_cast %350 : vector<1x8x256xf32> to vector<8x256xf32>
    %352 = vector.extract_strided_slice %349 {offsets = [0, 0], sizes = [1, 512], strides = [1, 1]} : vector<2x512xf32> to vector<1x512xf32>
    %353 = vector.extract_strided_slice %349 {offsets = [1, 0], sizes = [1, 512], strides = [1, 1]} : vector<2x512xf32> to vector<1x512xf32>
    %354 = vector.extract_strided_slice %351 {offsets = [0, 0], sizes = [1, 256], strides = [1, 1]} : vector<8x256xf32> to vector<1x256xf32>
    %355 = vector.extract_strided_slice %351 {offsets = [1, 0], sizes = [1, 256], strides = [1, 1]} : vector<8x256xf32> to vector<1x256xf32>
    %356 = vector.extract_strided_slice %351 {offsets = [2, 0], sizes = [1, 256], strides = [1, 1]} : vector<8x256xf32> to vector<1x256xf32>
    %357 = vector.extract_strided_slice %351 {offsets = [3, 0], sizes = [1, 256], strides = [1, 1]} : vector<8x256xf32> to vector<1x256xf32>
    %358 = vector.extract_strided_slice %351 {offsets = [4, 0], sizes = [1, 256], strides = [1, 1]} : vector<8x256xf32> to vector<1x256xf32>
    %359 = vector.extract_strided_slice %351 {offsets = [5, 0], sizes = [1, 256], strides = [1, 1]} : vector<8x256xf32> to vector<1x256xf32>
    %360 = vector.extract_strided_slice %351 {offsets = [6, 0], sizes = [1, 256], strides = [1, 1]} : vector<8x256xf32> to vector<1x256xf32>
    %361 = arith.addf %347, %9 : vector<16x256xf32>
    %362 = arith.truncf %361 : vector<16x256xf32> to vector<16x256xbf16>
    %c2_135 = arith.constant 2 : index
    %c0_136 = arith.constant 0 : index
    %c0_137 = arith.constant 0 : index
    %363 = vector.load %arg2[%c2_135, %c0_136, %c0_137] : memref<3x256x512xbf16, #tpu.memory_space<vmem>>, vector<1x256x512xbf16>
    %364 = vector.shape_cast %363 : vector<1x256x512xbf16> to vector<256x512xbf16>
    %cst_138 = arith.constant dense<0.000000e+00> : vector<16x512xf32>
    %365 = tpu.matmul %362, %364, %cst_138 {dimension_numbers = #tpu.dot_dimension_numbers<[1], [0], [0], [1], [0, 0, 1, 1], [], []>} : vector<16x256xbf16>, vector<256x512xbf16>, vector<16x512xf32> -> vector<16x512xf32>
    %366 = vector.broadcast %352 : vector<1x512xf32> to vector<16x512xf32>
    %367 = arith.addf %365, %366 : vector<16x512xf32>
    %368 = arith.truncf %347 : vector<16x256xf32> to vector<16x256xbf16>
    %c2_139 = arith.constant 2 : index
    %c0_140 = arith.constant 0 : index
    %c0_141 = arith.constant 0 : index
    %369 = vector.load %arg3[%c2_139, %c0_140, %c0_141] : memref<3x256x256xbf16, #tpu.memory_space<vmem>>, vector<1x256x256xbf16>
    %370 = vector.shape_cast %369 : vector<1x256x256xbf16> to vector<256x256xbf16>
    %cst_142 = arith.constant dense<0.000000e+00> : vector<16x256xf32>
    %371 = tpu.matmul %368, %370, %cst_142 {dimension_numbers = #tpu.dot_dimension_numbers<[1], [0], [0], [1], [0, 0, 1, 1], [], []>} : vector<16x256xbf16>, vector<256x256xbf16>, vector<16x256xf32> -> vector<16x256xf32>
    %372 = vector.broadcast %354 : vector<1x256xf32> to vector<16x256xf32>
    %373 = arith.addf %371, %372 : vector<16x256xf32>
    %374 = vector.extract_strided_slice %367 {offsets = [0, 0], sizes = [16, 256], strides = [1, 1]} : vector<16x512xf32> to vector<16x256xf32>
    %375 = vector.extract_strided_slice %367 {offsets = [0, 256], sizes = [16, 256], strides = [1, 1]} : vector<16x512xf32> to vector<16x256xf32>
    %376 = vector.extract_strided_slice %374 {offsets = [0, 0], sizes = [8, 128], strides = [1, 1]} : vector<16x256xf32> to vector<8x128xf32>
    %377 = vector.extract_strided_slice %375 {offsets = [0, 0], sizes = [8, 128], strides = [1, 1]} : vector<16x256xf32> to vector<8x128xf32>
    %378 = vector.extract_strided_slice %373 {offsets = [0, 0], sizes = [8, 128], strides = [1, 1]} : vector<16x256xf32> to vector<8x128xf32>
    %cst_143 = arith.constant dense<0.000000e+00> : vector<8x8xf32>
    %379 = tpu.matmul %376, %377, %cst_143 {dimension_numbers = #tpu.dot_dimension_numbers<[1], [1], [0], [0], [0, 0, 1, 0], [], []>} : vector<8x128xf32>, vector<8x128xf32>, vector<8x8xf32> -> vector<8x8xf32>
    %cst_144 = arith.constant 0.0883883461 : f32
    %380 = vector.broadcast %cst_144 : f32 to vector<8x8xf32>
    %381 = arith.mulf %379, %380 : vector<8x8xf32>
    %cst_145 = arith.constant dense<0xFF800000> : vector<8xf32>
    %382 = vector.multi_reduction <maximumf>, %381, %cst_145 [1] : vector<8x8xf32> to vector<8xf32>
    %383 = vector.shape_cast %382 : vector<8xf32> to vector<8x1xf32>
    %384 = vector.broadcast %383 : vector<8x1xf32> to vector<8x8xf32>
    %385 = arith.subf %381, %384 : vector<8x8xf32>
    %386 = math.exp %385 : vector<8x8xf32>
    %cst_146 = arith.constant dense<0.000000e+00> : vector<8xf32>
    %387 = vector.multi_reduction <add>, %386, %cst_146 [1] : vector<8x8xf32> to vector<8xf32>
    %388 = vector.shape_cast %387 : vector<8xf32> to vector<8x1xf32>
    %389 = tpu.reciprocal %388 {approx = true} : vector<8x1xf32> -> vector<8x1xf32>
    %390 = vector.broadcast %389 : vector<8x1xf32> to vector<8x8xf32>
    %391 = arith.mulf %386, %390 : vector<8x8xf32>
    %cst_147 = arith.constant dense<0.000000e+00> : vector<8x128xf32>
    %392 = tpu.matmul %391, %378, %cst_147 {dimension_numbers = #tpu.dot_dimension_numbers<[1], [0], [0], [1], [0, 0, 1, 1], [], []>} : vector<8x8xf32>, vector<8x128xf32>, vector<8x128xf32> -> vector<8x128xf32>
    %393 = vector.extract_strided_slice %374 {offsets = [8, 0], sizes = [8, 128], strides = [1, 1]} : vector<16x256xf32> to vector<8x128xf32>
    %394 = vector.extract_strided_slice %375 {offsets = [8, 0], sizes = [8, 128], strides = [1, 1]} : vector<16x256xf32> to vector<8x128xf32>
    %395 = vector.extract_strided_slice %373 {offsets = [8, 0], sizes = [8, 128], strides = [1, 1]} : vector<16x256xf32> to vector<8x128xf32>
    %cst_148 = arith.constant dense<0.000000e+00> : vector<8x8xf32>
    %396 = tpu.matmul %393, %394, %cst_148 {dimension_numbers = #tpu.dot_dimension_numbers<[1], [1], [0], [0], [0, 0, 1, 0], [], []>} : vector<8x128xf32>, vector<8x128xf32>, vector<8x8xf32> -> vector<8x8xf32>
    %cst_149 = arith.constant 0.0883883461 : f32
    %397 = vector.broadcast %cst_149 : f32 to vector<8x8xf32>
    %398 = arith.mulf %396, %397 : vector<8x8xf32>
    %cst_150 = arith.constant dense<0xFF800000> : vector<8xf32>
    %399 = vector.multi_reduction <maximumf>, %398, %cst_150 [1] : vector<8x8xf32> to vector<8xf32>
    %400 = vector.shape_cast %399 : vector<8xf32> to vector<8x1xf32>
    %401 = vector.broadcast %400 : vector<8x1xf32> to vector<8x8xf32>
    %402 = arith.subf %398, %401 : vector<8x8xf32>
    %403 = math.exp %402 : vector<8x8xf32>
    %cst_151 = arith.constant dense<0.000000e+00> : vector<8xf32>
    %404 = vector.multi_reduction <add>, %403, %cst_151 [1] : vector<8x8xf32> to vector<8xf32>
    %405 = vector.shape_cast %404 : vector<8xf32> to vector<8x1xf32>
    %406 = tpu.reciprocal %405 {approx = true} : vector<8x1xf32> -> vector<8x1xf32>
    %407 = vector.broadcast %406 : vector<8x1xf32> to vector<8x8xf32>
    %408 = arith.mulf %403, %407 : vector<8x8xf32>
    %cst_152 = arith.constant dense<0.000000e+00> : vector<8x128xf32>
    %409 = tpu.matmul %408, %395, %cst_152 {dimension_numbers = #tpu.dot_dimension_numbers<[1], [0], [0], [1], [0, 0, 1, 1], [], []>} : vector<8x8xf32>, vector<8x128xf32>, vector<8x128xf32> -> vector<8x128xf32>
    %410 = tpu.concatenate %392, %409 in 0 : vector<8x128xf32>, vector<8x128xf32> -> vector<16x128xf32>
    %411 = arith.truncf %410 : vector<16x128xf32> to vector<16x128xbf16>
    %c2_153 = arith.constant 2 : index
    %c0_154 = arith.constant 0 : index
    %c0_155 = arith.constant 0 : index
    %412 = vector.load %arg4[%c2_153, %c0_154, %c0_155] : memref<3x256x256xbf16, #tpu.memory_space<vmem>>, vector<1x128x256xbf16>
    %413 = vector.shape_cast %412 : vector<1x128x256xbf16> to vector<128x256xbf16>
    %cst_156 = arith.constant dense<0.000000e+00> : vector<16x256xf32>
    %414 = tpu.matmul %411, %413, %cst_156 {dimension_numbers = #tpu.dot_dimension_numbers<[1], [0], [0], [1], [0, 0, 1, 1], [], []>} : vector<16x128xbf16>, vector<128x256xbf16>, vector<16x256xf32> -> vector<16x256xf32>
    %415 = vector.broadcast %355 : vector<1x256xf32> to vector<16x256xf32>
    %416 = arith.addf %415, %414 : vector<16x256xf32>
    %417 = vector.extract_strided_slice %374 {offsets = [0, 128], sizes = [8, 128], strides = [1, 1]} : vector<16x256xf32> to vector<8x128xf32>
    %418 = vector.extract_strided_slice %375 {offsets = [0, 128], sizes = [8, 128], strides = [1, 1]} : vector<16x256xf32> to vector<8x128xf32>
    %419 = vector.extract_strided_slice %373 {offsets = [0, 128], sizes = [8, 128], strides = [1, 1]} : vector<16x256xf32> to vector<8x128xf32>
    %cst_157 = arith.constant dense<0.000000e+00> : vector<8x8xf32>
    %420 = tpu.matmul %417, %418, %cst_157 {dimension_numbers = #tpu.dot_dimension_numbers<[1], [1], [0], [0], [0, 0, 1, 0], [], []>} : vector<8x128xf32>, vector<8x128xf32>, vector<8x8xf32> -> vector<8x8xf32>
    %cst_158 = arith.constant 0.0883883461 : f32
    %421 = vector.broadcast %cst_158 : f32 to vector<8x8xf32>
    %422 = arith.mulf %420, %421 : vector<8x8xf32>
    %cst_159 = arith.constant dense<0xFF800000> : vector<8xf32>
    %423 = vector.multi_reduction <maximumf>, %422, %cst_159 [1] : vector<8x8xf32> to vector<8xf32>
    %424 = vector.shape_cast %423 : vector<8xf32> to vector<8x1xf32>
    %425 = vector.broadcast %424 : vector<8x1xf32> to vector<8x8xf32>
    %426 = arith.subf %422, %425 : vector<8x8xf32>
    %427 = math.exp %426 : vector<8x8xf32>
    %cst_160 = arith.constant dense<0.000000e+00> : vector<8xf32>
    %428 = vector.multi_reduction <add>, %427, %cst_160 [1] : vector<8x8xf32> to vector<8xf32>
    %429 = vector.shape_cast %428 : vector<8xf32> to vector<8x1xf32>
    %430 = tpu.reciprocal %429 {approx = true} : vector<8x1xf32> -> vector<8x1xf32>
    %431 = vector.broadcast %430 : vector<8x1xf32> to vector<8x8xf32>
    %432 = arith.mulf %427, %431 : vector<8x8xf32>
    %cst_161 = arith.constant dense<0.000000e+00> : vector<8x128xf32>
    %433 = tpu.matmul %432, %419, %cst_161 {dimension_numbers = #tpu.dot_dimension_numbers<[1], [0], [0], [1], [0, 0, 1, 1], [], []>} : vector<8x8xf32>, vector<8x128xf32>, vector<8x128xf32> -> vector<8x128xf32>
    %434 = vector.extract_strided_slice %374 {offsets = [8, 128], sizes = [8, 128], strides = [1, 1]} : vector<16x256xf32> to vector<8x128xf32>
    %435 = vector.extract_strided_slice %375 {offsets = [8, 128], sizes = [8, 128], strides = [1, 1]} : vector<16x256xf32> to vector<8x128xf32>
    %436 = vector.extract_strided_slice %373 {offsets = [8, 128], sizes = [8, 128], strides = [1, 1]} : vector<16x256xf32> to vector<8x128xf32>
    %cst_162 = arith.constant dense<0.000000e+00> : vector<8x8xf32>
    %437 = tpu.matmul %434, %435, %cst_162 {dimension_numbers = #tpu.dot_dimension_numbers<[1], [1], [0], [0], [0, 0, 1, 0], [], []>} : vector<8x128xf32>, vector<8x128xf32>, vector<8x8xf32> -> vector<8x8xf32>
    %cst_163 = arith.constant 0.0883883461 : f32
    %438 = vector.broadcast %cst_163 : f32 to vector<8x8xf32>
    %439 = arith.mulf %437, %438 : vector<8x8xf32>
    %cst_164 = arith.constant dense<0xFF800000> : vector<8xf32>
    %440 = vector.multi_reduction <maximumf>, %439, %cst_164 [1] : vector<8x8xf32> to vector<8xf32>
    %441 = vector.shape_cast %440 : vector<8xf32> to vector<8x1xf32>
    %442 = vector.broadcast %441 : vector<8x1xf32> to vector<8x8xf32>
    %443 = arith.subf %439, %442 : vector<8x8xf32>
    %444 = math.exp %443 : vector<8x8xf32>
    %cst_165 = arith.constant dense<0.000000e+00> : vector<8xf32>
    %445 = vector.multi_reduction <add>, %444, %cst_165 [1] : vector<8x8xf32> to vector<8xf32>
    %446 = vector.shape_cast %445 : vector<8xf32> to vector<8x1xf32>
    %447 = tpu.reciprocal %446 {approx = true} : vector<8x1xf32> -> vector<8x1xf32>
    %448 = vector.broadcast %447 : vector<8x1xf32> to vector<8x8xf32>
    %449 = arith.mulf %444, %448 : vector<8x8xf32>
    %cst_166 = arith.constant dense<0.000000e+00> : vector<8x128xf32>
    %450 = tpu.matmul %449, %436, %cst_166 {dimension_numbers = #tpu.dot_dimension_numbers<[1], [0], [0], [1], [0, 0, 1, 1], [], []>} : vector<8x8xf32>, vector<8x128xf32>, vector<8x128xf32> -> vector<8x128xf32>
    %451 = tpu.concatenate %433, %450 in 0 : vector<8x128xf32>, vector<8x128xf32> -> vector<16x128xf32>
    %452 = arith.truncf %451 : vector<16x128xf32> to vector<16x128xbf16>
    %c2_167 = arith.constant 2 : index
    %c128_168 = arith.constant 128 : index
    %c0_169 = arith.constant 0 : index
    %453 = vector.load %arg4[%c2_167, %c128_168, %c0_169] : memref<3x256x256xbf16, #tpu.memory_space<vmem>>, vector<1x128x256xbf16>
    %454 = vector.shape_cast %453 : vector<1x128x256xbf16> to vector<128x256xbf16>
    %cst_170 = arith.constant dense<0.000000e+00> : vector<16x256xf32>
    %455 = tpu.matmul %452, %454, %cst_170 {dimension_numbers = #tpu.dot_dimension_numbers<[1], [0], [0], [1], [0, 0, 1, 1], [], []>} : vector<16x128xbf16>, vector<128x256xbf16>, vector<16x256xf32> -> vector<16x256xf32>
    %456 = arith.addf %416, %455 : vector<16x256xf32>
    %457 = arith.addf %347, %456 : vector<16x256xf32>
    %cst_171 = arith.constant dense<0.000000e+00> : vector<16xf32>
    %458 = vector.multi_reduction <add>, %457, %cst_171 [1] : vector<16x256xf32> to vector<16xf32>
    %459 = vector.shape_cast %458 : vector<16xf32> to vector<16x1xf32>
    %cst_172 = arith.constant 2.560000e+02 : f32
    %460 = vector.broadcast %cst_172 : f32 to vector<16x1xf32>
    %461 = arith.divf %459, %460 : vector<16x1xf32>
    %462 = vector.broadcast %461 : vector<16x1xf32> to vector<16x256xf32>
    %463 = arith.subf %457, %462 : vector<16x256xf32>
    %464 = arith.mulf %463, %463 : vector<16x256xf32>
    %cst_173 = arith.constant dense<0.000000e+00> : vector<16xf32>
    %465 = vector.multi_reduction <add>, %464, %cst_173 [1] : vector<16x256xf32> to vector<16xf32>
    %466 = vector.shape_cast %465 : vector<16xf32> to vector<16x1xf32>
    %cst_174 = arith.constant 2.560000e+02 : f32
    %467 = vector.broadcast %cst_174 : f32 to vector<16x1xf32>
    %468 = arith.divf %466, %467 : vector<16x1xf32>
    %469 = vector.broadcast %461 : vector<16x1xf32> to vector<16x256xf32>
    %470 = arith.subf %457, %469 : vector<16x256xf32>
    %cst_175 = arith.constant 9.99999974E-6 : f32
    %471 = vector.broadcast %cst_175 : f32 to vector<16x1xf32>
    %472 = arith.addf %468, %471 : vector<16x1xf32>
    %473 = math.rsqrt %472 : vector<16x1xf32>
    %474 = vector.broadcast %473 : vector<16x1xf32> to vector<16x256xf32>
    %475 = arith.mulf %470, %474 : vector<16x256xf32>
    %476 = vector.broadcast %357 : vector<1x256xf32> to vector<16x256xf32>
    %477 = arith.mulf %475, %476 : vector<16x256xf32>
    %478 = vector.broadcast %358 : vector<1x256xf32> to vector<16x256xf32>
    %479 = arith.addf %477, %478 : vector<16x256xf32>
    %480 = arith.truncf %479 : vector<16x256xf32> to vector<16x256xbf16>
    %c2_176 = arith.constant 2 : index
    %c0_177 = arith.constant 0 : index
    %c0_178 = arith.constant 0 : index
    %481 = vector.load %arg5[%c2_176, %c0_177, %c0_178] : memref<3x256x512xbf16, #tpu.memory_space<vmem>>, vector<1x256x512xbf16>
    %482 = vector.shape_cast %481 : vector<1x256x512xbf16> to vector<256x512xbf16>
    %cst_179 = arith.constant dense<0.000000e+00> : vector<16x512xf32>
    %483 = tpu.matmul %480, %482, %cst_179 {dimension_numbers = #tpu.dot_dimension_numbers<[1], [0], [0], [1], [0, 0, 1, 1], [], []>} : vector<16x256xbf16>, vector<256x512xbf16>, vector<16x512xf32> -> vector<16x512xf32>
    %484 = vector.broadcast %353 : vector<1x512xf32> to vector<16x512xf32>
    %485 = arith.addf %483, %484 : vector<16x512xf32>
    %cst_180 = arith.constant 0.000000e+00 : f32
    %486 = vector.broadcast %cst_180 : f32 to vector<16x512xf32>
    %487 = arith.maximumf %485, %486 : vector<16x512xf32>
    %488 = arith.truncf %487 : vector<16x512xf32> to vector<16x512xbf16>
    %c2_181 = arith.constant 2 : index
    %c0_182 = arith.constant 0 : index
    %c0_183 = arith.constant 0 : index
    %489 = vector.load %arg6[%c2_181, %c0_182, %c0_183] : memref<3x512x256xbf16, #tpu.memory_space<vmem>>, vector<1x512x256xbf16>
    %490 = vector.shape_cast %489 : vector<1x512x256xbf16> to vector<512x256xbf16>
    %cst_184 = arith.constant dense<0.000000e+00> : vector<16x256xf32>
    %491 = tpu.matmul %488, %490, %cst_184 {dimension_numbers = #tpu.dot_dimension_numbers<[1], [0], [0], [1], [0, 0, 1, 1], [], []>} : vector<16x512xbf16>, vector<512x256xbf16>, vector<16x256xf32> -> vector<16x256xf32>
    %492 = vector.broadcast %356 : vector<1x256xf32> to vector<16x256xf32>
    %493 = arith.addf %491, %492 : vector<16x256xf32>
    %494 = arith.addf %479, %493 : vector<16x256xf32>
    %cst_185 = arith.constant dense<0.000000e+00> : vector<16xf32>
    %495 = vector.multi_reduction <add>, %494, %cst_185 [1] : vector<16x256xf32> to vector<16xf32>
    %496 = vector.shape_cast %495 : vector<16xf32> to vector<16x1xf32>
    %cst_186 = arith.constant 2.560000e+02 : f32
    %497 = vector.broadcast %cst_186 : f32 to vector<16x1xf32>
    %498 = arith.divf %496, %497 : vector<16x1xf32>
    %499 = vector.broadcast %498 : vector<16x1xf32> to vector<16x256xf32>
    %500 = arith.subf %494, %499 : vector<16x256xf32>
    %501 = arith.mulf %500, %500 : vector<16x256xf32>
    %cst_187 = arith.constant dense<0.000000e+00> : vector<16xf32>
    %502 = vector.multi_reduction <add>, %501, %cst_187 [1] : vector<16x256xf32> to vector<16xf32>
    %503 = vector.shape_cast %502 : vector<16xf32> to vector<16x1xf32>
    %cst_188 = arith.constant 2.560000e+02 : f32
    %504 = vector.broadcast %cst_188 : f32 to vector<16x1xf32>
    %505 = arith.divf %503, %504 : vector<16x1xf32>
    %506 = vector.broadcast %498 : vector<16x1xf32> to vector<16x256xf32>
    %507 = arith.subf %494, %506 : vector<16x256xf32>
    %cst_189 = arith.constant 9.99999974E-6 : f32
    %508 = vector.broadcast %cst_189 : f32 to vector<16x1xf32>
    %509 = arith.addf %505, %508 : vector<16x1xf32>
    %510 = math.rsqrt %509 : vector<16x1xf32>
    %511 = vector.broadcast %510 : vector<16x1xf32> to vector<16x256xf32>
    %512 = arith.mulf %507, %511 : vector<16x256xf32>
    %513 = vector.broadcast %359 : vector<1x256xf32> to vector<16x256xf32>
    %514 = arith.mulf %512, %513 : vector<16x256xf32>
    %515 = vector.broadcast %360 : vector<1x256xf32> to vector<16x256xf32>
    %516 = arith.addf %514, %515 : vector<16x256xf32>
    %517 = vector.extract_strided_slice %516 {offsets = [0, 0], sizes = [8, 256], strides = [1, 1]} : vector<16x256xf32> to vector<8x256xf32>
    %c0_190 = arith.constant 0 : index
    %c0_191 = arith.constant 0 : index
    %c0_192 = arith.constant 0 : index
    %518 = vector.load %arg15[%c0_190, %c0_191, %c0_192] : memref<2x8x256xf32, #tpu.memory_space<vmem>>, vector<1x8x256xf32>
    %519 = vector.shape_cast %518 : vector<1x8x256xf32> to vector<8x256xf32>
    %520 = vector.shape_cast %517 : vector<8x256xf32> to vector<1x8x256xf32>
    tpu.vector_store %arg15[%c0_190, %c0_191, %c0_192], %520 {strides = array<i32>} : memref<2x8x256xf32, #tpu.memory_space<vmem>>, vector<1x8x256xf32>,
    %521 = vector.extract_strided_slice %516 {offsets = [8, 0], sizes = [8, 256], strides = [1, 1]} : vector<16x256xf32> to vector<8x256xf32>
    %c1_193 = arith.constant 1 : index
    %c0_194 = arith.constant 0 : index
    %c0_195 = arith.constant 0 : index
    %522 = vector.load %arg15[%c1_193, %c0_194, %c0_195] : memref<2x8x256xf32, #tpu.memory_space<vmem>>, vector<1x8x256xf32>
    %523 = vector.shape_cast %522 : vector<1x8x256xf32> to vector<8x256xf32>
    %524 = vector.shape_cast %521 : vector<8x256xf32> to vector<1x8x256xf32>
    tpu.vector_store %arg15[%c1_193, %c0_194, %c0_195], %524 {strides = array<i32>} : memref<2x8x256xf32, #tpu.memory_space<vmem>>, vector<1x8x256xf32>,
    %c0_196 = arith.constant 0 : index
    %c0_197 = arith.constant 0 : index
    %c0_198 = arith.constant 0 : index
    %525 = vector.load %arg10[%c0_196, %c0_197, %c0_198] : memref<3x3x256xf32, #tpu.memory_space<vmem>>, vector<1x3x256xf32>
    %526 = vector.shape_cast %525 : vector<1x3x256xf32> to vector<3x256xf32>
    %527 = arith.truncf %516 : vector<16x256xf32> to vector<16x256xbf16>
    %c0_199 = arith.constant 0 : index
    %c0_200 = arith.constant 0 : index
    %c0_201 = arith.constant 0 : index
    %528 = vector.load %arg9[%c0_199, %c0_200, %c0_201] : memref<3x256x256xbf16, #tpu.memory_space<vmem>>, vector<1x256x256xbf16>
    %529 = vector.shape_cast %528 : vector<1x256x256xbf16> to vector<256x256xbf16>
    %cst_202 = arith.constant dense<0.000000e+00> : vector<16x256xf32>
    %530 = tpu.matmul %527, %529, %cst_202 {dimension_numbers = #tpu.dot_dimension_numbers<[1], [0], [0], [1], [0, 0, 1, 1], [], []>} : vector<16x256xbf16>, vector<256x256xbf16>, vector<16x256xf32> -> vector<16x256xf32>
    %531 = vector.extract_strided_slice %526 {offsets = [0, 0], sizes = [1, 256], strides = [1, 1]} : vector<3x256xf32> to vector<1x256xf32>
    %532 = vector.broadcast %531 : vector<1x256xf32> to vector<16x256xf32>
    %533 = arith.addf %530, %532 : vector<16x256xf32>
    %534 = vector.extract_strided_slice %526 {offsets = [1, 0], sizes = [1, 256], strides = [1, 1]} : vector<3x256xf32> to vector<1x256xf32>
    %535 = vector.extract_strided_slice %526 {offsets = [2, 0], sizes = [1, 256], strides = [1, 1]} : vector<3x256xf32> to vector<1x256xf32>
    %cst_203 = arith.constant dense<0.000000e+00> : vector<16xf32>
    %536 = vector.multi_reduction <add>, %533, %cst_203 [1] : vector<16x256xf32> to vector<16xf32>
    %537 = vector.shape_cast %536 : vector<16xf32> to vector<16x1xf32>
    %cst_204 = arith.constant 2.560000e+02 : f32
    %538 = vector.broadcast %cst_204 : f32 to vector<16x1xf32>
    %539 = arith.divf %537, %538 : vector<16x1xf32>
    %540 = vector.broadcast %539 : vector<16x1xf32> to vector<16x256xf32>
    %541 = arith.subf %533, %540 : vector<16x256xf32>
    %542 = arith.mulf %541, %541 : vector<16x256xf32>
    %cst_205 = arith.constant dense<0.000000e+00> : vector<16xf32>
    %543 = vector.multi_reduction <add>, %542, %cst_205 [1] : vector<16x256xf32> to vector<16xf32>
    %544 = vector.shape_cast %543 : vector<16xf32> to vector<16x1xf32>
    %cst_206 = arith.constant 2.560000e+02 : f32
    %545 = vector.broadcast %cst_206 : f32 to vector<16x1xf32>
    %546 = arith.divf %544, %545 : vector<16x1xf32>
    %547 = vector.broadcast %539 : vector<16x1xf32> to vector<16x256xf32>
    %548 = arith.subf %533, %547 : vector<16x256xf32>
    %cst_207 = arith.constant 9.99999974E-6 : f32
    %549 = vector.broadcast %cst_207 : f32 to vector<16x1xf32>
    %550 = arith.addf %546, %549 : vector<16x1xf32>
    %551 = math.rsqrt %550 : vector<16x1xf32>
    %552 = vector.broadcast %551 : vector<16x1xf32> to vector<16x256xf32>
    %553 = arith.mulf %548, %552 : vector<16x256xf32>
    %554 = vector.broadcast %534 : vector<1x256xf32> to vector<16x256xf32>
    %555 = arith.mulf %553, %554 : vector<16x256xf32>
    %556 = vector.broadcast %535 : vector<1x256xf32> to vector<16x256xf32>
    %557 = arith.addf %555, %556 : vector<16x256xf32>
    %cst_208 = arith.constant 0.000000e+00 : f32
    %558 = vector.broadcast %cst_208 : f32 to vector<16x256xf32>
    %559 = arith.maximumf %557, %558 : vector<16x256xf32>
    %c1_209 = arith.constant 1 : index
    %c0_210 = arith.constant 0 : index
    %c0_211 = arith.constant 0 : index
    %560 = vector.load %arg10[%c1_209, %c0_210, %c0_211] : memref<3x3x256xf32, #tpu.memory_space<vmem>>, vector<1x3x256xf32>
    %561 = vector.shape_cast %560 : vector<1x3x256xf32> to vector<3x256xf32>
    %562 = arith.truncf %559 : vector<16x256xf32> to vector<16x256xbf16>
    %c1_212 = arith.constant 1 : index
    %c0_213 = arith.constant 0 : index
    %c0_214 = arith.constant 0 : index
    %563 = vector.load %arg9[%c1_212, %c0_213, %c0_214] : memref<3x256x256xbf16, #tpu.memory_space<vmem>>, vector<1x256x256xbf16>
    %564 = vector.shape_cast %563 : vector<1x256x256xbf16> to vector<256x256xbf16>
    %cst_215 = arith.constant dense<0.000000e+00> : vector<16x256xf32>
    %565 = tpu.matmul %562, %564, %cst_215 {dimension_numbers = #tpu.dot_dimension_numbers<[1], [0], [0], [1], [0, 0, 1, 1], [], []>} : vector<16x256xbf16>, vector<256x256xbf16>, vector<16x256xf32> -> vector<16x256xf32>
    %566 = vector.extract_strided_slice %561 {offsets = [0, 0], sizes = [1, 256], strides = [1, 1]} : vector<3x256xf32> to vector<1x256xf32>
    %567 = vector.broadcast %566 : vector<1x256xf32> to vector<16x256xf32>
    %568 = arith.addf %565, %567 : vector<16x256xf32>
    %569 = vector.extract_strided_slice %561 {offsets = [1, 0], sizes = [1, 256], strides = [1, 1]} : vector<3x256xf32> to vector<1x256xf32>
    %570 = vector.extract_strided_slice %561 {offsets = [2, 0], sizes = [1, 256], strides = [1, 1]} : vector<3x256xf32> to vector<1x256xf32>
    %cst_216 = arith.constant dense<0.000000e+00> : vector<16xf32>
    %571 = vector.multi_reduction <add>, %568, %cst_216 [1] : vector<16x256xf32> to vector<16xf32>
    %572 = vector.shape_cast %571 : vector<16xf32> to vector<16x1xf32>
    %cst_217 = arith.constant 2.560000e+02 : f32
    %573 = vector.broadcast %cst_217 : f32 to vector<16x1xf32>
    %574 = arith.divf %572, %573 : vector<16x1xf32>
    %575 = vector.broadcast %574 : vector<16x1xf32> to vector<16x256xf32>
    %576 = arith.subf %568, %575 : vector<16x256xf32>
    %577 = arith.mulf %576, %576 : vector<16x256xf32>
    %cst_218 = arith.constant dense<0.000000e+00> : vector<16xf32>
    %578 = vector.multi_reduction <add>, %577, %cst_218 [1] : vector<16x256xf32> to vector<16xf32>
    %579 = vector.shape_cast %578 : vector<16xf32> to vector<16x1xf32>
    %cst_219 = arith.constant 2.560000e+02 : f32
    %580 = vector.broadcast %cst_219 : f32 to vector<16x1xf32>
    %581 = arith.divf %579, %580 : vector<16x1xf32>
    %582 = vector.broadcast %574 : vector<16x1xf32> to vector<16x256xf32>
    %583 = arith.subf %568, %582 : vector<16x256xf32>
    %cst_220 = arith.constant 9.99999974E-6 : f32
    %584 = vector.broadcast %cst_220 : f32 to vector<16x1xf32>
    %585 = arith.addf %581, %584 : vector<16x1xf32>
    %586 = math.rsqrt %585 : vector<16x1xf32>
    %587 = vector.broadcast %586 : vector<16x1xf32> to vector<16x256xf32>
    %588 = arith.mulf %583, %587 : vector<16x256xf32>
    %589 = vector.broadcast %569 : vector<1x256xf32> to vector<16x256xf32>
    %590 = arith.mulf %588, %589 : vector<16x256xf32>
    %591 = vector.broadcast %570 : vector<1x256xf32> to vector<16x256xf32>
    %592 = arith.addf %590, %591 : vector<16x256xf32>
    %cst_221 = arith.constant 0.000000e+00 : f32
    %593 = vector.broadcast %cst_221 : f32 to vector<16x256xf32>
    %594 = arith.maximumf %592, %593 : vector<16x256xf32>
    %c2_222 = arith.constant 2 : index
    %c0_223 = arith.constant 0 : index
    %c0_224 = arith.constant 0 : index
    %595 = vector.load %arg10[%c2_222, %c0_223, %c0_224] : memref<3x3x256xf32, #tpu.memory_space<vmem>>, vector<1x3x256xf32>
    %596 = vector.shape_cast %595 : vector<1x3x256xf32> to vector<3x256xf32>
    %597 = arith.truncf %594 : vector<16x256xf32> to vector<16x256xbf16>
    %c2_225 = arith.constant 2 : index
    %c0_226 = arith.constant 0 : index
    %c0_227 = arith.constant 0 : index
    %598 = vector.load %arg9[%c2_225, %c0_226, %c0_227] : memref<3x256x256xbf16, #tpu.memory_space<vmem>>, vector<1x256x256xbf16>
    %599 = vector.shape_cast %598 : vector<1x256x256xbf16> to vector<256x256xbf16>
    %cst_228 = arith.constant dense<0.000000e+00> : vector<16x256xf32>
    %600 = tpu.matmul %597, %599, %cst_228 {dimension_numbers = #tpu.dot_dimension_numbers<[1], [0], [0], [1], [0, 0, 1, 1], [], []>} : vector<16x256xbf16>, vector<256x256xbf16>, vector<16x256xf32> -> vector<16x256xf32>
    %601 = vector.extract_strided_slice %596 {offsets = [0, 0], sizes = [1, 256], strides = [1, 1]} : vector<3x256xf32> to vector<1x256xf32>
    %602 = vector.broadcast %601 : vector<1x256xf32> to vector<16x256xf32>
    %603 = arith.addf %600, %602 : vector<16x256xf32>
    %604 = vector.extract_strided_slice %596 {offsets = [1, 0], sizes = [1, 256], strides = [1, 1]} : vector<3x256xf32> to vector<1x256xf32>
    %605 = vector.extract_strided_slice %596 {offsets = [2, 0], sizes = [1, 256], strides = [1, 1]} : vector<3x256xf32> to vector<1x256xf32>
    %cst_229 = arith.constant dense<0.000000e+00> : vector<16xf32>
    %606 = vector.multi_reduction <add>, %603, %cst_229 [1] : vector<16x256xf32> to vector<16xf32>
    %607 = vector.shape_cast %606 : vector<16xf32> to vector<16x1xf32>
    %cst_230 = arith.constant 2.560000e+02 : f32
    %608 = vector.broadcast %cst_230 : f32 to vector<16x1xf32>
    %609 = arith.divf %607, %608 : vector<16x1xf32>
    %610 = vector.broadcast %609 : vector<16x1xf32> to vector<16x256xf32>
    %611 = arith.subf %603, %610 : vector<16x256xf32>
    %612 = arith.mulf %611, %611 : vector<16x256xf32>
    %cst_231 = arith.constant dense<0.000000e+00> : vector<16xf32>
    %613 = vector.multi_reduction <add>, %612, %cst_231 [1] : vector<16x256xf32> to vector<16xf32>
    %614 = vector.shape_cast %613 : vector<16xf32> to vector<16x1xf32>
    %cst_232 = arith.constant 2.560000e+02 : f32
    %615 = vector.broadcast %cst_232 : f32 to vector<16x1xf32>
    %616 = arith.divf %614, %615 : vector<16x1xf32>
    %617 = vector.broadcast %609 : vector<16x1xf32> to vector<16x256xf32>
    %618 = arith.subf %603, %617 : vector<16x256xf32>
    %cst_233 = arith.constant 9.99999974E-6 : f32
    %619 = vector.broadcast %cst_233 : f32 to vector<16x1xf32>
    %620 = arith.addf %616, %619 : vector<16x1xf32>
    %621 = math.rsqrt %620 : vector<16x1xf32>
    %622 = vector.broadcast %621 : vector<16x1xf32> to vector<16x256xf32>
    %623 = arith.mulf %618, %622 : vector<16x256xf32>
    %624 = vector.broadcast %604 : vector<1x256xf32> to vector<16x256xf32>
    %625 = arith.mulf %623, %624 : vector<16x256xf32>
    %626 = vector.broadcast %605 : vector<1x256xf32> to vector<16x256xf32>
    %627 = arith.addf %625, %626 : vector<16x256xf32>
    %cst_234 = arith.constant 0.000000e+00 : f32
    %628 = vector.broadcast %cst_234 : f32 to vector<16x256xf32>
    %629 = arith.maximumf %627, %628 : vector<16x256xf32>
    %630 = arith.truncf %629 : vector<16x256xf32> to vector<16x256xbf16>
    %c0_235 = arith.constant 0 : index
    %c0_236 = arith.constant 0 : index
    %631 = vector.load %arg11[%c0_235, %c0_236] : memref<256x1024xbf16, #tpu.memory_space<vmem>>, vector<256x1024xbf16>
    %cst_237 = arith.constant dense<0.000000e+00> : vector<16x1024xf32>
    %632 = tpu.matmul %630, %631, %cst_237 {dimension_numbers = #tpu.dot_dimension_numbers<[1], [0], [0], [1], [0, 0, 1, 1], [], []>} : vector<16x256xbf16>, vector<256x1024xbf16>, vector<16x1024xf32> -> vector<16x1024xf32>
    %c0_238 = arith.constant 0 : index
    %c0_239 = arith.constant 0 : index
    %633 = vector.load %arg14[%c0_238, %c0_239] : memref<3x1024xf32, #tpu.memory_space<vmem>>, vector<1x1024xf32>
    %634 = vector.broadcast %633 : vector<1x1024xf32> to vector<16x1024xf32>
    %635 = arith.addf %632, %634 : vector<16x1024xf32>
    %cst_240 = arith.constant 0.000000e+00 : f32
    %636 = vector.broadcast %cst_240 : f32 to vector<16x1024xf32>
    %637 = arith.maximumf %635, %636 : vector<16x1024xf32>
    %638 = arith.truncf %637 : vector<16x1024xf32> to vector<16x1024xbf16>
    %c0_241 = arith.constant 0 : index
    %c0_242 = arith.constant 0 : index
    %639 = vector.load %arg12[%c0_241, %c0_242] : memref<1024x1024xbf16, #tpu.memory_space<vmem>>, vector<1024x1024xbf16>
    %cst_243 = arith.constant dense<0.000000e+00> : vector<16x1024xf32>
    %640 = tpu.matmul %638, %639, %cst_243 {dimension_numbers = #tpu.dot_dimension_numbers<[1], [0], [0], [1], [0, 0, 1, 1], [], []>} : vector<16x1024xbf16>, vector<1024x1024xbf16>, vector<16x1024xf32> -> vector<16x1024xf32>
    %c1_244 = arith.constant 1 : index
    %c0_245 = arith.constant 0 : index
    %641 = vector.load %arg14[%c1_244, %c0_245] : memref<3x1024xf32, #tpu.memory_space<vmem>>, vector<1x1024xf32>
    %642 = vector.broadcast %641 : vector<1x1024xf32> to vector<16x1024xf32>
    %643 = arith.addf %640, %642 : vector<16x1024xf32>
    %644 = arith.truncf %643 : vector<16x1024xf32> to vector<16x1024xbf16>
    %c0_246 = arith.constant 0 : index
    %c0_247 = arith.constant 0 : index
    %645 = vector.load %arg13[%c0_246, %c0_247] : memref<1024x128xbf16, #tpu.memory_space<vmem>>, vector<1024x128xbf16>
    %cst_248 = arith.constant dense<0.000000e+00> : vector<16x128xf32>
    %646 = tpu.matmul %644, %645, %cst_248 {dimension_numbers = #tpu.dot_dimension_numbers<[1], [0], [0], [1], [0, 0, 1, 1], [], []>} : vector<16x1024xbf16>, vector<1024x128xbf16>, vector<16x128xf32> -> vector<16x128xf32>
    %c2_249 = arith.constant 2 : index
    %c0_250 = arith.constant 0 : index
    %647 = vector.load %arg14[%c2_249, %c0_250] : memref<3x1024xf32, #tpu.memory_space<vmem>>, vector<1x128xf32>
    %648 = vector.broadcast %647 : vector<1x128xf32> to vector<16x128xf32>
    %649 = arith.addf %646, %648 : vector<16x128xf32>
    %650 = tpu.iota {dimensions = array<i32: 1>} : vector<16x128xi32>
    %c3_i32 = arith.constant 3 : i32
    %651 = vector.broadcast %c3_i32 : i32 to vector<16x128xi32>
    %652 = arith.cmpi sge, %650, %651 : vector<16x128xi32>
    %cst_251 = arith.constant 0.000000e+00 : f32
    %653 = vector.broadcast %cst_251 : f32 to vector<16x128xf32>
    %654 = arith.select %652, %649, %653 : vector<16x128xi1>, vector<16x128xf32>
    %655 = arith.mulf %654, %654 : vector<16x128xf32>
    %cst_252 = arith.constant dense<0.000000e+00> : vector<16xf32>
    %656 = vector.multi_reduction <add>, %655, %cst_252 [1] : vector<16x128xf32> to vector<16xf32>
    %657 = vector.shape_cast %656 : vector<16xf32> to vector<16x1xf32>
    %cst_253 = arith.constant 9.99999996E-13 : f32
    %658 = vector.broadcast %cst_253 : f32 to vector<16x1xf32>
    %659 = arith.addf %658, %657 : vector<16x1xf32>
    %660 = math.rsqrt %659 : vector<16x1xf32>
    %c3_i32_254 = arith.constant 3 : i32
    %661 = vector.broadcast %c3_i32_254 : i32 to vector<16x128xi32>
    %662 = arith.cmpi slt, %650, %661 : vector<16x128xi32>
    %663 = math.tanh %649 : vector<16x128xf32>
    %664 = vector.broadcast %660 : vector<16x1xf32> to vector<16x128xf32>
    %665 = arith.mulf %649, %664 : vector<16x128xf32>
    %666 = arith.select %662, %663, %665 : vector<16x128xi1>, vector<16x128xf32>
    %667 = vector.extract_strided_slice %666 {offsets = [0, 0], sizes = [8, 128], strides = [1, 1]} : vector<16x128xf32> to vector<8x128xf32>
    %c0_255 = arith.constant 0 : index
    %c0_256 = arith.constant 0 : index
    %c0_257 = arith.constant 0 : index
    %668 = vector.load %arg16[%c0_255, %c0_256, %c0_257] : memref<2x8x128xf32, #tpu.memory_space<vmem>>, vector<1x8x128xf32>
    %669 = vector.shape_cast %668 : vector<1x8x128xf32> to vector<8x128xf32>
    %670 = vector.shape_cast %667 : vector<8x128xf32> to vector<1x8x128xf32>
    tpu.vector_store %arg16[%c0_255, %c0_256, %c0_257], %670 {strides = array<i32>} : memref<2x8x128xf32, #tpu.memory_space<vmem>>, vector<1x8x128xf32>,
    %671 = vector.extract_strided_slice %666 {offsets = [8, 0], sizes = [8, 128], strides = [1, 1]} : vector<16x128xf32> to vector<8x128xf32>
    %c1_258 = arith.constant 1 : index
    %c0_259 = arith.constant 0 : index
    %c0_260 = arith.constant 0 : index
    %672 = vector.load %arg16[%c1_258, %c0_259, %c0_260] : memref<2x8x128xf32, #tpu.memory_space<vmem>>, vector<1x8x128xf32>
    %673 = vector.shape_cast %672 : vector<1x8x128xf32> to vector<8x128xf32>
    %674 = vector.shape_cast %671 : vector<8x128xf32> to vector<1x8x128xf32>
    tpu.vector_store %arg16[%c1_258, %c0_259, %c0_260], %674 {strides = array<i32>} : memref<2x8x128xf32, #tpu.memory_space<vmem>>, vector<1x8x128xf32>,
    return
  }
}

</mosaic_0001>

<bundles_post_ra>
// kernel: transformer_encoder_forward.1
= control target key start
LH: loop header
LB: loop body
LE: loop exit
PB: predicated region body
PF: predicated region fallthrough
CT: control target
= control target key end

     0   :  { %s19994_s0 = inlined_call_operand.vmem [shape: f32[2,8,256], index: 0, kind: input, shape index: {}]   ;;  %s19995_s1 = inlined_call_operand.vmem [shape: f32[2,8,256], index: 1, kind: input, shape index: {}]   ;;  %s19996_s2 = inlined_call_operand.hbm [shape: bf16[3,256,512], index: 2, kind: input, shape index: {}]   ;;  %s19997_s3 = inlined_call_operand.hbm [shape: bf16[3,256,256], index: 3, kind: input, shape index: {}]   ;;  %s19998_s4 = inlined_call_operand.hbm [shape: bf16[3,256,256], index: 4, kind: input, shape index: {}]   ;;  %s19999_s5 = inlined_call_operand.hbm [shape: bf16[3,256,512], index: 5, kind: input, shape index: {}]   ;;  %s20000_s6 = inlined_call_operand.hbm [shape: bf16[3,512,256], index: 6, kind: input, shape index: {}]   ;;  %s20001_s7 = inlined_call_operand.hbm [shape: f32[3,2,512], index: 7, kind: input, shape index: {}]   ;;  %s20002_s8 = inlined_call_operand.hbm [shape: f32[3,8,256], index: 8, kind: input, shape index: {}]   ;;  %s20003_s9 = inlined_call_operand.hbm [shape: bf16[3,256,256], index: 9, kind: input, shape index: {}]   ;;  %s20004_s10 = inlined_call_operand.hbm [shape: f32[3,3,256], index: 10, kind: input, shape index: {}]   ;;  %s20005_s11 = inlined_call_operand.hbm [shape: bf16[256,1024], index: 11, kind: input, shape index: {}]   ;;  %s20006_s12 = inlined_call_operand.hbm [shape: bf16[1024,1024], index: 12, kind: input, shape index: {}]   ;;  %s20007_s13 = inlined_call_operand.hbm [shape: bf16[1024,128], index: 13, kind: input, shape index: {}]   ;;  %s20008_s14 = inlined_call_operand.hbm [shape: f32[3,1024], index: 14, kind: input, shape index: {}]   ;;  %s20009_s15 = inlined_call_operand.vmem [shape: f32[2,8,256], index: 15, kind: output, shape index: {0}]   ;;  %s20010_s16 = inlined_call_operand.vmem [shape: f32[2,8,128], index: 16, kind: output, shape index: {1}]  }
   0x1   :  { %20012 = sst [smem:[#allocation29_spill]] %s19994_s0 }
   0x2   :  { %22 = vsyncpa [#allocation3], 0 }
   0x3   :  { %23 = vsyncpa [#allocation5], 0 }
   0x4   :  { %24 = vsyncpa [#allocation8], 0 }
   0x5   :  { %25 = vsyncpa [#allocation11], 0 }
   0x6   :  { %26 = vsyncpa [#allocation14], 0 }
   0x7   :  { %27 = vsyncpa [#allocation17], 0 }
   0x8   :  { %28 = vsyncpa [#allocation20], 0  ;;  %s18813_s21 = smov [#allocation4]  }
   0x9   :  { %s50_s22 = sshll.u32 %s18813_s21, 4  ;;  %s51_s22 = int_to_ptr.vmem [resolvable:$true] %s50_s22 }
   0xa   :  { %s18547_s23 = scalar_lea.vmem %s51_s22, 12288  ;;  %p18552_p1 = scmp.lt.s32.totalorder %s51_s22, %s51_s22 }
   0xb   :  { %p18548_p0 = scmp.ne.s32.totalorder %s51_s22, %s18547_s23  ;;  %p18553_p2 = scmp.lt.s32.totalorder %s18547_s23, %s18547_s23 }
   0xd   :  { %p18554_p3 = por %p18553_p2, %p18552_p1 }
   0xf   :  { %p18555_p4 = pnand %p18554_p3, %p18548_p0 }
  0x11   :  { %18558 = shalt.err (!%p18555_p4)
}
  0x12   :  { %s18814_s24 = smov 128   ;;  %s18815_s25 = smov 8  }
  0x13   :  { %56 = dma.hbm_to_vmem [thread:$0]  %s19997_s3, 12288, %s51_s22, [#allocation5], %s18814_s24, %s18814_s24, %s18815_s25  }
  0x14   :  { %s18816_s28 = smov [#allocation7]   ;;  %s18817_s30 = smov [#allocation10]  }
  0x15   :  { %s74_s29 = sshll.u32 %s18816_s28, 4  ;;  %s98_s0 = sshll.u32 %s18817_s30, 4  ;;  %s75_s29 = int_to_ptr.vmem [resolvable:$true] %s74_s29  ;;  %s99_s0 = int_to_ptr.vmem [resolvable:$true] %s98_s0 }
  0x16   :  { %s18567_s17 = scalar_lea.vmem %s75_s29, 24576  ;;  %p18572_p6 = scmp.lt.s32.totalorder %s75_s29, %s75_s29 }
  0x17   :  { %p18568_p5 = scmp.ne.s32.totalorder %s75_s29, %s18567_s17  ;;  %p18573_p7 = scmp.lt.s32.totalorder %s18567_s17, %s18567_s17 }
  0x19   :  { %p18574_p8 = por %p18573_p7, %p18572_p6 }
  0x1b   :  { %p18575_p9 = pnand %p18574_p8, %p18568_p5 }
  0x1d   :  { %18578 = shalt.err (!%p18575_p9)
}
  0x1e   :  { %s18818_s18 = smov 256   ;;  %s18819_s19 = smov 16  }
  0x1f   :  { %80 = dma.hbm_to_vmem [thread:$0]  %s19999_s5, 24576, %s75_s29, [#allocation8], %s18818_s18, %s18818_s18, %s18819_s19  }
  0x20   :  { %s18587_s3 = scalar_lea.vmem %s99_s0, 384  ;;  %p18592_p11 = scmp.lt.s32.totalorder %s99_s0, %s99_s0 }
  0x21   :  { %p18588_p10 = scmp.ne.s32.totalorder %s99_s0, %s18587_s3  ;;  %p18593_p12 = scmp.lt.s32.totalorder %s18587_s3, %s18587_s3 }
  0x23   :  { %p18594_p13 = por %p18593_p12, %p18592_p11 }
  0x25   :  { %p18595_p0 = pnand %p18594_p13, %p18588_p10 }
  0x27   :  { %18598 = shalt.err (!%p18595_p0)
}
  0x28   :  { %104 = dma.hbm_to_vmem [thread:$0]  %s20001_s7, 384, %s99_s0, [#allocation11], %s18814_s24, %s18814_s24, %s18815_s25  }
  0x29   :  { %s18820_s26 = smov [#allocation13]   ;;  %s18821_s28 = smov [#allocation16]  }
  0x2a   :  { %s122_s27 = sshll.u32 %s18820_s26, 4  ;;  %s146_s5 = sshll.u32 %s18821_s28, 4  ;;  %s123_s27 = int_to_ptr.vmem [resolvable:$true] %s122_s27  ;;  %s147_s5 = int_to_ptr.vmem [resolvable:$true] %s146_s5 }
  0x2b   :  { %s18607_s29 = scalar_lea.vmem %s123_s27, 12288  ;;  %p18612_p2 = scmp.lt.s32.totalorder %s123_s27, %s123_s27 }
  0x2c   :  { %p18608_p1 = scmp.ne.s32.totalorder %s123_s27, %s18607_s29  ;;  %p18613_p3 = scmp.lt.s32.totalorder %s18607_s29, %s18607_s29 }
  0x2e   :  { %p18614_p4 = por %p18613_p3, %p18612_p2 }
  0x30   :  { %p18615_p5 = pnand %p18614_p4, %p18608_p1 }
  0x32   :  { %18618 = shalt.err (!%p18615_p5)
}
  0x33   :  { %128 = dma.hbm_to_vmem [thread:$0]  %s20003_s9, 12288, %s123_s27, [#allocation14], %s18814_s24, %s18814_s24, %s18815_s25  }
  0x34   :  { %s18627_s7 = scalar_lea.vmem %s147_s5, 16384  ;;  %p18632_p7 = scmp.lt.s32.totalorder %s147_s5, %s147_s5 }
  0x35   :  { %p18628_p6 = scmp.ne.s32.totalorder %s147_s5, %s18627_s7  ;;  %p18633_p8 = scmp.lt.s32.totalorder %s18627_s7, %s18627_s7 }
  0x37   :  { %p18634_p9 = por %p18633_p8, %p18632_p7 }
  0x39   :  { %p18635_p10 = pnand %p18634_p9, %p18628_p6 }
  0x3b   :  { %18638 = shalt.err (!%p18635_p10)
}
  0x3c   :  { %s18822_s0 = smov 512   ;;  %s18823_s20 = smov 32  }
  0x3d   :  { %152 = dma.hbm_to_vmem [thread:$0]  %s20005_s11, 16384, %s147_s5, [#allocation17], %s18822_s0, %s18822_s0, %s18823_s20  }
  0x3e   :  { %s18824_s22 = smov [#allocation19]  }
  0x3f   :  { %s170_s23 = sshll.u32 %s18824_s22, 4  ;;  %s171_s23 = int_to_ptr.vmem [resolvable:$true] %s170_s23 }
  0x40   :  { %s18647_s9 = scalar_lea.vmem %s171_s23, 8192  ;;  %p18652_p12 = scmp.lt.s32.totalorder %s171_s23, %s171_s23 }
  0x41   :  { %p18648_p11 = scmp.ne.s32.totalorder %s171_s23, %s18647_s9  ;;  %p18653_p13 = scmp.lt.s32.totalorder %s18647_s9, %s18647_s9 }
  0x43   :  { %p18654_p0 = por %p18653_p13, %p18652_p12 }
  0x45   :  { %p18655_p1 = pnand %p18654_p0, %p18648_p11 }
  0x47   :  { %18658 = shalt.err (!%p18655_p1)
}
  0x48   :  { %s18825_s26 = smov 64   ;;  %s18826_s27 = smov 4  }
  0x49   :  { %176 = dma.hbm_to_vmem [thread:$0]  %s20007_s13, 8192, %s171_s23, [#allocation20], %s18825_s26, %s18825_s26, %s18826_s27  }
  0x4a   :  { %s18827_s30 = smov [#allocation2]   ;;  %s18828_s7 = smov [#allocation6]  }
  0x4b   :  { %s38_s17 = sshll.u32 %s18827_s30, 4  ;;  %s62_s11 = sshll.u32 %s18828_s7, 4  ;;  %s39_s17 = int_to_ptr.vmem [resolvable:$true] %s38_s17  ;;  %s63_s11 = int_to_ptr.vmem [resolvable:$true] %s62_s11 }
  0x4c   :  { %s18667_s5 = scalar_lea.vmem %s39_s17, 24576  ;;  %p18672_p3 = scmp.lt.s32.totalorder %s39_s17, %s39_s17 }
  0x4d   :  { %p18668_p2 = scmp.ne.s32.totalorder %s39_s17, %s18667_s5  ;;  %p18673_p4 = scmp.lt.s32.totalorder %s18667_s5, %s18667_s5 }
  0x4f   :  { %p18674_p5 = por %p18673_p4, %p18672_p3 }
  0x51   :  { %p18675_p6 = pnand %p18674_p5, %p18668_p2 }
  0x53   :  { %18678 = shalt.err (!%p18675_p6)
}
  0x54   :  { %44 = dma.hbm_to_vmem [thread:$0]  %s19996_s2, 24576, %s39_s17, [#allocation3], %s18818_s18, %s18818_s18, %s18819_s19  }
  0x55   :  { %s18687_s13 = scalar_lea.vmem %s63_s11, 12288  ;;  %p18692_p8 = scmp.lt.s32.totalorder %s63_s11, %s63_s11 }
  0x56   :  { %p18688_p7 = scmp.ne.s32.totalorder %s63_s11, %s18687_s13  ;;  %p18693_p9 = scmp.lt.s32.totalorder %s18687_s13, %s18687_s13 }
  0x58   :  { %p18694_p10 = por %p18693_p9, %p18692_p8 }
  0x5a   :  { %p18695_p11 = pnand %p18694_p10, %p18688_p7 }
  0x5c   :  { %18698 = shalt.err (!%p18695_p11)
}
  0x5d   :  { %68 = dma.hbm_to_vmem [thread:$0]  %s19998_s4, 12288, %s63_s11, [#allocation5], %s18814_s24, %s18814_s24, %s18815_s25  }
  0x5e   :  { %s18829_s9 = smov [#allocation9]   ;;  %s18830_s27 = smov [#allocation12]  }
  0x5f   :  { %s86_s26 = sshll.u32 %s18829_s9, 4  ;;  %s110_s28 = sshll.u32 %s18830_s27, 4  ;;  %s87_s26 = int_to_ptr.vmem [resolvable:$true] %s86_s26  ;;  %s111_s28 = int_to_ptr.vmem [resolvable:$true] %s110_s28 }
  0x60   :  { %s18707_s2 = scalar_lea.vmem %s87_s26, 24576  ;;  %p18712_p13 = scmp.lt.s32.totalorder %s87_s26, %s87_s26 }
  0x61   :  { %p18708_p12 = scmp.ne.s32.totalorder %s87_s26, %s18707_s2  ;;  %p18713_p0 = scmp.lt.s32.totalorder %s18707_s2, %s18707_s2 }
  0x63   :  { %p18714_p1 = por %p18713_p0, %p18712_p13 }
  0x65   :  { %p18715_p2 = pnand %p18714_p1, %p18708_p12 }
  0x67   :  { %18718 = shalt.err (!%p18715_p2)
}
  0x68   :  { %92 = dma.hbm_to_vmem [thread:$0]  %s20000_s6, 24576, %s87_s26, [#allocation8], %s18814_s24, %s18814_s24, %s18815_s25  }
  0x69   :  { %s18727_s4 = scalar_lea.vmem %s111_s28, 768  ;;  %p18732_p4 = scmp.lt.s32.totalorder %s111_s28, %s111_s28 }
  0x6a   :  { %p18728_p3 = scmp.ne.s32.totalorder %s111_s28, %s18727_s4  ;;  %p18733_p5 = scmp.lt.s32.totalorder %s18727_s4, %s18727_s4 }
  0x6c   :  { %p18734_p6 = por %p18733_p5, %p18732_p4 }
  0x6e   :  { %p18735_p7 = pnand %p18734_p6, %p18728_p3 }
  0x70   :  { %18738 = shalt.err (!%p18735_p7)
}
  0x71   :  { %116 = dma.hbm_to_vmem [thread:$0]  %s20002_s8, 768, %s111_s28, [#allocation11], %s18818_s18, %s18818_s18, %s18819_s19  }
  0x72   :  { %s18831_s11 = smov [#allocation15]   ;;  %s18832_s21 = smov [#allocation18]  }
  0x73   :  { %s134_s5 = sshll.u32 %s18831_s11, 4  ;;  %s158_s3 = sshll.u32 %s18832_s21, 4  ;;  %s135_s5 = int_to_ptr.vmem [resolvable:$true] %s134_s5  ;;  %s159_s3 = int_to_ptr.vmem [resolvable:$true] %s158_s3 }
  0x74   :  { %s18747_s6 = scalar_lea.vmem %s135_s5, 384  ;;  %p18752_p9 = scmp.lt.s32.totalorder %s135_s5, %s135_s5 }
  0x75   :  { %p18748_p8 = scmp.ne.s32.totalorder %s135_s5, %s18747_s6  ;;  %p18753_p10 = scmp.lt.s32.totalorder %s18747_s6, %s18747_s6 }
  0x77   :  { %p18754_p11 = por %p18753_p10, %p18752_p9 }
  0x79   :  { %p18755_p12 = pnand %p18754_p11, %p18748_p8 }
  0x7b   :  { %18758 = shalt.err (!%p18755_p12)
}
  0x7c   :  { %140 = dma.hbm_to_vmem [thread:$0]  %s20004_s10, 384, %s135_s5, [#allocation14], %s18814_s24, %s18814_s24, %s18815_s25  }
  0x7d   :  { %s18767_s8 = scalar_lea.vmem %s159_s3, 65536  ;;  %p18772_p0 = scmp.lt.s32.totalorder %s159_s3, %s159_s3 }
  0x7e   :  { %p18768_p13 = scmp.ne.s32.totalorder %s159_s3, %s18767_s8  ;;  %p18773_p1 = scmp.lt.s32.totalorder %s18767_s8, %s18767_s8 }
  0x80   :  { %p18774_p2 = por %p18773_p1, %p18772_p0 }
  0x82   :  { %p18775_p3 = pnand %p18774_p2, %p18768_p13 }
  0x84   :  { %18778 = shalt.err (!%p18775_p3)
}
  0x85   :  { %164 = dma.hbm_to_vmem [thread:$0]  %s20006_s12, 65536, %s159_s3, [#allocation17], %s18822_s0, %s18822_s0, %s18823_s20  }
  0x86   :  { %s18833_s23 = smov [#allocation21]  }
  0x87   :  { %s183_s9 = sshll.u32 %s18833_s23, 4  ;;  %s184_s9 = int_to_ptr.vmem [resolvable:$true] %s183_s9 }
  0x88   :  { %s18787_s26 = scalar_lea.vmem %s184_s9, 512  ;;  %p18792_p5 = scmp.lt.s32.totalorder %s184_s9, %s184_s9 }
  0x89   :  { %p18788_p4 = scmp.ne.s32.totalorder %s184_s9, %s18787_s26  ;;  %p18793_p6 = scmp.lt.s32.totalorder %s18787_s26, %s18787_s26 }
  0x8b   :  { %p18794_p7 = por %p18793_p6, %p18792_p5 }
  0x8d   :  { %p18795_p8 = pnand %p18794_p7, %p18788_p4 }
  0x8f   :  { %18798 = shalt.err (!%p18795_p8)
}
  0x90   :  { %186 = dma.hbm_to_vmem [thread:$0]  %s20008_s14, 512, %s184_s9, [#allocation20]  }
  0x91   :  { %18799 = dma.done.wait [#allocation3], 24576  }
  0x92   :  { %18800 = vsyncadd [#allocation3], 4294942720 }
  0x93   :  { %18801 = dma.done.wait [#allocation5], 24576  }
  0x94   :  { %18802 = vsyncadd [#allocation5], 4294942720 }
  0x95   :  { %18803 = dma.done.wait [#allocation8], 49152  }
  0x96   :  { %18804 = vsyncadd [#allocation8], 4294918144 }
  0x97   :  { %18805 = dma.done.wait [#allocation11], 1152  }
  0x98   :  { %18806 = vsyncadd [#allocation11], 4294966144 }
  0x99   :  { %18807 = dma.done.wait [#allocation14], 12672  }
  0x9a   :  { %18808 = vsyncadd [#allocation14], 4294954624 }
  0x9b   :  { %18809 = dma.done.wait [#allocation17], 81920  }
  0x9c   :  { %18810 = vsyncadd [#allocation17], 4294885376 }
  0x9d   :  { %18811 = dma.done.wait [#allocation20], 8704  }
  0x9e   :  { %18812 = vsyncadd [#allocation20], 4294958592  ;;  %v17066_v0 = vld [vmem:[#allocation2 + $0xe4] ss:$16 sps:$4 sm:$0xff]   ;;  %v17068_v1 = vld [vmem:[#allocation2 + $0xec] ss:$16 sps:$4 sm:$0xff]  }
  0x9f   :  { %667 = vmatprep.subr.bf16.mxu0 %v17066_v0  ;;  %v17070_v2 = vld [vmem:[#allocation2 + $0xe0] ss:$16 sps:$4 sm:$0xff]   ;;  %v17071_v3 = vld [vmem:[#allocation2 + $0xe8] ss:$16 sps:$4 sm:$0xff]   ;;  %710 = vmatprep.subr.bf16.mxu1 %v17068_v1  ;;  %v17072_v4 = vld [vmem:[#allocation2 + $0xc4] ss:$16 sps:$4 sm:$0xff]  }
  0xa0   :  { %668 = vmatpush1.bf16.msra.mxu0 %v17070_v2  ;;  %711 = vmatpush1.bf16.msra.mxu1 %v17071_v3  ;;  %v17074_v5 = vld [vmem:[#allocation2 + $0xcc] ss:$16 sps:$4 sm:$0xff]   ;;  %v17076_v6 = vld [vmem:[#allocation2 + $0xc0] ss:$16 sps:$4 sm:$0xff]   ;;  %v17077_v7 = vld [vmem:[#allocation2 + $0xc8] ss:$16 sps:$4 sm:$0xff]  }
  0xa1   :  { %669 = vmatprep.subr.bf16.mxu0 %v17072_v4  ;;  %712 = vmatprep.subr.bf16.mxu1 %v17074_v5  ;;  %v17078_v8 = vld [vmem:[#allocation2 + $0xa4] ss:$16 sps:$4 sm:$0xff]   ;;  %v17080_v9 = vld [vmem:[#allocation2 + $0xac] ss:$16 sps:$4 sm:$0xff]   ;;  %v17082_v10 = vld [vmem:[#allocation2 + $0xa0] ss:$16 sps:$4 sm:$0xff]  }
  0xa2   :  { %v17083_v11 = vld [vmem:[#allocation2 + $0xa8] ss:$16 sps:$4 sm:$0xff]   ;;  %v17084_v12 = vld [vmem:[#allocation2 + $0x84] ss:$16 sps:$4 sm:$0xff]   ;;  %v17086_v13 = vld [vmem:[#allocation2 + $0x8c] ss:$16 sps:$4 sm:$0xff]  }
  0xa3   :  { %v17088_v14 = vld [vmem:[#allocation2 + $0x80] ss:$16 sps:$4 sm:$0xff]   ;;  %v17089_v15 = vld [vmem:[#allocation2 + $0x88] ss:$16 sps:$4 sm:$0xff]   ;;  %v17090_v16 = vld [vmem:[#allocation2 + $0x64] ss:$16 sps:$4 sm:$0xff]  }
  0xa4   :  { %670 = vmatpush1.bf16.msra.mxu0 %v17076_v6  ;;  %713 = vmatpush1.bf16.msra.mxu1 %v17077_v7  ;;  %v17092_v17 = vld [vmem:[#allocation2 + $0x6c] ss:$16 sps:$4 sm:$0xff]   ;;  %v17094_v18 = vld [vmem:[#allocation2 + $0x60] ss:$16 sps:$4 sm:$0xff]   ;;  %v17095_v19 = vld [vmem:[#allocation2 + $0x68] ss:$16 sps:$4 sm:$0xff]  }
  0xa5   :  { %671 = vmatprep.subr.bf16.mxu0 %v17078_v8  ;;  %714 = vmatprep.subr.bf16.mxu1 %v17080_v9  ;;  %v17096_v20 = vld [vmem:[#allocation2 + $0x44] ss:$16 sps:$4 sm:$0xff]   ;;  %v17098_v21 = vld [vmem:[#allocation2 + $0x4c] ss:$16 sps:$4 sm:$0xff]   ;;  %v17100_v22 = vld [vmem:[#allocation2 + $0x40] ss:$16 sps:$4 sm:$0xff]  }
  0xa6   :  { %v17101_v23 = vld [vmem:[#allocation2 + $0x48] ss:$16 sps:$4 sm:$0xff]   ;;  %v17102_v24 = vld [vmem:[#allocation2 + $0x24] ss:$16 sps:$4 sm:$0xff]   ;;  %v17104_v25 = vld [vmem:[#allocation2 + $0x2c] ss:$16 sps:$4 sm:$0xff]  }
  0xa7   :  { %v17106_v26 = vld [vmem:[#allocation2 + $0x20] ss:$16 sps:$4 sm:$0xff]   ;;  %v17107_v27 = vld [vmem:[#allocation2 + $0x28] ss:$16 sps:$4 sm:$0xff]   ;;  %v17108_v28 = vld [vmem:[#allocation2 + $0x4] ss:$16 sps:$4 sm:$0xff]  }
  0xa8   :  { %672 = vmatpush1.bf16.msra.mxu0 %v17082_v10  ;;  %715 = vmatpush1.bf16.msra.mxu1 %v17083_v11  ;;  %v17110_v29 = vld [vmem:[#allocation2 + $0xc] ss:$16 sps:$4 sm:$0xff]   ;;  %v17112_v30 = vld [vmem:[#allocation2] ss:$16 sps:$4 sm:$0xff]   ;;  %v17113_v31 = vld [vmem:[#allocation2 + $0x8] ss:$16 sps:$4 sm:$0xff]  }
  0xa9   :  { %673 = vmatprep.subr.bf16.mxu0 %v17084_v12  ;;  %716 = vmatprep.subr.bf16.mxu1 %v17086_v13  ;;  %v17114_v32 = vld [vmem:[#allocation2 + $0x1e4] ss:$16 sps:$4 sm:$0xff]   ;;  %v17116_v33 = vld [vmem:[#allocation2 + $0x1ec] ss:$16 sps:$4 sm:$0xff]   ;;  %v17118_v34 = vld [vmem:[#allocation2 + $0x1e0] ss:$16 sps:$4 sm:$0xff]  }
  0xaa   :  { %v17119_v35 = vld [vmem:[#allocation2 + $0x1e8] ss:$16 sps:$4 sm:$0xff]   ;;  %v17120_v36 = vld [vmem:[#allocation2 + $0x1c4] ss:$16 sps:$4 sm:$0xff]   ;;  %v17122_v37 = vld [vmem:[#allocation2 + $0x1cc] ss:$16 sps:$4 sm:$0xff]  }
  0xab   :  { %v17124_v38 = vld [vmem:[#allocation2 + $0x1c0] ss:$16 sps:$4 sm:$0xff]   ;;  %v17125_v39 = vld [vmem:[#allocation2 + $0x1c8] ss:$16 sps:$4 sm:$0xff]   ;;  %v17126_v40 = vld [vmem:[#allocation2 + $0x1a4] ss:$16 sps:$4 sm:$0xff]  }
  0xac   :  { %674 = vmatpush1.bf16.msra.mxu0 %v17088_v14  ;;  %717 = vmatpush1.bf16.msra.mxu1 %v17089_v15  ;;  %v17128_v41 = vld [vmem:[#allocation2 + $0x1ac] ss:$16 sps:$4 sm:$0xff]   ;;  %v17130_v42 = vld [vmem:[#allocation2 + $0x1a0] ss:$16 sps:$4 sm:$0xff]   ;;  %v17131_v43 = vld [vmem:[#allocation2 + $0x1a8] ss:$16 sps:$4 sm:$0xff]  }
  0xad   :  { %675 = vmatprep.subr.bf16.mxu0 %v17090_v16  ;;  %718 = vmatprep.subr.bf16.mxu1 %v17092_v17  ;;  %v17132_v44 = vld [vmem:[#allocation2 + $0x184] ss:$16 sps:$4 sm:$0xff]   ;;  %v17134_v45 = vld [vmem:[#allocation2 + $0x18c] ss:$16 sps:$4 sm:$0xff]   ;;  %s20013_s25 = sld [smem:[#allocation29_spill]]  ;;  %vm18835_vm0 = vmmov 0  }
  0xae   :  { %v233_v48 = vld [vmem:[%s19995_s1 + $0x8] sm:$0xff]  ;;  %v15201_v49 = vld [vmem:[%s19995_s1 + $0x18] sm:$0xff]  ;;  %v17136_v50 = vld [vmem:[#allocation2 + $0x180] ss:$16 sps:$4 sm:$0xff]   ;;  %vm1069_vm1 = vcmask 64512  }
  0xaf   :  { %v17137_v51 = vld [vmem:[#allocation2 + $0x188] ss:$16 sps:$4 sm:$0xff]   ;;  %v17138_v52 = vld [vmem:[#allocation2 + $0x164] ss:$16 sps:$4 sm:$0xff]   ;;  %v17140_v55 = vld [vmem:[#allocation2 + $0x16c] ss:$16 sps:$4 sm:$0xff]  }
  0xb0   :  { %676 = vmatpush1.bf16.msra.mxu0 %v17094_v18  ;;  %719 = vmatpush1.bf16.msra.mxu1 %v17095_v19  ;;  %v17142_v57 = vld [vmem:[#allocation2 + $0x160] ss:$16 sps:$4 sm:$0xff]   ;;  %v17143_v58 = vld [vmem:[#allocation2 + $0x168] ss:$16 sps:$4 sm:$0xff]   ;;  %v17144_v59 = vld [vmem:[#allocation2 + $0x144] ss:$16 sps:$4 sm:$0xff]  }
  0xb1   :  { %677 = vmatprep.subr.bf16.mxu0 %v17096_v20  ;;  %720 = vmatprep.subr.bf16.mxu1 %v17098_v21  ;;  %v17146_v60 = vld [vmem:[#allocation2 + $0x14c] ss:$16 sps:$4 sm:$0xff]   ;;  %v17148_v61 = vld [vmem:[#allocation2 + $0x140] ss:$16 sps:$4 sm:$0xff]   ;;  %v17149_v62 = vld [vmem:[#allocation2 + $0x148] ss:$16 sps:$4 sm:$0xff]  }
  0xb2   :  { %v17150_v63 = vld [vmem:[#allocation2 + $0x124] ss:$16 sps:$4 sm:$0xff]   ;;  %v17152_v0 = vld [vmem:[#allocation2 + $0x12c] ss:$16 sps:$4 sm:$0xff]   ;;  %v17154_v1 = vld [vmem:[#allocation2 + $0x120] ss:$16 sps:$4 sm:$0xff]  }
  0xb3   :  { %v18997_v46 = vld [vmem:[%s20013_s25 + $0x8] sm:$0xff]  ;;  %v19002_v47 = vld [vmem:[%s20013_s25 + $0x18] sm:$0xff]  ;;  %v19015_v3 = vld [vmem:[%s20013_s25] sm:$0xff] }
  0xb4   :  { %678 = vmatpush1.bf16.msra.mxu0 %v17100_v22  ;;  %721 = vmatpush1.bf16.msra.mxu1 %v17101_v23  ;;  %v241_v53 = vadd.f32 %v233_v48, %v18997_v46  ;;  %v243_v54 = vadd.f32 %v15201_v49, %v19002_v47  ;;  %v17155_v2 = vld [vmem:[#allocation2 + $0x128] ss:$16 sps:$4 sm:$0xff]   ;;  %v17156_v4 = vld [vmem:[#allocation2 + $0x104] ss:$16 sps:$4 sm:$0xff]   ;;  %v17158_v8 = vld [vmem:[#allocation2 + $0x10c] ss:$16 sps:$4 sm:$0xff]   ;;  %v754_v16 = vpack.c.bf16 %v19002_v47, %v18997_v46  ;;  %v311_v49 = vlaneseq }
  0xb5   :  { %679 = vmatprep.subr.bf16.mxu0 %v17102_v24  ;;  %722 = vmatprep.subr.bf16.mxu1 %v17104_v25  ;;  %v19020_v5 = vld [vmem:[%s20013_s25 + $0x10] sm:$0xff]  ;;  %v232_v6 = vld [vmem:[%s19995_s1] sm:$0xff]  ;;  %v17161_v12 = vld [vmem:[#allocation2 + $0x108] ss:$16 sps:$4 sm:$0xff]   ;;  %v18834_v48 = vmov 0.0  }
  0xb6   :  { %v245_v56 = vpack.c.bf16 %v243_v54, %v241_v53  ;;  %v15200_v7 = vld [vmem:[%s19995_s1 + $0x10] sm:$0xff]  ;;  %v240_v10 = vadd.f32 %v232_v6, %v19015_v3  ;;  %v17167_v17 = vld [vmem:[#allocation4 + $0x64] ss:$8 sps:$4 sm:$0xff]   ;;  %v17165_v18 = vld [vmem:[#allocation4 + $0x60] ss:$8 sps:$4 sm:$0xff]   ;;  %v753_v47 = vpack.c.bf16 %v19020_v5, %v19015_v3 }
  0xb7   :  { %v17160_v9 = vld [vmem:[#allocation2 + $0x100] ss:$16 sps:$4 sm:$0xff]   ;;  %v242_v11 = vadd.f32 %v15200_v7, %v19020_v5  ;;  %v17164_v13 = vld [vmem:[#allocation4 + $0x74] ss:$8 sps:$4 sm:$0xff]   ;;  %v17173_v21 = vld [vmem:[#allocation4 + $0x44] ss:$8 sps:$4 sm:$0xff]  }
  0xb8   :  { %680 = vmatpush1.bf16.msra.mxu0 %v17106_v26  ;;  %723 = vmatpush1.bf16.msra.mxu1 %v17107_v27  ;;  %v17162_v15 = vld [vmem:[#allocation4 + $0x70] ss:$8 sps:$4 sm:$0xff]   ;;  %v17170_v19 = vld [vmem:[#allocation4 + $0x54] ss:$8 sps:$4 sm:$0xff]   ;;  %v17171_v22 = vld [vmem:[#allocation4 + $0x40] ss:$8 sps:$4 sm:$0xff]  }
  0xb9   :  { %681 = vmatprep.subr.bf16.mxu0 %v17108_v28  ;;  %724 = vmatprep.subr.bf16.mxu1 %v17110_v29  ;;  %v244_v14 = vpack.c.bf16 %v242_v11, %v240_v10  ;;  %v17168_v20 = vld [vmem:[#allocation4 + $0x50] ss:$8 sps:$4 sm:$0xff]   ;;  %v17176_v23 = vld [vmem:[#allocation4 + $0x34] ss:$8 sps:$4 sm:$0xff]   ;;  %v17179_v25 = vld [vmem:[#allocation4 + $0x24] ss:$8 sps:$4 sm:$0xff]  }
  0xba   :  { %699 = vmatprep.mubr.bf16.mxu0 %v245_v56  ;;  %742 = vmatprep.mubr.bf16.mxu1 %v245_v56  ;;  %v17174_v24 = vld [vmem:[#allocation4 + $0x30] ss:$8 sps:$4 sm:$0xff]   ;;  %v17177_v26 = vld [vmem:[#allocation4 + $0x20] ss:$8 sps:$4 sm:$0xff]   ;;  %v17182_v27 = vld [vmem:[#allocation4 + $0x14] ss:$8 sps:$4 sm:$0xff]  }
  0xbb   :  { %v17180_v28 = vld [vmem:[#allocation4 + $0x10] ss:$8 sps:$4 sm:$0xff]   ;;  %v17185_v29 = vld [vmem:[#allocation4 + $0x4] ss:$8 sps:$4 sm:$0xff]   ;;  %v17207_v46 = vld [vmem:[#allocation4 + $0x80] ss:$8 sps:$4 sm:$0xff]  }
  0xbc   :  { %682 = vmatpush1.bf16.msra.mxu0 %v17112_v30  ;;  %725 = vmatpush1.bf16.msra.mxu1 %v17113_v31  ;;  %v17183_v30 = vld [vmem:[#allocation4] ss:$8 sps:$4 sm:$0xff]   ;;  %v17188_v31 = vld [vmem:[#allocation4 + $0xf4] ss:$8 sps:$4 sm:$0xff]  }
  0xbd   :  { %683 = vmatprep.subr.bf16.mxu0 %v17114_v32  ;;  %726 = vmatprep.subr.bf16.mxu1 %v17116_v33  ;;  %v17186_v32 = vld [vmem:[#allocation4 + $0xf0] ss:$8 sps:$4 sm:$0xff]   ;;  %v17191_v33 = vld [vmem:[#allocation4 + $0xe4] ss:$8 sps:$4 sm:$0xff]  }
  0xc0   :  { %684 = vmatpush2.bf16.msra.mxu0 %v17118_v34  ;;  %727 = vmatpush2.bf16.msra.mxu1 %v17119_v35  ;;  %v17189_v34 = vld [vmem:[#allocation4 + $0xe0] ss:$8 sps:$4 sm:$0xff]   ;;  %v17194_v35 = vld [vmem:[#allocation4 + $0xd4] ss:$8 sps:$4 sm:$0xff]  }
  0xc1   :  { %685 = vmatprep.subr.bf16.mxu0 %v17120_v36  ;;  %728 = vmatprep.subr.bf16.mxu1 %v17122_v37  ;;  %v17192_v36 = vld [vmem:[#allocation4 + $0xd0] ss:$8 sps:$4 sm:$0xff]   ;;  %v17197_v37 = vld [vmem:[#allocation4 + $0xc4] ss:$8 sps:$4 sm:$0xff]  }
  0xc4   :  { %686 = vmatpush2.bf16.msra.mxu0 %v17124_v38  ;;  %729 = vmatpush2.bf16.msra.mxu1 %v17125_v39  ;;  %v17195_v38 = vld [vmem:[#allocation4 + $0xc0] ss:$8 sps:$4 sm:$0xff]   ;;  %v17200_v39 = vld [vmem:[#allocation4 + $0xb4] ss:$8 sps:$4 sm:$0xff]  }
  0xc5   :  { %687 = vmatprep.subr.bf16.mxu0 %v17126_v40  ;;  %730 = vmatprep.subr.bf16.mxu1 %v17128_v41  ;;  %v17198_v40 = vld [vmem:[#allocation4 + $0xb0] ss:$8 sps:$4 sm:$0xff]   ;;  %v17203_v41 = vld [vmem:[#allocation4 + $0xa4] ss:$8 sps:$4 sm:$0xff]  }
  0xc8   :  { %688 = vmatpush2.bf16.msra.mxu0 %v17130_v42  ;;  %731 = vmatpush2.bf16.msra.mxu1 %v17131_v43  ;;  %v17201_v42 = vld [vmem:[#allocation4 + $0xa0] ss:$8 sps:$4 sm:$0xff]   ;;  %v17206_v43 = vld [vmem:[#allocation4 + $0x94] ss:$8 sps:$4 sm:$0xff]  }
  0xc9   :  { %689 = vmatprep.subr.bf16.mxu0 %v17132_v44  ;;  %732 = vmatprep.subr.bf16.mxu1 %v17134_v45  ;;  %v17204_v44 = vld [vmem:[#allocation4 + $0x90] ss:$8 sps:$4 sm:$0xff]   ;;  %v17209_v45 = vld [vmem:[#allocation4 + $0x84] ss:$8 sps:$4 sm:$0xff]  }
  0xcc   :  { %690 = vmatpush2.bf16.msra.mxu0 %v17136_v50  ;;  %733 = vmatpush2.bf16.msra.mxu1 %v17137_v51  ;;  %v19041_v50 = vshrl.u32 %v311_v49, 7  ;;  %v19043_v51 = vld [vmem:[#allocation10] sm:$0xff] }
  0xcd   :  { %691 = vmatprep.subr.bf16.mxu0 %v17138_v52  ;;  %734 = vmatprep.subr.bf16.mxu1 %v17140_v55 }
  0xce   :  { %v19046_v52 = vsub.s32 4, %v19041_v50  ;;  %v19049_v53 = vsub.s32 0, %v19041_v50 }
  0xd0   :  { %692 = vmatpush2.bf16.msra.mxu0 %v17142_v57  ;;  %735 = vmatpush2.bf16.msra.mxu1 %v17143_v58  ;;  %v322_v54 = vrot.slane %v19043_v51, %v19046_v52  ;;  %v314_v55 = vrot.slane %v19043_v51, %v19049_v53 }
  0xd1   :  { %693 = vmatprep.subr.bf16.mxu0 %v17144_v59  ;;  %736 = vmatprep.subr.bf16.mxu1 %v17146_v60 }
  0xd2   :  { %v342_v56 = vrot.slane %v322_v54, %v19049_v53  ;;  %v334_v57 = vrot.slane %v314_v55, %v19049_v53  ;;  %v17216_v54 = vld [vmem:[#allocation6 + $0x50] ss:$8 sps:$4 sm:$0xff]   ;;  %v17221_v55 = vld [vmem:[#allocation6 + $0x44] ss:$8 sps:$4 sm:$0xff]  }
  0xd4   :  { %694 = vmatpush2.bf16.msra.mxu0 %v17148_v61  ;;  %737 = vmatpush2.bf16.msra.mxu1 %v17149_v62 }
  0xd5   :  { %695 = vmatprep.subr.bf16.mxu0 %v17150_v63  ;;  %738 = vmatprep.subr.bf16.mxu1 %v17152_v0 }
  0xd8   :  { %696 = vmatpush2.bf16.msra.mxu0 %v17154_v1  ;;  %739 = vmatpush2.bf16.msra.mxu1 %v17155_v2  ;;  %v19062_v1 = vld [vmem:[#allocation12] sm:$0xff]  ;;  %v19064_v2 = vld [vmem:[#allocation12 + $0x8] sm:$0xff] }
  0xd9   :  { %697 = vmatprep.subr.bf16.mxu0 %v17156_v4  ;;  %740 = vmatprep.subr.bf16.mxu1 %v17158_v8  ;;  %v790_v3 = vrot.slane %v19062_v1, %v19049_v53  ;;  %v794_v5 = vrot.slane %v19064_v2, %v19049_v53 }
  0xdc   :  { %698 = vmatpush2.bf16.msra.mxu0 %v17160_v9  ;;  %741 = vmatpush2.bf16.msra.mxu1 %v17161_v12 }
  0xdd   :  { %955 = vmatprep.subr.bf16.mxu0 %v17164_v13  ;;  %16937 = vmatprep.subr.mxu1 %v18834_v48 }
  0xdf   :  { %700 = vmatmul.mubr.bf16.vlgmr.msra.gmra.mxu0 %v244_v14  ;;  %743 = vmatmul.mubr.bf16.vlgmr.msra.gmra.mxu1 %v244_v14 }
  0xe0   :  { %956 = vmatpush1.bf16.msra.mxu0 %v17162_v15  ;;  %987 = vmatprep.mubr.bf16.mxu0 %v754_v16 }
  0xe1   :  { %957 = vmatprep.subr.bf16.mxu0 %v17167_v17  ;;  %16939 = vmatprep.mubr.msk.f32.mxu1 %vm18835_vm0, %v18834_v48 }
  0xe4   :  { %958 = vmatpush1.bf16.msra.mxu0 %v17165_v18 }
  0xe5   :  { %959 = vmatprep.subr.bf16.mxu0 %v17170_v19 }
  0xe8   :  { %960 = vmatpush1.bf16.msra.mxu0 %v17168_v20 }
  0xe9   :  { %961 = vmatprep.subr.bf16.mxu0 %v17173_v21 }
  0xec   :  { %962 = vmatpush1.bf16.msra.mxu0 %v17171_v22 }
  0xed   :  { %963 = vmatprep.subr.bf16.mxu0 %v17176_v23 }
  0xf0   :  { %964 = vmatpush1.bf16.msra.mxu0 %v17174_v24 }
  0xf1   :  { %965 = vmatprep.subr.bf16.mxu0 %v17179_v25 }
  0xf4   :  { %966 = vmatpush1.bf16.msra.mxu0 %v17177_v26 }
  0xf5   :  { %967 = vmatprep.subr.bf16.mxu0 %v17182_v27 }
  0xf8   :  { %968 = vmatpush1.bf16.msra.mxu0 %v17180_v28 }
  0xf9   :  { %969 = vmatprep.subr.bf16.mxu0 %v17185_v29 }
  0xfc   :  { %970 = vmatpush1.bf16.msra.mxu0 %v17183_v30 }
  0xfd   :  { %971 = vmatprep.subr.bf16.mxu0 %v17188_v31 }
 0x100   :  { %972 = vmatpush2.bf16.msra.mxu0 %v17186_v32 }
 0x101   :  { %973 = vmatprep.subr.bf16.mxu0 %v17191_v33 }
 0x104   :  { %974 = vmatpush2.bf16.msra.mxu0 %v17189_v34 }
 0x105   :  { %975 = vmatprep.subr.bf16.mxu0 %v17194_v35 }
 0x108   :  { %976 = vmatpush2.bf16.msra.mxu0 %v17192_v36 }
 0x109   :  { %977 = vmatprep.subr.bf16.mxu0 %v17197_v37 }
 0x10c   :  { %978 = vmatpush2.bf16.msra.mxu0 %v17195_v38 }
 0x10d   :  { %979 = vmatprep.subr.bf16.mxu0 %v17200_v39 }
 0x110   :  { %980 = vmatpush2.bf16.msra.mxu0 %v17198_v40  ;;  %v17212_v40 = vld [vmem:[#allocation6 + $0x74] ss:$8 sps:$4 sm:$0xff]  }
 0x111   :  { %981 = vmatprep.subr.bf16.mxu0 %v17203_v41 }
 0x114   :  { %982 = vmatpush2.bf16.msra.mxu0 %v17201_v42 }
 0x115   :  { %983 = vmatprep.subr.bf16.mxu0 %v17206_v43  ;;  %v17210_v43 = vld [vmem:[#allocation6 + $0x70] ss:$8 sps:$4 sm:$0xff]  }
 0x118   :  { %984 = vmatpush2.bf16.msra.mxu0 %v17204_v44 }
 0x119   :  { %985 = vmatprep.subr.bf16.mxu0 %v17209_v45  ;;  %v17215_v45 = vld [vmem:[#allocation6 + $0x64] ss:$8 sps:$4 sm:$0xff]  }
 0x11c   :  { %986 = vmatpush2.bf16.msra.mxu0 %v17207_v46  ;;  %v17213_v46 = vld [vmem:[#allocation6 + $0x60] ss:$8 sps:$4 sm:$0xff]  }
 0x11d   :  { %16922 = vmatprep.subr.mxu0 %v18834_v48 }
 0x11f   :  { %988 = vmatmul.mubr.bf16.vlgmr.msra.gmra.mxu0 %v753_v47  ;;  %v17218_v47 = vld [vmem:[#allocation6 + $0x54] ss:$8 sps:$4 sm:$0xff]  }
 0x120   :  { %16924 = vmatprep.mubr.msk.f32.mxu0 %vm18835_vm0, %v18834_v48 }
 0x19f   :  { %v701_v58 = vpop.f32.mrf.mxu0  ;;  %v744_v59 = vpop.f32.mrf.mxu1 }
 0x1a0   :  { %v745_v60 = vadd.f32 %v744_v59, %v342_v56  ;;  %v702_v61 = vadd.f32 %v701_v58, %v334_v57  ;;  %v17222_v58 = vld [vmem:[#allocation6 + $0x30] ss:$8 sps:$4 sm:$0xff]   ;;  %v17227_v59 = vld [vmem:[#allocation6 + $0x24] ss:$8 sps:$4 sm:$0xff]  }
 0x1a1   :  { %v19057_v62 = vpop.f32.mrf.mxu0  ;;  %v19077_v23 = vpop.f32.mrf.mxu1 }
 0x1a2   :  { %16923 = vmatpush3.xpose.msra.mxu0 %v745_v60  ;;  %v17225_v60 = vld [vmem:[#allocation6 + $0x20] ss:$8 sps:$4 sm:$0xff]  }
 0x1a3   :  { %v705_v63 = vpop.f32.mrf.mxu0  ;;  %16927 = vmatprep.subr.mxu0 %v18834_v48  ;;  %v748_v24 = vpop.f32.mrf.mxu1 }
 0x1a4   :  { %v706_v0 = vadd.f32 %v705_v63, %v334_v57  ;;  %v749_v27 = vadd.f32 %v748_v24, %v342_v56  ;;  %v17219_v56 = vld [vmem:[#allocation6 + $0x40] ss:$8 sps:$4 sm:$0xff]   ;;  %v17224_v57 = vld [vmem:[#allocation6 + $0x34] ss:$8 sps:$4 sm:$0xff]   ;;  %v17228_v63 = vld [vmem:[#allocation6 + $0x10] ss:$8 sps:$4 sm:$0xff]  }
 0x1a5   :  { %16925 = vmatmul.mubr.f32.vlgmr.msra.gmra.mxu0 %v702_v61  ;;  %v19068_v4 = vpop.f32.mrf.mxu0  ;;  %v17230_v61 = vld [vmem:[#allocation6 + $0x14] ss:$8 sps:$4 sm:$0xff]  }
 0x1a6   :  { %16929 = vmatprep.mubr.msk.f32.mxu0 %vm18835_vm0, %v18834_v48 }
 0x1df   :  { %v989_v6 = vpop.f32.mrf.mxu0 }
 0x1e0   :  { %v990_v7 = vadd.f32 %v989_v6, %v790_v3  ;;  %v19093_v6 = vsub.s32 6, %v19041_v50 }
 0x1e1   :  { %v991_v8 = vpop.f32.mrf.mxu0 }
 0x1e2   :  { %v19072_v9 = vadd.f32 %v991_v8, %v794_v5  ;;  %16928 = vmatpush3.msra.mxu0 %v990_v7  ;;  %v326_v7 = vrot.slane %v19043_v51, %v19093_v6  ;;  %v19098_v8 = vsub.s32 2, %v19041_v50 }
 0x1e3   :  { %v993_v10 = vpop.f32.mrf.mxu0  ;;  %16932 = vmatprep.subr.mxu0 %v18834_v48 }
 0x1e4   :  { %v994_v11 = vadd.f32 %v993_v10, %v790_v3  ;;  %v17231_v3 = vld [vmem:[#allocation6] ss:$8 sps:$4 sm:$0xff]   ;;  %v346_v10 = vrot.slane %v326_v7, %v19049_v53 }
 0x1e5   :  { %v995_v12 = vpop.f32.mrf.mxu0  ;;  %v17255_v7 = vld [vmem:[#allocation6 + $0x80] ss:$8 sps:$4 sm:$0xff]  }
 0x1e6   :  { %16938 = vmatpush3.msra.mxu1 %v994_v11  ;;  %v996_v28 = vadd.f32 %v995_v12, %v794_v5  ;;  %v18836_v5 = vmov 0   ;;  %v750_v11 = vpop.f32.mrf.mxu1 }
 0x1e7   :  { %1406 = vmatprep.subr.bf16.mxu1 %v17212_v40 }
 0x265   :  { %v1064_v13 = vpop.f32.mrf.mxu0 }
 0x266   :  { %v1068_v14 = vmul.f32 0.088388346, %v1064_v13  ;;  %v318_v13 = vrot.slane %v19043_v51, %v19098_v8 }
 0x267   :  { %v16926_v15 = vpop.f32.mrf.mxu0 }
 0x268   :  { %v1070_v16 = vsel %vm1069_vm1, %v1068_v14, -inf  ;;  %v747_v15 = vadd.f32 %v19077_v23, %v346_v10 }
 0x269   :  { %1071 = vmax.xlane.f32.xlu0 %v1070_v16 }
 0x2f2   :  { %v1072_v17 = vpop.xlane.xlu0 %1071 }
 0x2f3   :  { %v1073_v18 = vsub.f32 %v1068_v14, %v1072_v17  ;;  %v338_v17 = vrot.slane %v318_v13, %v19049_v53 }
 0x2f5   :  { %v1074_v19 = vmul.f32 1.442695, %v1073_v18  ;;  %v704_v18 = vadd.f32 %v19057_v62, %v338_v17 }
 0x2f7   :  { %18426 = vpow2.f32 %v1074_v19 }
 0x304   :  { %v18427_v20 = vpop.eup %18426 }
 0x305   :  { %v1076_v21 = vsel %vm1069_vm1, %v18427_v20, 0.0 }
 0x306   :  { %1077 = vadd.xlane.f32.xlu0 %v1076_v21 }
 0x38f   :  { %v1078_v22 = vpop.xlane.xlu0 %1077 }
 0x390   :  { %18428 = vrcp.f32 %v1078_v22 }
 0x39d   :  { %v18429_v25 = vpop.eup %18428 }
 0x39e   :  { %v1080_v26 = vmul.f32 %v18429_v25, %v18427_v20 }
 0x3a0   :  { %16930 = vmatmul.mubr.msk.f32.vlgmr.msra.gmra.mxu0 %vm1069_vm1, %v1080_v26 }
 0x3a1   :  { %16933 = vmatpush3.xpose.msra.mxu0 %v749_v27  ;;  %16934 = vmatprep.mubr.msk.f32.mxu0 %vm18835_vm0, %v18834_v48 }
 0x3a2   :  { %16957 = vmatprep.subr.mxu0 %v18834_v48 }
 0x3a4   :  { %16935 = vmatmul.mubr.f32.vlgmr.msra.gmra.mxu0 %v706_v0  ;;  %v17233_v0 = vld [vmem:[#allocation6 + $0x4] ss:$8 sps:$4 sm:$0xff]  }
 0x3a5   :  { %16958 = vmatpush3.msra.mxu0 %v996_v28  ;;  %16959 = vmatprep.mubr.msk.f32.mxu0 %vm18835_vm0, %v18834_v48 }
 0x460   :  { %v19085_v29 = vpop.f32.mrf.mxu0 }
 0x462   :  { %v16931_v30 = vpop.f32.mrf.mxu0 }
 0x464   :  { %v1220_v31 = vpop.f32.mrf.mxu0 }
 0x465   :  { %v1224_v32 = vmul.f32 0.088388346, %v1220_v31 }
 0x466   :  { %v16936_v33 = vpop.f32.mrf.mxu0 }
 0x467   :  { %v1225_v34 = vsel %vm1069_vm1, %v1224_v32, -inf  ;;  %v708_v33 = vadd.f32 %v19068_v4, %v338_v17  ;;  %v17234_v4 = vld [vmem:[#allocation6 + $0xf0] ss:$8 sps:$4 sm:$0xff]  }
 0x468   :  { %1226 = vmax.xlane.f32.xlu1 %v1225_v34 }
 0x4f1   :  { %v1227_v35 = vpop.xlane.xlu1 %1226 }
 0x4f2   :  { %v1228_v36 = vsub.f32 %v1224_v32, %v1227_v35  ;;  %v751_v32 = vadd.f32 %v750_v11, %v346_v10 }
 0x4f4   :  { %v1229_v37 = vmul.f32 1.442695, %v1228_v36 }
 0x4f6   :  { %18430 = vpow2.f32 %v1229_v37 }
 0x503   :  { %v18431_v38 = vpop.eup %18430 }
 0x504   :  { %v1231_v39 = vsel %vm1069_vm1, %v18431_v38, 0.0 }
 0x505   :  { %1232 = vadd.xlane.f32.xlu1 %v1231_v39 }
 0x58e   :  { %v1233_v41 = vpop.xlane.xlu1 %1232 }
 0x58f   :  { %18432 = vrcp.f32 %v1233_v41 }
 0x59c   :  { %v18433_v42 = vpop.eup %18432 }
 0x59d   :  { %v1235_v44 = vmul.f32 %v18433_v42, %v18431_v38 }
 0x59f   :  { %16940 = vmatmul.mubr.msk.f32.vlgmr.msra.gmra.mxu1 %vm1069_vm1, %v1235_v44 }
 0x5a0   :  { %1407 = vmatpush1.bf16.msra.mxu1 %v17210_v43  ;;  %1438 = vmatprep.mubr.bf16.mxu1 %v18836_v5 }
 0x5a1   :  { %1408 = vmatprep.subr.bf16.mxu1 %v17215_v45  ;;  %v17236_v45 = vld [vmem:[#allocation6 + $0xf4] ss:$8 sps:$4 sm:$0xff]  }
 0x5a4   :  { %1409 = vmatpush1.bf16.msra.mxu1 %v17213_v46  ;;  %v17239_v46 = vld [vmem:[#allocation6 + $0xe4] ss:$8 sps:$4 sm:$0xff]  }
 0x5a5   :  { %1410 = vmatprep.subr.bf16.mxu1 %v17218_v47  ;;  %v17237_v47 = vld [vmem:[#allocation6 + $0xe0] ss:$8 sps:$4 sm:$0xff]  }
 0x5a8   :  { %1411 = vmatpush1.bf16.msra.mxu1 %v17216_v54  ;;  %v17242_v54 = vld [vmem:[#allocation6 + $0xd4] ss:$8 sps:$4 sm:$0xff]  }
 0x5a9   :  { %1412 = vmatprep.subr.bf16.mxu1 %v17221_v55  ;;  %v17240_v55 = vld [vmem:[#allocation6 + $0xd0] ss:$8 sps:$4 sm:$0xff]  }
 0x5ac   :  { %1413 = vmatpush1.bf16.msra.mxu1 %v17219_v56  ;;  %v17245_v56 = vld [vmem:[#allocation6 + $0xc4] ss:$8 sps:$4 sm:$0xff]  }
 0x5ad   :  { %1414 = vmatprep.subr.bf16.mxu1 %v17224_v57  ;;  %v17243_v57 = vld [vmem:[#allocation6 + $0xc0] ss:$8 sps:$4 sm:$0xff]  }
 0x5b0   :  { %1415 = vmatpush1.bf16.msra.mxu1 %v17222_v58  ;;  %v17248_v58 = vld [vmem:[#allocation6 + $0xb4] ss:$8 sps:$4 sm:$0xff]  }
 0x5b1   :  { %1416 = vmatprep.subr.bf16.mxu1 %v17227_v59  ;;  %v17246_v59 = vld [vmem:[#allocation6 + $0xb0] ss:$8 sps:$4 sm:$0xff]  }
 0x5b4   :  { %1417 = vmatpush1.bf16.msra.mxu1 %v17225_v60  ;;  %v17251_v60 = vld [vmem:[#allocation6 + $0xa4] ss:$8 sps:$4 sm:$0xff]  }
 0x5b5   :  { %1418 = vmatprep.subr.bf16.mxu1 %v17230_v61  ;;  %v17249_v61 = vld [vmem:[#allocation6 + $0xa0] ss:$8 sps:$4 sm:$0xff]  }
 0x5b8   :  { %1419 = vmatpush1.bf16.msra.mxu1 %v17228_v63  ;;  %v17254_v63 = vld [vmem:[#allocation6 + $0x94] ss:$8 sps:$4 sm:$0xff]  }
 0x5b9   :  { %1420 = vmatprep.subr.bf16.mxu1 %v17233_v0  ;;  %v17252_v0 = vld [vmem:[#allocation6 + $0x90] ss:$8 sps:$4 sm:$0xff]  }
 0x5bc   :  { %1421 = vmatpush1.bf16.msra.mxu1 %v17231_v3  ;;  %v17257_v3 = vld [vmem:[#allocation6 + $0x84] ss:$8 sps:$4 sm:$0xff]  }
 0x5bd   :  { %16942 = vmatprep.subr.mxu1 %v18834_v48 }
 0x65f   :  { %v1305_v12 = vpop.f32.mrf.mxu1 }
 0x660   :  { %v1309_v14 = vpack.c.bf16 %v1305_v12, %v19085_v29 }
 0x661   :  { %v16941_v16 = vpop.f32.mrf.mxu1 }
 0x662   :  { %1439 = vmatmul.mubr.bf16.vlgmr.msra.gmra.mxu1 %v1309_v14  ;;  %v19133_v16 = vsub.s32 1, %v19041_v50 }
 0x663   :  { %16943 = vmatpush3.xpose.msra.mxu1 %v747_v15  ;;  %16944 = vmatprep.mubr.msk.f32.mxu1 %vm18835_vm0, %v18834_v48 }
 0x664   :  { %16947 = vmatprep.subr.mxu1 %v18834_v48  ;;  %v1452_v17 = vrot.slane %v19062_v1, %v19133_v16  ;;  %v18518_v1 = vld [vmem:[%s20013_s25] sm:$0xff] }
 0x66a   :  { %16945 = vmatmul.mubr.f32.vlgmr.msra.gmra.mxu1 %v704_v18  ;;  %v1456_v18 = vrot.slane %v19064_v2, %v19133_v16  ;;  %v18519_v2 = vld [vmem:[%s20013_s25 + $0x8] sm:$0xff] }
 0x66b   :  { %16948 = vmatpush3.msra.mxu1 %v19072_v9  ;;  %16949 = vmatprep.mubr.msk.f32.mxu1 %vm18835_vm0, %v18834_v48 }
 0x66c   :  { %16952 = vmatprep.subr.mxu1 %v18834_v48 }
 0x722   :  { %v19114_v51 = vpop.f32.mrf.mxu1 }
 0x724   :  { %v19116_v19 = vpop.f32.mrf.mxu1 }
 0x726   :  { %v19118_v20 = vpop.f32.mrf.mxu1 }
 0x728   :  { %v19120_v21 = vpop.f32.mrf.mxu1 }
 0x72a   :  { %v1527_v22 = vpop.f32.mrf.mxu1 }
 0x72b   :  { %v1531_v23 = vmul.f32 0.088388346, %v1527_v22  ;;  %v1457_v22 = vadd.f32 %v1452_v17, %v19114_v51 }
 0x72c   :  { %v16946_v24 = vpop.f32.mrf.mxu1 }
 0x72d   :  { %v1532_v62 = vsel %vm1069_vm1, %v1531_v23, -inf  ;;  %v1458_v24 = vadd.f32 %v1456_v18, %v19116_v19 }
 0x72e   :  { %1533 = vmax.xlane.f32.xlu0 %v1532_v62 }
 0x7b7   :  { %v1534_v9 = vpop.xlane.xlu0 %1533 }
 0x7b8   :  { %v1535_v25 = vsub.f32 %v1531_v23, %v1534_v9 }
 0x7ba   :  { %v1536_v26 = vmul.f32 1.442695, %v1535_v25  ;;  %v1459_v25 = vadd.f32 %v1452_v17, %v19118_v20  ;;  %v17303_v17 = vld [vmem:[#allocation7 + $0x8] ss:$16 sps:$4 sm:$0xff]  }
 0x7bc   :  { %18434 = vpow2.f32 %v1536_v26 }
 0x7c9   :  { %v18435_v27 = vpop.eup %18434 }
 0x7ca   :  { %v1538_v28 = vsel %vm1069_vm1, %v18435_v27, 0.0 }
 0x7cb   :  { %1539 = vadd.xlane.f32.xlu1 %v1538_v28  ;;  %v1460_v28 = vadd.f32 %v1456_v18, %v19120_v21  ;;  %v18520_v21 = vld [vmem:[%s20013_s25 + $0x10] sm:$0xff] }
 0x7cc   :  { %v17308_v18 = vld [vmem:[#allocation7 + $0x1e4] ss:$16 sps:$4 sm:$0xff]  }
 0x854   :  { %v1540_v29 = vpop.xlane.xlu1 %1539 }
 0x855   :  { %18436 = vrcp.f32 %v1540_v29 }
 0x862   :  { %v18437_v30 = vpop.eup %18436 }
 0x863   :  { %v1542_v31 = vmul.f32 %v18437_v30, %v18435_v27 }
 0x865   :  { %16950 = vmatmul.mubr.msk.f32.vlgmr.msra.gmra.mxu1 %vm1069_vm1, %v1542_v31 }
 0x866   :  { %16953 = vmatpush3.xpose.msra.mxu1 %v751_v32  ;;  %16954 = vmatprep.mubr.msk.f32.mxu1 %vm18835_vm0, %v18834_v48 }
 0x867   :  { %1868 = vmatprep.subr.bf16.mxu1 %v17236_v45  ;;  %v17270_v45 = vld [vmem:[#allocation7 + $0xa0] ss:$16 sps:$4 sm:$0xff]  }
 0x869   :  { %16955 = vmatmul.mubr.f32.vlgmr.msra.gmra.mxu1 %v708_v33  ;;  %v18521_v33 = vld [vmem:[%s20013_s25 + $0x18] sm:$0xff] }
 0x86a   :  { %1900 = vmatprep.mubr.bf16.mxu1 %v18836_v5  ;;  %1869 = vmatpush1.bf16.msra.mxu1 %v17234_v4  ;;  %v17275_v4 = vld [vmem:[#allocation7 + $0xac] ss:$16 sps:$4 sm:$0xff]  }
 0x86b   :  { %1870 = vmatprep.subr.bf16.mxu1 %v17239_v46  ;;  %v17273_v46 = vld [vmem:[#allocation7 + $0xa8] ss:$16 sps:$4 sm:$0xff]  }
 0x86e   :  { %1871 = vmatpush1.bf16.msra.mxu1 %v17237_v47  ;;  %v17278_v47 = vld [vmem:[#allocation7 + $0x84] ss:$16 sps:$4 sm:$0xff]  }
 0x86f   :  { %1872 = vmatprep.subr.bf16.mxu1 %v17242_v54  ;;  %v17281_v54 = vld [vmem:[#allocation7 + $0x8c] ss:$16 sps:$4 sm:$0xff]  }
 0x872   :  { %1873 = vmatpush1.bf16.msra.mxu1 %v17240_v55  ;;  %v17276_v55 = vld [vmem:[#allocation7 + $0x80] ss:$16 sps:$4 sm:$0xff]  }
 0x873   :  { %1874 = vmatprep.subr.bf16.mxu1 %v17245_v56  ;;  %v17279_v56 = vld [vmem:[#allocation7 + $0x88] ss:$16 sps:$4 sm:$0xff]  }
 0x876   :  { %1875 = vmatpush1.bf16.msra.mxu1 %v17243_v57  ;;  %v17284_v57 = vld [vmem:[#allocation7 + $0x64] ss:$16 sps:$4 sm:$0xff]  }
 0x877   :  { %1876 = vmatprep.subr.bf16.mxu1 %v17248_v58  ;;  %v17287_v58 = vld [vmem:[#allocation7 + $0x6c] ss:$16 sps:$4 sm:$0xff]  }
 0x87a   :  { %1877 = vmatpush1.bf16.msra.mxu1 %v17246_v59  ;;  %v17282_v59 = vld [vmem:[#allocation7 + $0x60] ss:$16 sps:$4 sm:$0xff]  }
 0x87b   :  { %1878 = vmatprep.subr.bf16.mxu1 %v17251_v60  ;;  %v17285_v60 = vld [vmem:[#allocation7 + $0x68] ss:$16 sps:$4 sm:$0xff]  }
 0x87e   :  { %1879 = vmatpush1.bf16.msra.mxu1 %v17249_v61  ;;  %v17290_v61 = vld [vmem:[#allocation7 + $0x44] ss:$16 sps:$4 sm:$0xff]  }
 0x87f   :  { %1880 = vmatprep.subr.bf16.mxu1 %v17254_v63  ;;  %v17293_v63 = vld [vmem:[#allocation7 + $0x4c] ss:$16 sps:$4 sm:$0xff]  }
 0x882   :  { %1881 = vmatpush1.bf16.msra.mxu1 %v17252_v0  ;;  %v17288_v0 = vld [vmem:[#allocation7 + $0x40] ss:$16 sps:$4 sm:$0xff]  }
 0x883   :  { %1882 = vmatprep.subr.bf16.mxu1 %v17257_v3  ;;  %v17291_v3 = vld [vmem:[#allocation7 + $0x48] ss:$16 sps:$4 sm:$0xff]  }
 0x886   :  { %1883 = vmatpush1.bf16.msra.mxu1 %v17255_v7  ;;  %v17296_v7 = vld [vmem:[#allocation7 + $0x24] ss:$16 sps:$4 sm:$0xff]  }
 0x925   :  { %v1612_v34 = vpop.f32.mrf.mxu1 }
 0x927   :  { %v16951_v35 = vpop.f32.mrf.mxu1 }
 0x929   :  { %v1682_v36 = vpop.f32.mrf.mxu1 }
 0x92a   :  { %v1686_v37 = vmul.f32 0.088388346, %v1682_v36  ;;  %v17258_v36 = vld [vmem:[#allocation7 + $0xe0] ss:$16 sps:$4 sm:$0xff]  }
 0x92b   :  { %v16956_v38 = vpop.f32.mrf.mxu1 }
 0x92c   :  { %v1687_v39 = vsel %vm1069_vm1, %v1686_v37, -inf  ;;  %v17261_v38 = vld [vmem:[#allocation7 + $0xe8] ss:$16 sps:$4 sm:$0xff]  }
 0x92d   :  { %1688 = vmax.xlane.f32.xlu0 %v1687_v39  ;;  %v17263_v39 = vld [vmem:[#allocation7 + $0xec] ss:$16 sps:$4 sm:$0xff]  }
 0x92e   :  { %2441 = vmatprep.subr.bf16.mxu1 %v17263_v39  ;;  %v17326_v39 = vld [vmem:[#allocation7 + $0x184] ss:$16 sps:$4 sm:$0xff]  }
 0x9b6   :  { %v1689_v40 = vpop.xlane.xlu0 %1688 }
 0x9b7   :  { %v1690_v41 = vsub.f32 %v1686_v37, %v1689_v40  ;;  %v17260_v37 = vld [vmem:[#allocation7 + $0xe4] ss:$16 sps:$4 sm:$0xff]  }
 0x9b8   :  { %v17266_v40 = vld [vmem:[#allocation7 + $0xc4] ss:$16 sps:$4 sm:$0xff]   ;;  %2398 = vmatprep.subr.bf16.mxu0 %v17260_v37  ;;  %v17318_v37 = vld [vmem:[#allocation7 + $0x1a0] ss:$16 sps:$4 sm:$0xff]  }
 0x9b9   :  { %v1691_v42 = vmul.f32 1.442695, %v1690_v41  ;;  %v17269_v41 = vld [vmem:[#allocation7 + $0xcc] ss:$16 sps:$4 sm:$0xff]  }
 0x9bb   :  { %18438 = vpow2.f32 %v1691_v42  ;;  %v17264_v42 = vld [vmem:[#allocation7 + $0xc0] ss:$16 sps:$4 sm:$0xff]  }
 0x9c8   :  { %v18439_v43 = vpop.eup %18438 }
 0x9c9   :  { %v1693_v44 = vsel %vm1069_vm1, %v18439_v43, 0.0 }
 0x9ca   :  { %1694 = vadd.xlane.f32.xlu1 %v1693_v44  ;;  %v17272_v44 = vld [vmem:[#allocation7 + $0xa4] ss:$16 sps:$4 sm:$0xff]  }
 0xa53   :  { %v1695_v10 = vpop.xlane.xlu1 %1694 }
 0xa54   :  { %18440 = vrcp.f32 %v1695_v10  ;;  %v17299_v10 = vld [vmem:[#allocation7 + $0x2c] ss:$16 sps:$4 sm:$0xff]  }
 0xa61   :  { %v18441_v11 = vpop.eup %18440 }
 0xa62   :  { %v1697_v12 = vmul.f32 %v18441_v11, %v18439_v43  ;;  %v17267_v43 = vld [vmem:[#allocation7 + $0xc8] ss:$16 sps:$4 sm:$0xff]   ;;  %v17294_v11 = vld [vmem:[#allocation7 + $0x20] ss:$16 sps:$4 sm:$0xff]  }
 0xa64   :  { %16960 = vmatmul.mubr.msk.f32.vlgmr.msra.gmra.mxu0 %vm1069_vm1, %v1697_v12  ;;  %v17297_v12 = vld [vmem:[#allocation7 + $0x28] ss:$16 sps:$4 sm:$0xff]  }
 0xa65   :  { %2399 = vmatpush1.bf16.msra.mxu0 %v17258_v36  ;;  %v17315_v36 = vld [vmem:[#allocation7 + $0x1c8] ss:$16 sps:$4 sm:$0xff]  }
 0xa66   :  { %2400 = vmatprep.subr.bf16.mxu0 %v17266_v40  ;;  %v17324_v40 = vld [vmem:[#allocation7 + $0x180] ss:$16 sps:$4 sm:$0xff]  }
 0xa69   :  { %2401 = vmatpush1.bf16.msra.mxu0 %v17264_v42  ;;  %v17329_v42 = vld [vmem:[#allocation7 + $0x18c] ss:$16 sps:$4 sm:$0xff]  }
 0xa6a   :  { %2402 = vmatprep.subr.bf16.mxu0 %v17272_v44  ;;  %v17335_v44 = vld [vmem:[#allocation7 + $0x16c] ss:$16 sps:$4 sm:$0xff]  }
 0xa6d   :  { %2403 = vmatpush1.bf16.msra.mxu0 %v17270_v45  ;;  %v17333_v45 = vld [vmem:[#allocation7 + $0x168] ss:$16 sps:$4 sm:$0xff]  }
 0xa6e   :  { %2404 = vmatprep.subr.bf16.mxu0 %v17278_v47  ;;  %v17341_v47 = vld [vmem:[#allocation7 + $0x14c] ss:$16 sps:$4 sm:$0xff]  }
 0xa71   :  { %2405 = vmatpush1.bf16.msra.mxu0 %v17276_v55  ;;  %v17339_v55 = vld [vmem:[#allocation7 + $0x148] ss:$16 sps:$4 sm:$0xff]  }
 0xa72   :  { %2406 = vmatprep.subr.bf16.mxu0 %v17284_v57  ;;  %v17347_v57 = vld [vmem:[#allocation7 + $0x12c] ss:$16 sps:$4 sm:$0xff]  }
 0xa75   :  { %2407 = vmatpush1.bf16.msra.mxu0 %v17282_v59  ;;  %v17345_v59 = vld [vmem:[#allocation7 + $0x128] ss:$16 sps:$4 sm:$0xff]  }
 0xa76   :  { %2408 = vmatprep.subr.bf16.mxu0 %v17290_v61  ;;  %v17353_v61 = vld [vmem:[#allocation7 + $0x10c] ss:$16 sps:$4 sm:$0xff]  }
 0xa79   :  { %2409 = vmatpush1.bf16.msra.mxu0 %v17288_v0  ;;  %v17351_v0 = vld [vmem:[#allocation7 + $0x108] ss:$16 sps:$4 sm:$0xff]  }
 0xa7a   :  { %2410 = vmatprep.subr.bf16.mxu0 %v17296_v7  ;;  %v17359_v7 = vld [vmem:[#allocation9 + $0x174] ss:$8 sps:$4 sm:$0xff]  }
 0xa7d   :  { %2411 = vmatpush1.bf16.msra.mxu0 %v17294_v11 }
 0xb24   :  { %v1767_v13 = vpop.f32.mrf.mxu0 }
 0xb25   :  { %v1771_v14 = vpack.c.bf16 %v1767_v13, %v1612_v34  ;;  %v17302_v13 = vld [vmem:[#allocation7 + $0x4] ss:$16 sps:$4 sm:$0xff]  }
 0xb26   :  { %v16961_v15 = vpop.f32.mrf.mxu0  ;;  %2412 = vmatprep.subr.bf16.mxu0 %v17302_v13 }
 0xb27   :  { %1901 = vmatmul.mubr.bf16.vlgmr.msra.gmra.mxu1 %v1771_v14  ;;  %v17305_v14 = vld [vmem:[#allocation7 + $0xc] ss:$16 sps:$4 sm:$0xff]   ;;  %v17300_v15 = vld [vmem:[#allocation7] ss:$16 sps:$4 sm:$0xff]  }
 0xb28   :  { %2442 = vmatpush1.bf16.msra.mxu1 %v17261_v38  ;;  %2413 = vmatpush1.bf16.msra.mxu0 %v17300_v15  ;;  %v17321_v38 = vld [vmem:[#allocation7 + $0x1a8] ss:$16 sps:$4 sm:$0xff]  }
 0xb29   :  { %2443 = vmatprep.subr.bf16.mxu1 %v17269_v41  ;;  %2414 = vmatprep.subr.bf16.mxu0 %v17308_v18  ;;  %v17327_v41 = vld [vmem:[#allocation7 + $0x188] ss:$16 sps:$4 sm:$0xff]  }
 0xb2c   :  { %2444 = vmatpush1.bf16.msra.mxu1 %v17267_v43  ;;  %v17332_v43 = vld [vmem:[#allocation7 + $0x164] ss:$16 sps:$4 sm:$0xff]  }
 0xb2d   :  { %2445 = vmatprep.subr.bf16.mxu1 %v17275_v4  ;;  %v17330_v4 = vld [vmem:[#allocation7 + $0x160] ss:$16 sps:$4 sm:$0xff]  }
 0xb30   :  { %2446 = vmatpush1.bf16.msra.mxu1 %v17273_v46  ;;  %v17338_v46 = vld [vmem:[#allocation7 + $0x144] ss:$16 sps:$4 sm:$0xff]  }
 0xb31   :  { %2447 = vmatprep.subr.bf16.mxu1 %v17281_v54  ;;  %v17336_v54 = vld [vmem:[#allocation7 + $0x140] ss:$16 sps:$4 sm:$0xff]  }
 0xb34   :  { %2448 = vmatpush1.bf16.msra.mxu1 %v17279_v56  ;;  %v17344_v56 = vld [vmem:[#allocation7 + $0x124] ss:$16 sps:$4 sm:$0xff]  }
 0xb35   :  { %2449 = vmatprep.subr.bf16.mxu1 %v17287_v58  ;;  %v17342_v58 = vld [vmem:[#allocation7 + $0x120] ss:$16 sps:$4 sm:$0xff]  }
 0xb38   :  { %2450 = vmatpush1.bf16.msra.mxu1 %v17285_v60  ;;  %v17350_v60 = vld [vmem:[#allocation7 + $0x104] ss:$16 sps:$4 sm:$0xff]  }
 0xb39   :  { %2451 = vmatprep.subr.bf16.mxu1 %v17293_v63  ;;  %v17348_v63 = vld [vmem:[#allocation7 + $0x100] ss:$16 sps:$4 sm:$0xff]  }
 0xb3c   :  { %2452 = vmatpush1.bf16.msra.mxu1 %v17291_v3  ;;  %v17356_v3 = vld [vmem:[#allocation9 + $0x74] ss:$8 sps:$4 sm:$0xff]  }
 0xb3d   :  { %2453 = vmatprep.subr.bf16.mxu1 %v17299_v10 }
 0xb40   :  { %2454 = vmatpush1.bf16.msra.mxu1 %v17297_v12 }
 0xb41   :  { %2455 = vmatprep.subr.bf16.mxu1 %v17305_v14 }
 0xb44   :  { %2456 = vmatpush1.bf16.msra.mxu1 %v17303_v17  ;;  %v19188_v17 = vsub.s32 3, %v19041_v50 }
 0xbe7   :  { %v1902_v23 = vpop.f32.mrf.mxu1 }
 0xbe8   :  { %v1911_v62 = vadd.f32 %v1902_v23, %v1457_v22  ;;  %v17311_v22 = vld [vmem:[#allocation7 + $0x1ec] ss:$16 sps:$4 sm:$0xff]   ;;  %v17306_v23 = vld [vmem:[#allocation7 + $0x1e0] ss:$16 sps:$4 sm:$0xff]  }
 0xbe9   :  { %v1904_v9 = vpop.f32.mrf.mxu1  ;;  %2457 = vmatprep.subr.bf16.mxu1 %v17311_v22  ;;  %2415 = vmatpush2.bf16.msra.mxu0 %v17306_v23  ;;  %v19191_v23 = vld [vmem:[#allocation12 + $0x8] sm:$0xff] }
 0xbea   :  { %v1912_v26 = vadd.f32 %v1904_v9, %v1458_v24  ;;  %v19146_v29 = vadd.f32 %v18518_v1, %v1911_v62  ;;  %v17309_v24 = vld [vmem:[#allocation7 + $0x1e8] ss:$16 sps:$4 sm:$0xff]  }
 0xbeb   :  { %v1906_v27 = vpop.f32.mrf.mxu1  ;;  %2458 = vmatpush2.bf16.msra.mxu1 %v17309_v24  ;;  %v1959_v24 = vrot.slane %v19191_v23, %v19188_v17 }
 0xbec   :  { %v19151_v51 = vadd.f32 %v18519_v2, %v1912_v26  ;;  %v1913_v19 = vadd.f32 %v1906_v27, %v1459_v25 }
 0xbed   :  { %v1908_v30 = vpop.f32.mrf.mxu1 }
 0xbee   :  { %v1914_v31 = vadd.f32 %v1908_v30, %v1460_v28  ;;  %v1919_v20 = vadd.f32 %v19151_v51, %v19146_v29  ;;  %v19158_v32 = vadd.f32 %v18520_v21, %v1913_v19  ;;  %v17314_v21 = vld [vmem:[#allocation7 + $0x1c4] ss:$16 sps:$4 sm:$0xff]  }
 0xbef   :  { %2416 = vmatprep.subr.bf16.mxu0 %v17314_v21 }
 0xbf0   :  { %1920 = vadd.xlane.f32.xlu0 %v1919_v20  ;;  %v19163_v34 = vadd.f32 %v18521_v33, %v1914_v31  ;;  %v17317_v33 = vld [vmem:[#allocation7 + $0x1cc] ss:$16 sps:$4 sm:$0xff]  }
 0xbf1   :  { %2459 = vmatprep.subr.bf16.mxu1 %v17317_v33 }
 0xbf2   :  { %v1922_v35 = vadd.f32 %v19163_v34, %v19158_v32  ;;  %2460 = vmatpush2.bf16.msra.mxu1 %v17315_v36 }
 0xbf4   :  { %1923 = vadd.xlane.f32.xlu1 %v1922_v35  ;;  %v17312_v35 = vld [vmem:[#allocation7 + $0x1c0] ss:$16 sps:$4 sm:$0xff]  }
 0xbf5   :  { %2417 = vmatpush2.bf16.msra.mxu0 %v17312_v35 }
 0xc79   :  { %v1921_v62 = vpop.xlane.xlu0 %1920 }
 0xc7a   :  { %v1926_v9 = vmul.f32 0.00390625, %v1921_v62 }
 0xc7c   :  { %v19168_v25 = vsub.f32 %v19146_v29, %v1926_v9  ;;  %v19171_v26 = vsub.f32 %v19151_v51, %v1926_v9  ;;  %v19196_v9 = vld [vmem:[#allocation12] sm:$0xff] }
 0xc7d   :  { %v1924_v27 = vpop.xlane.xlu1 %1923 }
 0xc7e   :  { %v1927_v28 = vmul.f32 0.00390625, %v1924_v27  ;;  %v1932_v1 = vmul.f32 %v19168_v25, %v19168_v25  ;;  %v1933_v2 = vmul.f32 %v19171_v26, %v19171_v26  ;;  %v1955_v27 = vrot.slane %v19196_v9, %v19188_v17 }
 0xc80   :  { %v19178_v19 = vsub.f32 %v19158_v32, %v1927_v28  ;;  %v19181_v30 = vsub.f32 %v19163_v34, %v1927_v28  ;;  %v1936_v31 = vadd.f32 %v1933_v2, %v1932_v1  ;;  %v17320_v32 = vld [vmem:[#allocation7 + $0x1a4] ss:$16 sps:$4 sm:$0xff]   ;;  %v17323_v34 = vld [vmem:[#allocation7 + $0x1ac] ss:$16 sps:$4 sm:$0xff]   ;;  %v1971_v1 = vrot.slane %v19191_v23, %v19046_v52 }
 0xc81   :  { %2418 = vmatprep.subr.bf16.mxu0 %v17320_v32  ;;  %2461 = vmatprep.subr.bf16.mxu1 %v17323_v34  ;;  %v1967_v2 = vrot.slane %v19196_v9, %v19046_v52  ;;  %v17354_v34 = vld [vmem:[#allocation9 + $0x70] ss:$8 sps:$4 sm:$0xff]  }
 0xc82   :  { %1937 = vadd.xlane.f32.xlu0 %v1936_v31  ;;  %v1934_v29 = vmul.f32 %v19178_v19, %v19178_v19  ;;  %v1935_v51 = vmul.f32 %v19181_v30, %v19181_v30  ;;  %2419 = vmatpush2.bf16.msra.mxu0 %v17318_v37  ;;  %v17357_v37 = vld [vmem:[#allocation9 + $0x170] ss:$8 sps:$4 sm:$0xff]  }
 0xc83   :  { %2462 = vmatpush2.bf16.msra.mxu1 %v17321_v38  ;;  %2420 = vmatprep.subr.bf16.mxu0 %v17326_v39  ;;  %v17365_v38 = vld [vmem:[#allocation9 + $0x164] ss:$8 sps:$4 sm:$0xff]   ;;  %v17360_v39 = vld [vmem:[#allocation9 + $0x60] ss:$8 sps:$4 sm:$0xff]  }
 0xc84   :  { %v1939_v20 = vadd.f32 %v1935_v51, %v1934_v29  ;;  %2463 = vmatprep.subr.bf16.mxu1 %v17329_v42  ;;  %v17371_v42 = vld [vmem:[#allocation9 + $0x154] ss:$8 sps:$4 sm:$0xff]  }
 0xc86   :  { %1940 = vadd.xlane.f32.xlu1 %v1939_v20  ;;  %2421 = vmatpush2.bf16.msra.mxu0 %v17324_v40  ;;  %v17363_v40 = vld [vmem:[#allocation9 + $0x160] ss:$8 sps:$4 sm:$0xff]  }
 0xc87   :  { %2464 = vmatpush2.bf16.msra.mxu1 %v17327_v41  ;;  %2422 = vmatprep.subr.bf16.mxu0 %v17332_v43  ;;  %v17368_v41 = vld [vmem:[#allocation9 + $0x54] ss:$8 sps:$4 sm:$0xff]   ;;  %v17366_v43 = vld [vmem:[#allocation9 + $0x50] ss:$8 sps:$4 sm:$0xff]  }
 0xc88   :  { %2465 = vmatprep.subr.bf16.mxu1 %v17335_v44  ;;  %v17369_v44 = vld [vmem:[#allocation9 + $0x150] ss:$8 sps:$4 sm:$0xff]  }
 0xc8a   :  { %2423 = vmatpush2.bf16.msra.mxu0 %v17330_v4  ;;  %v17374_v4 = vld [vmem:[#allocation9 + $0x44] ss:$8 sps:$4 sm:$0xff]  }
 0xc8b   :  { %2466 = vmatpush2.bf16.msra.mxu1 %v17333_v45  ;;  %2424 = vmatprep.subr.bf16.mxu0 %v17338_v46  ;;  %v17377_v45 = vld [vmem:[#allocation9 + $0x144] ss:$8 sps:$4 sm:$0xff]   ;;  %v17372_v46 = vld [vmem:[#allocation9 + $0x40] ss:$8 sps:$4 sm:$0xff]  }
 0xc8c   :  { %2467 = vmatprep.subr.bf16.mxu1 %v17341_v47  ;;  %v17375_v47 = vld [vmem:[#allocation9 + $0x140] ss:$8 sps:$4 sm:$0xff]  }
 0xc8e   :  { %2425 = vmatpush2.bf16.msra.mxu0 %v17336_v54  ;;  %v17380_v54 = vld [vmem:[#allocation9 + $0x34] ss:$8 sps:$4 sm:$0xff]  }
 0xc8f   :  { %2468 = vmatpush2.bf16.msra.mxu1 %v17339_v55  ;;  %2426 = vmatprep.subr.bf16.mxu0 %v17344_v56  ;;  %v17383_v55 = vld [vmem:[#allocation9 + $0x134] ss:$8 sps:$4 sm:$0xff]   ;;  %v17378_v56 = vld [vmem:[#allocation9 + $0x30] ss:$8 sps:$4 sm:$0xff]  }
 0xc90   :  { %2469 = vmatprep.subr.bf16.mxu1 %v17347_v57  ;;  %v17381_v57 = vld [vmem:[#allocation9 + $0x130] ss:$8 sps:$4 sm:$0xff]  }
 0xc92   :  { %2427 = vmatpush2.bf16.msra.mxu0 %v17342_v58  ;;  %v17386_v58 = vld [vmem:[#allocation9 + $0x24] ss:$8 sps:$4 sm:$0xff]  }
 0xc93   :  { %2470 = vmatpush2.bf16.msra.mxu1 %v17345_v59  ;;  %2428 = vmatprep.subr.bf16.mxu0 %v17350_v60  ;;  %v17389_v59 = vld [vmem:[#allocation9 + $0x124] ss:$8 sps:$4 sm:$0xff]   ;;  %v17384_v60 = vld [vmem:[#allocation9 + $0x20] ss:$8 sps:$4 sm:$0xff]  }
 0xc94   :  { %2471 = vmatprep.subr.bf16.mxu1 %v17353_v61  ;;  %v17387_v61 = vld [vmem:[#allocation9 + $0x120] ss:$8 sps:$4 sm:$0xff]  }
 0xc96   :  { %2429 = vmatpush2.bf16.msra.mxu0 %v17348_v63  ;;  %v17392_v63 = vld [vmem:[#allocation9 + $0x14] ss:$8 sps:$4 sm:$0xff]  }
 0xc97   :  { %2472 = vmatpush2.bf16.msra.mxu1 %v17351_v0  ;;  %2888 = vmatprep.subr.bf16.mxu0 %v17356_v3  ;;  %v17395_v0 = vld [vmem:[#allocation9 + $0x114] ss:$8 sps:$4 sm:$0xff]   ;;  %v17390_v3 = vld [vmem:[#allocation9 + $0x10] ss:$8 sps:$4 sm:$0xff]  }
 0xc98   :  { %2931 = vmatprep.subr.bf16.mxu1 %v17359_v7  ;;  %v17393_v7 = vld [vmem:[#allocation9 + $0x110] ss:$8 sps:$4 sm:$0xff]  }
 0xd0b   :  { %v1938_v10 = vpop.xlane.xlu0 %1937 }
 0xd0c   :  { %v1942_v11 = vmul.f32 0.00390625, %v1938_v10  ;;  %v17398_v10 = vld [vmem:[#allocation9 + $0x4] ss:$8 sps:$4 sm:$0xff]  }
 0xd0e   :  { %v1944_v12 = vadd.f32 1e-05, %v1942_v11  ;;  %v17401_v11 = vld [vmem:[#allocation9 + $0x104] ss:$8 sps:$4 sm:$0xff]  }
 0xd0f   :  { %v1941_v13 = vpop.xlane.xlu1 %1940 }
 0xd10   :  { %18442 = vrsqrt.f32 %v1944_v12  ;;  %v1943_v14 = vmul.f32 0.00390625, %v1941_v13  ;;  %v17396_v12 = vld [vmem:[#allocation9] ss:$8 sps:$4 sm:$0xff]  }
 0xd11   :  { %v17399_v13 = vld [vmem:[#allocation9 + $0x100] ss:$8 sps:$4 sm:$0xff]  }
 0xd12   :  { %v1945_v15 = vadd.f32 1e-05, %v1943_v14  ;;  %v17404_v14 = vld [vmem:[#allocation9 + $0xf4] ss:$8 sps:$4 sm:$0xff]  }
 0xd14   :  { %18444 = vrsqrt.f32 %v1945_v15  ;;  %v17407_v15 = vld [vmem:[#allocation9 + $0x1f4] ss:$8 sps:$4 sm:$0xff]  }
 0xd1d   :  { %v18443_v18 = vpop.eup %18442 }
 0xd1e   :  { %v1949_v22 = vmul.f32 %v18443_v18, %v19171_v26  ;;  %v1948_v62 = vmul.f32 %v18443_v18, %v19168_v25  ;;  %v17402_v18 = vld [vmem:[#allocation9 + $0xf0] ss:$8 sps:$4 sm:$0xff]  }
 0xd20   :  { %v1961_v31 = vmul.f32 %v1959_v24, %v1949_v22  ;;  %v1960_v51 = vmul.f32 %v1955_v27, %v1948_v62  ;;  %v17405_v22 = vld [vmem:[#allocation9 + $0x1f0] ss:$8 sps:$4 sm:$0xff]   ;;  %v17413_v62 = vld [vmem:[#allocation9 + $0x1e4] ss:$8 sps:$4 sm:$0xff]  }
 0xd21   :  { %v18445_v28 = vpop.eup %18444 }
 0xd22   :  { %v1951_v26 = vmul.f32 %v18445_v28, %v19181_v30  ;;  %v1950_v29 = vmul.f32 %v18445_v28, %v19178_v19  ;;  %v19206_v21 = vadd.f32 %v1971_v1, %v1961_v31  ;;  %v19210_v35 = vadd.f32 %v1967_v2, %v1960_v51  ;;  %v17362_v19 = vld [vmem:[#allocation9 + $0x64] ss:$8 sps:$4 sm:$0xff]   ;;  %v17411_v28 = vld [vmem:[#allocation9 + $0x1e0] ss:$8 sps:$4 sm:$0xff]   ;;  %v17417_v31 = vld [vmem:[#allocation9 + $0x1d0] ss:$8 sps:$4 sm:$0xff]  }
 0xd23   :  { %v17425_v51 = vld [vmem:[#allocation9 + $0x1c4] ss:$8 sps:$4 sm:$0xff]  }
 0xd24   :  { %v1963_v20 = vmul.f32 %v1959_v24, %v1951_v26  ;;  %v1962_v25 = vmul.f32 %v1955_v27, %v1950_v29  ;;  %v17410_v24 = vld [vmem:[#allocation9 + $0xe4] ss:$8 sps:$4 sm:$0xff]   ;;  %v17408_v27 = vld [vmem:[#allocation9 + $0xe0] ss:$8 sps:$4 sm:$0xff]   ;;  %v17414_v26 = vld [vmem:[#allocation9 + $0xd0] ss:$8 sps:$4 sm:$0xff]  }
 0xd25   :  { %v17422_v29 = vld [vmem:[#allocation9 + $0xc4] ss:$8 sps:$4 sm:$0xff]  }
 0xd26   :  { %v19208_v33 = vadd.f32 %v1971_v1, %v1963_v20  ;;  %v19212_v36 = vadd.f32 %v1967_v2, %v1962_v25  ;;  %v17416_v1 = vld [vmem:[#allocation9 + $0xd4] ss:$8 sps:$4 sm:$0xff]   ;;  %v17420_v20 = vld [vmem:[#allocation9 + $0xc0] ss:$8 sps:$4 sm:$0xff]  }
 0xd27   :  { %v17419_v2 = vld [vmem:[#allocation9 + $0x1d4] ss:$8 sps:$4 sm:$0xff]   ;;  %v17423_v25 = vld [vmem:[#allocation9 + $0x1c0] ss:$8 sps:$4 sm:$0xff]  }
 0xd28   :  { %v1977_v32 = vpack.c.bf16 %v19208_v33, %v19206_v21  ;;  %v1976_v30 = vpack.c.bf16 %v19212_v36, %v19210_v35 }
 0xd2a   :  { %2430 = vmatprep.mubr.bf16.mxu0 %v1977_v32  ;;  %2473 = vmatprep.mubr.bf16.mxu1 %v1977_v32  ;;  %v17428_v32 = vld [vmem:[#allocation9 + $0xb4] ss:$8 sps:$4 sm:$0xff]  }
 0xd2b   :  { %2431 = vmatmul.mubr.bf16.vlgmr.msra.gmra.mxu0 %v1976_v30  ;;  %2474 = vmatmul.mubr.bf16.vlgmr.msra.gmra.mxu1 %v1976_v30  ;;  %v17431_v30 = vld [vmem:[#allocation9 + $0x1b4] ss:$8 sps:$4 sm:$0xff]  }
 0xd2c   :  { %2889 = vmatpush1.bf16.msra.mxu0 %v17354_v34  ;;  %2932 = vmatpush1.bf16.msra.mxu1 %v17357_v37  ;;  %v17426_v34 = vld [vmem:[#allocation9 + $0xb0] ss:$8 sps:$4 sm:$0xff]  }
 0xd2d   :  { %2890 = vmatprep.subr.bf16.mxu0 %v17362_v19  ;;  %2933 = vmatprep.subr.bf16.mxu1 %v17365_v38  ;;  %v17429_v37 = vld [vmem:[#allocation9 + $0x1b0] ss:$8 sps:$4 sm:$0xff]   ;;  %v17434_v19 = vld [vmem:[#allocation9 + $0xa4] ss:$8 sps:$4 sm:$0xff]  }
 0xd2e   :  { %v17437_v38 = vld [vmem:[#allocation9 + $0x1a4] ss:$8 sps:$4 sm:$0xff]  }
 0xd30   :  { %2891 = vmatpush1.bf16.msra.mxu0 %v17360_v39  ;;  %2934 = vmatpush1.bf16.msra.mxu1 %v17363_v40  ;;  %v17432_v39 = vld [vmem:[#allocation9 + $0xa0] ss:$8 sps:$4 sm:$0xff]  }
 0xd31   :  { %2892 = vmatprep.subr.bf16.mxu0 %v17368_v41  ;;  %2935 = vmatprep.subr.bf16.mxu1 %v17371_v42  ;;  %v17435_v40 = vld [vmem:[#allocation9 + $0x1a0] ss:$8 sps:$4 sm:$0xff]   ;;  %v17440_v41 = vld [vmem:[#allocation9 + $0x94] ss:$8 sps:$4 sm:$0xff]  }
 0xd32   :  { %v17443_v42 = vld [vmem:[#allocation9 + $0x194] ss:$8 sps:$4 sm:$0xff]  }
 0xd34   :  { %2893 = vmatpush1.bf16.msra.mxu0 %v17366_v43  ;;  %2936 = vmatpush1.bf16.msra.mxu1 %v17369_v44  ;;  %v17438_v43 = vld [vmem:[#allocation9 + $0x90] ss:$8 sps:$4 sm:$0xff]  }
 0xd35   :  { %2894 = vmatprep.subr.bf16.mxu0 %v17374_v4  ;;  %2937 = vmatprep.subr.bf16.mxu1 %v17377_v45  ;;  %v17441_v44 = vld [vmem:[#allocation9 + $0x190] ss:$8 sps:$4 sm:$0xff]   ;;  %v17446_v4 = vld [vmem:[#allocation9 + $0x84] ss:$8 sps:$4 sm:$0xff]  }
 0xd36   :  { %v17449_v45 = vld [vmem:[#allocation9 + $0x184] ss:$8 sps:$4 sm:$0xff]  }
 0xd38   :  { %2895 = vmatpush1.bf16.msra.mxu0 %v17372_v46  ;;  %2938 = vmatpush1.bf16.msra.mxu1 %v17375_v47  ;;  %v17444_v46 = vld [vmem:[#allocation9 + $0x80] ss:$8 sps:$4 sm:$0xff]  }
 0xd39   :  { %2896 = vmatprep.subr.bf16.mxu0 %v17380_v54  ;;  %2939 = vmatprep.subr.bf16.mxu1 %v17383_v55  ;;  %v17447_v47 = vld [vmem:[#allocation9 + $0x180] ss:$8 sps:$4 sm:$0xff]   ;;  %v19219_v54 = vsub.s32 7, %v19041_v50  ;;  %v19222_v55 = vsub.s32 5, %v19041_v50 }
 0xd3c   :  { %2897 = vmatpush1.bf16.msra.mxu0 %v17378_v56  ;;  %2940 = vmatpush1.bf16.msra.mxu1 %v17381_v57  ;;  %v18524_v56 = vld [vmem:[#allocation10] sm:$0xff] }
 0xd3d   :  { %2898 = vmatprep.subr.bf16.mxu0 %v17386_v58  ;;  %2941 = vmatprep.subr.bf16.mxu1 %v17389_v59  ;;  %v2049_v57 = vrot.slane %v18524_v56, %v19188_v17  ;;  %v2057_v58 = vrot.slane %v18524_v56, %v19219_v54  ;;  %v2045_v59 = vrot.slane %v18524_v56, %v19133_v16 }
 0xd40   :  { %2899 = vmatpush1.bf16.msra.mxu0 %v17384_v60  ;;  %2942 = vmatpush1.bf16.msra.mxu1 %v17387_v61  ;;  %v2053_v60 = vrot.slane %v18524_v56, %v19222_v55 }
 0xd41   :  { %2900 = vmatprep.subr.bf16.mxu0 %v17392_v63  ;;  %2943 = vmatprep.subr.bf16.mxu1 %v17395_v0  ;;  %v2069_v0 = vrot.slane %v2049_v57, %v19133_v16 }
 0xd42   :  { %v2073_v50 = vrot.slane %v2053_v60, %v19133_v16 }
 0xd44   :  { %2901 = vmatpush1.bf16.msra.mxu0 %v17390_v3  ;;  %2944 = vmatpush1.bf16.msra.mxu1 %v17393_v7  ;;  %v2077_v3 = vrot.slane %v2057_v58, %v19133_v16  ;;  %v2065_v7 = vrot.slane %v2045_v59, %v19133_v16 }
 0xd45   :  { %2902 = vmatprep.subr.bf16.mxu0 %v17398_v10  ;;  %2945 = vmatprep.subr.bf16.mxu1 %v17401_v11 }
 0xd48   :  { %2903 = vmatpush1.bf16.msra.mxu0 %v17396_v12  ;;  %2946 = vmatpush1.bf16.msra.mxu1 %v17399_v13 }
 0xd49   :  { %2904 = vmatprep.subr.bf16.mxu0 %v17404_v14  ;;  %2947 = vmatprep.subr.bf16.mxu1 %v17407_v15 }
 0xd4c   :  { %2905 = vmatpush2.bf16.msra.mxu0 %v17402_v18  ;;  %2948 = vmatpush2.bf16.msra.mxu1 %v17405_v22 }
 0xd4d   :  { %2906 = vmatprep.subr.bf16.mxu0 %v17410_v24  ;;  %2949 = vmatprep.subr.bf16.mxu1 %v17413_v62 }
 0xd50   :  { %2907 = vmatpush2.bf16.msra.mxu0 %v17408_v27  ;;  %2950 = vmatpush2.bf16.msra.mxu1 %v17411_v28 }
 0xd51   :  { %2908 = vmatprep.subr.bf16.mxu0 %v17416_v1  ;;  %2951 = vmatprep.subr.bf16.mxu1 %v17419_v2 }
 0xd54   :  { %2909 = vmatpush2.bf16.msra.mxu0 %v17414_v26  ;;  %2952 = vmatpush2.bf16.msra.mxu1 %v17417_v31 }
 0xd55   :  { %2910 = vmatprep.subr.bf16.mxu0 %v17422_v29  ;;  %2953 = vmatprep.subr.bf16.mxu1 %v17425_v51 }
 0xd58   :  { %2911 = vmatpush2.bf16.msra.mxu0 %v17420_v20  ;;  %2954 = vmatpush2.bf16.msra.mxu1 %v17423_v25 }
 0xd59   :  { %2912 = vmatprep.subr.bf16.mxu0 %v17428_v32  ;;  %2955 = vmatprep.subr.bf16.mxu1 %v17431_v30 }
 0xd5c   :  { %2913 = vmatpush2.bf16.msra.mxu0 %v17426_v34  ;;  %2956 = vmatpush2.bf16.msra.mxu1 %v17429_v37 }
 0xd5d   :  { %2914 = vmatprep.subr.bf16.mxu0 %v17434_v19  ;;  %2957 = vmatprep.subr.bf16.mxu1 %v17437_v38 }
 0xd60   :  { %2915 = vmatpush2.bf16.msra.mxu0 %v17432_v39  ;;  %2958 = vmatpush2.bf16.msra.mxu1 %v17435_v40  ;;  %v2563_v39 = vrot.slane %v19196_v9, %v19098_v8  ;;  %v2567_v40 = vrot.slane %v19191_v23, %v19098_v8 }
 0xd61   :  { %2916 = vmatprep.subr.bf16.mxu0 %v17440_v41  ;;  %2959 = vmatprep.subr.bf16.mxu1 %v17443_v42 }
 0xd64   :  { %2917 = vmatpush2.bf16.msra.mxu0 %v17438_v43  ;;  %2960 = vmatpush2.bf16.msra.mxu1 %v17441_v44 }
 0xd65   :  { %2918 = vmatprep.subr.bf16.mxu0 %v17446_v4  ;;  %2961 = vmatprep.subr.bf16.mxu1 %v17449_v45 }
 0xd68   :  { %2919 = vmatpush2.bf16.msra.mxu0 %v17444_v46  ;;  %2962 = vmatpush2.bf16.msra.mxu1 %v17447_v47 }
 0xdeb   :  { %v2432_v61 = vpop.f32.mrf.mxu0  ;;  %v2475_v63 = vpop.f32.mrf.mxu1 }
 0xdec   :  { %v2433_v24 = vadd.f32 %v2432_v61, %v2065_v7  ;;  %v2476_v62 = vadd.f32 %v2475_v63, %v2073_v50 }
 0xded   :  { %v2434_v10 = vpop.f32.mrf.mxu0  ;;  %v2477_v11 = vpop.f32.mrf.mxu1 }
 0xdee   :  { %v2435_v14 = vadd.f32 %v2434_v10, %v2069_v0  ;;  %v2478_v15 = vadd.f32 %v2477_v11, %v2077_v3  ;;  %v2484_v32 = vmax.f32 %v2433_v24, 0.0  ;;  %v2486_v30 = vmax.f32 %v2476_v62, 0.0  ;;  %v17464_v24 = vld [vmem:[#allocation2 + $0x2a4] ss:$16 sps:$4 sm:$0xff]   ;;  %v17462_v62 = vld [vmem:[#allocation2 + $0x2a0] ss:$16 sps:$4 sm:$0xff]  }
 0xdef   :  { %v2436_v12 = vpop.f32.mrf.mxu0  ;;  %v2479_v13 = vpop.f32.mrf.mxu1 }
 0xdf0   :  { %v2437_v18 = vadd.f32 %v2436_v12, %v2065_v7  ;;  %v2480_v22 = vadd.f32 %v2479_v13, %v2073_v50  ;;  %v2485_v29 = vmax.f32 %v2435_v14, 0.0  ;;  %v2487_v51 = vmax.f32 %v2478_v15, 0.0  ;;  %v17452_v12 = vld [vmem:[#allocation2 + $0x2e4] ss:$16 sps:$4 sm:$0xff]   ;;  %v17453_v13 = vld [vmem:[#allocation2 + $0x2e8] ss:$16 sps:$4 sm:$0xff]  }
 0xdf1   :  { %v2438_v27 = vpop.f32.mrf.mxu0  ;;  %v2481_v28 = vpop.f32.mrf.mxu1  ;;  %v17455_v14 = vld [vmem:[#allocation2 + $0x2ec] ss:$16 sps:$4 sm:$0xff]   ;;  %v17458_v15 = vld [vmem:[#allocation2 + $0x2c4] ss:$16 sps:$4 sm:$0xff]   ;;  %3467 = vmatprep.subr.bf16.mxu0 %v17452_v12 }
 0xdf2   :  { %v2439_v1 = vadd.f32 %v2438_v27, %v2069_v0  ;;  %v2482_v2 = vadd.f32 %v2481_v28, %v2077_v3  ;;  %v2488_v26 = vmax.f32 %v2437_v18, 0.0  ;;  %v2490_v31 = vmax.f32 %v2480_v22, 0.0  ;;  %v17461_v18 = vld [vmem:[#allocation2 + $0x2cc] ss:$16 sps:$4 sm:$0xff]   ;;  %3510 = vmatprep.subr.bf16.mxu1 %v17455_v14  ;;  %v17456_v22 = vld [vmem:[#allocation2 + $0x2c0] ss:$16 sps:$4 sm:$0xff]  }
 0xdf3   :  { %v17465_v27 = vld [vmem:[#allocation2 + $0x2a8] ss:$16 sps:$4 sm:$0xff]   ;;  %v17470_v28 = vld [vmem:[#allocation2 + $0x284] ss:$16 sps:$4 sm:$0xff]   ;;  %v17509_v12 = vld [vmem:[#allocation2 + $0x3cc] ss:$16 sps:$4 sm:$0xff]  }
 0xdf4   :  { %v2489_v20 = vmax.f32 %v2439_v1, 0.0  ;;  %v2491_v25 = vmax.f32 %v2482_v2, 0.0  ;;  %v2492_v19 = vpack.c.bf16 %v2488_v26, %v2484_v32  ;;  %v2494_v38 = vpack.c.bf16 %v2490_v31, %v2486_v30  ;;  %v17473_v1 = vld [vmem:[#allocation2 + $0x28c] ss:$16 sps:$4 sm:$0xff]   ;;  %v17468_v2 = vld [vmem:[#allocation2 + $0x280] ss:$16 sps:$4 sm:$0xff]  }
 0xdf5   :  { %v17471_v26 = vld [vmem:[#allocation2 + $0x288] ss:$16 sps:$4 sm:$0xff]   ;;  %v17476_v31 = vld [vmem:[#allocation2 + $0x264] ss:$16 sps:$4 sm:$0xff]   ;;  %v17485_v32 = vld [vmem:[#allocation2 + $0x24c] ss:$16 sps:$4 sm:$0xff]  }
 0xdf6   :  { %v2493_v34 = vpack.c.bf16 %v2489_v20, %v2485_v29  ;;  %v2495_v37 = vpack.c.bf16 %v2491_v25, %v2487_v51  ;;  %v17479_v29 = vld [vmem:[#allocation2 + $0x26c] ss:$16 sps:$4 sm:$0xff]   ;;  %v17474_v51 = vld [vmem:[#allocation2 + $0x260] ss:$16 sps:$4 sm:$0xff]   ;;  %v17477_v20 = vld [vmem:[#allocation2 + $0x268] ss:$16 sps:$4 sm:$0xff]  }
 0xdf7   :  { %v17482_v25 = vld [vmem:[#allocation2 + $0x244] ss:$16 sps:$4 sm:$0xff]   ;;  %v17480_v30 = vld [vmem:[#allocation2 + $0x240] ss:$16 sps:$4 sm:$0xff]  }
 0xdf8   :  { %2920 = vmatprep.mubr.bf16.mxu0 %v2493_v34  ;;  %2963 = vmatprep.mubr.bf16.mxu1 %v2495_v37  ;;  %v17483_v34 = vld [vmem:[#allocation2 + $0x248] ss:$16 sps:$4 sm:$0xff]   ;;  %v17488_v37 = vld [vmem:[#allocation2 + $0x224] ss:$16 sps:$4 sm:$0xff]  }
 0xdf9   :  { %2921 = vmatmul.mubr.bf16.vlgmr.msra.gmra.mxu0 %v2492_v19  ;;  %2964 = vmatmul.mubr.bf16.vlgmr.msra.gmra.mxu1 %v2494_v38  ;;  %v17491_v19 = vld [vmem:[#allocation2 + $0x22c] ss:$16 sps:$4 sm:$0xff]   ;;  %v17486_v38 = vld [vmem:[#allocation2 + $0x220] ss:$16 sps:$4 sm:$0xff]   ;;  %v17512_v14 = vld [vmem:[#allocation2 + $0x3a4] ss:$16 sps:$4 sm:$0xff]  }
 0xdfa   :  { %3511 = vmatpush1.bf16.msra.mxu1 %v17453_v13  ;;  %v17507_v13 = vld [vmem:[#allocation2 + $0x3c8] ss:$16 sps:$4 sm:$0xff]  }
 0xdfb   :  { %3512 = vmatprep.subr.bf16.mxu1 %v17461_v18  ;;  %v17515_v18 = vld [vmem:[#allocation2 + $0x3ac] ss:$16 sps:$4 sm:$0xff]  }
 0xeb9   :  { %v2922_v41 = vpop.f32.mrf.mxu0  ;;  %v2965_v42 = vpop.f32.mrf.mxu1 }
 0xeba   :  { %v2923_v43 = vadd.f32 %v2922_v41, %v2563_v39  ;;  %v17497_v41 = vld [vmem:[#allocation2 + $0x20c] ss:$16 sps:$4 sm:$0xff]  }
 0xebb   :  { %v2924_v44 = vpop.f32.mrf.mxu0  ;;  %v2967_v4 = vpop.f32.mrf.mxu1 }
 0xebc   :  { %v2966_v45 = vadd.f32 %v2965_v42, %v2923_v43  ;;  %v2925_v46 = vadd.f32 %v2924_v44, %v2567_v40  ;;  %v17492_v42 = vld [vmem:[#allocation2 + $0x200] ss:$16 sps:$4 sm:$0xff]   ;;  %v17495_v43 = vld [vmem:[#allocation2 + $0x208] ss:$16 sps:$4 sm:$0xff]  }
 0xebd   :  { %v2926_v47 = vpop.f32.mrf.mxu0  ;;  %v2969_v56 = vpop.f32.mrf.mxu1 }
 0xebe   :  { %v2968_v57 = vadd.f32 %v2967_v4, %v2925_v46  ;;  %v2927_v58 = vadd.f32 %v2926_v47, %v2563_v39  ;;  %v19237_v60 = vadd.f32 %v2966_v45, %v19210_v35  ;;  %v17489_v39 = vld [vmem:[#allocation2 + $0x228] ss:$16 sps:$4 sm:$0xff]  }
 0xebf   :  { %v2928_v59 = vpop.f32.mrf.mxu0  ;;  %v2971_v3 = vpop.f32.mrf.mxu1 }
 0xec0   :  { %v19240_v61 = vadd.f32 %v2968_v57, %v19206_v21  ;;  %v2970_v63 = vadd.f32 %v2969_v56, %v2927_v58  ;;  %v2929_v0 = vadd.f32 %v2928_v59, %v2567_v40  ;;  %v17450_v21 = vld [vmem:[#allocation2 + $0x2e0] ss:$16 sps:$4 sm:$0xff]   ;;  %v17494_v40 = vld [vmem:[#allocation2 + $0x204] ss:$16 sps:$4 sm:$0xff]  }
 0xec1   :  { %3468 = vmatpush1.bf16.msra.mxu0 %v17450_v21  ;;  %v17501_v21 = vld [vmem:[#allocation2 + $0x3e8] ss:$16 sps:$4 sm:$0xff]  }
 0xec2   :  { %v2972_v7 = vadd.f32 %v2971_v3, %v2929_v0  ;;  %v2978_v50 = vadd.f32 %v19240_v61, %v19237_v60  ;;  %v19245_v10 = vadd.f32 %v2970_v63, %v19212_v36  ;;  %3469 = vmatprep.subr.bf16.mxu0 %v17458_v15  ;;  %v17459_v36 = vld [vmem:[#allocation2 + $0x2c8] ss:$16 sps:$4 sm:$0xff]   ;;  %v17510_v15 = vld [vmem:[#allocation2 + $0x3a0] ss:$16 sps:$4 sm:$0xff]  }
 0xec3   :  { %3513 = vmatpush1.bf16.msra.mxu1 %v17459_v36  ;;  %v17518_v36 = vld [vmem:[#allocation2 + $0x384] ss:$16 sps:$4 sm:$0xff]  }
 0xec4   :  { %2979 = vadd.xlane.f32.xlu0 %v2978_v50  ;;  %v19248_v11 = vadd.f32 %v2972_v7, %v19208_v33  ;;  %v17467_v33 = vld [vmem:[#allocation2 + $0x2ac] ss:$16 sps:$4 sm:$0xff]   ;;  %v17500_v7 = vld [vmem:[#allocation2 + $0x3e4] ss:$16 sps:$4 sm:$0xff]   ;;  %v17498_v50 = vld [vmem:[#allocation2 + $0x3e0] ss:$16 sps:$4 sm:$0xff]  }
 0xec5   :  { %3470 = vmatpush1.bf16.msra.mxu0 %v17456_v22  ;;  %3514 = vmatprep.subr.bf16.mxu1 %v17467_v33  ;;  %v17513_v22 = vld [vmem:[#allocation2 + $0x3a8] ss:$16 sps:$4 sm:$0xff]   ;;  %v17521_v33 = vld [vmem:[#allocation2 + $0x38c] ss:$16 sps:$4 sm:$0xff]  }
 0xec6   :  { %v2981_v35 = vadd.f32 %v19248_v11, %v19245_v10  ;;  %3471 = vmatprep.subr.bf16.mxu0 %v17464_v24  ;;  %v17516_v24 = vld [vmem:[#allocation2 + $0x380] ss:$16 sps:$4 sm:$0xff]  }
 0xec7   :  { %3515 = vmatpush1.bf16.msra.mxu1 %v17465_v27  ;;  %v17524_v27 = vld [vmem:[#allocation2 + $0x364] ss:$16 sps:$4 sm:$0xff]  }
 0xec8   :  { %2982 = vadd.xlane.f32.xlu1 %v2981_v35  ;;  %3516 = vmatprep.subr.bf16.mxu1 %v17473_v1  ;;  %v17503_v35 = vld [vmem:[#allocation2 + $0x3ec] ss:$16 sps:$4 sm:$0xff]  }
 0xec9   :  { %3472 = vmatpush1.bf16.msra.mxu0 %v17462_v62  ;;  %v17519_v62 = vld [vmem:[#allocation2 + $0x388] ss:$16 sps:$4 sm:$0xff]   ;;  %v17527_v1 = vld [vmem:[#allocation2 + $0x36c] ss:$16 sps:$4 sm:$0xff]  }
 0xeca   :  { %3473 = vmatprep.subr.bf16.mxu0 %v17470_v28  ;;  %v17522_v28 = vld [vmem:[#allocation2 + $0x360] ss:$16 sps:$4 sm:$0xff]  }
 0xecb   :  { %3517 = vmatpush1.bf16.msra.mxu1 %v17471_v26  ;;  %v17530_v26 = vld [vmem:[#allocation2 + $0x344] ss:$16 sps:$4 sm:$0xff]  }
 0xecc   :  { %3518 = vmatprep.subr.bf16.mxu1 %v17479_v29  ;;  %v17533_v29 = vld [vmem:[#allocation2 + $0x34c] ss:$16 sps:$4 sm:$0xff]  }
 0xecd   :  { %3474 = vmatpush1.bf16.msra.mxu0 %v17468_v2  ;;  %v17525_v2 = vld [vmem:[#allocation2 + $0x368] ss:$16 sps:$4 sm:$0xff]  }
 0xece   :  { %3475 = vmatprep.subr.bf16.mxu0 %v17476_v31  ;;  %v17528_v31 = vld [vmem:[#allocation2 + $0x340] ss:$16 sps:$4 sm:$0xff]  }
 0xecf   :  { %3519 = vmatpush1.bf16.msra.mxu1 %v17477_v20  ;;  %v17534_v20 = vld [vmem:[#allocation2 + $0x320] ss:$16 sps:$4 sm:$0xff]  }
 0xed0   :  { %3520 = vmatprep.subr.bf16.mxu1 %v17485_v32  ;;  %v17537_v32 = vld [vmem:[#allocation2 + $0x328] ss:$16 sps:$4 sm:$0xff]  }
 0xed1   :  { %3476 = vmatpush1.bf16.msra.mxu0 %v17474_v51  ;;  %v17531_v51 = vld [vmem:[#allocation2 + $0x348] ss:$16 sps:$4 sm:$0xff]  }
 0xed2   :  { %3477 = vmatprep.subr.bf16.mxu0 %v17482_v25  ;;  %v17536_v25 = vld [vmem:[#allocation2 + $0x324] ss:$16 sps:$4 sm:$0xff]  }
 0xed3   :  { %3521 = vmatpush1.bf16.msra.mxu1 %v17483_v34  ;;  %v17542_v34 = vld [vmem:[#allocation2 + $0x304] ss:$16 sps:$4 sm:$0xff]  }
 0xed4   :  { %3522 = vmatprep.subr.bf16.mxu1 %v17491_v19  ;;  %v17540_v19 = vld [vmem:[#allocation2 + $0x300] ss:$16 sps:$4 sm:$0xff]  }
 0xed5   :  { %3478 = vmatpush1.bf16.msra.mxu0 %v17480_v30  ;;  %v17539_v30 = vld [vmem:[#allocation2 + $0x32c] ss:$16 sps:$4 sm:$0xff]  }
 0xed6   :  { %3479 = vmatprep.subr.bf16.mxu0 %v17488_v37  ;;  %v17545_v37 = vld [vmem:[#allocation2 + $0x30c] ss:$16 sps:$4 sm:$0xff]  }
 0xed7   :  { %3523 = vmatpush1.bf16.msra.mxu1 %v17489_v39  ;;  %v17548_v39 = vld [vmem:[#allocation4 + $0x174] ss:$8 sps:$4 sm:$0xff]  }
 0xed8   :  { %3524 = vmatprep.subr.bf16.mxu1 %v17497_v41 }
 0xed9   :  { %3480 = vmatpush1.bf16.msra.mxu0 %v17486_v38  ;;  %v17543_v38 = vld [vmem:[#allocation2 + $0x308] ss:$16 sps:$4 sm:$0xff]  }
 0xeda   :  { %3481 = vmatprep.subr.bf16.mxu0 %v17494_v40 }
 0xedb   :  { %3525 = vmatpush1.bf16.msra.mxu1 %v17495_v43 }
 0xedc   :  { %3526 = vmatprep.subr.bf16.mxu1 %v17503_v35 }
 0xedd   :  { %3482 = vmatpush1.bf16.msra.mxu0 %v17492_v42 }
 0xede   :  { %3483 = vmatprep.subr.bf16.mxu0 %v17500_v7  ;;  %v3025_v7 = vrot.slane %v19196_v9, %v19093_v6 }
 0xedf   :  { %3527 = vmatpush2.bf16.msra.mxu1 %v17501_v21 }
 0xee0   :  { %3528 = vmatprep.subr.bf16.mxu1 %v17509_v12 }
 0xee1   :  { %3484 = vmatpush2.bf16.msra.mxu0 %v17498_v50 }
 0xee3   :  { %3529 = vmatpush2.bf16.msra.mxu1 %v17507_v13 }
 0xee4   :  { %3530 = vmatprep.subr.bf16.mxu1 %v17515_v18  ;;  %v18528_v18 = vld [vmem:[%s19995_s1 + $0x10] sm:$0xff] }
 0xee7   :  { %3531 = vmatpush2.bf16.msra.mxu1 %v17513_v22 }
 0xee8   :  { %3532 = vmatprep.subr.bf16.mxu1 %v17521_v33 }
 0xeeb   :  { %3533 = vmatpush2.bf16.msra.mxu1 %v17519_v62  ;;  %v17551_v62 = vld [vmem:[#allocation4 + $0x164] ss:$8 sps:$4 sm:$0xff]  }
 0xeec   :  { %3534 = vmatprep.subr.bf16.mxu1 %v17527_v1  ;;  %v17554_v1 = vld [vmem:[#allocation4 + $0x154] ss:$8 sps:$4 sm:$0xff]  }
 0xeef   :  { %3535 = vmatpush2.bf16.msra.mxu1 %v17525_v2  ;;  %v17552_v2 = vld [vmem:[#allocation4 + $0x150] ss:$8 sps:$4 sm:$0xff]  }
 0xef0   :  { %3536 = vmatprep.subr.bf16.mxu1 %v17533_v29  ;;  %v17560_v29 = vld [vmem:[#allocation4 + $0x134] ss:$8 sps:$4 sm:$0xff]  }
 0xef3   :  { %3537 = vmatpush2.bf16.msra.mxu1 %v17531_v51  ;;  %v17558_v51 = vld [vmem:[#allocation4 + $0x130] ss:$8 sps:$4 sm:$0xff]  }
 0xef4   :  { %3538 = vmatprep.subr.bf16.mxu1 %v17539_v30  ;;  %v17564_v30 = vld [vmem:[#allocation4 + $0x110] ss:$8 sps:$4 sm:$0xff]  }
 0xef7   :  { %3539 = vmatpush2.bf16.msra.mxu1 %v17537_v32  ;;  %v17566_v32 = vld [vmem:[#allocation4 + $0x114] ss:$8 sps:$4 sm:$0xff]  }
 0xef8   :  { %3540 = vmatprep.subr.bf16.mxu1 %v17545_v37  ;;  %v17567_v37 = vld [vmem:[#allocation4 + $0x100] ss:$8 sps:$4 sm:$0xff]  }
 0xefb   :  { %3541 = vmatpush2.bf16.msra.mxu1 %v17543_v38  ;;  %v17570_v38 = vld [vmem:[#allocation4 + $0x1f0] ss:$8 sps:$4 sm:$0xff]  }
 0xefc   :  { %16962 = vmatprep.subr.mxu1 %v18834_v48 }
 0xf4d   :  { %v2980_v44 = vpop.xlane.xlu0 %2979 }
 0xf4e   :  { %v2984_v4 = vmul.f32 0.00390625, %v2980_v44 }
 0xf50   :  { %v19253_v45 = vsub.f32 %v19237_v60, %v2984_v4  ;;  %v19256_v46 = vsub.f32 %v19240_v61, %v2984_v4 }
 0xf51   :  { %v2983_v47 = vpop.xlane.xlu1 %2982 }
 0xf52   :  { %v2985_v56 = vmul.f32 0.00390625, %v2983_v47  ;;  %v2990_v57 = vmul.f32 %v19253_v45, %v19253_v45  ;;  %v2991_v58 = vmul.f32 %v19256_v46, %v19256_v46  ;;  %v3017_v47 = vrot.slane %v19191_v23, %v19222_v55 }
 0xf54   :  { %v19263_v59 = vsub.f32 %v19245_v10, %v2985_v56  ;;  %v19266_v63 = vsub.f32 %v19248_v11, %v2985_v56  ;;  %v2994_v0 = vadd.f32 %v2991_v58, %v2990_v57  ;;  %v17506_v10 = vld [vmem:[#allocation2 + $0x3c4] ss:$16 sps:$4 sm:$0xff]   ;;  %v17504_v11 = vld [vmem:[#allocation2 + $0x3c0] ss:$16 sps:$4 sm:$0xff]   ;;  %v3013_v56 = vrot.slane %v19196_v9, %v19222_v55 }
 0xf55   :  { %3485 = vmatprep.subr.bf16.mxu0 %v17506_v10 }
 0xf56   :  { %2995 = vadd.xlane.f32.xlu0 %v2994_v0  ;;  %v2992_v60 = vmul.f32 %v19263_v59, %v19263_v59  ;;  %v2993_v61 = vmul.f32 %v19266_v63, %v19266_v63  ;;  %3486 = vmatpush2.bf16.msra.mxu0 %v17504_v11 }
 0xf57   :  { %3487 = vmatprep.subr.bf16.mxu0 %v17512_v14  ;;  %v18527_v14 = vld [vmem:[%s19995_s1] sm:$0xff] }
 0xf58   :  { %v2997_v3 = vadd.f32 %v2993_v61, %v2992_v60  ;;  %v3029_v61 = vrot.slane %v19191_v23, %v19093_v6  ;;  %v18525_v23 = vld [vmem:[%s19995_s1 + $0x8] sm:$0xff] }
 0xf5a   :  { %2998 = vadd.xlane.f32.xlu1 %v2997_v3  ;;  %3488 = vmatpush2.bf16.msra.mxu0 %v17510_v15 }
 0xf5b   :  { %3489 = vmatprep.subr.bf16.mxu0 %v17518_v36 }
 0xf5e   :  { %3490 = vmatpush2.bf16.msra.mxu0 %v17516_v24  ;;  %v17546_v24 = vld [vmem:[#allocation4 + $0x170] ss:$8 sps:$4 sm:$0xff]  }
 0xf5f   :  { %3491 = vmatprep.subr.bf16.mxu0 %v17524_v27 }
 0xf62   :  { %3492 = vmatpush2.bf16.msra.mxu0 %v17522_v28  ;;  %v17549_v28 = vld [vmem:[#allocation4 + $0x160] ss:$8 sps:$4 sm:$0xff]  }
 0xf63   :  { %3493 = vmatprep.subr.bf16.mxu0 %v17530_v26  ;;  %v17557_v26 = vld [vmem:[#allocation4 + $0x144] ss:$8 sps:$4 sm:$0xff]  }
 0xf66   :  { %3494 = vmatpush2.bf16.msra.mxu0 %v17528_v31  ;;  %v17555_v31 = vld [vmem:[#allocation4 + $0x140] ss:$8 sps:$4 sm:$0xff]  }
 0xf67   :  { %3495 = vmatprep.subr.bf16.mxu0 %v17536_v25  ;;  %v17561_v25 = vld [vmem:[#allocation4 + $0x120] ss:$8 sps:$4 sm:$0xff]  }
 0xf6a   :  { %3496 = vmatpush2.bf16.msra.mxu0 %v17534_v20  ;;  %v17563_v20 = vld [vmem:[#allocation4 + $0x124] ss:$8 sps:$4 sm:$0xff]  }
 0xf6b   :  { %3497 = vmatprep.subr.bf16.mxu0 %v17542_v34  ;;  %v17569_v34 = vld [vmem:[#allocation4 + $0x104] ss:$8 sps:$4 sm:$0xff]  }
 0xf6e   :  { %3498 = vmatpush2.bf16.msra.mxu0 %v17540_v19  ;;  %v17572_v19 = vld [vmem:[#allocation4 + $0x1f4] ss:$8 sps:$4 sm:$0xff]  }
 0xf6f   :  { %3756 = vmatprep.subr.bf16.mxu0 %v17548_v39  ;;  %v17575_v39 = vld [vmem:[#allocation4 + $0x1e4] ss:$8 sps:$4 sm:$0xff]  }
 0xfdf   :  { %v2996_v40 = vpop.xlane.xlu0 %2995 }
 0xfe0   :  { %v3000_v41 = vmul.f32 0.00390625, %v2996_v40  ;;  %v17573_v40 = vld [vmem:[#allocation4 + $0x1e0] ss:$8 sps:$4 sm:$0xff]  }
 0xfe2   :  { %v3002_v42 = vadd.f32 1e-05, %v3000_v41  ;;  %v17578_v41 = vld [vmem:[#allocation4 + $0x1d4] ss:$8 sps:$4 sm:$0xff]  }
 0xfe3   :  { %v2999_v43 = vpop.xlane.xlu1 %2998 }
 0xfe4   :  { %18446 = vrsqrt.f32 %v3002_v42  ;;  %v3001_v44 = vmul.f32 0.00390625, %v2999_v43  ;;  %v17576_v42 = vld [vmem:[#allocation4 + $0x1d0] ss:$8 sps:$4 sm:$0xff]   ;;  %v17581_v43 = vld [vmem:[#allocation4 + $0x1c4] ss:$8 sps:$4 sm:$0xff]  }
 0xfe6   :  { %v3003_v4 = vadd.f32 1e-05, %v3001_v44  ;;  %v17579_v44 = vld [vmem:[#allocation4 + $0x1c0] ss:$8 sps:$4 sm:$0xff]  }
 0xfe8   :  { %18448 = vrsqrt.f32 %v3003_v4  ;;  %v17584_v4 = vld [vmem:[#allocation4 + $0x1b4] ss:$8 sps:$4 sm:$0xff]  }
 0xff1   :  { %v18447_v57 = vpop.eup %18446 }
 0xff2   :  { %v3006_v58 = vmul.f32 %v18447_v57, %v19253_v45  ;;  %v3007_v0 = vmul.f32 %v18447_v57, %v19256_v46  ;;  %v17585_v57 = vld [vmem:[#allocation4 + $0x1a0] ss:$8 sps:$4 sm:$0xff]  }
 0xff4   :  { %v3019_v60 = vmul.f32 %v3017_v47, %v3007_v0  ;;  %v3018_v3 = vmul.f32 %v3013_v56, %v3006_v58  ;;  %v17590_v58 = vld [vmem:[#allocation4 + $0x194] ss:$8 sps:$4 sm:$0xff]   ;;  %v17588_v0 = vld [vmem:[#allocation4 + $0x190] ss:$8 sps:$4 sm:$0xff]  }
 0xff5   :  { %v18449_v50 = vpop.eup %18448 }
 0xff6   :  { %v3008_v35 = vmul.f32 %v18449_v50, %v19263_v59  ;;  %v3009_v21 = vmul.f32 %v18449_v50, %v19266_v63  ;;  %v19285_v11 = vadd.f32 %v3029_v61, %v3019_v60  ;;  %v19287_v45 = vadd.f32 %v3025_v7, %v3018_v3  ;;  %v18526_v59 = vld [vmem:[%s19995_s1 + $0x18] sm:$0xff]  ;;  %v17593_v60 = vld [vmem:[#allocation4 + $0x184] ss:$8 sps:$4 sm:$0xff]  }
 0xff8   :  { %v3021_v10 = vmul.f32 %v3017_v47, %v3009_v21  ;;  %v3020_v12 = vmul.f32 %v3013_v56, %v3008_v35  ;;  %v3040_v9 = vadd.f32 %v18525_v23, %v19285_v11  ;;  %v3039_v15 = vadd.f32 %v18527_v14, %v19287_v45  ;;  %v17582_v47 = vld [vmem:[#allocation4 + $0x1b0] ss:$8 sps:$4 sm:$0xff]   ;;  %v17587_v56 = vld [vmem:[#allocation4 + $0x1a4] ss:$8 sps:$4 sm:$0xff]  }
 0xffa   :  { %v19289_v46 = vadd.f32 %v3029_v61, %v3021_v10  ;;  %v19291_v13 = vadd.f32 %v3025_v7, %v3020_v12  ;;  %v17591_v61 = vld [vmem:[#allocation4 + $0x180] ss:$8 sps:$4 sm:$0xff]  }
 0xffb   :  { %v3035_v7 = vld [vmem:[#allocation10 + $0x8] sm:$0xff] }
 0xffc   :  { %v3042_v63 = vadd.f32 %v18526_v59, %v19289_v46  ;;  %v3041_v22 = vadd.f32 %v18528_v18, %v19291_v13  ;;  %v3554_v27 = vpack.c.bf16 %v19289_v46, %v19285_v11  ;;  %v3553_v3 = vpack.c.bf16 %v19291_v13, %v19287_v45 }
 0xffd   :  { %v3122_v50 = vrot.slane %v3035_v7, %v19046_v52  ;;  %v3126_v35 = vrot.slane %v3035_v7, %v19093_v6  ;;  %v3114_v21 = vrot.slane %v3035_v7, %v19049_v53  ;;  %v3118_v12 = vrot.slane %v3035_v7, %v19098_v8 }
 0xffe   :  { %v3044_v36 = vpack.c.bf16 %v3042_v63, %v3040_v9  ;;  %v3043_v33 = vpack.c.bf16 %v3041_v22, %v3039_v15 }
 0xfff   :  { %v3142_v10 = vrot.slane %v3122_v50, %v19049_v53  ;;  %v19324_v23 = vrot.slane %v3126_v35, %v19049_v53  ;;  %v3134_v9 = vrot.slane %v3114_v21, %v19049_v53  ;;  %v3138_v15 = vrot.slane %v3118_v12, %v19049_v53 }
0x1000   :  { %3499 = vmatprep.mubr.bf16.mxu0 %v3044_v36  ;;  %3542 = vmatprep.mubr.bf16.mxu1 %v3044_v36 }
0x1001   :  { %3500 = vmatmul.mubr.bf16.vlgmr.msra.gmra.mxu0 %v3043_v33  ;;  %3543 = vmatmul.mubr.bf16.vlgmr.msra.gmra.mxu1 %v3043_v33 }
0x1002   :  { %3757 = vmatpush1.bf16.msra.mxu0 %v17546_v24  ;;  %3788 = vmatprep.mubr.bf16.mxu0 %v3554_v27 }
0x1003   :  { %3758 = vmatprep.subr.bf16.mxu0 %v17551_v62  ;;  %16964 = vmatprep.mubr.msk.f32.mxu1 %vm18835_vm0, %v18834_v48 }
0x1006   :  { %3759 = vmatpush1.bf16.msra.mxu0 %v17549_v28 }
0x1007   :  { %3760 = vmatprep.subr.bf16.mxu0 %v17554_v1 }
0x100a   :  { %3761 = vmatpush1.bf16.msra.mxu0 %v17552_v2 }
0x100b   :  { %3762 = vmatprep.subr.bf16.mxu0 %v17557_v26 }
0x100e   :  { %3763 = vmatpush1.bf16.msra.mxu0 %v17555_v31  ;;  %v19339_v31 = vld [vmem:[#allocation12 + $0x10] sm:$0xff] }
0x100f   :  { %3764 = vmatprep.subr.bf16.mxu0 %v17560_v29  ;;  %v19341_v29 = vld [vmem:[#allocation12 + $0x18] sm:$0xff] }
0x1012   :  { %3765 = vmatpush1.bf16.msra.mxu0 %v17558_v51  ;;  %v3591_v51 = vrot.slane %v19339_v31, %v19049_v53 }
0x1013   :  { %3766 = vmatprep.subr.bf16.mxu0 %v17563_v20  ;;  %v3595_v20 = vrot.slane %v19341_v29, %v19049_v53 }
0x1016   :  { %3767 = vmatpush1.bf16.msra.mxu0 %v17561_v25 }
0x1017   :  { %3768 = vmatprep.subr.bf16.mxu0 %v17566_v32 }
0x101a   :  { %3769 = vmatpush1.bf16.msra.mxu0 %v17564_v30 }
0x101b   :  { %3770 = vmatprep.subr.bf16.mxu0 %v17569_v34 }
0x101e   :  { %3771 = vmatpush1.bf16.msra.mxu0 %v17567_v37 }
0x101f   :  { %3772 = vmatprep.subr.bf16.mxu0 %v17572_v19 }
0x1022   :  { %3773 = vmatpush2.bf16.msra.mxu0 %v17570_v38 }
0x1023   :  { %3774 = vmatprep.subr.bf16.mxu0 %v17575_v39 }
0x1026   :  { %3775 = vmatpush2.bf16.msra.mxu0 %v17573_v40 }
0x1027   :  { %3776 = vmatprep.subr.bf16.mxu0 %v17578_v41 }
0x102a   :  { %3777 = vmatpush2.bf16.msra.mxu0 %v17576_v42 }
0x102b   :  { %3778 = vmatprep.subr.bf16.mxu0 %v17581_v43 }
0x102e   :  { %3779 = vmatpush2.bf16.msra.mxu0 %v17579_v44 }
0x102f   :  { %3780 = vmatprep.subr.bf16.mxu0 %v17584_v4 }
0x1032   :  { %3781 = vmatpush2.bf16.msra.mxu0 %v17582_v47 }
0x1033   :  { %3782 = vmatprep.subr.bf16.mxu0 %v17587_v56 }
0x1036   :  { %3783 = vmatpush2.bf16.msra.mxu0 %v17585_v57 }
0x1037   :  { %3784 = vmatprep.subr.bf16.mxu0 %v17590_v58 }
0x103a   :  { %3785 = vmatpush2.bf16.msra.mxu0 %v17588_v0 }
0x103b   :  { %3786 = vmatprep.subr.bf16.mxu0 %v17593_v60 }
0x103e   :  { %3787 = vmatpush2.bf16.msra.mxu0 %v17591_v61 }
0x103f   :  { %16982 = vmatprep.subr.mxu0 %v18834_v48 }
0x1041   :  { %3789 = vmatmul.mubr.bf16.vlgmr.msra.gmra.mxu0 %v3553_v3 }
0x1042   :  { %16984 = vmatprep.mubr.msk.f32.mxu0 %vm18835_vm0, %v18834_v48 }
0x10c1   :  { %v3501_v59 = vpop.f32.mrf.mxu0  ;;  %v3544_v63 = vpop.f32.mrf.mxu1 }
0x10c2   :  { %v3545_v14 = vadd.f32 %v3544_v63, %v3142_v10  ;;  %v3502_v24 = vadd.f32 %v3501_v59, %v3134_v9 }
0x10c3   :  { %v3503_v18 = vpop.f32.mrf.mxu0  ;;  %v3546_v22 = vpop.f32.mrf.mxu1 }
0x10c4   :  { %v3547_v36 = vadd.f32 %v3546_v22, %v19324_v23  ;;  %16963 = vmatpush3.xpose.msra.mxu1 %v3545_v14  ;;  %v3504_v1 = vadd.f32 %v3503_v18, %v3138_v15 }
0x10c5   :  { %v3505_v33 = vpop.f32.mrf.mxu0  ;;  %v3548_v62 = vpop.f32.mrf.mxu1  ;;  %16967 = vmatprep.subr.mxu1 %v18834_v48 }
0x10c6   :  { %v19330_v27 = vadd.f32 %v3505_v33, %v3134_v9  ;;  %v3549_v28 = vadd.f32 %v3548_v62, %v3142_v10  ;;  %16983 = vmatpush3.xpose.msra.mxu0 %v3547_v36 }
0x10c7   :  { %v3507_v2 = vpop.f32.mrf.mxu0  ;;  %16965 = vmatmul.mubr.f32.vlgmr.msra.gmra.mxu1 %v3502_v24  ;;  %16987 = vmatprep.subr.mxu0 %v18834_v48  ;;  %v3550_v38 = vpop.f32.mrf.mxu1 }
0x10c8   :  { %v19333_v26 = vadd.f32 %v3507_v2, %v3138_v15  ;;  %16969 = vmatprep.mubr.msk.f32.mxu1 %vm18835_vm0, %v18834_v48  ;;  %v3551_v15 = vadd.f32 %v3550_v38, %v19324_v23 }
0x10c9   :  { %16985 = vmatmul.mubr.f32.vlgmr.msra.gmra.mxu0 %v3504_v1 }
0x10ca   :  { %16989 = vmatprep.mubr.msk.f32.mxu0 %vm18835_vm0, %v18834_v48 }
0x1101   :  { %v3790_v25 = vpop.f32.mrf.mxu0 }
0x1102   :  { %v3791_v32 = vadd.f32 %v3790_v25, %v3591_v51 }
0x1103   :  { %v3792_v30 = vpop.f32.mrf.mxu0 }
0x1104   :  { %v3793_v34 = vadd.f32 %v3792_v30, %v3595_v20  ;;  %16968 = vmatpush3.msra.mxu1 %v3791_v32 }
0x1105   :  { %v3794_v37 = vpop.f32.mrf.mxu0  ;;  %16972 = vmatprep.subr.mxu1 %v18834_v48 }
0x1106   :  { %v3795_v19 = vadd.f32 %v3794_v37, %v3591_v51  ;;  %16988 = vmatpush3.msra.mxu0 %v3793_v34 }
0x1107   :  { %16992 = vmatprep.subr.mxu0 %v18834_v48  ;;  %v3796_v39 = vpop.f32.mrf.mxu0 }
0x1108   :  { %v3797_v18 = vadd.f32 %v3796_v39, %v3595_v20 }
0x1187   :  { %v3865_v40 = vpop.f32.mrf.mxu1 }
0x1188   :  { %v3869_v41 = vmul.f32 0.088388346, %v3865_v40 }
0x1189   :  { %v16966_v42 = vpop.f32.mrf.mxu1  ;;  %v4328_v43 = vpop.f32.mrf.mxu0 }
0x118a   :  { %v4332_v44 = vmul.f32 0.088388346, %v4328_v43  ;;  %v3870_v4 = vsel %vm1069_vm1, %v3869_v41, -inf }
0x118b   :  { %v16986_v47 = vpop.f32.mrf.mxu0  ;;  %3871 = vmax.xlane.f32.xlu0 %v3870_v4  ;;  %v17594_v4 = vld [vmem:[#allocation6 + $0x170] ss:$8 sps:$4 sm:$0xff]  }
0x118c   :  { %v4333_v56 = vsel %vm1069_vm1, %v4332_v44, -inf }
0x118d   :  { %4334 = vmax.xlane.f32.xlu1 %v4333_v56  ;;  %v17599_v56 = vld [vmem:[#allocation6 + $0x164] ss:$8 sps:$4 sm:$0xff]  }
0x1214   :  { %v3872_v57 = vpop.xlane.xlu0 %3871 }
0x1215   :  { %v3873_v58 = vsub.f32 %v3869_v41, %v3872_v57  ;;  %v17596_v41 = vld [vmem:[#allocation6 + $0x174] ss:$8 sps:$4 sm:$0xff]  }
0x1216   :  { %v4335_v0 = vpop.xlane.xlu1 %4334 }
0x1217   :  { %v3874_v60 = vmul.f32 1.442695, %v3873_v58  ;;  %v4336_v61 = vsub.f32 %v4332_v44, %v4335_v0  ;;  %v17597_v0 = vld [vmem:[#allocation6 + $0x160] ss:$8 sps:$4 sm:$0xff]  }
0x1219   :  { %18450 = vpow2.f32 %v3874_v60  ;;  %v4337_v3 = vmul.f32 1.442695, %v4336_v61  ;;  %v17602_v60 = vld [vmem:[#allocation6 + $0x154] ss:$8 sps:$4 sm:$0xff]   ;;  %v17600_v61 = vld [vmem:[#allocation6 + $0x150] ss:$8 sps:$4 sm:$0xff]  }
0x121b   :  { %18452 = vpow2.f32 %v4337_v3  ;;  %v17605_v3 = vld [vmem:[#allocation6 + $0x144] ss:$8 sps:$4 sm:$0xff]  }
0x1226   :  { %v18451_v7 = vpop.eup %18450 }
0x1227   :  { %v3876_v50 = vsel %vm1069_vm1, %v18451_v7, 0.0 }
0x1228   :  { %v18453_v35 = vpop.eup %18452  ;;  %3877 = vadd.xlane.f32.xlu0 %v3876_v50  ;;  %v17608_v50 = vld [vmem:[#allocation6 + $0x134] ss:$8 sps:$4 sm:$0xff]  }
0x1229   :  { %v4339_v21 = vsel %vm1069_vm1, %v18453_v35, 0.0 }
0x122a   :  { %4340 = vadd.xlane.f32.xlu1 %v4339_v21  ;;  %v17611_v21 = vld [vmem:[#allocation6 + $0x124] ss:$8 sps:$4 sm:$0xff]  }
0x12b1   :  { %v3878_v10 = vpop.xlane.xlu0 %3877 }
0x12b2   :  { %18454 = vrcp.f32 %v3878_v10  ;;  %v17609_v10 = vld [vmem:[#allocation6 + $0x120] ss:$8 sps:$4 sm:$0xff]  }
0x12b3   :  { %v4341_v12 = vpop.xlane.xlu1 %4340 }
0x12b4   :  { %18456 = vrcp.f32 %v4341_v12  ;;  %v17614_v12 = vld [vmem:[#allocation6 + $0x114] ss:$8 sps:$4 sm:$0xff]  }
0x12bf   :  { %v18455_v9 = vpop.eup %18454 }
0x12c0   :  { %v3880_v59 = vmul.f32 %v18455_v9, %v18451_v7  ;;  %v17603_v7 = vld [vmem:[#allocation6 + $0x140] ss:$8 sps:$4 sm:$0xff]   ;;  %v17612_v9 = vld [vmem:[#allocation6 + $0x110] ss:$8 sps:$4 sm:$0xff]  }
0x12c1   :  { %v18457_v63 = vpop.eup %18456 }
0x12c2   :  { %16970 = vmatmul.mubr.msk.f32.vlgmr.msra.gmra.mxu1 %vm1069_vm1, %v3880_v59  ;;  %v4343_v14 = vmul.f32 %v18457_v63, %v18453_v35  ;;  %v17606_v35 = vld [vmem:[#allocation6 + $0x130] ss:$8 sps:$4 sm:$0xff]   ;;  %v17617_v59 = vld [vmem:[#allocation6 + $0x104] ss:$8 sps:$4 sm:$0xff]   ;;  %v17615_v63 = vld [vmem:[#allocation6 + $0x100] ss:$8 sps:$4 sm:$0xff]  }
0x12c3   :  { %16973 = vmatpush3.xpose.msra.mxu1 %v3549_v28  ;;  %16974 = vmatprep.mubr.msk.f32.mxu1 %vm18835_vm0, %v18834_v48 }
0x12c4   :  { %16990 = vmatmul.mubr.msk.f32.vlgmr.msra.gmra.mxu0 %vm1069_vm1, %v4343_v14  ;;  %16977 = vmatprep.subr.mxu1 %v18834_v48  ;;  %v17620_v14 = vld [vmem:[#allocation6 + $0x1f4] ss:$8 sps:$4 sm:$0xff]  }
0x12c5   :  { %16993 = vmatpush3.xpose.msra.mxu0 %v3551_v15  ;;  %16994 = vmatprep.mubr.msk.f32.mxu0 %vm18835_vm0, %v18834_v48 }
0x12c6   :  { %16975 = vmatmul.mubr.f32.vlgmr.msra.gmra.mxu1 %v19330_v27  ;;  %16997 = vmatprep.subr.mxu0 %v18834_v48 }
0x12c7   :  { %16978 = vmatpush3.msra.mxu1 %v3795_v19  ;;  %16979 = vmatprep.mubr.msk.f32.mxu1 %vm18835_vm0, %v18834_v48 }
0x12c8   :  { %16995 = vmatmul.mubr.f32.vlgmr.msra.gmra.mxu0 %v19333_v26  ;;  %4207 = vmatprep.subr.bf16.mxu1 %v17596_v41 }
0x12c9   :  { %16998 = vmatpush3.msra.mxu0 %v3797_v18  ;;  %16999 = vmatprep.mubr.msk.f32.mxu0 %vm18835_vm0, %v18834_v48  ;;  %v17618_v18 = vld [vmem:[#allocation6 + $0x1f0] ss:$8 sps:$4 sm:$0xff]  }
0x1382   :  { %v19368_v23 = vpop.f32.mrf.mxu1 }
0x1384   :  { %v16971_v22 = vpop.f32.mrf.mxu1  ;;  %v19370_v36 = vpop.f32.mrf.mxu0 }
0x1386   :  { %v4020_v24 = vpop.f32.mrf.mxu1  ;;  %v16991_v33 = vpop.f32.mrf.mxu0 }
0x1387   :  { %v4024_v62 = vmul.f32 0.088388346, %v4020_v24  ;;  %v17623_v24 = vld [vmem:[#allocation6 + $0x1e4] ss:$8 sps:$4 sm:$0xff]  }
0x1388   :  { %v16976_v27 = vpop.f32.mrf.mxu1  ;;  %v4483_v28 = vpop.f32.mrf.mxu0 }
0x1389   :  { %v4487_v1 = vmul.f32 0.088388346, %v4483_v28  ;;  %v4025_v2 = vsel %vm1069_vm1, %v4024_v62, -inf  ;;  %v17621_v28 = vld [vmem:[#allocation6 + $0x1e0] ss:$8 sps:$4 sm:$0xff]  }
0x138a   :  { %v16996_v51 = vpop.f32.mrf.mxu0  ;;  %4026 = vmax.xlane.f32.xlu0 %v4025_v2  ;;  %v17624_v2 = vld [vmem:[#allocation6 + $0x1d0] ss:$8 sps:$4 sm:$0xff]  }
0x138b   :  { %v4488_v26 = vsel %vm1069_vm1, %v4487_v1, -inf  ;;  %v17629_v51 = vld [vmem:[#allocation6 + $0x1c4] ss:$8 sps:$4 sm:$0xff]  }
0x138c   :  { %4489 = vmax.xlane.f32.xlu1 %v4488_v26  ;;  %v17627_v26 = vld [vmem:[#allocation6 + $0x1c0] ss:$8 sps:$4 sm:$0xff]  }
0x1413   :  { %v4027_v20 = vpop.xlane.xlu0 %4026 }
0x1414   :  { %v4028_v25 = vsub.f32 %v4024_v62, %v4027_v20  ;;  %v17632_v20 = vld [vmem:[#allocation6 + $0x1b4] ss:$8 sps:$4 sm:$0xff]  }
0x1415   :  { %v4490_v32 = vpop.xlane.xlu1 %4489 }
0x1416   :  { %v4029_v30 = vmul.f32 1.442695, %v4028_v25  ;;  %v4491_v34 = vsub.f32 %v4487_v1, %v4490_v32  ;;  %v17626_v1 = vld [vmem:[#allocation6 + $0x1d4] ss:$8 sps:$4 sm:$0xff]   ;;  %v17635_v25 = vld [vmem:[#allocation6 + $0x1a4] ss:$8 sps:$4 sm:$0xff]  }
0x1417   :  { %v17633_v32 = vld [vmem:[#allocation6 + $0x1a0] ss:$8 sps:$4 sm:$0xff]  }
0x1418   :  { %18458 = vpow2.f32 %v4029_v30  ;;  %v4492_v37 = vmul.f32 1.442695, %v4491_v34  ;;  %v17638_v30 = vld [vmem:[#allocation6 + $0x194] ss:$8 sps:$4 sm:$0xff]   ;;  %v17636_v34 = vld [vmem:[#allocation6 + $0x190] ss:$8 sps:$4 sm:$0xff]  }
0x141a   :  { %18460 = vpow2.f32 %v4492_v37  ;;  %v17641_v37 = vld [vmem:[#allocation6 + $0x184] ss:$8 sps:$4 sm:$0xff]  }
0x1425   :  { %v18459_v19 = vpop.eup %18458 }
0x1426   :  { %v4031_v38 = vsel %vm1069_vm1, %v18459_v19, 0.0 }
0x1427   :  { %v18461_v39 = vpop.eup %18460  ;;  %4032 = vadd.xlane.f32.xlu0 %v4031_v38 }
0x1428   :  { %v4494_v40 = vsel %vm1069_vm1, %v18461_v39, 0.0 }
0x1429   :  { %4495 = vadd.xlane.f32.xlu1 %v4494_v40 }
0x14b0   :  { %v4033_v42 = vpop.xlane.xlu0 %4032 }
0x14b1   :  { %18462 = vrcp.f32 %v4033_v42  ;;  %v4253_v42 = vrot.slane %v19339_v31, %v19133_v16 }
0x14b2   :  { %v4496_v43 = vpop.xlane.xlu1 %4495 }
0x14b3   :  { %18464 = vrcp.f32 %v4496_v43  ;;  %v4257_v43 = vrot.slane %v19341_v29, %v19133_v16 }
0x14be   :  { %v18463_v44 = vpop.eup %18462 }
0x14bf   :  { %v4035_v47 = vmul.f32 %v18463_v44, %v18459_v19  ;;  %v17639_v19 = vld [vmem:[#allocation6 + $0x180] ss:$8 sps:$4 sm:$0xff]  }
0x14c0   :  { %v18465_v57 = vpop.eup %18464 }
0x14c1   :  { %16980 = vmatmul.mubr.msk.f32.vlgmr.msra.gmra.mxu1 %vm1069_vm1, %v4035_v47  ;;  %v4498_v58 = vmul.f32 %v18465_v57, %v18461_v39 }
0x14c2   :  { %4208 = vmatpush1.bf16.msra.mxu1 %v17594_v4  ;;  %4239 = vmatprep.mubr.bf16.mxu1 %v18836_v5 }
0x14c3   :  { %17000 = vmatmul.mubr.msk.f32.vlgmr.msra.gmra.mxu0 %vm1069_vm1, %v4498_v58  ;;  %4209 = vmatprep.subr.bf16.mxu1 %v17599_v56 }
0x14c6   :  { %4210 = vmatpush1.bf16.msra.mxu1 %v17597_v0 }
0x14c7   :  { %4211 = vmatprep.subr.bf16.mxu1 %v17602_v60 }
0x14ca   :  { %4212 = vmatpush1.bf16.msra.mxu1 %v17600_v61 }
0x14cb   :  { %4213 = vmatprep.subr.bf16.mxu1 %v17605_v3 }
0x14ce   :  { %4214 = vmatpush1.bf16.msra.mxu1 %v17603_v7 }
0x14cf   :  { %4215 = vmatprep.subr.bf16.mxu1 %v17608_v50 }
0x14d2   :  { %4216 = vmatpush1.bf16.msra.mxu1 %v17606_v35 }
0x14d3   :  { %4217 = vmatprep.subr.bf16.mxu1 %v17611_v21 }
0x14d6   :  { %4218 = vmatpush1.bf16.msra.mxu1 %v17609_v10 }
0x14d7   :  { %4219 = vmatprep.subr.bf16.mxu1 %v17614_v12 }
0x14da   :  { %4220 = vmatpush1.bf16.msra.mxu1 %v17612_v9 }
0x14db   :  { %4221 = vmatprep.subr.bf16.mxu1 %v17617_v59  ;;  %v17642_v59 = vld [vmem:[#allocation7 + $0x2e0] ss:$16 sps:$4 sm:$0xff]  }
0x14de   :  { %4222 = vmatpush1.bf16.msra.mxu1 %v17615_v63  ;;  %v17645_v63 = vld [vmem:[#allocation7 + $0x2e8] ss:$16 sps:$4 sm:$0xff]  }
0x14df   :  { %4669 = vmatprep.subr.bf16.mxu1 %v17620_v14  ;;  %v17647_v14 = vld [vmem:[#allocation7 + $0x2ec] ss:$16 sps:$4 sm:$0xff]  }
0x1581   :  { %v4105_v15 = vpop.f32.mrf.mxu1 }
0x1582   :  { %v4109_v22 = vpack.c.bf16 %v4105_v15, %v19368_v23  ;;  %v17630_v23 = vld [vmem:[#allocation6 + $0x1b0] ss:$8 sps:$4 sm:$0xff]   ;;  %v17650_v15 = vld [vmem:[#allocation7 + $0x2c4] ss:$16 sps:$4 sm:$0xff]  }
0x1583   :  { %v16981_v33 = vpop.f32.mrf.mxu1  ;;  %v4568_v62 = vpop.f32.mrf.mxu0 }
0x1584   :  { %4240 = vmatmul.mubr.bf16.vlgmr.msra.gmra.mxu1 %v4109_v22  ;;  %v4572_v38 = vpack.c.bf16 %v4568_v62, %v19370_v36  ;;  %v17648_v22 = vld [vmem:[#allocation7 + $0x2c0] ss:$16 sps:$4 sm:$0xff]   ;;  %v17657_v62 = vld [vmem:[#allocation7 + $0x2a8] ss:$16 sps:$4 sm:$0xff]  }
0x1585   :  { %4670 = vmatpush1.bf16.msra.mxu1 %v17618_v18  ;;  %v17001_v27 = vpop.f32.mrf.mxu0  ;;  %4701 = vmatprep.mubr.bf16.mxu1 %v18836_v5  ;;  %v17653_v18 = vld [vmem:[#allocation7 + $0x2cc] ss:$16 sps:$4 sm:$0xff]   ;;  %v17654_v33 = vld [vmem:[#allocation7 + $0x2a0] ss:$16 sps:$4 sm:$0xff]  }
0x1586   :  { %4671 = vmatprep.subr.bf16.mxu1 %v17623_v24  ;;  %v17659_v24 = vld [vmem:[#allocation7 + $0x2ac] ss:$16 sps:$4 sm:$0xff]   ;;  %v17662_v27 = vld [vmem:[#allocation7 + $0x284] ss:$16 sps:$4 sm:$0xff]  }
0x1589   :  { %4672 = vmatpush1.bf16.msra.mxu1 %v17621_v28  ;;  %v17665_v28 = vld [vmem:[#allocation7 + $0x28c] ss:$16 sps:$4 sm:$0xff]  }
0x158a   :  { %4673 = vmatprep.subr.bf16.mxu1 %v17626_v1  ;;  %v17660_v1 = vld [vmem:[#allocation7 + $0x280] ss:$16 sps:$4 sm:$0xff]  }
0x158d   :  { %4674 = vmatpush1.bf16.msra.mxu1 %v17624_v2  ;;  %v17663_v2 = vld [vmem:[#allocation7 + $0x288] ss:$16 sps:$4 sm:$0xff]  }
0x158e   :  { %4675 = vmatprep.subr.bf16.mxu1 %v17629_v51  ;;  %v17668_v51 = vld [vmem:[#allocation7 + $0x264] ss:$16 sps:$4 sm:$0xff]  }
0x1591   :  { %4676 = vmatpush1.bf16.msra.mxu1 %v17627_v26  ;;  %v17671_v26 = vld [vmem:[#allocation7 + $0x26c] ss:$16 sps:$4 sm:$0xff]  }
0x1592   :  { %4677 = vmatprep.subr.bf16.mxu1 %v17632_v20  ;;  %v17666_v20 = vld [vmem:[#allocation7 + $0x260] ss:$16 sps:$4 sm:$0xff]  }
0x1595   :  { %4678 = vmatpush1.bf16.msra.mxu1 %v17630_v23  ;;  %v17669_v23 = vld [vmem:[#allocation7 + $0x268] ss:$16 sps:$4 sm:$0xff]  }
0x1596   :  { %4679 = vmatprep.subr.bf16.mxu1 %v17635_v25  ;;  %v17674_v25 = vld [vmem:[#allocation7 + $0x244] ss:$16 sps:$4 sm:$0xff]  }
0x1599   :  { %4680 = vmatpush1.bf16.msra.mxu1 %v17633_v32  ;;  %v17677_v32 = vld [vmem:[#allocation7 + $0x24c] ss:$16 sps:$4 sm:$0xff]  }
0x159a   :  { %4681 = vmatprep.subr.bf16.mxu1 %v17638_v30  ;;  %v17672_v30 = vld [vmem:[#allocation7 + $0x240] ss:$16 sps:$4 sm:$0xff]  }
0x159d   :  { %4682 = vmatpush1.bf16.msra.mxu1 %v17636_v34  ;;  %v17675_v34 = vld [vmem:[#allocation7 + $0x248] ss:$16 sps:$4 sm:$0xff]  }
0x159e   :  { %4683 = vmatprep.subr.bf16.mxu1 %v17641_v37  ;;  %v17680_v37 = vld [vmem:[#allocation7 + $0x224] ss:$16 sps:$4 sm:$0xff]  }
0x15a1   :  { %4684 = vmatpush1.bf16.msra.mxu1 %v17639_v19  ;;  %v17683_v19 = vld [vmem:[#allocation7 + $0x22c] ss:$16 sps:$4 sm:$0xff]  }
0x15a2   :  { %5242 = vmatprep.subr.bf16.mxu1 %v17647_v14  ;;  %v17696_v14 = vld [vmem:[#allocation7 + $0x3c0] ss:$16 sps:$4 sm:$0xff]  }
0x15a4   :  { %4702 = vmatmul.mubr.bf16.vlgmr.msra.gmra.mxu1 %v4572_v38  ;;  %v17678_v38 = vld [vmem:[#allocation7 + $0x220] ss:$16 sps:$4 sm:$0xff]  }
0x15a5   :  { %5243 = vmatpush1.bf16.msra.mxu1 %v17645_v63  ;;  %v17701_v63 = vld [vmem:[#allocation7 + $0x3cc] ss:$16 sps:$4 sm:$0xff]  }
0x15a6   :  { %5244 = vmatprep.subr.bf16.mxu1 %v17653_v18  ;;  %v17702_v18 = vld [vmem:[#allocation7 + $0x3a0] ss:$16 sps:$4 sm:$0xff]  }
0x1644   :  { %v4241_v39 = vpop.f32.mrf.mxu1 }
0x1645   :  { %v4258_v4 = vadd.f32 %v4253_v42, %v4241_v39  ;;  %v17681_v39 = vld [vmem:[#allocation7 + $0x228] ss:$16 sps:$4 sm:$0xff]  }
0x1646   :  { %v4243_v40 = vpop.f32.mrf.mxu1 }
0x1647   :  { %v4259_v56 = vadd.f32 %v4257_v43, %v4243_v40  ;;  %v17686_v40 = vld [vmem:[#allocation7 + $0x204] ss:$16 sps:$4 sm:$0xff]  }
0x1648   :  { %v4245_v41 = vpop.f32.mrf.mxu1 }
0x1649   :  { %v4260_v0 = vadd.f32 %v4253_v42, %v4245_v41  ;;  %v17689_v41 = vld [vmem:[#allocation7 + $0x20c] ss:$16 sps:$4 sm:$0xff]   ;;  %v17684_v42 = vld [vmem:[#allocation7 + $0x200] ss:$16 sps:$4 sm:$0xff]  }
0x164a   :  { %v4247_v44 = vpop.f32.mrf.mxu1 }
0x164b   :  { %v4261_v36 = vadd.f32 %v4257_v43, %v4247_v44  ;;  %v17687_v43 = vld [vmem:[#allocation7 + $0x208] ss:$16 sps:$4 sm:$0xff]   ;;  %v17692_v44 = vld [vmem:[#allocation7 + $0x3e4] ss:$16 sps:$4 sm:$0xff]  }
0x1664   :  { %v4703_v47 = vpop.f32.mrf.mxu1 }
0x1665   :  { %v4712_v57 = vadd.f32 %v4703_v47, %v4258_v4  ;;  %v17695_v4 = vld [vmem:[#allocation7 + $0x3ec] ss:$16 sps:$4 sm:$0xff]   ;;  %v17690_v47 = vld [vmem:[#allocation7 + $0x3e0] ss:$16 sps:$4 sm:$0xff]  }
0x1666   :  { %v4705_v58 = vpop.f32.mrf.mxu1 }
0x1667   :  { %v4713_v60 = vadd.f32 %v4705_v58, %v4259_v56  ;;  %v19387_v3 = vadd.f32 %v4712_v57, %v19287_v45  ;;  %v17693_v56 = vld [vmem:[#allocation7 + $0x3e8] ss:$16 sps:$4 sm:$0xff]  }
0x1668   :  { %v4707_v61 = vpop.f32.mrf.mxu1 }
0x1669   :  { %v19390_v7 = vadd.f32 %v4713_v60, %v19285_v11  ;;  %v4714_v50 = vadd.f32 %v4707_v61, %v4260_v0  ;;  %v17644_v11 = vld [vmem:[#allocation7 + $0x2e4] ss:$16 sps:$4 sm:$0xff]  }
0x166a   :  { %v4709_v35 = vpop.f32.mrf.mxu1  ;;  %5199 = vmatprep.subr.bf16.mxu0 %v17644_v11  ;;  %v17698_v11 = vld [vmem:[#allocation7 + $0x3c4] ss:$16 sps:$4 sm:$0xff]  }
0x166b   :  { %v4715_v21 = vadd.f32 %v4709_v35, %v4261_v36  ;;  %v4720_v10 = vadd.f32 %v19390_v7, %v19387_v3  ;;  %v19395_v12 = vadd.f32 %v4714_v50, %v19291_v13  ;;  %5200 = vmatpush1.bf16.msra.mxu0 %v17642_v59  ;;  %v17651_v13 = vld [vmem:[#allocation7 + $0x2c8] ss:$16 sps:$4 sm:$0xff]  }
0x166c   :  { %5201 = vmatprep.subr.bf16.mxu0 %v17650_v15  ;;  %5245 = vmatpush1.bf16.msra.mxu1 %v17651_v13  ;;  %v17699_v15 = vld [vmem:[#allocation7 + $0x3c8] ss:$16 sps:$4 sm:$0xff]   ;;  %v17708_v13 = vld [vmem:[#allocation7 + $0x380] ss:$16 sps:$4 sm:$0xff]  }
0x166d   :  { %v19398_v9 = vadd.f32 %v4715_v21, %v19289_v46  ;;  %4721 = vadd.xlane.f32.xlu0 %v4720_v10  ;;  %v17656_v46 = vld [vmem:[#allocation7 + $0x2a4] ss:$16 sps:$4 sm:$0xff]   ;;  %5246 = vmatprep.subr.bf16.mxu1 %v17659_v24  ;;  %v17711_v24 = vld [vmem:[#allocation7 + $0x388] ss:$16 sps:$4 sm:$0xff]  }
0x166f   :  { %v4723_v45 = vadd.f32 %v19398_v9, %v19395_v12  ;;  %5202 = vmatpush1.bf16.msra.mxu0 %v17648_v22  ;;  %v17705_v22 = vld [vmem:[#allocation7 + $0x3a8] ss:$16 sps:$4 sm:$0xff]  }
0x1670   :  { %5203 = vmatprep.subr.bf16.mxu0 %v17656_v46  ;;  %5247 = vmatpush1.bf16.msra.mxu1 %v17657_v62  ;;  %v17710_v46 = vld [vmem:[#allocation7 + $0x384] ss:$16 sps:$4 sm:$0xff]  }
0x1671   :  { %4724 = vadd.xlane.f32.xlu1 %v4723_v45  ;;  %5248 = vmatprep.subr.bf16.mxu1 %v17665_v28  ;;  %v17716_v62 = vld [vmem:[#allocation7 + $0x364] ss:$16 sps:$4 sm:$0xff]   ;;  %v17714_v28 = vld [vmem:[#allocation7 + $0x360] ss:$16 sps:$4 sm:$0xff]  }
0x1673   :  { %5204 = vmatpush1.bf16.msra.mxu0 %v17654_v33  ;;  %v17713_v33 = vld [vmem:[#allocation7 + $0x38c] ss:$16 sps:$4 sm:$0xff]  }
0x1674   :  { %5205 = vmatprep.subr.bf16.mxu0 %v17662_v27  ;;  %5249 = vmatpush1.bf16.msra.mxu1 %v17663_v2  ;;  %v17719_v27 = vld [vmem:[#allocation7 + $0x36c] ss:$16 sps:$4 sm:$0xff]   ;;  %v17722_v2 = vld [vmem:[#allocation7 + $0x344] ss:$16 sps:$4 sm:$0xff]  }
0x1675   :  { %5250 = vmatprep.subr.bf16.mxu1 %v17671_v26  ;;  %v17720_v26 = vld [vmem:[#allocation7 + $0x340] ss:$16 sps:$4 sm:$0xff]  }
0x1677   :  { %5206 = vmatpush1.bf16.msra.mxu0 %v17660_v1  ;;  %v17717_v1 = vld [vmem:[#allocation7 + $0x368] ss:$16 sps:$4 sm:$0xff]  }
0x1678   :  { %5207 = vmatprep.subr.bf16.mxu0 %v17668_v51  ;;  %5251 = vmatpush1.bf16.msra.mxu1 %v17669_v23  ;;  %v17725_v51 = vld [vmem:[#allocation7 + $0x34c] ss:$16 sps:$4 sm:$0xff]   ;;  %v17728_v23 = vld [vmem:[#allocation7 + $0x324] ss:$16 sps:$4 sm:$0xff]  }
0x1679   :  { %5252 = vmatprep.subr.bf16.mxu1 %v17677_v32  ;;  %v17726_v32 = vld [vmem:[#allocation7 + $0x320] ss:$16 sps:$4 sm:$0xff]  }
0x167b   :  { %5208 = vmatpush1.bf16.msra.mxu0 %v17666_v20  ;;  %v17723_v20 = vld [vmem:[#allocation7 + $0x348] ss:$16 sps:$4 sm:$0xff]  }
0x167c   :  { %5209 = vmatprep.subr.bf16.mxu0 %v17674_v25  ;;  %5253 = vmatpush1.bf16.msra.mxu1 %v17675_v34  ;;  %v17731_v25 = vld [vmem:[#allocation7 + $0x32c] ss:$16 sps:$4 sm:$0xff]   ;;  %v17734_v34 = vld [vmem:[#allocation7 + $0x304] ss:$16 sps:$4 sm:$0xff]  }
0x167d   :  { %5254 = vmatprep.subr.bf16.mxu1 %v17683_v19  ;;  %v17732_v19 = vld [vmem:[#allocation7 + $0x300] ss:$16 sps:$4 sm:$0xff]  }
0x167f   :  { %5210 = vmatpush1.bf16.msra.mxu0 %v17672_v30  ;;  %v17729_v30 = vld [vmem:[#allocation7 + $0x328] ss:$16 sps:$4 sm:$0xff]  }
0x1680   :  { %5211 = vmatprep.subr.bf16.mxu0 %v17680_v37  ;;  %5255 = vmatpush1.bf16.msra.mxu1 %v17681_v39  ;;  %v17737_v37 = vld [vmem:[#allocation7 + $0x30c] ss:$16 sps:$4 sm:$0xff]  }
0x1681   :  { %5256 = vmatprep.subr.bf16.mxu1 %v17689_v41  ;;  %v17740_v39 = vld [vmem:[#allocation9 + $0x274] ss:$8 sps:$4 sm:$0xff]  }
0x1683   :  { %5212 = vmatpush1.bf16.msra.mxu0 %v17678_v38  ;;  %v17735_v38 = vld [vmem:[#allocation7 + $0x308] ss:$16 sps:$4 sm:$0xff]  }
0x1684   :  { %5213 = vmatprep.subr.bf16.mxu0 %v17686_v40  ;;  %5257 = vmatpush1.bf16.msra.mxu1 %v17687_v43  ;;  %v17743_v40 = vld [vmem:[#allocation9 + $0x374] ss:$8 sps:$4 sm:$0xff]  }
0x1685   :  { %5258 = vmatprep.subr.bf16.mxu1 %v17695_v4 }
0x1687   :  { %5214 = vmatpush1.bf16.msra.mxu0 %v17684_v42 }
0x1688   :  { %5215 = vmatprep.subr.bf16.mxu0 %v17692_v44  ;;  %5259 = vmatpush2.bf16.msra.mxu1 %v17693_v56 }
0x1689   :  { %5260 = vmatprep.subr.bf16.mxu1 %v17701_v63 }
0x168b   :  { %5216 = vmatpush2.bf16.msra.mxu0 %v17690_v47 }
0x168c   :  { %5217 = vmatprep.subr.bf16.mxu0 %v17698_v11  ;;  %5261 = vmatpush2.bf16.msra.mxu1 %v17699_v15 }
0x168f   :  { %5218 = vmatpush2.bf16.msra.mxu0 %v17696_v14 }
0x16f6   :  { %v4722_v57 = vpop.xlane.xlu0 %4721 }
0x16f7   :  { %v4726_v58 = vmul.f32 0.00390625, %v4722_v57 }
0x16f9   :  { %v19403_v0 = vsub.f32 %v19387_v3, %v4726_v58  ;;  %v19406_v60 = vsub.f32 %v19390_v7, %v4726_v58  ;;  %v4759_v58 = vrot.slane %v19341_v29, %v19188_v17 }
0x16fa   :  { %v4725_v61 = vpop.xlane.xlu1 %4724 }
0x16fb   :  { %v4727_v36 = vmul.f32 0.00390625, %v4725_v61  ;;  %v4732_v50 = vmul.f32 %v19403_v0, %v19403_v0  ;;  %v4733_v35 = vmul.f32 %v19406_v60, %v19406_v60 }
0x16fd   :  { %v19413_v21 = vsub.f32 %v19395_v12, %v4727_v36  ;;  %v19416_v10 = vsub.f32 %v19398_v9, %v4727_v36  ;;  %v4736_v45 = vadd.f32 %v4733_v35, %v4732_v50  ;;  %v17704_v12 = vld [vmem:[#allocation7 + $0x3a4] ss:$16 sps:$4 sm:$0xff]   ;;  %v17707_v9 = vld [vmem:[#allocation7 + $0x3ac] ss:$16 sps:$4 sm:$0xff]   ;;  %v4755_v36 = vrot.slane %v19339_v31, %v19188_v17 }
0x16fe   :  { %5219 = vmatprep.subr.bf16.mxu0 %v17704_v12  ;;  %5262 = vmatprep.subr.bf16.mxu1 %v17707_v9  ;;  %v4771_v35 = vrot.slane %v19341_v29, %v19046_v52  ;;  %v17741_v9 = vld [vmem:[#allocation9 + $0x370] ss:$8 sps:$4 sm:$0xff]  }
0x16ff   :  { %4737 = vadd.xlane.f32.xlu0 %v4736_v45  ;;  %v4734_v3 = vmul.f32 %v19413_v21, %v19413_v21  ;;  %v4735_v7 = vmul.f32 %v19416_v10, %v19416_v10  ;;  %5220 = vmatpush2.bf16.msra.mxu0 %v17702_v18  ;;  %v4767_v45 = vrot.slane %v19339_v31, %v19046_v52  ;;  %v17749_v18 = vld [vmem:[#allocation9 + $0x364] ss:$8 sps:$4 sm:$0xff]  }
0x1700   :  { %5263 = vmatpush2.bf16.msra.mxu1 %v17705_v22  ;;  %5221 = vmatprep.subr.bf16.mxu0 %v17710_v46  ;;  %v17744_v22 = vld [vmem:[#allocation9 + $0x260] ss:$8 sps:$4 sm:$0xff]   ;;  %v17752_v46 = vld [vmem:[#allocation9 + $0x254] ss:$8 sps:$4 sm:$0xff]  }
0x1701   :  { %v4739_v59 = vadd.f32 %v4735_v7, %v4734_v3  ;;  %5264 = vmatprep.subr.bf16.mxu1 %v17713_v33  ;;  %v17750_v33 = vld [vmem:[#allocation9 + $0x250] ss:$8 sps:$4 sm:$0xff]  }
0x1703   :  { %4740 = vadd.xlane.f32.xlu1 %v4739_v59  ;;  %5222 = vmatpush2.bf16.msra.mxu0 %v17708_v13  ;;  %v17747_v13 = vld [vmem:[#allocation9 + $0x360] ss:$8 sps:$4 sm:$0xff]  }
0x1704   :  { %5265 = vmatpush2.bf16.msra.mxu1 %v17711_v24  ;;  %5223 = vmatprep.subr.bf16.mxu0 %v17716_v62  ;;  %v17755_v24 = vld [vmem:[#allocation9 + $0x354] ss:$8 sps:$4 sm:$0xff]   ;;  %v17753_v62 = vld [vmem:[#allocation9 + $0x350] ss:$8 sps:$4 sm:$0xff]  }
0x1705   :  { %5266 = vmatprep.subr.bf16.mxu1 %v17719_v27  ;;  %v17758_v27 = vld [vmem:[#allocation9 + $0x244] ss:$8 sps:$4 sm:$0xff]  }
0x1707   :  { %5224 = vmatpush2.bf16.msra.mxu0 %v17714_v28  ;;  %v17761_v28 = vld [vmem:[#allocation9 + $0x344] ss:$8 sps:$4 sm:$0xff]  }
0x1708   :  { %5267 = vmatpush2.bf16.msra.mxu1 %v17717_v1  ;;  %5225 = vmatprep.subr.bf16.mxu0 %v17722_v2  ;;  %v17756_v1 = vld [vmem:[#allocation9 + $0x240] ss:$8 sps:$4 sm:$0xff]  }
0x1709   :  { %5268 = vmatprep.subr.bf16.mxu1 %v17725_v51  ;;  %v17759_v2 = vld [vmem:[#allocation9 + $0x340] ss:$8 sps:$4 sm:$0xff]   ;;  %v17764_v51 = vld [vmem:[#allocation9 + $0x234] ss:$8 sps:$4 sm:$0xff]  }
0x170b   :  { %5226 = vmatpush2.bf16.msra.mxu0 %v17720_v26  ;;  %v17767_v26 = vld [vmem:[#allocation9 + $0x334] ss:$8 sps:$4 sm:$0xff]  }
0x170c   :  { %5269 = vmatpush2.bf16.msra.mxu1 %v17723_v20  ;;  %5227 = vmatprep.subr.bf16.mxu0 %v17728_v23  ;;  %v17762_v20 = vld [vmem:[#allocation9 + $0x230] ss:$8 sps:$4 sm:$0xff]  }
0x170d   :  { %5270 = vmatprep.subr.bf16.mxu1 %v17731_v25  ;;  %v17765_v23 = vld [vmem:[#allocation9 + $0x330] ss:$8 sps:$4 sm:$0xff]   ;;  %v17770_v25 = vld [vmem:[#allocation9 + $0x224] ss:$8 sps:$4 sm:$0xff]  }
0x170f   :  { %5228 = vmatpush2.bf16.msra.mxu0 %v17726_v32  ;;  %v17773_v32 = vld [vmem:[#allocation9 + $0x324] ss:$8 sps:$4 sm:$0xff]  }
0x1710   :  { %5271 = vmatpush2.bf16.msra.mxu1 %v17729_v30  ;;  %5229 = vmatprep.subr.bf16.mxu0 %v17734_v34  ;;  %v17768_v30 = vld [vmem:[#allocation9 + $0x220] ss:$8 sps:$4 sm:$0xff]  }
0x1711   :  { %5272 = vmatprep.subr.bf16.mxu1 %v17737_v37  ;;  %v17771_v34 = vld [vmem:[#allocation9 + $0x320] ss:$8 sps:$4 sm:$0xff]   ;;  %v17776_v37 = vld [vmem:[#allocation9 + $0x214] ss:$8 sps:$4 sm:$0xff]  }
0x1713   :  { %5230 = vmatpush2.bf16.msra.mxu0 %v17732_v19  ;;  %v17779_v19 = vld [vmem:[#allocation9 + $0x314] ss:$8 sps:$4 sm:$0xff]  }
0x1714   :  { %5273 = vmatpush2.bf16.msra.mxu1 %v17735_v38  ;;  %5690 = vmatprep.subr.bf16.mxu0 %v17740_v39  ;;  %v17774_v38 = vld [vmem:[#allocation9 + $0x210] ss:$8 sps:$4 sm:$0xff]  }
0x1715   :  { %5733 = vmatprep.subr.bf16.mxu1 %v17743_v40  ;;  %v17777_v39 = vld [vmem:[#allocation9 + $0x310] ss:$8 sps:$4 sm:$0xff]   ;;  %v17782_v40 = vld [vmem:[#allocation9 + $0x204] ss:$8 sps:$4 sm:$0xff]  }
0x1788   :  { %v4738_v41 = vpop.xlane.xlu0 %4737 }
0x1789   :  { %v4742_v42 = vmul.f32 0.00390625, %v4738_v41  ;;  %v17785_v41 = vld [vmem:[#allocation9 + $0x304] ss:$8 sps:$4 sm:$0xff]  }
0x178b   :  { %v4744_v43 = vadd.f32 1e-05, %v4742_v42  ;;  %v17780_v42 = vld [vmem:[#allocation9 + $0x200] ss:$8 sps:$4 sm:$0xff]  }
0x178c   :  { %v4741_v44 = vpop.xlane.xlu1 %4740 }
0x178d   :  { %18466 = vrsqrt.f32 %v4744_v43  ;;  %v4743_v4 = vmul.f32 0.00390625, %v4741_v44  ;;  %v17783_v43 = vld [vmem:[#allocation9 + $0x300] ss:$8 sps:$4 sm:$0xff]   ;;  %v17788_v44 = vld [vmem:[#allocation9 + $0x2f4] ss:$8 sps:$4 sm:$0xff]  }
0x178f   :  { %v4745_v47 = vadd.f32 1e-05, %v4743_v4  ;;  %v17791_v4 = vld [vmem:[#allocation9 + $0x3f4] ss:$8 sps:$4 sm:$0xff]  }
0x1791   :  { %18468 = vrsqrt.f32 %v4745_v47  ;;  %v17786_v47 = vld [vmem:[#allocation9 + $0x2f0] ss:$8 sps:$4 sm:$0xff]  }
0x179a   :  { %v18467_v56 = vpop.eup %18466 }
0x179b   :  { %v4749_v57 = vmul.f32 %v18467_v56, %v19406_v60  ;;  %v4748_v61 = vmul.f32 %v18467_v56, %v19403_v0  ;;  %v17789_v56 = vld [vmem:[#allocation9 + $0x3f0] ss:$8 sps:$4 sm:$0xff]  }
0x179d   :  { %v4761_v7 = vmul.f32 %v4759_v58, %v4749_v57  ;;  %v4760_v59 = vmul.f32 %v4755_v36, %v4748_v61  ;;  %v17794_v57 = vld [vmem:[#allocation9 + $0x2e4] ss:$8 sps:$4 sm:$0xff]   ;;  %v17792_v61 = vld [vmem:[#allocation9 + $0x2e0] ss:$8 sps:$4 sm:$0xff]  }
0x179e   :  { %v18469_v50 = vpop.eup %18468 }
0x179f   :  { %v4751_v3 = vmul.f32 %v18469_v50, %v19416_v10  ;;  %v4750_v60 = vmul.f32 %v18469_v50, %v19413_v21  ;;  %v19434_v14 = vadd.f32 %v4771_v35, %v4761_v7  ;;  %v19438_v15 = vadd.f32 %v4767_v45, %v4760_v59  ;;  %v17738_v10 = vld [vmem:[#allocation9 + $0x270] ss:$8 sps:$4 sm:$0xff]   ;;  %v17746_v21 = vld [vmem:[#allocation9 + $0x264] ss:$8 sps:$4 sm:$0xff]   ;;  %v17800_v50 = vld [vmem:[#allocation9 + $0x2d4] ss:$8 sps:$4 sm:$0xff]  }
0x17a0   :  { %v17806_v7 = vld [vmem:[#allocation9 + $0x2c4] ss:$8 sps:$4 sm:$0xff]   ;;  %v17804_v59 = vld [vmem:[#allocation9 + $0x2c0] ss:$8 sps:$4 sm:$0xff]  }
0x17a1   :  { %v4763_v11 = vmul.f32 %v4759_v58, %v4751_v3  ;;  %v4762_v63 = vmul.f32 %v4755_v36, %v4750_v60  ;;  %v17797_v58 = vld [vmem:[#allocation9 + $0x3e4] ss:$8 sps:$4 sm:$0xff]   ;;  %v17795_v36 = vld [vmem:[#allocation9 + $0x3e0] ss:$8 sps:$4 sm:$0xff]   ;;  %v17801_v3 = vld [vmem:[#allocation9 + $0x3d0] ss:$8 sps:$4 sm:$0xff]  }
0x17a2   :  { %v17809_v60 = vld [vmem:[#allocation9 + $0x3c4] ss:$8 sps:$4 sm:$0xff]  }
0x17a3   :  { %v19436_v0 = vadd.f32 %v4771_v35, %v4763_v11  ;;  %v19440_v12 = vadd.f32 %v4767_v45, %v4762_v63  ;;  %v17803_v35 = vld [vmem:[#allocation9 + $0x3d4] ss:$8 sps:$4 sm:$0xff]   ;;  %v17798_v45 = vld [vmem:[#allocation9 + $0x2d0] ss:$8 sps:$4 sm:$0xff]   ;;  %v17807_v11 = vld [vmem:[#allocation9 + $0x3c0] ss:$8 sps:$4 sm:$0xff]  }
0x17a4   :  { %v17812_v63 = vld [vmem:[#allocation9 + $0x2b4] ss:$8 sps:$4 sm:$0xff]  }
0x17a5   :  { %v4777_v29 = vpack.c.bf16 %v19436_v0, %v19434_v14  ;;  %v4776_v31 = vpack.c.bf16 %v19440_v12, %v19438_v15 }
0x17a7   :  { %5231 = vmatprep.mubr.bf16.mxu0 %v4777_v29  ;;  %5274 = vmatprep.mubr.bf16.mxu1 %v4777_v29  ;;  %v17815_v29 = vld [vmem:[#allocation9 + $0x3b4] ss:$8 sps:$4 sm:$0xff]  }
0x17a8   :  { %5232 = vmatmul.mubr.bf16.vlgmr.msra.gmra.mxu0 %v4776_v31  ;;  %5275 = vmatmul.mubr.bf16.vlgmr.msra.gmra.mxu1 %v4776_v31  ;;  %v17810_v31 = vld [vmem:[#allocation9 + $0x2b0] ss:$8 sps:$4 sm:$0xff]  }
0x17a9   :  { %5691 = vmatpush1.bf16.msra.mxu0 %v17738_v10  ;;  %5734 = vmatpush1.bf16.msra.mxu1 %v17741_v9  ;;  %v17813_v10 = vld [vmem:[#allocation9 + $0x3b0] ss:$8 sps:$4 sm:$0xff]   ;;  %v17818_v9 = vld [vmem:[#allocation9 + $0x2a4] ss:$8 sps:$4 sm:$0xff]  }
0x17aa   :  { %5692 = vmatprep.subr.bf16.mxu0 %v17746_v21  ;;  %5735 = vmatprep.subr.bf16.mxu1 %v17749_v18  ;;  %v17821_v21 = vld [vmem:[#allocation9 + $0x3a4] ss:$8 sps:$4 sm:$0xff]   ;;  %v17816_v18 = vld [vmem:[#allocation9 + $0x2a0] ss:$8 sps:$4 sm:$0xff]  }
0x17ad   :  { %5693 = vmatpush1.bf16.msra.mxu0 %v17744_v22  ;;  %5736 = vmatpush1.bf16.msra.mxu1 %v17747_v13  ;;  %v17819_v22 = vld [vmem:[#allocation9 + $0x3a0] ss:$8 sps:$4 sm:$0xff]   ;;  %v17824_v13 = vld [vmem:[#allocation9 + $0x294] ss:$8 sps:$4 sm:$0xff]  }
0x17ae   :  { %5694 = vmatprep.subr.bf16.mxu0 %v17752_v46  ;;  %5737 = vmatprep.subr.bf16.mxu1 %v17755_v24  ;;  %v17827_v46 = vld [vmem:[#allocation9 + $0x394] ss:$8 sps:$4 sm:$0xff]   ;;  %v17822_v24 = vld [vmem:[#allocation9 + $0x290] ss:$8 sps:$4 sm:$0xff]  }
0x17b1   :  { %5695 = vmatpush1.bf16.msra.mxu0 %v17750_v33  ;;  %5738 = vmatpush1.bf16.msra.mxu1 %v17753_v62  ;;  %v17825_v33 = vld [vmem:[#allocation9 + $0x390] ss:$8 sps:$4 sm:$0xff]   ;;  %v17830_v62 = vld [vmem:[#allocation9 + $0x284] ss:$8 sps:$4 sm:$0xff]  }
0x17b2   :  { %5696 = vmatprep.subr.bf16.mxu0 %v17758_v27  ;;  %5739 = vmatprep.subr.bf16.mxu1 %v17761_v28  ;;  %v17833_v27 = vld [vmem:[#allocation9 + $0x384] ss:$8 sps:$4 sm:$0xff]   ;;  %v17828_v28 = vld [vmem:[#allocation9 + $0x280] ss:$8 sps:$4 sm:$0xff]  }
0x17b5   :  { %5697 = vmatpush1.bf16.msra.mxu0 %v17756_v1  ;;  %5740 = vmatpush1.bf16.msra.mxu1 %v17759_v2  ;;  %v17831_v1 = vld [vmem:[#allocation9 + $0x380] ss:$8 sps:$4 sm:$0xff]  }
0x17b6   :  { %5698 = vmatprep.subr.bf16.mxu0 %v17764_v51  ;;  %5741 = vmatprep.subr.bf16.mxu1 %v17767_v26  ;;  %v18529_v2 = vld [vmem:[#allocation10 + $0x8] sm:$0xff] }
0x17b7   :  { %v4850_v51 = vrot.slane %v18529_v2, %v19188_v17  ;;  %v4858_v26 = vrot.slane %v18529_v2, %v19219_v54 }
0x17b9   :  { %5699 = vmatpush1.bf16.msra.mxu0 %v17762_v20  ;;  %5742 = vmatpush1.bf16.msra.mxu1 %v17765_v23  ;;  %v4846_v20 = vrot.slane %v18529_v2, %v19133_v16  ;;  %v4854_v23 = vrot.slane %v18529_v2, %v19222_v55 }
0x17ba   :  { %5700 = vmatprep.subr.bf16.mxu0 %v17770_v25  ;;  %5743 = vmatprep.subr.bf16.mxu1 %v17773_v32 }
0x17bd   :  { %5701 = vmatpush1.bf16.msra.mxu0 %v17768_v30  ;;  %5744 = vmatpush1.bf16.msra.mxu1 %v17771_v34  ;;  %v4870_v30 = vrot.slane %v4850_v51, %v19133_v16  ;;  %v4878_v34 = vrot.slane %v4858_v26, %v19133_v16 }
0x17be   :  { %5702 = vmatprep.subr.bf16.mxu0 %v17776_v37  ;;  %5745 = vmatprep.subr.bf16.mxu1 %v17779_v19  ;;  %v4866_v37 = vrot.slane %v4846_v20, %v19133_v16  ;;  %v4874_v19 = vrot.slane %v4854_v23, %v19133_v16 }
0x17c1   :  { %5703 = vmatpush1.bf16.msra.mxu0 %v17774_v38  ;;  %5746 = vmatpush1.bf16.msra.mxu1 %v17777_v39 }
0x17c2   :  { %5704 = vmatprep.subr.bf16.mxu0 %v17782_v40  ;;  %5747 = vmatprep.subr.bf16.mxu1 %v17785_v41 }
0x17c5   :  { %5705 = vmatpush1.bf16.msra.mxu0 %v17780_v42  ;;  %5748 = vmatpush1.bf16.msra.mxu1 %v17783_v43 }
0x17c6   :  { %5706 = vmatprep.subr.bf16.mxu0 %v17788_v44  ;;  %5749 = vmatprep.subr.bf16.mxu1 %v17791_v4 }
0x17c9   :  { %5707 = vmatpush2.bf16.msra.mxu0 %v17786_v47  ;;  %5750 = vmatpush2.bf16.msra.mxu1 %v17789_v56 }
0x17ca   :  { %5708 = vmatprep.subr.bf16.mxu0 %v17794_v57  ;;  %5751 = vmatprep.subr.bf16.mxu1 %v17797_v58 }
0x17cd   :  { %5709 = vmatpush2.bf16.msra.mxu0 %v17792_v61  ;;  %5752 = vmatpush2.bf16.msra.mxu1 %v17795_v36 }
0x17ce   :  { %5710 = vmatprep.subr.bf16.mxu0 %v17800_v50  ;;  %5753 = vmatprep.subr.bf16.mxu1 %v17803_v35 }
0x17d1   :  { %5711 = vmatpush2.bf16.msra.mxu0 %v17798_v45  ;;  %5754 = vmatpush2.bf16.msra.mxu1 %v17801_v3 }
0x17d2   :  { %5712 = vmatprep.subr.bf16.mxu0 %v17806_v7  ;;  %5755 = vmatprep.subr.bf16.mxu1 %v17809_v60 }
0x17d5   :  { %5713 = vmatpush2.bf16.msra.mxu0 %v17804_v59  ;;  %5756 = vmatpush2.bf16.msra.mxu1 %v17807_v11 }
0x17d6   :  { %5714 = vmatprep.subr.bf16.mxu0 %v17812_v63  ;;  %5757 = vmatprep.subr.bf16.mxu1 %v17815_v29 }
0x17d9   :  { %5715 = vmatpush2.bf16.msra.mxu0 %v17810_v31  ;;  %5758 = vmatpush2.bf16.msra.mxu1 %v17813_v10 }
0x17da   :  { %5716 = vmatprep.subr.bf16.mxu0 %v17818_v9  ;;  %5759 = vmatprep.subr.bf16.mxu1 %v17821_v21  ;;  %v19454_v9 = vld [vmem:[#allocation12 + $0x10] sm:$0xff] }
0x17db   :  { %v5365_v21 = vrot.slane %v19454_v9, %v19098_v8 }
0x17dd   :  { %5717 = vmatpush2.bf16.msra.mxu0 %v17816_v18  ;;  %5760 = vmatpush2.bf16.msra.mxu1 %v17819_v22  ;;  %v19458_v18 = vld [vmem:[#allocation12 + $0x18] sm:$0xff] }
0x17de   :  { %5718 = vmatprep.subr.bf16.mxu0 %v17824_v13  ;;  %5761 = vmatprep.subr.bf16.mxu1 %v17827_v46  ;;  %v5369_v22 = vrot.slane %v19458_v18, %v19098_v8 }
0x17e1   :  { %5719 = vmatpush2.bf16.msra.mxu0 %v17822_v24  ;;  %5762 = vmatpush2.bf16.msra.mxu1 %v17825_v33 }
0x17e2   :  { %5720 = vmatprep.subr.bf16.mxu0 %v17830_v62  ;;  %5763 = vmatprep.subr.bf16.mxu1 %v17833_v27 }
0x17e5   :  { %5721 = vmatpush2.bf16.msra.mxu0 %v17828_v28  ;;  %5764 = vmatpush2.bf16.msra.mxu1 %v17831_v1 }
0x1868   :  { %v5233_v25 = vpop.f32.mrf.mxu0  ;;  %v5276_v32 = vpop.f32.mrf.mxu1 }
0x1869   :  { %v5234_v47 = vadd.f32 %v5233_v25, %v4866_v37  ;;  %v5277_v56 = vadd.f32 %v5276_v32, %v4874_v19 }
0x186a   :  { %v5235_v38 = vpop.f32.mrf.mxu0  ;;  %v5278_v39 = vpop.f32.mrf.mxu1 }
0x186b   :  { %v5236_v42 = vadd.f32 %v5235_v38, %v4870_v30  ;;  %v5279_v43 = vadd.f32 %v5278_v39, %v4878_v34  ;;  %v5285_v59 = vmax.f32 %v5234_v47, 0.0  ;;  %v5287_v11 = vmax.f32 %v5277_v56, 0.0  ;;  %v17851_v47 = vld [vmem:[#allocation2 + $0x4ac] ss:$16 sps:$4 sm:$0xff]   ;;  %v17846_v56 = vld [vmem:[#allocation2 + $0x4a0] ss:$16 sps:$4 sm:$0xff]  }
0x186c   :  { %v5237_v40 = vpop.f32.mrf.mxu0  ;;  %v5280_v41 = vpop.f32.mrf.mxu1 }
0x186d   :  { %v5238_v44 = vadd.f32 %v5237_v40, %v4866_v37  ;;  %v5281_v4 = vadd.f32 %v5280_v41, %v4874_v19  ;;  %v5286_v45 = vmax.f32 %v5236_v42, 0.0  ;;  %v5288_v3 = vmax.f32 %v5279_v43, 0.0  ;;  %v17836_v40 = vld [vmem:[#allocation2 + $0x4e4] ss:$16 sps:$4 sm:$0xff]   ;;  %v17837_v41 = vld [vmem:[#allocation2 + $0x4e8] ss:$16 sps:$4 sm:$0xff]  }
0x186e   :  { %v5239_v57 = vpop.f32.mrf.mxu0  ;;  %v5282_v58 = vpop.f32.mrf.mxu1  ;;  %v17839_v42 = vld [vmem:[#allocation2 + $0x4ec] ss:$16 sps:$4 sm:$0xff]   ;;  %v17842_v43 = vld [vmem:[#allocation2 + $0x4c4] ss:$16 sps:$4 sm:$0xff]   ;;  %6269 = vmatprep.subr.bf16.mxu0 %v17836_v40 }
0x186f   :  { %v5240_v61 = vadd.f32 %v5239_v57, %v4870_v30  ;;  %v5283_v36 = vadd.f32 %v5282_v58, %v4878_v34  ;;  %v5289_v50 = vmax.f32 %v5238_v44, 0.0  ;;  %v5291_v35 = vmax.f32 %v5281_v4, 0.0  ;;  %v17845_v44 = vld [vmem:[#allocation2 + $0x4cc] ss:$16 sps:$4 sm:$0xff]   ;;  %6312 = vmatprep.subr.bf16.mxu1 %v17839_v42  ;;  %v17840_v4 = vld [vmem:[#allocation2 + $0x4c0] ss:$16 sps:$4 sm:$0xff]  }
0x1870   :  { %v17849_v57 = vld [vmem:[#allocation2 + $0x4a8] ss:$16 sps:$4 sm:$0xff]   ;;  %v17854_v58 = vld [vmem:[#allocation2 + $0x484] ss:$16 sps:$4 sm:$0xff]   ;;  %v17893_v40 = vld [vmem:[#allocation2 + $0x5cc] ss:$16 sps:$4 sm:$0xff]  }
0x1871   :  { %v5290_v7 = vmax.f32 %v5240_v61, 0.0  ;;  %v5292_v60 = vmax.f32 %v5283_v36, 0.0  ;;  %v5293_v31 = vpack.c.bf16 %v5289_v50, %v5285_v59  ;;  %v5295_v10 = vpack.c.bf16 %v5291_v35, %v5287_v11  ;;  %v17857_v61 = vld [vmem:[#allocation2 + $0x48c] ss:$16 sps:$4 sm:$0xff]   ;;  %v17852_v36 = vld [vmem:[#allocation2 + $0x480] ss:$16 sps:$4 sm:$0xff]  }
0x1872   :  { %v17855_v50 = vld [vmem:[#allocation2 + $0x488] ss:$16 sps:$4 sm:$0xff]   ;;  %v17860_v35 = vld [vmem:[#allocation2 + $0x464] ss:$16 sps:$4 sm:$0xff]   ;;  %v17869_v59 = vld [vmem:[#allocation2 + $0x44c] ss:$16 sps:$4 sm:$0xff]  }
0x1873   :  { %v5294_v63 = vpack.c.bf16 %v5290_v7, %v5286_v45  ;;  %v5296_v29 = vpack.c.bf16 %v5292_v60, %v5288_v3  ;;  %v17863_v45 = vld [vmem:[#allocation2 + $0x46c] ss:$16 sps:$4 sm:$0xff]   ;;  %v17858_v3 = vld [vmem:[#allocation2 + $0x460] ss:$16 sps:$4 sm:$0xff]   ;;  %v17861_v7 = vld [vmem:[#allocation2 + $0x468] ss:$16 sps:$4 sm:$0xff]  }
0x1874   :  { %v17866_v60 = vld [vmem:[#allocation2 + $0x444] ss:$16 sps:$4 sm:$0xff]   ;;  %v17864_v11 = vld [vmem:[#allocation2 + $0x440] ss:$16 sps:$4 sm:$0xff]  }
0x1875   :  { %5722 = vmatprep.mubr.bf16.mxu0 %v5294_v63  ;;  %5765 = vmatprep.mubr.bf16.mxu1 %v5296_v29  ;;  %v17867_v63 = vld [vmem:[#allocation2 + $0x448] ss:$16 sps:$4 sm:$0xff]   ;;  %v17872_v29 = vld [vmem:[#allocation2 + $0x424] ss:$16 sps:$4 sm:$0xff]  }
0x1876   :  { %5723 = vmatmul.mubr.bf16.vlgmr.msra.gmra.mxu0 %v5293_v31  ;;  %5766 = vmatmul.mubr.bf16.vlgmr.msra.gmra.mxu1 %v5295_v10  ;;  %v17875_v31 = vld [vmem:[#allocation2 + $0x42c] ss:$16 sps:$4 sm:$0xff]   ;;  %v17870_v10 = vld [vmem:[#allocation2 + $0x420] ss:$16 sps:$4 sm:$0xff]   ;;  %v17896_v42 = vld [vmem:[#allocation2 + $0x5a4] ss:$16 sps:$4 sm:$0xff]  }
0x1877   :  { %6313 = vmatpush1.bf16.msra.mxu1 %v17837_v41  ;;  %v17891_v41 = vld [vmem:[#allocation2 + $0x5c8] ss:$16 sps:$4 sm:$0xff]  }
0x1878   :  { %6314 = vmatprep.subr.bf16.mxu1 %v17845_v44  ;;  %v17899_v44 = vld [vmem:[#allocation2 + $0x5ac] ss:$16 sps:$4 sm:$0xff]  }
0x1936   :  { %v5724_v13 = vpop.f32.mrf.mxu0  ;;  %v5767_v46 = vpop.f32.mrf.mxu1 }
0x1937   :  { %v5725_v24 = vadd.f32 %v5724_v13, %v5365_v21  ;;  %v17881_v13 = vld [vmem:[#allocation2 + $0x40c] ss:$16 sps:$4 sm:$0xff]  }
0x1938   :  { %v5726_v33 = vpop.f32.mrf.mxu0  ;;  %v5769_v62 = vpop.f32.mrf.mxu1 }
0x1939   :  { %v5768_v27 = vadd.f32 %v5767_v46, %v5725_v24  ;;  %v5727_v28 = vadd.f32 %v5726_v33, %v5369_v22  ;;  %v17876_v46 = vld [vmem:[#allocation2 + $0x400] ss:$16 sps:$4 sm:$0xff]   ;;  %v17879_v24 = vld [vmem:[#allocation2 + $0x408] ss:$16 sps:$4 sm:$0xff]  }
0x193a   :  { %v5728_v1 = vpop.f32.mrf.mxu0  ;;  %v5771_v2 = vpop.f32.mrf.mxu1 }
0x193b   :  { %v5770_v51 = vadd.f32 %v5769_v62, %v5727_v28  ;;  %v5729_v26 = vadd.f32 %v5728_v1, %v5365_v21  ;;  %v19463_v23 = vadd.f32 %v5768_v27, %v19438_v15  ;;  %v17873_v21 = vld [vmem:[#allocation2 + $0x428] ss:$16 sps:$4 sm:$0xff]  }
0x193c   :  { %v5730_v20 = vpop.f32.mrf.mxu0  ;;  %v5773_v34 = vpop.f32.mrf.mxu1 }
0x193d   :  { %v19466_v25 = vadd.f32 %v5770_v51, %v19434_v14  ;;  %v5772_v32 = vadd.f32 %v5771_v2, %v5729_v26  ;;  %v5731_v30 = vadd.f32 %v5730_v20, %v5369_v22  ;;  %v17834_v14 = vld [vmem:[#allocation2 + $0x4e0] ss:$16 sps:$4 sm:$0xff]   ;;  %v17878_v22 = vld [vmem:[#allocation2 + $0x404] ss:$16 sps:$4 sm:$0xff]  }
0x193e   :  { %6270 = vmatpush1.bf16.msra.mxu0 %v17834_v14  ;;  %v17885_v14 = vld [vmem:[#allocation2 + $0x5e8] ss:$16 sps:$4 sm:$0xff]  }
0x193f   :  { %v5774_v37 = vadd.f32 %v5773_v34, %v5731_v30  ;;  %v5780_v19 = vadd.f32 %v19466_v25, %v19463_v23  ;;  %v19471_v38 = vadd.f32 %v5772_v32, %v19440_v12  ;;  %6271 = vmatprep.subr.bf16.mxu0 %v17842_v43  ;;  %v17843_v12 = vld [vmem:[#allocation2 + $0x4c8] ss:$16 sps:$4 sm:$0xff]   ;;  %v17894_v43 = vld [vmem:[#allocation2 + $0x5a0] ss:$16 sps:$4 sm:$0xff]  }
0x1940   :  { %6315 = vmatpush1.bf16.msra.mxu1 %v17843_v12  ;;  %v17902_v12 = vld [vmem:[#allocation2 + $0x584] ss:$16 sps:$4 sm:$0xff]  }
0x1941   :  { %v19474_v39 = vadd.f32 %v5774_v37, %v19436_v0  ;;  %5781 = vadd.xlane.f32.xlu0 %v5780_v19  ;;  %v17848_v0 = vld [vmem:[#allocation2 + $0x4a4] ss:$16 sps:$4 sm:$0xff]   ;;  %6316 = vmatprep.subr.bf16.mxu1 %v17851_v47  ;;  %v17882_v19 = vld [vmem:[#allocation2 + $0x5e0] ss:$16 sps:$4 sm:$0xff]   ;;  %v17905_v47 = vld [vmem:[#allocation2 + $0x58c] ss:$16 sps:$4 sm:$0xff]  }
0x1942   :  { %6272 = vmatpush1.bf16.msra.mxu0 %v17840_v4  ;;  %v17884_v37 = vld [vmem:[#allocation2 + $0x5e4] ss:$16 sps:$4 sm:$0xff]   ;;  %v17897_v4 = vld [vmem:[#allocation2 + $0x5a8] ss:$16 sps:$4 sm:$0xff]  }
0x1943   :  { %v5783_v15 = vadd.f32 %v19474_v39, %v19471_v38  ;;  %6273 = vmatprep.subr.bf16.mxu0 %v17848_v0  ;;  %v17900_v0 = vld [vmem:[#allocation2 + $0x580] ss:$16 sps:$4 sm:$0xff]  }
0x1944   :  { %6317 = vmatpush1.bf16.msra.mxu1 %v17849_v57  ;;  %v17908_v57 = vld [vmem:[#allocation2 + $0x564] ss:$16 sps:$4 sm:$0xff]  }
0x1945   :  { %5784 = vadd.xlane.f32.xlu1 %v5783_v15  ;;  %6318 = vmatprep.subr.bf16.mxu1 %v17857_v61  ;;  %v17887_v15 = vld [vmem:[#allocation2 + $0x5ec] ss:$16 sps:$4 sm:$0xff]  }
0x1946   :  { %6274 = vmatpush1.bf16.msra.mxu0 %v17846_v56  ;;  %v17903_v56 = vld [vmem:[#allocation2 + $0x588] ss:$16 sps:$4 sm:$0xff]   ;;  %v17911_v61 = vld [vmem:[#allocation2 + $0x56c] ss:$16 sps:$4 sm:$0xff]  }
0x1947   :  { %6275 = vmatprep.subr.bf16.mxu0 %v17854_v58  ;;  %v17906_v58 = vld [vmem:[#allocation2 + $0x560] ss:$16 sps:$4 sm:$0xff]  }
0x1948   :  { %6319 = vmatpush1.bf16.msra.mxu1 %v17855_v50  ;;  %v17914_v50 = vld [vmem:[#allocation2 + $0x544] ss:$16 sps:$4 sm:$0xff]  }
0x1949   :  { %6320 = vmatprep.subr.bf16.mxu1 %v17863_v45  ;;  %v17917_v45 = vld [vmem:[#allocation2 + $0x54c] ss:$16 sps:$4 sm:$0xff]  }
0x194a   :  { %6276 = vmatpush1.bf16.msra.mxu0 %v17852_v36  ;;  %v17909_v36 = vld [vmem:[#allocation2 + $0x568] ss:$16 sps:$4 sm:$0xff]  }
0x194b   :  { %6277 = vmatprep.subr.bf16.mxu0 %v17860_v35  ;;  %v17912_v35 = vld [vmem:[#allocation2 + $0x540] ss:$16 sps:$4 sm:$0xff]  }
0x194c   :  { %6321 = vmatpush1.bf16.msra.mxu1 %v17861_v7  ;;  %v17918_v7 = vld [vmem:[#allocation2 + $0x520] ss:$16 sps:$4 sm:$0xff]  }
0x194d   :  { %6322 = vmatprep.subr.bf16.mxu1 %v17869_v59  ;;  %v17921_v59 = vld [vmem:[#allocation2 + $0x528] ss:$16 sps:$4 sm:$0xff]  }
0x194e   :  { %6278 = vmatpush1.bf16.msra.mxu0 %v17858_v3  ;;  %v17915_v3 = vld [vmem:[#allocation2 + $0x548] ss:$16 sps:$4 sm:$0xff]  }
0x194f   :  { %6279 = vmatprep.subr.bf16.mxu0 %v17866_v60  ;;  %v17920_v60 = vld [vmem:[#allocation2 + $0x524] ss:$16 sps:$4 sm:$0xff]  }
0x1950   :  { %6323 = vmatpush1.bf16.msra.mxu1 %v17867_v63  ;;  %v17926_v63 = vld [vmem:[#allocation2 + $0x504] ss:$16 sps:$4 sm:$0xff]  }
0x1951   :  { %6324 = vmatprep.subr.bf16.mxu1 %v17875_v31  ;;  %v17924_v31 = vld [vmem:[#allocation2 + $0x500] ss:$16 sps:$4 sm:$0xff]  }
0x1952   :  { %6280 = vmatpush1.bf16.msra.mxu0 %v17864_v11  ;;  %v17923_v11 = vld [vmem:[#allocation2 + $0x52c] ss:$16 sps:$4 sm:$0xff]  }
0x1953   :  { %6281 = vmatprep.subr.bf16.mxu0 %v17872_v29  ;;  %v17929_v29 = vld [vmem:[#allocation2 + $0x50c] ss:$16 sps:$4 sm:$0xff]  }
0x1954   :  { %6325 = vmatpush1.bf16.msra.mxu1 %v17873_v21  ;;  %v17932_v21 = vld [vmem:[#allocation4 + $0x274] ss:$8 sps:$4 sm:$0xff]  }
0x1955   :  { %6326 = vmatprep.subr.bf16.mxu1 %v17881_v13 }
0x1956   :  { %6282 = vmatpush1.bf16.msra.mxu0 %v17870_v10  ;;  %v17927_v10 = vld [vmem:[#allocation2 + $0x508] ss:$16 sps:$4 sm:$0xff]  }
0x1957   :  { %6283 = vmatprep.subr.bf16.mxu0 %v17878_v22 }
0x1958   :  { %6327 = vmatpush1.bf16.msra.mxu1 %v17879_v24 }
0x1959   :  { %6328 = vmatprep.subr.bf16.mxu1 %v17887_v15 }
0x195a   :  { %6284 = vmatpush1.bf16.msra.mxu0 %v17876_v46 }
0x195b   :  { %6285 = vmatprep.subr.bf16.mxu0 %v17884_v37  ;;  %v5827_v37 = vrot.slane %v19454_v9, %v19093_v6 }
0x195c   :  { %6329 = vmatpush2.bf16.msra.mxu1 %v17885_v14 }
0x195d   :  { %6330 = vmatprep.subr.bf16.mxu1 %v17893_v40 }
0x195e   :  { %6286 = vmatpush2.bf16.msra.mxu0 %v17882_v19 }
0x1960   :  { %6331 = vmatpush2.bf16.msra.mxu1 %v17891_v41 }
0x1961   :  { %6332 = vmatprep.subr.bf16.mxu1 %v17899_v44  ;;  %v18535_v44 = vld [vmem:[%s19995_s1 + $0x10] sm:$0xff] }
0x1964   :  { %6333 = vmatpush2.bf16.msra.mxu1 %v17897_v4 }
0x1965   :  { %6334 = vmatprep.subr.bf16.mxu1 %v17905_v47 }
0x1968   :  { %6335 = vmatpush2.bf16.msra.mxu1 %v17903_v56  ;;  %v17935_v56 = vld [vmem:[#allocation4 + $0x264] ss:$8 sps:$4 sm:$0xff]  }
0x1969   :  { %6336 = vmatprep.subr.bf16.mxu1 %v17911_v61  ;;  %v17938_v61 = vld [vmem:[#allocation4 + $0x254] ss:$8 sps:$4 sm:$0xff]  }
0x196c   :  { %6337 = vmatpush2.bf16.msra.mxu1 %v17909_v36  ;;  %v17936_v36 = vld [vmem:[#allocation4 + $0x250] ss:$8 sps:$4 sm:$0xff]  }
0x196d   :  { %6338 = vmatprep.subr.bf16.mxu1 %v17917_v45  ;;  %v17944_v45 = vld [vmem:[#allocation4 + $0x234] ss:$8 sps:$4 sm:$0xff]  }
0x1970   :  { %6339 = vmatpush2.bf16.msra.mxu1 %v17915_v3  ;;  %v17942_v3 = vld [vmem:[#allocation4 + $0x230] ss:$8 sps:$4 sm:$0xff]  }
0x1971   :  { %6340 = vmatprep.subr.bf16.mxu1 %v17923_v11  ;;  %v17948_v11 = vld [vmem:[#allocation4 + $0x210] ss:$8 sps:$4 sm:$0xff]  }
0x1974   :  { %6341 = vmatpush2.bf16.msra.mxu1 %v17921_v59  ;;  %v17950_v59 = vld [vmem:[#allocation4 + $0x214] ss:$8 sps:$4 sm:$0xff]  }
0x1975   :  { %6342 = vmatprep.subr.bf16.mxu1 %v17929_v29  ;;  %v17951_v29 = vld [vmem:[#allocation4 + $0x200] ss:$8 sps:$4 sm:$0xff]  }
0x1978   :  { %6343 = vmatpush2.bf16.msra.mxu1 %v17927_v10  ;;  %v17954_v10 = vld [vmem:[#allocation4 + $0x2f0] ss:$8 sps:$4 sm:$0xff]  }
0x1979   :  { %17002 = vmatprep.subr.mxu1 %v18834_v48 }
0x19ca   :  { %v5782_v33 = vpop.xlane.xlu0 %5781 }
0x19cb   :  { %v5786_v62 = vmul.f32 0.00390625, %v5782_v33 }
0x19cd   :  { %v19479_v27 = vsub.f32 %v19463_v23, %v5786_v62  ;;  %v19482_v28 = vsub.f32 %v19466_v25, %v5786_v62 }
0x19ce   :  { %v5785_v1 = vpop.xlane.xlu1 %5784 }
0x19cf   :  { %v5787_v2 = vmul.f32 0.00390625, %v5785_v1  ;;  %v5792_v51 = vmul.f32 %v19479_v27, %v19479_v27  ;;  %v5793_v26 = vmul.f32 %v19482_v28, %v19482_v28  ;;  %v5819_v1 = vrot.slane %v19458_v18, %v19222_v55 }
0x19d1   :  { %v19489_v20 = vsub.f32 %v19471_v38, %v5787_v2  ;;  %v19492_v32 = vsub.f32 %v19474_v39, %v5787_v2  ;;  %v5796_v30 = vadd.f32 %v5793_v26, %v5792_v51  ;;  %v17890_v38 = vld [vmem:[#allocation2 + $0x5c4] ss:$16 sps:$4 sm:$0xff]   ;;  %v17888_v39 = vld [vmem:[#allocation2 + $0x5c0] ss:$16 sps:$4 sm:$0xff]   ;;  %v5815_v2 = vrot.slane %v19454_v9, %v19222_v55 }
0x19d2   :  { %6287 = vmatprep.subr.bf16.mxu0 %v17890_v38 }
0x19d3   :  { %5797 = vadd.xlane.f32.xlu0 %v5796_v30  ;;  %v5794_v23 = vmul.f32 %v19489_v20, %v19489_v20  ;;  %v5795_v25 = vmul.f32 %v19492_v32, %v19492_v32  ;;  %6288 = vmatpush2.bf16.msra.mxu0 %v17888_v39 }
0x19d4   :  { %6289 = vmatprep.subr.bf16.mxu0 %v17896_v42  ;;  %v18534_v42 = vld [vmem:[%s19995_s1] sm:$0xff] }
0x19d5   :  { %v5799_v34 = vadd.f32 %v5795_v25, %v5794_v23  ;;  %v5831_v25 = vrot.slane %v19458_v18, %v19093_v6  ;;  %v18532_v18 = vld [vmem:[%s19995_s1 + $0x8] sm:$0xff] }
0x19d7   :  { %5800 = vadd.xlane.f32.xlu1 %v5799_v34  ;;  %6290 = vmatpush2.bf16.msra.mxu0 %v17894_v43 }
0x19d8   :  { %6291 = vmatprep.subr.bf16.mxu0 %v17902_v12 }
0x19db   :  { %6292 = vmatpush2.bf16.msra.mxu0 %v17900_v0  ;;  %v17930_v0 = vld [vmem:[#allocation4 + $0x270] ss:$8 sps:$4 sm:$0xff]  }
0x19dc   :  { %6293 = vmatprep.subr.bf16.mxu0 %v17908_v57 }
0x19df   :  { %6294 = vmatpush2.bf16.msra.mxu0 %v17906_v58  ;;  %v17933_v58 = vld [vmem:[#allocation4 + $0x260] ss:$8 sps:$4 sm:$0xff]  }
0x19e0   :  { %6295 = vmatprep.subr.bf16.mxu0 %v17914_v50  ;;  %v17941_v50 = vld [vmem:[#allocation4 + $0x244] ss:$8 sps:$4 sm:$0xff]  }
0x19e3   :  { %6296 = vmatpush2.bf16.msra.mxu0 %v17912_v35  ;;  %v17939_v35 = vld [vmem:[#allocation4 + $0x240] ss:$8 sps:$4 sm:$0xff]  }
0x19e4   :  { %6297 = vmatprep.subr.bf16.mxu0 %v17920_v60  ;;  %v17945_v60 = vld [vmem:[#allocation4 + $0x220] ss:$8 sps:$4 sm:$0xff]  }
0x19e7   :  { %6298 = vmatpush2.bf16.msra.mxu0 %v17918_v7  ;;  %v17947_v7 = vld [vmem:[#allocation4 + $0x224] ss:$8 sps:$4 sm:$0xff]  }
0x19e8   :  { %6299 = vmatprep.subr.bf16.mxu0 %v17926_v63  ;;  %v17953_v63 = vld [vmem:[#allocation4 + $0x204] ss:$8 sps:$4 sm:$0xff]  }
0x19eb   :  { %6300 = vmatpush2.bf16.msra.mxu0 %v17924_v31  ;;  %v17956_v31 = vld [vmem:[#allocation4 + $0x2f4] ss:$8 sps:$4 sm:$0xff]  }
0x19ec   :  { %6558 = vmatprep.subr.bf16.mxu0 %v17932_v21  ;;  %v17959_v21 = vld [vmem:[#allocation4 + $0x2e4] ss:$8 sps:$4 sm:$0xff]  }
0x1a5c   :  { %v5798_v22 = vpop.xlane.xlu0 %5797 }
0x1a5d   :  { %v5802_v13 = vmul.f32 0.00390625, %v5798_v22  ;;  %v17957_v22 = vld [vmem:[#allocation4 + $0x2e0] ss:$8 sps:$4 sm:$0xff]  }
0x1a5f   :  { %v5804_v46 = vadd.f32 1e-05, %v5802_v13  ;;  %v17962_v13 = vld [vmem:[#allocation4 + $0x2d4] ss:$8 sps:$4 sm:$0xff]  }
0x1a60   :  { %v5801_v24 = vpop.xlane.xlu1 %5800 }
0x1a61   :  { %18470 = vrsqrt.f32 %v5804_v46  ;;  %v5803_v33 = vmul.f32 0.00390625, %v5801_v24  ;;  %v17960_v46 = vld [vmem:[#allocation4 + $0x2d0] ss:$8 sps:$4 sm:$0xff]   ;;  %v17965_v24 = vld [vmem:[#allocation4 + $0x2c4] ss:$8 sps:$4 sm:$0xff]  }
0x1a63   :  { %v5805_v62 = vadd.f32 1e-05, %v5803_v33  ;;  %v17963_v33 = vld [vmem:[#allocation4 + $0x2c0] ss:$8 sps:$4 sm:$0xff]  }
0x1a65   :  { %18472 = vrsqrt.f32 %v5805_v62  ;;  %v17968_v62 = vld [vmem:[#allocation4 + $0x2b4] ss:$8 sps:$4 sm:$0xff]  }
0x1a6e   :  { %v18471_v51 = vpop.eup %18470 }
0x1a6f   :  { %v5808_v26 = vmul.f32 %v18471_v51, %v19479_v27  ;;  %v5809_v30 = vmul.f32 %v18471_v51, %v19482_v28  ;;  %v17969_v51 = vld [vmem:[#allocation4 + $0x2a0] ss:$8 sps:$4 sm:$0xff]  }
0x1a71   :  { %v5821_v23 = vmul.f32 %v5819_v1, %v5809_v30  ;;  %v5820_v34 = vmul.f32 %v5815_v2, %v5808_v26  ;;  %v17974_v26 = vld [vmem:[#allocation4 + $0x294] ss:$8 sps:$4 sm:$0xff]   ;;  %v17972_v30 = vld [vmem:[#allocation4 + $0x290] ss:$8 sps:$4 sm:$0xff]  }
0x1a72   :  { %v18473_v19 = vpop.eup %18472 }
0x1a73   :  { %v5810_v15 = vmul.f32 %v18473_v19, %v19489_v20  ;;  %v5811_v14 = vmul.f32 %v18473_v19, %v19492_v32  ;;  %v19511_v39 = vadd.f32 %v5831_v25, %v5821_v23  ;;  %v19513_v27 = vadd.f32 %v5827_v37, %v5820_v34  ;;  %v18533_v20 = vld [vmem:[%s19995_s1 + $0x18] sm:$0xff]  ;;  %v17977_v23 = vld [vmem:[#allocation4 + $0x284] ss:$8 sps:$4 sm:$0xff]  }
0x1a75   :  { %v5823_v38 = vmul.f32 %v5819_v1, %v5811_v14  ;;  %v5822_v40 = vmul.f32 %v5815_v2, %v5810_v15  ;;  %v5842_v9 = vadd.f32 %v18532_v18, %v19511_v39  ;;  %v5841_v43 = vadd.f32 %v18534_v42, %v19513_v27  ;;  %v17966_v1 = vld [vmem:[#allocation4 + $0x2b0] ss:$8 sps:$4 sm:$0xff]   ;;  %v17971_v2 = vld [vmem:[#allocation4 + $0x2a4] ss:$8 sps:$4 sm:$0xff]  }
0x1a77   :  { %v19515_v28 = vadd.f32 %v5831_v25, %v5823_v38  ;;  %v19517_v41 = vadd.f32 %v5827_v37, %v5822_v40  ;;  %v17975_v25 = vld [vmem:[#allocation4 + $0x280] ss:$8 sps:$4 sm:$0xff]   ;;  %v5837_v37 = vld [vmem:[#allocation10 + $0x10] sm:$0xff] }
0x1a78   :  { %v5924_v19 = vrot.slane %v5837_v37, %v19046_v52  ;;  %v5928_v15 = vrot.slane %v5837_v37, %v19093_v6  ;;  %v5916_v14 = vrot.slane %v5837_v37, %v19049_v53  ;;  %v5920_v40 = vrot.slane %v5837_v37, %v19098_v8 }
0x1a79   :  { %v5844_v32 = vadd.f32 %v18533_v20, %v19515_v28  ;;  %v5843_v4 = vadd.f32 %v18535_v44, %v19517_v41  ;;  %v6356_v57 = vpack.c.bf16 %v19515_v28, %v19511_v39  ;;  %v6355_v34 = vpack.c.bf16 %v19517_v41, %v19513_v27 }
0x1a7a   :  { %v5944_v38 = vrot.slane %v5924_v19, %v19049_v53  ;;  %v19550_v18 = vrot.slane %v5928_v15, %v19049_v53 }
0x1a7b   :  { %v5846_v12 = vpack.c.bf16 %v5844_v32, %v5842_v9  ;;  %v5845_v47 = vpack.c.bf16 %v5843_v4, %v5841_v43  ;;  %v5936_v9 = vrot.slane %v5916_v14, %v19049_v53  ;;  %v5940_v43 = vrot.slane %v5920_v40, %v19049_v53 }
0x1a7d   :  { %6301 = vmatprep.mubr.bf16.mxu0 %v5846_v12  ;;  %6344 = vmatprep.mubr.bf16.mxu1 %v5846_v12 }
0x1a7e   :  { %6302 = vmatmul.mubr.bf16.vlgmr.msra.gmra.mxu0 %v5845_v47  ;;  %6345 = vmatmul.mubr.bf16.vlgmr.msra.gmra.mxu1 %v5845_v47 }
0x1a7f   :  { %6559 = vmatpush1.bf16.msra.mxu0 %v17930_v0  ;;  %6590 = vmatprep.mubr.bf16.mxu0 %v6356_v57 }
0x1a80   :  { %6560 = vmatprep.subr.bf16.mxu0 %v17935_v56  ;;  %17004 = vmatprep.mubr.msk.f32.mxu1 %vm18835_vm0, %v18834_v48 }
0x1a83   :  { %6561 = vmatpush1.bf16.msra.mxu0 %v17933_v58 }
0x1a84   :  { %6562 = vmatprep.subr.bf16.mxu0 %v17938_v61 }
0x1a87   :  { %6563 = vmatpush1.bf16.msra.mxu0 %v17936_v36 }
0x1a88   :  { %6564 = vmatprep.subr.bf16.mxu0 %v17941_v50 }
0x1a8b   :  { %6565 = vmatpush1.bf16.msra.mxu0 %v17939_v35  ;;  %v19565_v35 = vld [vmem:[#allocation12 + $0x20] sm:$0xff] }
0x1a8c   :  { %6566 = vmatprep.subr.bf16.mxu0 %v17944_v45  ;;  %v19567_v45 = vld [vmem:[#allocation12 + $0x28] sm:$0xff] }
0x1a8f   :  { %6567 = vmatpush1.bf16.msra.mxu0 %v17942_v3  ;;  %v6393_v3 = vrot.slane %v19565_v35, %v19049_v53 }
0x1a90   :  { %6568 = vmatprep.subr.bf16.mxu0 %v17947_v7  ;;  %v6397_v7 = vrot.slane %v19567_v45, %v19049_v53 }
0x1a93   :  { %6569 = vmatpush1.bf16.msra.mxu0 %v17945_v60 }
0x1a94   :  { %6570 = vmatprep.subr.bf16.mxu0 %v17950_v59 }
0x1a97   :  { %6571 = vmatpush1.bf16.msra.mxu0 %v17948_v11 }
0x1a98   :  { %6572 = vmatprep.subr.bf16.mxu0 %v17953_v63 }
0x1a9b   :  { %6573 = vmatpush1.bf16.msra.mxu0 %v17951_v29 }
0x1a9c   :  { %6574 = vmatprep.subr.bf16.mxu0 %v17956_v31 }
0x1a9f   :  { %6575 = vmatpush2.bf16.msra.mxu0 %v17954_v10 }
0x1aa0   :  { %6576 = vmatprep.subr.bf16.mxu0 %v17959_v21 }
0x1aa3   :  { %6577 = vmatpush2.bf16.msra.mxu0 %v17957_v22 }
0x1aa4   :  { %6578 = vmatprep.subr.bf16.mxu0 %v17962_v13 }
0x1aa7   :  { %6579 = vmatpush2.bf16.msra.mxu0 %v17960_v46 }
0x1aa8   :  { %6580 = vmatprep.subr.bf16.mxu0 %v17965_v24 }
0x1aab   :  { %6581 = vmatpush2.bf16.msra.mxu0 %v17963_v33 }
0x1aac   :  { %6582 = vmatprep.subr.bf16.mxu0 %v17968_v62 }
0x1aaf   :  { %6583 = vmatpush2.bf16.msra.mxu0 %v17966_v1 }
0x1ab0   :  { %6584 = vmatprep.subr.bf16.mxu0 %v17971_v2 }
0x1ab3   :  { %6585 = vmatpush2.bf16.msra.mxu0 %v17969_v51 }
0x1ab4   :  { %6586 = vmatprep.subr.bf16.mxu0 %v17974_v26 }
0x1ab7   :  { %6587 = vmatpush2.bf16.msra.mxu0 %v17972_v30 }
0x1ab8   :  { %6588 = vmatprep.subr.bf16.mxu0 %v17977_v23 }
0x1abb   :  { %6589 = vmatpush2.bf16.msra.mxu0 %v17975_v25 }
0x1abc   :  { %17022 = vmatprep.subr.mxu0 %v18834_v48 }
0x1abe   :  { %6591 = vmatmul.mubr.bf16.vlgmr.msra.gmra.mxu0 %v6355_v34 }
0x1abf   :  { %17024 = vmatprep.mubr.msk.f32.mxu0 %vm18835_vm0, %v18834_v48 }
0x1b3e   :  { %v6303_v20 = vpop.f32.mrf.mxu0  ;;  %v6346_v32 = vpop.f32.mrf.mxu1 }
0x1b3f   :  { %v6347_v42 = vadd.f32 %v6346_v32, %v5944_v38  ;;  %v6304_v0 = vadd.f32 %v6303_v20, %v5936_v9 }
0x1b40   :  { %v6305_v44 = vpop.f32.mrf.mxu0  ;;  %v6348_v4 = vpop.f32.mrf.mxu1 }
0x1b41   :  { %v6349_v12 = vadd.f32 %v6348_v4, %v19550_v18  ;;  %17003 = vmatpush3.xpose.msra.mxu1 %v6347_v42  ;;  %v6306_v61 = vadd.f32 %v6305_v44, %v5940_v43 }
0x1b42   :  { %v6307_v47 = vpop.f32.mrf.mxu0  ;;  %v6350_v56 = vpop.f32.mrf.mxu1  ;;  %17007 = vmatprep.subr.mxu1 %v18834_v48 }
0x1b43   :  { %v19556_v57 = vadd.f32 %v6307_v47, %v5936_v9  ;;  %v6351_v58 = vadd.f32 %v6350_v56, %v5944_v38  ;;  %17023 = vmatpush3.xpose.msra.mxu0 %v6349_v12 }
0x1b44   :  { %v6309_v36 = vpop.f32.mrf.mxu0  ;;  %17005 = vmatmul.mubr.f32.vlgmr.msra.gmra.mxu1 %v6304_v0  ;;  %17027 = vmatprep.subr.mxu0 %v18834_v48  ;;  %v6352_v10 = vpop.f32.mrf.mxu1 }
0x1b45   :  { %v19559_v50 = vadd.f32 %v6309_v36, %v5940_v43  ;;  %17009 = vmatprep.mubr.msk.f32.mxu1 %vm18835_vm0, %v18834_v48  ;;  %v6353_v43 = vadd.f32 %v6352_v10, %v19550_v18 }
0x1b46   :  { %17025 = vmatmul.mubr.f32.vlgmr.msra.gmra.mxu0 %v6306_v61 }
0x1b47   :  { %17029 = vmatprep.mubr.msk.f32.mxu0 %vm18835_vm0, %v18834_v48 }
0x1b7e   :  { %v6592_v60 = vpop.f32.mrf.mxu0 }
0x1b7f   :  { %v6593_v59 = vadd.f32 %v6592_v60, %v6393_v3 }
0x1b80   :  { %v6594_v11 = vpop.f32.mrf.mxu0 }
0x1b81   :  { %v6595_v63 = vadd.f32 %v6594_v11, %v6397_v7  ;;  %17008 = vmatpush3.msra.mxu1 %v6593_v59 }
0x1b82   :  { %v6596_v29 = vpop.f32.mrf.mxu0  ;;  %17012 = vmatprep.subr.mxu1 %v18834_v48 }
0x1b83   :  { %v6597_v31 = vadd.f32 %v6596_v29, %v6393_v3  ;;  %17028 = vmatpush3.msra.mxu0 %v6595_v63 }
0x1b84   :  { %17032 = vmatprep.subr.mxu0 %v18834_v48  ;;  %v6598_v21 = vpop.f32.mrf.mxu0 }
0x1b85   :  { %v6599_v44 = vadd.f32 %v6598_v21, %v6397_v7 }
0x1c04   :  { %v6667_v22 = vpop.f32.mrf.mxu1 }
0x1c05   :  { %v6671_v13 = vmul.f32 0.088388346, %v6667_v22  ;;  %v17980_v22 = vld [vmem:[#allocation6 + $0x274] ss:$8 sps:$4 sm:$0xff]  }
0x1c06   :  { %v17006_v46 = vpop.f32.mrf.mxu1  ;;  %v7130_v24 = vpop.f32.mrf.mxu0 }
0x1c07   :  { %v7134_v33 = vmul.f32 0.088388346, %v7130_v24  ;;  %v6672_v62 = vsel %vm1069_vm1, %v6671_v13, -inf }
0x1c08   :  { %v17026_v1 = vpop.f32.mrf.mxu0  ;;  %6673 = vmax.xlane.f32.xlu0 %v6672_v62 }
0x1c09   :  { %v7135_v2 = vsel %vm1069_vm1, %v7134_v33, -inf  ;;  %v17983_v1 = vld [vmem:[#allocation6 + $0x264] ss:$8 sps:$4 sm:$0xff]  }
0x1c0a   :  { %7136 = vmax.xlane.f32.xlu1 %v7135_v2 }
0x1c91   :  { %v6674_v51 = vpop.xlane.xlu0 %6673 }
0x1c92   :  { %v6675_v26 = vsub.f32 %v6671_v13, %v6674_v51 }
0x1c93   :  { %v7137_v30 = vpop.xlane.xlu1 %7136 }
0x1c94   :  { %v6676_v23 = vmul.f32 1.442695, %v6675_v26  ;;  %v7138_v25 = vsub.f32 %v7134_v33, %v7137_v30  ;;  %v17978_v33 = vld [vmem:[#allocation6 + $0x270] ss:$8 sps:$4 sm:$0xff]   ;;  %v17981_v26 = vld [vmem:[#allocation6 + $0x260] ss:$8 sps:$4 sm:$0xff]  }
0x1c95   :  { %v17986_v30 = vld [vmem:[#allocation6 + $0x254] ss:$8 sps:$4 sm:$0xff]  }
0x1c96   :  { %18474 = vpow2.f32 %v6676_v23  ;;  %v7139_v34 = vmul.f32 1.442695, %v7138_v25  ;;  %v17984_v23 = vld [vmem:[#allocation6 + $0x250] ss:$8 sps:$4 sm:$0xff]   ;;  %v17989_v25 = vld [vmem:[#allocation6 + $0x244] ss:$8 sps:$4 sm:$0xff]  }
0x1c98   :  { %18476 = vpow2.f32 %v7139_v34  ;;  %v17987_v34 = vld [vmem:[#allocation6 + $0x240] ss:$8 sps:$4 sm:$0xff]  }
0x1ca3   :  { %v18475_v37 = vpop.eup %18474 }
0x1ca4   :  { %v6678_v19 = vsel %vm1069_vm1, %v18475_v37, 0.0 }
0x1ca5   :  { %v18477_v15 = vpop.eup %18476  ;;  %6679 = vadd.xlane.f32.xlu0 %v6678_v19  ;;  %v17990_v19 = vld [vmem:[#allocation6 + $0x230] ss:$8 sps:$4 sm:$0xff]  }
0x1ca6   :  { %v7141_v14 = vsel %vm1069_vm1, %v18477_v15, 0.0 }
0x1ca7   :  { %7142 = vadd.xlane.f32.xlu1 %v7141_v14  ;;  %v17993_v14 = vld [vmem:[#allocation6 + $0x220] ss:$8 sps:$4 sm:$0xff]  }
0x1d2e   :  { %v6680_v38 = vpop.xlane.xlu0 %6679 }
0x1d2f   :  { %18478 = vrcp.f32 %v6680_v38  ;;  %v17998_v38 = vld [vmem:[#allocation6 + $0x214] ss:$8 sps:$4 sm:$0xff]  }
0x1d30   :  { %v7143_v40 = vpop.xlane.xlu1 %7142 }
0x1d31   :  { %18480 = vrcp.f32 %v7143_v40  ;;  %v17996_v40 = vld [vmem:[#allocation6 + $0x210] ss:$8 sps:$4 sm:$0xff]  }
0x1d3c   :  { %v18479_v9 = vpop.eup %18478 }
0x1d3d   :  { %v6682_v20 = vmul.f32 %v18479_v9, %v18475_v37  ;;  %v17992_v37 = vld [vmem:[#allocation6 + $0x234] ss:$8 sps:$4 sm:$0xff]   ;;  %v18001_v9 = vld [vmem:[#allocation6 + $0x204] ss:$8 sps:$4 sm:$0xff]  }
0x1d3e   :  { %v18481_v32 = vpop.eup %18480 }
0x1d3f   :  { %17010 = vmatmul.mubr.msk.f32.vlgmr.msra.gmra.mxu1 %vm1069_vm1, %v6682_v20  ;;  %v7145_v42 = vmul.f32 %v18481_v32, %v18477_v15  ;;  %v17995_v15 = vld [vmem:[#allocation6 + $0x224] ss:$8 sps:$4 sm:$0xff]   ;;  %v17999_v20 = vld [vmem:[#allocation6 + $0x200] ss:$8 sps:$4 sm:$0xff]   ;;  %v18004_v32 = vld [vmem:[#allocation6 + $0x2f4] ss:$8 sps:$4 sm:$0xff]  }
0x1d40   :  { %17013 = vmatpush3.xpose.msra.mxu1 %v6351_v58  ;;  %17014 = vmatprep.mubr.msk.f32.mxu1 %vm18835_vm0, %v18834_v48 }
0x1d41   :  { %17030 = vmatmul.mubr.msk.f32.vlgmr.msra.gmra.mxu0 %vm1069_vm1, %v7145_v42  ;;  %17017 = vmatprep.subr.mxu1 %v18834_v48 }
0x1d42   :  { %17033 = vmatpush3.xpose.msra.mxu0 %v6353_v43  ;;  %17034 = vmatprep.mubr.msk.f32.mxu0 %vm18835_vm0, %v18834_v48  ;;  %v18002_v43 = vld [vmem:[#allocation6 + $0x2f0] ss:$8 sps:$4 sm:$0xff]  }
0x1d43   :  { %17015 = vmatmul.mubr.f32.vlgmr.msra.gmra.mxu1 %v19556_v57  ;;  %17037 = vmatprep.subr.mxu0 %v18834_v48 }
0x1d44   :  { %17018 = vmatpush3.msra.mxu1 %v6597_v31  ;;  %17019 = vmatprep.mubr.msk.f32.mxu1 %vm18835_vm0, %v18834_v48 }
0x1d45   :  { %17035 = vmatmul.mubr.f32.vlgmr.msra.gmra.mxu0 %v19559_v50  ;;  %7009 = vmatprep.subr.bf16.mxu1 %v17980_v22  ;;  %v7059_v22 = vrot.slane %v19567_v45, %v19133_v16 }
0x1d46   :  { %17038 = vmatpush3.msra.mxu0 %v6599_v44  ;;  %17039 = vmatprep.mubr.msk.f32.mxu0 %vm18835_vm0, %v18834_v48 }
0x1dff   :  { %v19594_v18 = vpop.f32.mrf.mxu1 }
0x1e01   :  { %v17011_v4 = vpop.f32.mrf.mxu1  ;;  %v19596_v12 = vpop.f32.mrf.mxu0 }
0x1e02   :  { %v18007_v4 = vld [vmem:[#allocation6 + $0x2e4] ss:$8 sps:$4 sm:$0xff]  }
0x1e03   :  { %v6822_v0 = vpop.f32.mrf.mxu1  ;;  %v17031_v47 = vpop.f32.mrf.mxu0 }
0x1e04   :  { %v6826_v56 = vmul.f32 0.088388346, %v6822_v0 }
0x1e05   :  { %v17016_v57 = vpop.f32.mrf.mxu1  ;;  %v7285_v58 = vpop.f32.mrf.mxu0 }
0x1e06   :  { %v7289_v61 = vmul.f32 0.088388346, %v7285_v58  ;;  %v6827_v36 = vsel %vm1069_vm1, %v6826_v56, -inf  ;;  %v18005_v57 = vld [vmem:[#allocation6 + $0x2e0] ss:$8 sps:$4 sm:$0xff]  }
0x1e07   :  { %v17036_v3 = vpop.f32.mrf.mxu0  ;;  %6828 = vmax.xlane.f32.xlu0 %v6827_v36  ;;  %v18010_v58 = vld [vmem:[#allocation6 + $0x2d4] ss:$8 sps:$4 sm:$0xff]   ;;  %v18013_v36 = vld [vmem:[#allocation6 + $0x2c4] ss:$8 sps:$4 sm:$0xff]  }
0x1e08   :  { %v7290_v50 = vsel %vm1069_vm1, %v7289_v61, -inf  ;;  %v18011_v3 = vld [vmem:[#allocation6 + $0x2c0] ss:$8 sps:$4 sm:$0xff]  }
0x1e09   :  { %7291 = vmax.xlane.f32.xlu1 %v7290_v50  ;;  %v18016_v50 = vld [vmem:[#allocation6 + $0x2b4] ss:$8 sps:$4 sm:$0xff]  }
0x1e90   :  { %v6829_v7 = vpop.xlane.xlu0 %6828 }
0x1e91   :  { %v6830_v48 = vsub.f32 %v6826_v56, %v6829_v7  ;;  %v18019_v7 = vld [vmem:[#allocation6 + $0x2a4] ss:$8 sps:$4 sm:$0xff]  }
0x1e92   :  { %v7292_v60 = vpop.xlane.xlu1 %7291 }
0x1e93   :  { %v6831_v59 = vmul.f32 1.442695, %v6830_v48  ;;  %v7293_v11 = vsub.f32 %v7289_v61, %v7292_v60  ;;  %v18008_v61 = vld [vmem:[#allocation6 + $0x2d0] ss:$8 sps:$4 sm:$0xff]   ;;  %v18017_v48 = vld [vmem:[#allocation6 + $0x2a0] ss:$8 sps:$4 sm:$0xff]  }
0x1e94   :  { %v18022_v60 = vld [vmem:[#allocation6 + $0x294] ss:$8 sps:$4 sm:$0xff]  }
0x1e95   :  { %18482 = vpow2.f32 %v6831_v59  ;;  %v7294_v63 = vmul.f32 1.442695, %v7293_v11  ;;  %v18025_v59 = vld [vmem:[#allocation6 + $0x284] ss:$8 sps:$4 sm:$0xff]   ;;  %v18023_v11 = vld [vmem:[#allocation6 + $0x280] ss:$8 sps:$4 sm:$0xff]  }
0x1e97   :  { %18484 = vpow2.f32 %v7294_v63 }
0x1ea2   :  { %v18483_v29 = vpop.eup %18482 }
0x1ea3   :  { %v6833_v31 = vsel %vm1069_vm1, %v18483_v29, 0.0 }
0x1ea4   :  { %v18485_v10 = vpop.eup %18484  ;;  %6834 = vadd.xlane.f32.xlu0 %v6833_v31 }
0x1ea5   :  { %v7296_v21 = vsel %vm1069_vm1, %v18485_v10, 0.0 }
0x1ea6   :  { %7297 = vadd.xlane.f32.xlu1 %v7296_v21  ;;  %v7055_v21 = vrot.slane %v19565_v35, %v19133_v16 }
0x1f2d   :  { %v6835_v13 = vpop.xlane.xlu0 %6834 }
0x1f2e   :  { %18486 = vrcp.f32 %v6835_v13 }
0x1f2f   :  { %v7298_v46 = vpop.xlane.xlu1 %7297 }
0x1f30   :  { %18488 = vrcp.f32 %v7298_v46 }
0x1f3b   :  { %v18487_v24 = vpop.eup %18486 }
0x1f3c   :  { %v6837_v62 = vmul.f32 %v18487_v24, %v18483_v29 }
0x1f3d   :  { %v18489_v2 = vpop.eup %18488 }
0x1f3e   :  { %17020 = vmatmul.mubr.msk.f32.vlgmr.msra.gmra.mxu1 %vm1069_vm1, %v6837_v62  ;;  %v7300_v51 = vmul.f32 %v18489_v2, %v18485_v10 }
0x1f3f   :  { %7010 = vmatpush1.bf16.msra.mxu1 %v17978_v33  ;;  %7041 = vmatprep.mubr.bf16.mxu1 %v18836_v5 }
0x1f40   :  { %17040 = vmatmul.mubr.msk.f32.vlgmr.msra.gmra.mxu0 %vm1069_vm1, %v7300_v51  ;;  %7011 = vmatprep.subr.bf16.mxu1 %v17983_v1 }
0x1f43   :  { %7012 = vmatpush1.bf16.msra.mxu1 %v17981_v26 }
0x1f44   :  { %7013 = vmatprep.subr.bf16.mxu1 %v17986_v30 }
0x1f47   :  { %7014 = vmatpush1.bf16.msra.mxu1 %v17984_v23 }
0x1f48   :  { %7015 = vmatprep.subr.bf16.mxu1 %v17989_v25 }
0x1f4b   :  { %7016 = vmatpush1.bf16.msra.mxu1 %v17987_v34 }
0x1f4c   :  { %7017 = vmatprep.subr.bf16.mxu1 %v17992_v37 }
0x1f4f   :  { %7018 = vmatpush1.bf16.msra.mxu1 %v17990_v19 }
0x1f50   :  { %7019 = vmatprep.subr.bf16.mxu1 %v17995_v15 }
0x1f53   :  { %7020 = vmatpush1.bf16.msra.mxu1 %v17993_v14 }
0x1f54   :  { %7021 = vmatprep.subr.bf16.mxu1 %v17998_v38  ;;  %v18026_v38 = vld [vmem:[#allocation7 + $0x4e0] ss:$16 sps:$4 sm:$0xff]  }
0x1f57   :  { %7022 = vmatpush1.bf16.msra.mxu1 %v17996_v40  ;;  %v18029_v40 = vld [vmem:[#allocation7 + $0x4e8] ss:$16 sps:$4 sm:$0xff]  }
0x1f58   :  { %7023 = vmatprep.subr.bf16.mxu1 %v18001_v9  ;;  %v18031_v9 = vld [vmem:[#allocation7 + $0x4ec] ss:$16 sps:$4 sm:$0xff]  }
0x1f5b   :  { %7024 = vmatpush1.bf16.msra.mxu1 %v17999_v20  ;;  %v18034_v20 = vld [vmem:[#allocation7 + $0x4c4] ss:$16 sps:$4 sm:$0xff]  }
0x1f5c   :  { %7471 = vmatprep.subr.bf16.mxu1 %v18004_v32  ;;  %v18037_v32 = vld [vmem:[#allocation7 + $0x4cc] ss:$16 sps:$4 sm:$0xff]  }
0x1ffe   :  { %v6907_v42 = vpop.f32.mrf.mxu1 }
0x1fff   :  { %v6911_v44 = vpack.c.bf16 %v6907_v42, %v19594_v18  ;;  %v18014_v18 = vld [vmem:[#allocation6 + $0x2b0] ss:$8 sps:$4 sm:$0xff]  }
0x2000   :  { %v17021_v0 = vpop.f32.mrf.mxu1  ;;  %v7370_v47 = vpop.f32.mrf.mxu0  ;;  %v18032_v42 = vld [vmem:[#allocation7 + $0x4c0] ss:$16 sps:$4 sm:$0xff]  }
0x2001   :  { %7042 = vmatmul.mubr.bf16.vlgmr.msra.gmra.mxu1 %v6911_v44  ;;  %v7374_v63 = vpack.c.bf16 %v7370_v47, %v19596_v12  ;;  %v18038_v44 = vld [vmem:[#allocation7 + $0x4a0] ss:$16 sps:$4 sm:$0xff]   ;;  %v18046_v0 = vld [vmem:[#allocation7 + $0x484] ss:$16 sps:$4 sm:$0xff]   ;;  %v18049_v47 = vld [vmem:[#allocation7 + $0x48c] ss:$16 sps:$4 sm:$0xff]  }
0x2002   :  { %7472 = vmatpush1.bf16.msra.mxu1 %v18002_v43  ;;  %v17041_v56 = vpop.f32.mrf.mxu0  ;;  %7503 = vmatprep.mubr.bf16.mxu1 %v18836_v5  ;;  %v18020_v5 = vld [vmem:[#allocation6 + $0x290] ss:$8 sps:$4 sm:$0xff]   ;;  %v18043_v43 = vld [vmem:[#allocation7 + $0x4ac] ss:$16 sps:$4 sm:$0xff]  }
0x2003   :  { %7473 = vmatprep.subr.bf16.mxu1 %v18007_v4  ;;  %v18041_v4 = vld [vmem:[#allocation7 + $0x4a8] ss:$16 sps:$4 sm:$0xff]   ;;  %v18044_v56 = vld [vmem:[#allocation7 + $0x480] ss:$16 sps:$4 sm:$0xff]  }
0x2006   :  { %7474 = vmatpush1.bf16.msra.mxu1 %v18005_v57  ;;  %v18047_v57 = vld [vmem:[#allocation7 + $0x488] ss:$16 sps:$4 sm:$0xff]  }
0x2007   :  { %7475 = vmatprep.subr.bf16.mxu1 %v18010_v58  ;;  %v18052_v58 = vld [vmem:[#allocation7 + $0x464] ss:$16 sps:$4 sm:$0xff]  }
0x200a   :  { %7476 = vmatpush1.bf16.msra.mxu1 %v18008_v61  ;;  %v18055_v61 = vld [vmem:[#allocation7 + $0x46c] ss:$16 sps:$4 sm:$0xff]  }
0x200b   :  { %7477 = vmatprep.subr.bf16.mxu1 %v18013_v36  ;;  %v18050_v36 = vld [vmem:[#allocation7 + $0x460] ss:$16 sps:$4 sm:$0xff]  }
0x200e   :  { %7478 = vmatpush1.bf16.msra.mxu1 %v18011_v3  ;;  %v18053_v3 = vld [vmem:[#allocation7 + $0x468] ss:$16 sps:$4 sm:$0xff]  }
0x200f   :  { %7479 = vmatprep.subr.bf16.mxu1 %v18016_v50  ;;  %v18058_v50 = vld [vmem:[#allocation7 + $0x444] ss:$16 sps:$4 sm:$0xff]  }
0x2012   :  { %7480 = vmatpush1.bf16.msra.mxu1 %v18014_v18  ;;  %v18061_v18 = vld [vmem:[#allocation7 + $0x44c] ss:$16 sps:$4 sm:$0xff]  }
0x2013   :  { %7481 = vmatprep.subr.bf16.mxu1 %v18019_v7  ;;  %v18056_v7 = vld [vmem:[#allocation7 + $0x440] ss:$16 sps:$4 sm:$0xff]  }
0x2016   :  { %7482 = vmatpush1.bf16.msra.mxu1 %v18017_v48  ;;  %v18059_v48 = vld [vmem:[#allocation7 + $0x448] ss:$16 sps:$4 sm:$0xff]  }
0x2017   :  { %7483 = vmatprep.subr.bf16.mxu1 %v18022_v60  ;;  %v18064_v60 = vld [vmem:[#allocation7 + $0x424] ss:$16 sps:$4 sm:$0xff]  }
0x201a   :  { %7484 = vmatpush1.bf16.msra.mxu1 %v18020_v5  ;;  %v18067_v5 = vld [vmem:[#allocation7 + $0x42c] ss:$16 sps:$4 sm:$0xff]  }
0x201b   :  { %7485 = vmatprep.subr.bf16.mxu1 %v18025_v59  ;;  %v18062_v59 = vld [vmem:[#allocation7 + $0x420] ss:$16 sps:$4 sm:$0xff]  }
0x201e   :  { %7486 = vmatpush1.bf16.msra.mxu1 %v18023_v11  ;;  %v18065_v11 = vld [vmem:[#allocation7 + $0x428] ss:$16 sps:$4 sm:$0xff]  }
0x201f   :  { %8044 = vmatprep.subr.bf16.mxu1 %v18031_v9  ;;  %v18086_v9 = vld [vmem:[#allocation7 + $0x5a0] ss:$16 sps:$4 sm:$0xff]  }
0x2021   :  { %7504 = vmatmul.mubr.bf16.vlgmr.msra.gmra.mxu1 %v7374_v63  ;;  %v18070_v63 = vld [vmem:[#allocation7 + $0x404] ss:$16 sps:$4 sm:$0xff]  }
0x2022   :  { %8045 = vmatpush1.bf16.msra.mxu1 %v18029_v40  ;;  %v18083_v40 = vld [vmem:[#allocation7 + $0x5c8] ss:$16 sps:$4 sm:$0xff]  }
0x2023   :  { %8046 = vmatprep.subr.bf16.mxu1 %v18037_v32  ;;  %v18092_v32 = vld [vmem:[#allocation7 + $0x580] ss:$16 sps:$4 sm:$0xff]  }
0x20c1   :  { %v7043_v29 = vpop.f32.mrf.mxu1 }
0x20c2   :  { %v7060_v46 = vadd.f32 %v7055_v21, %v7043_v29  ;;  %v18073_v29 = vld [vmem:[#allocation7 + $0x40c] ss:$16 sps:$4 sm:$0xff]  }
0x20c3   :  { %v7045_v31 = vpop.f32.mrf.mxu1 }
0x20c4   :  { %v7061_v33 = vadd.f32 %v7059_v22, %v7045_v31  ;;  %v18068_v31 = vld [vmem:[#allocation7 + $0x400] ss:$16 sps:$4 sm:$0xff]  }
0x20c5   :  { %v7047_v10 = vpop.f32.mrf.mxu1 }
0x20c6   :  { %v7062_v2 = vadd.f32 %v7055_v21, %v7047_v10  ;;  %v18071_v10 = vld [vmem:[#allocation7 + $0x408] ss:$16 sps:$4 sm:$0xff]   ;;  %v18076_v21 = vld [vmem:[#allocation7 + $0x5e4] ss:$16 sps:$4 sm:$0xff]  }
0x20c7   :  { %v7049_v13 = vpop.f32.mrf.mxu1 }
0x20c8   :  { %v7063_v12 = vadd.f32 %v7059_v22, %v7049_v13  ;;  %v18079_v22 = vld [vmem:[#allocation7 + $0x5ec] ss:$16 sps:$4 sm:$0xff]   ;;  %v18074_v13 = vld [vmem:[#allocation7 + $0x5e0] ss:$16 sps:$4 sm:$0xff]  }
0x20e1   :  { %v7505_v24 = vpop.f32.mrf.mxu1 }
0x20e2   :  { %v7514_v62 = vadd.f32 %v7505_v24, %v7060_v46  ;;  %v18077_v46 = vld [vmem:[#allocation7 + $0x5e8] ss:$16 sps:$4 sm:$0xff]  }
0x20e3   :  { %v7507_v1 = vpop.f32.mrf.mxu1 }
0x20e4   :  { %v7515_v51 = vadd.f32 %v7507_v1, %v7061_v33  ;;  %v19613_v30 = vadd.f32 %v7514_v62, %v19513_v27 }
0x20e5   :  { %v7509_v26 = vpop.f32.mrf.mxu1 }
0x20e6   :  { %v19616_v23 = vadd.f32 %v7515_v51, %v19511_v39  ;;  %v7516_v25 = vadd.f32 %v7509_v26, %v7062_v2  ;;  %v18028_v39 = vld [vmem:[#allocation7 + $0x4e4] ss:$16 sps:$4 sm:$0xff]  }
0x20e7   :  { %v7511_v34 = vpop.f32.mrf.mxu1  ;;  %8001 = vmatprep.subr.bf16.mxu0 %v18028_v39  ;;  %v18080_v39 = vld [vmem:[#allocation7 + $0x5c0] ss:$16 sps:$4 sm:$0xff]  }
0x20e8   :  { %v7517_v37 = vadd.f32 %v7511_v34, %v7063_v12  ;;  %v7522_v19 = vadd.f32 %v19616_v23, %v19613_v30  ;;  %v19621_v15 = vadd.f32 %v7516_v25, %v19517_v41  ;;  %8002 = vmatpush1.bf16.msra.mxu0 %v18026_v38  ;;  %v18035_v41 = vld [vmem:[#allocation7 + $0x4c8] ss:$16 sps:$4 sm:$0xff]   ;;  %v18085_v38 = vld [vmem:[#allocation7 + $0x5cc] ss:$16 sps:$4 sm:$0xff]  }
0x20e9   :  { %8003 = vmatprep.subr.bf16.mxu0 %v18034_v20  ;;  %8047 = vmatpush1.bf16.msra.mxu1 %v18035_v41  ;;  %v18089_v20 = vld [vmem:[#allocation7 + $0x5a8] ss:$16 sps:$4 sm:$0xff]  }
0x20ea   :  { %v19624_v14 = vadd.f32 %v7517_v37, %v19515_v28  ;;  %7523 = vadd.xlane.f32.xlu0 %v7522_v19  ;;  %v18040_v28 = vld [vmem:[#allocation7 + $0x4a4] ss:$16 sps:$4 sm:$0xff]   ;;  %8048 = vmatprep.subr.bf16.mxu1 %v18043_v43  ;;  %v18095_v41 = vld [vmem:[#allocation7 + $0x588] ss:$16 sps:$4 sm:$0xff]  }
0x20eb   :  { %v18100_v43 = vld [vmem:[#allocation7 + $0x564] ss:$16 sps:$4 sm:$0xff]  }
0x20ec   :  { %v7525_v27 = vadd.f32 %v19624_v14, %v19621_v15  ;;  %8004 = vmatpush1.bf16.msra.mxu0 %v18032_v42  ;;  %v18094_v42 = vld [vmem:[#allocation7 + $0x584] ss:$16 sps:$4 sm:$0xff]  }
0x20ed   :  { %8005 = vmatprep.subr.bf16.mxu0 %v18040_v28  ;;  %8049 = vmatpush1.bf16.msra.mxu1 %v18041_v4  ;;  %v18097_v28 = vld [vmem:[#allocation7 + $0x58c] ss:$16 sps:$4 sm:$0xff]   ;;  %v18098_v4 = vld [vmem:[#allocation7 + $0x560] ss:$16 sps:$4 sm:$0xff]  }
0x20ee   :  { %7526 = vadd.xlane.f32.xlu1 %v7525_v27  ;;  %8050 = vmatprep.subr.bf16.mxu1 %v18049_v47  ;;  %v18082_v27 = vld [vmem:[#allocation7 + $0x5c4] ss:$16 sps:$4 sm:$0xff]  }
0x20ef   :  { %v18106_v47 = vld [vmem:[#allocation7 + $0x544] ss:$16 sps:$4 sm:$0xff]  }
0x20f0   :  { %8006 = vmatpush1.bf16.msra.mxu0 %v18038_v44  ;;  %v18103_v44 = vld [vmem:[#allocation7 + $0x56c] ss:$16 sps:$4 sm:$0xff]  }
0x20f1   :  { %8007 = vmatprep.subr.bf16.mxu0 %v18046_v0  ;;  %8051 = vmatpush1.bf16.msra.mxu1 %v18047_v57  ;;  %v18101_v0 = vld [vmem:[#allocation7 + $0x568] ss:$16 sps:$4 sm:$0xff]   ;;  %v18104_v57 = vld [vmem:[#allocation7 + $0x540] ss:$16 sps:$4 sm:$0xff]  }
0x20f2   :  { %8052 = vmatprep.subr.bf16.mxu1 %v18055_v61  ;;  %v18112_v61 = vld [vmem:[#allocation7 + $0x524] ss:$16 sps:$4 sm:$0xff]  }
0x20f4   :  { %8008 = vmatpush1.bf16.msra.mxu0 %v18044_v56  ;;  %v18109_v56 = vld [vmem:[#allocation7 + $0x54c] ss:$16 sps:$4 sm:$0xff]  }
0x20f5   :  { %8009 = vmatprep.subr.bf16.mxu0 %v18052_v58  ;;  %8053 = vmatpush1.bf16.msra.mxu1 %v18053_v3  ;;  %v18107_v58 = vld [vmem:[#allocation7 + $0x548] ss:$16 sps:$4 sm:$0xff]   ;;  %v18110_v3 = vld [vmem:[#allocation7 + $0x520] ss:$16 sps:$4 sm:$0xff]  }
0x20f6   :  { %8054 = vmatprep.subr.bf16.mxu1 %v18061_v18  ;;  %v18118_v18 = vld [vmem:[#allocation7 + $0x504] ss:$16 sps:$4 sm:$0xff]  }
0x20f8   :  { %8010 = vmatpush1.bf16.msra.mxu0 %v18050_v36  ;;  %v18115_v36 = vld [vmem:[#allocation7 + $0x52c] ss:$16 sps:$4 sm:$0xff]  }
0x20f9   :  { %8011 = vmatprep.subr.bf16.mxu0 %v18058_v50  ;;  %8055 = vmatpush1.bf16.msra.mxu1 %v18059_v48  ;;  %v18113_v50 = vld [vmem:[#allocation7 + $0x528] ss:$16 sps:$4 sm:$0xff]   ;;  %v18116_v48 = vld [vmem:[#allocation7 + $0x500] ss:$16 sps:$4 sm:$0xff]  }
0x20fa   :  { %8056 = vmatprep.subr.bf16.mxu1 %v18067_v5  ;;  %v18124_v5 = vld [vmem:[#allocation9 + $0x474] ss:$8 sps:$4 sm:$0xff]  }
0x20fc   :  { %8012 = vmatpush1.bf16.msra.mxu0 %v18056_v7  ;;  %v18121_v7 = vld [vmem:[#allocation7 + $0x50c] ss:$16 sps:$4 sm:$0xff]  }
0x20fd   :  { %8013 = vmatprep.subr.bf16.mxu0 %v18064_v60  ;;  %8057 = vmatpush1.bf16.msra.mxu1 %v18065_v11  ;;  %v18119_v60 = vld [vmem:[#allocation7 + $0x508] ss:$16 sps:$4 sm:$0xff]  }
0x20fe   :  { %8058 = vmatprep.subr.bf16.mxu1 %v18073_v29 }
0x2100   :  { %8014 = vmatpush1.bf16.msra.mxu0 %v18062_v59  ;;  %v18127_v59 = vld [vmem:[#allocation9 + $0x574] ss:$8 sps:$4 sm:$0xff]  }
0x2101   :  { %8015 = vmatprep.subr.bf16.mxu0 %v18070_v63  ;;  %8059 = vmatpush1.bf16.msra.mxu1 %v18071_v10 }
0x2102   :  { %8060 = vmatprep.subr.bf16.mxu1 %v18079_v22 }
0x2104   :  { %8016 = vmatpush1.bf16.msra.mxu0 %v18068_v31 }
0x2105   :  { %8017 = vmatprep.subr.bf16.mxu0 %v18076_v21  ;;  %8061 = vmatpush2.bf16.msra.mxu1 %v18077_v46  ;;  %v7561_v46 = vrot.slane %v19567_v45, %v19188_v17 }
0x2106   :  { %8062 = vmatprep.subr.bf16.mxu1 %v18085_v38 }
0x2108   :  { %8018 = vmatpush2.bf16.msra.mxu0 %v18074_v13 }
0x2109   :  { %8019 = vmatprep.subr.bf16.mxu0 %v18082_v27  ;;  %8063 = vmatpush2.bf16.msra.mxu1 %v18083_v40  ;;  %v18125_v40 = vld [vmem:[#allocation9 + $0x570] ss:$8 sps:$4 sm:$0xff]  }
0x210c   :  { %8020 = vmatpush2.bf16.msra.mxu0 %v18080_v39 }
0x2173   :  { %v7524_v24 = vpop.xlane.xlu0 %7523 }
0x2174   :  { %v7528_v33 = vmul.f32 0.00390625, %v7524_v24 }
0x2176   :  { %v19629_v62 = vsub.f32 %v19613_v30, %v7528_v33  ;;  %v19632_v1 = vsub.f32 %v19616_v23, %v7528_v33  ;;  %v7557_v33 = vrot.slane %v19565_v35, %v19188_v17 }
0x2177   :  { %v7527_v2 = vpop.xlane.xlu1 %7526 }
0x2178   :  { %v7529_v51 = vmul.f32 0.00390625, %v7527_v2  ;;  %v7534_v26 = vmul.f32 %v19629_v62, %v19629_v62  ;;  %v7535_v12 = vmul.f32 %v19632_v1, %v19632_v1 }
0x217a   :  { %v19639_v25 = vsub.f32 %v19621_v15, %v7529_v51  ;;  %v19642_v34 = vsub.f32 %v19624_v14, %v7529_v51  ;;  %v7538_v37 = vadd.f32 %v7535_v12, %v7534_v26  ;;  %v18088_v15 = vld [vmem:[#allocation7 + $0x5a4] ss:$16 sps:$4 sm:$0xff]   ;;  %v18091_v14 = vld [vmem:[#allocation7 + $0x5ac] ss:$16 sps:$4 sm:$0xff]   ;;  %v7573_v51 = vrot.slane %v19567_v45, %v19046_v52 }
0x217b   :  { %8021 = vmatprep.subr.bf16.mxu0 %v18088_v15  ;;  %8064 = vmatprep.subr.bf16.mxu1 %v18091_v14  ;;  %v7569_v26 = vrot.slane %v19565_v35, %v19046_v52  ;;  %v18133_v15 = vld [vmem:[#allocation9 + $0x564] ss:$8 sps:$4 sm:$0xff]   ;;  %v18128_v14 = vld [vmem:[#allocation9 + $0x460] ss:$8 sps:$4 sm:$0xff]  }
0x217c   :  { %7539 = vadd.xlane.f32.xlu0 %v7538_v37  ;;  %v7536_v30 = vmul.f32 %v19639_v25, %v19639_v25  ;;  %v7537_v23 = vmul.f32 %v19642_v34, %v19642_v34  ;;  %8022 = vmatpush2.bf16.msra.mxu0 %v18086_v9  ;;  %v18131_v9 = vld [vmem:[#allocation9 + $0x560] ss:$8 sps:$4 sm:$0xff]  }
0x217d   :  { %8065 = vmatpush2.bf16.msra.mxu1 %v18089_v20  ;;  %8023 = vmatprep.subr.bf16.mxu0 %v18094_v42  ;;  %v18136_v20 = vld [vmem:[#allocation9 + $0x454] ss:$8 sps:$4 sm:$0xff]   ;;  %v18134_v42 = vld [vmem:[#allocation9 + $0x450] ss:$8 sps:$4 sm:$0xff]  }
0x217e   :  { %v7541_v19 = vadd.f32 %v7537_v23, %v7536_v30  ;;  %8066 = vmatprep.subr.bf16.mxu1 %v18097_v28  ;;  %v18142_v28 = vld [vmem:[#allocation9 + $0x444] ss:$8 sps:$4 sm:$0xff]  }
0x2180   :  { %7542 = vadd.xlane.f32.xlu1 %v7541_v19  ;;  %8024 = vmatpush2.bf16.msra.mxu0 %v18092_v32  ;;  %v18139_v32 = vld [vmem:[#allocation9 + $0x554] ss:$8 sps:$4 sm:$0xff]  }
0x2181   :  { %8067 = vmatpush2.bf16.msra.mxu1 %v18095_v41  ;;  %8025 = vmatprep.subr.bf16.mxu0 %v18100_v43  ;;  %v18137_v41 = vld [vmem:[#allocation9 + $0x550] ss:$8 sps:$4 sm:$0xff]   ;;  %v18145_v43 = vld [vmem:[#allocation9 + $0x544] ss:$8 sps:$4 sm:$0xff]  }
0x2182   :  { %8068 = vmatprep.subr.bf16.mxu1 %v18103_v44  ;;  %v18140_v44 = vld [vmem:[#allocation9 + $0x440] ss:$8 sps:$4 sm:$0xff]  }
0x2184   :  { %8026 = vmatpush2.bf16.msra.mxu0 %v18098_v4  ;;  %v18143_v4 = vld [vmem:[#allocation9 + $0x540] ss:$8 sps:$4 sm:$0xff]  }
0x2185   :  { %8069 = vmatpush2.bf16.msra.mxu1 %v18101_v0  ;;  %8027 = vmatprep.subr.bf16.mxu0 %v18106_v47  ;;  %v18148_v0 = vld [vmem:[#allocation9 + $0x434] ss:$8 sps:$4 sm:$0xff]  }
0x2186   :  { %8070 = vmatprep.subr.bf16.mxu1 %v18109_v56  ;;  %v18151_v47 = vld [vmem:[#allocation9 + $0x534] ss:$8 sps:$4 sm:$0xff]   ;;  %v18146_v56 = vld [vmem:[#allocation9 + $0x430] ss:$8 sps:$4 sm:$0xff]  }
0x2188   :  { %8028 = vmatpush2.bf16.msra.mxu0 %v18104_v57  ;;  %v18149_v57 = vld [vmem:[#allocation9 + $0x530] ss:$8 sps:$4 sm:$0xff]  }
0x2189   :  { %8071 = vmatpush2.bf16.msra.mxu1 %v18107_v58  ;;  %8029 = vmatprep.subr.bf16.mxu0 %v18112_v61  ;;  %v18154_v58 = vld [vmem:[#allocation9 + $0x424] ss:$8 sps:$4 sm:$0xff]  }
0x218a   :  { %8072 = vmatprep.subr.bf16.mxu1 %v18115_v36  ;;  %v18157_v61 = vld [vmem:[#allocation9 + $0x524] ss:$8 sps:$4 sm:$0xff]   ;;  %v18152_v36 = vld [vmem:[#allocation9 + $0x420] ss:$8 sps:$4 sm:$0xff]  }
0x218c   :  { %8030 = vmatpush2.bf16.msra.mxu0 %v18110_v3  ;;  %v18155_v3 = vld [vmem:[#allocation9 + $0x520] ss:$8 sps:$4 sm:$0xff]  }
0x218d   :  { %8073 = vmatpush2.bf16.msra.mxu1 %v18113_v50  ;;  %8031 = vmatprep.subr.bf16.mxu0 %v18118_v18  ;;  %v18160_v50 = vld [vmem:[#allocation9 + $0x414] ss:$8 sps:$4 sm:$0xff]  }
0x218e   :  { %8074 = vmatprep.subr.bf16.mxu1 %v18121_v7  ;;  %v18163_v18 = vld [vmem:[#allocation9 + $0x514] ss:$8 sps:$4 sm:$0xff]   ;;  %v18158_v7 = vld [vmem:[#allocation9 + $0x410] ss:$8 sps:$4 sm:$0xff]  }
0x2190   :  { %8032 = vmatpush2.bf16.msra.mxu0 %v18116_v48  ;;  %v18161_v48 = vld [vmem:[#allocation9 + $0x510] ss:$8 sps:$4 sm:$0xff]  }
0x2191   :  { %8075 = vmatpush2.bf16.msra.mxu1 %v18119_v60  ;;  %8492 = vmatprep.subr.bf16.mxu0 %v18124_v5  ;;  %v18166_v60 = vld [vmem:[#allocation9 + $0x404] ss:$8 sps:$4 sm:$0xff]  }
0x2192   :  { %8535 = vmatprep.subr.bf16.mxu1 %v18127_v59  ;;  %v18169_v5 = vld [vmem:[#allocation9 + $0x504] ss:$8 sps:$4 sm:$0xff]   ;;  %v18164_v59 = vld [vmem:[#allocation9 + $0x400] ss:$8 sps:$4 sm:$0xff]  }
0x2205   :  { %v7540_v11 = vpop.xlane.xlu0 %7539 }
0x2206   :  { %v7544_v63 = vmul.f32 0.00390625, %v7540_v11  ;;  %v18167_v11 = vld [vmem:[#allocation9 + $0x500] ss:$8 sps:$4 sm:$0xff]  }
0x2208   :  { %v7546_v29 = vadd.f32 1e-05, %v7544_v63  ;;  %v18172_v63 = vld [vmem:[#allocation9 + $0x4f4] ss:$8 sps:$4 sm:$0xff]  }
0x2209   :  { %v7543_v31 = vpop.xlane.xlu1 %7542 }
0x220a   :  { %18490 = vrsqrt.f32 %v7546_v29  ;;  %v7545_v10 = vmul.f32 0.00390625, %v7543_v31  ;;  %v18175_v29 = vld [vmem:[#allocation9 + $0x5f4] ss:$8 sps:$4 sm:$0xff]   ;;  %v18170_v31 = vld [vmem:[#allocation9 + $0x4f0] ss:$8 sps:$4 sm:$0xff]  }
0x220c   :  { %v7547_v21 = vadd.f32 1e-05, %v7545_v10  ;;  %v18173_v10 = vld [vmem:[#allocation9 + $0x5f0] ss:$8 sps:$4 sm:$0xff]  }
0x220e   :  { %18492 = vrsqrt.f32 %v7547_v21  ;;  %v18178_v21 = vld [vmem:[#allocation9 + $0x4e4] ss:$8 sps:$4 sm:$0xff]  }
0x2217   :  { %v18491_v22 = vpop.eup %18490 }
0x2218   :  { %v7551_v13 = vmul.f32 %v18491_v22, %v19632_v1  ;;  %v7550_v24 = vmul.f32 %v18491_v22, %v19629_v62  ;;  %v18181_v22 = vld [vmem:[#allocation9 + $0x5e4] ss:$8 sps:$4 sm:$0xff]  }
0x221a   :  { %v7563_v37 = vmul.f32 %v7561_v46, %v7551_v13  ;;  %v7562_v30 = vmul.f32 %v7557_v33, %v7550_v24  ;;  %v18176_v13 = vld [vmem:[#allocation9 + $0x4e0] ss:$8 sps:$4 sm:$0xff]   ;;  %v18184_v24 = vld [vmem:[#allocation9 + $0x4d4] ss:$8 sps:$4 sm:$0xff]  }
0x221b   :  { %v18493_v2 = vpop.eup %18492 }
0x221c   :  { %v7553_v12 = vmul.f32 %v18493_v2, %v19642_v34  ;;  %v7552_v1 = vmul.f32 %v18493_v2, %v19639_v25  ;;  %v19660_v27 = vadd.f32 %v7573_v51, %v7563_v37  ;;  %v19664_v38 = vadd.f32 %v7569_v26, %v7562_v30  ;;  %v18122_v34 = vld [vmem:[#allocation9 + $0x470] ss:$8 sps:$4 sm:$0xff]   ;;  %v18130_v25 = vld [vmem:[#allocation9 + $0x464] ss:$8 sps:$4 sm:$0xff]   ;;  %v18188_v37 = vld [vmem:[#allocation9 + $0x4c0] ss:$8 sps:$4 sm:$0xff]  }
0x221d   :  { %v18182_v2 = vld [vmem:[#allocation9 + $0x4d0] ss:$8 sps:$4 sm:$0xff]   ;;  %v18196_v30 = vld [vmem:[#allocation9 + $0x4b4] ss:$8 sps:$4 sm:$0xff]  }
0x221e   :  { %v7565_v23 = vmul.f32 %v7561_v46, %v7553_v12  ;;  %v7564_v19 = vmul.f32 %v7557_v33, %v7552_v1  ;;  %v18179_v46 = vld [vmem:[#allocation9 + $0x5e0] ss:$8 sps:$4 sm:$0xff]   ;;  %v18187_v33 = vld [vmem:[#allocation9 + $0x5d4] ss:$8 sps:$4 sm:$0xff]   ;;  %v18193_v12 = vld [vmem:[#allocation9 + $0x5c4] ss:$8 sps:$4 sm:$0xff]  }
0x221f   :  { %v18191_v1 = vld [vmem:[#allocation9 + $0x5c0] ss:$8 sps:$4 sm:$0xff]  }
0x2220   :  { %v19662_v62 = vadd.f32 %v7573_v51, %v7565_v23  ;;  %v19666_v39 = vadd.f32 %v7569_v26, %v7564_v19  ;;  %v18185_v51 = vld [vmem:[#allocation9 + $0x5d0] ss:$8 sps:$4 sm:$0xff]   ;;  %v18190_v26 = vld [vmem:[#allocation9 + $0x4c4] ss:$8 sps:$4 sm:$0xff]   ;;  %v18199_v23 = vld [vmem:[#allocation9 + $0x5b4] ss:$8 sps:$4 sm:$0xff]  }
0x2221   :  { %v18194_v19 = vld [vmem:[#allocation9 + $0x4b0] ss:$8 sps:$4 sm:$0xff]  }
0x2222   :  { %v7579_v45 = vpack.c.bf16 %v19662_v62, %v19660_v27  ;;  %v7578_v35 = vpack.c.bf16 %v19666_v39, %v19664_v38 }
0x2224   :  { %8033 = vmatprep.mubr.bf16.mxu0 %v7579_v45  ;;  %8076 = vmatprep.mubr.bf16.mxu1 %v7579_v45  ;;  %v18197_v45 = vld [vmem:[#allocation9 + $0x5b0] ss:$8 sps:$4 sm:$0xff]  }
0x2225   :  { %8034 = vmatmul.mubr.bf16.vlgmr.msra.gmra.mxu0 %v7578_v35  ;;  %8077 = vmatmul.mubr.bf16.vlgmr.msra.gmra.mxu1 %v7578_v35  ;;  %v18202_v35 = vld [vmem:[#allocation9 + $0x4a4] ss:$8 sps:$4 sm:$0xff]  }
0x2226   :  { %8493 = vmatpush1.bf16.msra.mxu0 %v18122_v34  ;;  %8536 = vmatpush1.bf16.msra.mxu1 %v18125_v40  ;;  %v18205_v34 = vld [vmem:[#allocation9 + $0x5a4] ss:$8 sps:$4 sm:$0xff]   ;;  %v18200_v40 = vld [vmem:[#allocation9 + $0x4a0] ss:$8 sps:$4 sm:$0xff]  }
0x2227   :  { %8494 = vmatprep.subr.bf16.mxu0 %v18130_v25  ;;  %8537 = vmatprep.subr.bf16.mxu1 %v18133_v15  ;;  %v18203_v25 = vld [vmem:[#allocation9 + $0x5a0] ss:$8 sps:$4 sm:$0xff]   ;;  %v18208_v15 = vld [vmem:[#allocation9 + $0x494] ss:$8 sps:$4 sm:$0xff]  }
0x222a   :  { %8495 = vmatpush1.bf16.msra.mxu0 %v18128_v14  ;;  %8538 = vmatpush1.bf16.msra.mxu1 %v18131_v9  ;;  %v18211_v14 = vld [vmem:[#allocation9 + $0x594] ss:$8 sps:$4 sm:$0xff]   ;;  %v18206_v9 = vld [vmem:[#allocation9 + $0x490] ss:$8 sps:$4 sm:$0xff]  }
0x222b   :  { %8496 = vmatprep.subr.bf16.mxu0 %v18136_v20  ;;  %8539 = vmatprep.subr.bf16.mxu1 %v18139_v32  ;;  %v18209_v20 = vld [vmem:[#allocation9 + $0x590] ss:$8 sps:$4 sm:$0xff]   ;;  %v18214_v32 = vld [vmem:[#allocation9 + $0x484] ss:$8 sps:$4 sm:$0xff]  }
0x222e   :  { %8497 = vmatpush1.bf16.msra.mxu0 %v18134_v42  ;;  %8540 = vmatpush1.bf16.msra.mxu1 %v18137_v41  ;;  %v18217_v42 = vld [vmem:[#allocation9 + $0x584] ss:$8 sps:$4 sm:$0xff]   ;;  %v18212_v41 = vld [vmem:[#allocation9 + $0x480] ss:$8 sps:$4 sm:$0xff]  }
0x222f   :  { %8498 = vmatprep.subr.bf16.mxu0 %v18142_v28  ;;  %8541 = vmatprep.subr.bf16.mxu1 %v18145_v43  ;;  %v18215_v28 = vld [vmem:[#allocation9 + $0x580] ss:$8 sps:$4 sm:$0xff]   ;;  %v18536_v43 = vld [vmem:[#allocation10 + $0x10] sm:$0xff] }
0x2232   :  { %8499 = vmatpush1.bf16.msra.mxu0 %v18140_v44  ;;  %8542 = vmatpush1.bf16.msra.mxu1 %v18143_v4  ;;  %v7652_v44 = vrot.slane %v18536_v43, %v19188_v17  ;;  %v7660_v4 = vrot.slane %v18536_v43, %v19219_v54 }
0x2233   :  { %8500 = vmatprep.subr.bf16.mxu0 %v18148_v0  ;;  %8543 = vmatprep.subr.bf16.mxu1 %v18151_v47  ;;  %v7648_v0 = vrot.slane %v18536_v43, %v19133_v16  ;;  %v7656_v47 = vrot.slane %v18536_v43, %v19222_v55 }
0x2236   :  { %8501 = vmatpush1.bf16.msra.mxu0 %v18146_v56  ;;  %8544 = vmatpush1.bf16.msra.mxu1 %v18149_v57 }
0x2237   :  { %8502 = vmatprep.subr.bf16.mxu0 %v18154_v58  ;;  %8545 = vmatprep.subr.bf16.mxu1 %v18157_v61  ;;  %v7672_v58 = vrot.slane %v7652_v44, %v19133_v16  ;;  %v7680_v61 = vrot.slane %v7660_v4, %v19133_v16 }
0x223a   :  { %8503 = vmatpush1.bf16.msra.mxu0 %v18152_v36  ;;  %8546 = vmatpush1.bf16.msra.mxu1 %v18155_v3  ;;  %v7668_v36 = vrot.slane %v7648_v0, %v19133_v16  ;;  %v7676_v3 = vrot.slane %v7656_v47, %v19133_v16 }
0x223b   :  { %8504 = vmatprep.subr.bf16.mxu0 %v18160_v50  ;;  %8547 = vmatprep.subr.bf16.mxu1 %v18163_v18 }
0x223e   :  { %8505 = vmatpush1.bf16.msra.mxu0 %v18158_v7  ;;  %8548 = vmatpush1.bf16.msra.mxu1 %v18161_v48 }
0x223f   :  { %8506 = vmatprep.subr.bf16.mxu0 %v18166_v60  ;;  %8549 = vmatprep.subr.bf16.mxu1 %v18169_v5 }
0x2242   :  { %8507 = vmatpush1.bf16.msra.mxu0 %v18164_v59  ;;  %8550 = vmatpush1.bf16.msra.mxu1 %v18167_v11 }
0x2243   :  { %8508 = vmatprep.subr.bf16.mxu0 %v18172_v63  ;;  %8551 = vmatprep.subr.bf16.mxu1 %v18175_v29 }
0x2246   :  { %8509 = vmatpush2.bf16.msra.mxu0 %v18170_v31  ;;  %8552 = vmatpush2.bf16.msra.mxu1 %v18173_v10 }
0x2247   :  { %8510 = vmatprep.subr.bf16.mxu0 %v18178_v21  ;;  %8553 = vmatprep.subr.bf16.mxu1 %v18181_v22 }
0x224a   :  { %8511 = vmatpush2.bf16.msra.mxu0 %v18176_v13  ;;  %8554 = vmatpush2.bf16.msra.mxu1 %v18179_v46 }
0x224b   :  { %8512 = vmatprep.subr.bf16.mxu0 %v18184_v24  ;;  %8555 = vmatprep.subr.bf16.mxu1 %v18187_v33 }
0x224e   :  { %8513 = vmatpush2.bf16.msra.mxu0 %v18182_v2  ;;  %8556 = vmatpush2.bf16.msra.mxu1 %v18185_v51 }
0x224f   :  { %8514 = vmatprep.subr.bf16.mxu0 %v18190_v26  ;;  %8557 = vmatprep.subr.bf16.mxu1 %v18193_v12 }
0x2252   :  { %8515 = vmatpush2.bf16.msra.mxu0 %v18188_v37  ;;  %8558 = vmatpush2.bf16.msra.mxu1 %v18191_v1 }
0x2253   :  { %8516 = vmatprep.subr.bf16.mxu0 %v18196_v30  ;;  %8559 = vmatprep.subr.bf16.mxu1 %v18199_v23 }
0x2256   :  { %8517 = vmatpush2.bf16.msra.mxu0 %v18194_v19  ;;  %8560 = vmatpush2.bf16.msra.mxu1 %v18197_v45  ;;  %v19680_v19 = vld [vmem:[#allocation12 + $0x20] sm:$0xff] }
0x2257   :  { %8518 = vmatprep.subr.bf16.mxu0 %v18202_v35  ;;  %8561 = vmatprep.subr.bf16.mxu1 %v18205_v34  ;;  %v8167_v45 = vrot.slane %v19680_v19, %v19098_v8  ;;  %v19684_v35 = vld [vmem:[#allocation12 + $0x28] sm:$0xff] }
0x2258   :  { %v8171_v34 = vrot.slane %v19684_v35, %v19098_v8 }
0x225a   :  { %8519 = vmatpush2.bf16.msra.mxu0 %v18200_v40  ;;  %8562 = vmatpush2.bf16.msra.mxu1 %v18203_v25 }
0x225b   :  { %8520 = vmatprep.subr.bf16.mxu0 %v18208_v15  ;;  %8563 = vmatprep.subr.bf16.mxu1 %v18211_v14 }
0x225e   :  { %8521 = vmatpush2.bf16.msra.mxu0 %v18206_v9  ;;  %8564 = vmatpush2.bf16.msra.mxu1 %v18209_v20 }
0x225f   :  { %8522 = vmatprep.subr.bf16.mxu0 %v18214_v32  ;;  %8565 = vmatprep.subr.bf16.mxu1 %v18217_v42 }
0x2262   :  { %8523 = vmatpush2.bf16.msra.mxu0 %v18212_v41  ;;  %8566 = vmatpush2.bf16.msra.mxu1 %v18215_v28 }
0x22e5   :  { %v8035_v56 = vpop.f32.mrf.mxu0  ;;  %v8078_v57 = vpop.f32.mrf.mxu1 }
0x22e6   :  { %v8036_v63 = vadd.f32 %v8035_v56, %v7668_v36  ;;  %v8079_v29 = vadd.f32 %v8078_v57, %v7676_v3 }
0x22e7   :  { %v8037_v50 = vpop.f32.mrf.mxu0  ;;  %v8080_v18 = vpop.f32.mrf.mxu1 }
0x22e8   :  { %v8038_v60 = vadd.f32 %v8037_v50, %v7672_v58  ;;  %v8081_v5 = vadd.f32 %v8080_v18, %v7680_v61  ;;  %v8087_v26 = vmax.f32 %v8036_v63, 0.0  ;;  %v8089_v12 = vmax.f32 %v8079_v29, 0.0  ;;  %v18218_v18 = vld [vmem:[#allocation13 + $0x70] ss:$8 sps:$4 sm:$0xff]   ;;  %v18233_v63 = vld [vmem:[#allocation13 + $0x20] ss:$8 sps:$4 sm:$0xff]  }
0x22e9   :  { %v8039_v7 = vpop.f32.mrf.mxu0  ;;  %v8082_v48 = vpop.f32.mrf.mxu1  ;;  %v18238_v29 = vld [vmem:[#allocation13 + $0x14] ss:$8 sps:$4 sm:$0xff]  }
0x22ea   :  { %v8040_v59 = vadd.f32 %v8039_v7, %v7668_v36  ;;  %v8083_v11 = vadd.f32 %v8082_v48, %v7676_v3  ;;  %v8088_v24 = vmax.f32 %v8038_v60, 0.0  ;;  %v8090_v33 = vmax.f32 %v8081_v5, 0.0  ;;  %v18220_v7 = vld [vmem:[#allocation13 + $0x74] ss:$8 sps:$4 sm:$0xff]   ;;  %v18223_v48 = vld [vmem:[#allocation13 + $0x64] ss:$8 sps:$4 sm:$0xff]  }
0x22eb   :  { %v8041_v31 = vpop.f32.mrf.mxu0  ;;  %v8084_v10 = vpop.f32.mrf.mxu1  ;;  %8857 = vmatprep.subr.bf16.mxu0 %v18220_v7  ;;  %v18224_v60 = vld [vmem:[#allocation13 + $0x50] ss:$8 sps:$4 sm:$0xff]   ;;  %v18229_v5 = vld [vmem:[#allocation13 + $0x44] ss:$8 sps:$4 sm:$0xff]  }
0x22ec   :  { %v8042_v21 = vadd.f32 %v8041_v31, %v7672_v58  ;;  %v8085_v22 = vadd.f32 %v8084_v10, %v7680_v61  ;;  %v8091_v13 = vmax.f32 %v8040_v59, 0.0  ;;  %v8093_v46 = vmax.f32 %v8083_v11, 0.0  ;;  %v18227_v59 = vld [vmem:[#allocation13 + $0x40] ss:$8 sps:$4 sm:$0xff]   ;;  %v18235_v11 = vld [vmem:[#allocation13 + $0x24] ss:$8 sps:$4 sm:$0xff]  }
0x22ed   :  { %v18236_v31 = vld [vmem:[#allocation13 + $0x10] ss:$8 sps:$4 sm:$0xff]   ;;  %v18241_v10 = vld [vmem:[#allocation13 + $0x4] ss:$8 sps:$4 sm:$0xff]  }
0x22ee   :  { %v8092_v2 = vmax.f32 %v8042_v21, 0.0  ;;  %v8094_v51 = vmax.f32 %v8085_v22, 0.0  ;;  %v8095_v30 = vpack.c.bf16 %v8091_v13, %v8087_v26  ;;  %v8097_v23 = vpack.c.bf16 %v8093_v46, %v8089_v12  ;;  %v18239_v21 = vld [vmem:[#allocation13] ss:$8 sps:$4 sm:$0xff]   ;;  %v18244_v22 = vld [vmem:[#allocation13 + $0xf4] ss:$8 sps:$4 sm:$0xff]  }
0x22ef   :  { %v18242_v13 = vld [vmem:[#allocation13 + $0xf0] ss:$8 sps:$4 sm:$0xff]  }
0x22f0   :  { %v8096_v37 = vpack.c.bf16 %v8092_v2, %v8088_v24  ;;  %v8098_v1 = vpack.c.bf16 %v8094_v51, %v8090_v33 }
0x22f2   :  { %8524 = vmatprep.mubr.bf16.mxu0 %v8096_v37  ;;  %8567 = vmatprep.mubr.bf16.mxu1 %v8098_v1 }
0x22f3   :  { %8525 = vmatmul.mubr.bf16.vlgmr.msra.gmra.mxu0 %v8095_v30  ;;  %8568 = vmatmul.mubr.bf16.vlgmr.msra.gmra.mxu1 %v8097_v23 }
0x22f4   :  { %8858 = vmatpush1.bf16.msra.mxu0 %v18218_v18  ;;  %v8617_v18 = vrot.slane %v19680_v19, %v19222_v55 }
0x22f5   :  { %8859 = vmatprep.subr.bf16.mxu0 %v18223_v48 }
0x23b3   :  { %v8526_v40 = vpop.f32.mrf.mxu0  ;;  %v8569_v25 = vpop.f32.mrf.mxu1 }
0x23b4   :  { %v8527_v15 = vadd.f32 %v8526_v40, %v8167_v45 }
0x23b5   :  { %v8528_v14 = vpop.f32.mrf.mxu0  ;;  %v8571_v9 = vpop.f32.mrf.mxu1 }
0x23b6   :  { %v8570_v20 = vadd.f32 %v8569_v25, %v8527_v15  ;;  %v8529_v32 = vadd.f32 %v8528_v14, %v8171_v34  ;;  %v18247_v25 = vld [vmem:[#allocation13 + $0xe4] ss:$8 sps:$4 sm:$0xff]   ;;  %v18245_v15 = vld [vmem:[#allocation13 + $0xe0] ss:$8 sps:$4 sm:$0xff]   ;;  %v18250_v14 = vld [vmem:[#allocation13 + $0xd4] ss:$8 sps:$4 sm:$0xff]  }
0x23b7   :  { %v8530_v42 = vpop.f32.mrf.mxu0  ;;  %v8573_v41 = vpop.f32.mrf.mxu1 }
0x23b8   :  { %v8572_v28 = vadd.f32 %v8571_v9, %v8529_v32  ;;  %v8531_v43 = vadd.f32 %v8530_v42, %v8167_v45  ;;  %v8578_v4 = vadd.f32 %v8570_v20, %v19664_v38  ;;  %v18221_v38 = vld [vmem:[#allocation13 + $0x60] ss:$8 sps:$4 sm:$0xff]   ;;  %v18248_v9 = vld [vmem:[#allocation13 + $0xd0] ss:$8 sps:$4 sm:$0xff]   ;;  %v18253_v32 = vld [vmem:[#allocation13 + $0xc4] ss:$8 sps:$4 sm:$0xff]  }
0x23b9   :  { %v8532_v44 = vpop.f32.mrf.mxu0  ;;  %v8575_v57 = vpop.f32.mrf.mxu1  ;;  %8860 = vmatpush1.bf16.msra.mxu0 %v18221_v38  ;;  %v18251_v20 = vld [vmem:[#allocation13 + $0xc0] ss:$8 sps:$4 sm:$0xff]   ;;  %v18256_v42 = vld [vmem:[#allocation13 + $0xb4] ss:$8 sps:$4 sm:$0xff]   ;;  %v8633_v38 = vrot.slane %v19684_v35, %v19093_v6 }
0x23ba   :  { %v8579_v0 = vadd.f32 %v8572_v28, %v19660_v27  ;;  %v8574_v47 = vadd.f32 %v8573_v41, %v8531_v43  ;;  %v8533_v56 = vadd.f32 %v8532_v44, %v8171_v34  ;;  %v18226_v27 = vld [vmem:[#allocation13 + $0x54] ss:$8 sps:$4 sm:$0xff]   ;;  %v18254_v41 = vld [vmem:[#allocation13 + $0xb0] ss:$8 sps:$4 sm:$0xff]   ;;  %v18259_v28 = vld [vmem:[#allocation13 + $0xa4] ss:$8 sps:$4 sm:$0xff]  }
0x23bb   :  { %8861 = vmatprep.subr.bf16.mxu0 %v18226_v27  ;;  %v18257_v43 = vld [vmem:[#allocation13 + $0xa0] ss:$8 sps:$4 sm:$0xff]   ;;  %v18262_v44 = vld [vmem:[#allocation13 + $0x94] ss:$8 sps:$4 sm:$0xff]  }
0x23bc   :  { %v8576_v58 = vadd.f32 %v8575_v57, %v8533_v56  ;;  %v8582_v61 = vadd.f32 %v8579_v0, %v8578_v4  ;;  %v8580_v36 = vadd.f32 %v8574_v47, %v19666_v39  ;;  %v18232_v39 = vld [vmem:[#allocation13 + $0x34] ss:$8 sps:$4 sm:$0xff]   ;;  %v18263_v47 = vld [vmem:[#allocation13 + $0x80] ss:$8 sps:$4 sm:$0xff]  }
0x23bd   :  { %8862 = vmatpush1.bf16.msra.mxu0 %v18224_v60  ;;  %v8629_v60 = vrot.slane %v19680_v19, %v19093_v6 }
0x23be   :  { %v8581_v3 = vadd.f32 %v8576_v58, %v19662_v62  ;;  %8583 = vadd.xlane.f32.xlu0 %v8582_v61  ;;  %8863 = vmatprep.subr.bf16.mxu0 %v18229_v5  ;;  %v18230_v62 = vld [vmem:[#allocation13 + $0x30] ss:$8 sps:$4 sm:$0xff]  }
0x23c0   :  { %v8585_v50 = vadd.f32 %v8581_v3, %v8580_v36 }
0x23c1   :  { %8864 = vmatpush1.bf16.msra.mxu0 %v18227_v59 }
0x23c2   :  { %8586 = vadd.xlane.f32.xlu1 %v8585_v50  ;;  %8865 = vmatprep.subr.bf16.mxu0 %v18232_v39  ;;  %v8621_v50 = vrot.slane %v19684_v35, %v19222_v55 }
0x23c5   :  { %8866 = vmatpush1.bf16.msra.mxu0 %v18230_v62 }
0x23c6   :  { %8867 = vmatprep.subr.bf16.mxu0 %v18235_v11 }
0x23c9   :  { %8868 = vmatpush1.bf16.msra.mxu0 %v18233_v63 }
0x23ca   :  { %8869 = vmatprep.subr.bf16.mxu0 %v18238_v29 }
0x23cd   :  { %8870 = vmatpush1.bf16.msra.mxu0 %v18236_v31 }
0x23ce   :  { %8871 = vmatprep.subr.bf16.mxu0 %v18241_v10 }
0x23d1   :  { %8872 = vmatpush1.bf16.msra.mxu0 %v18239_v21 }
0x23d2   :  { %8873 = vmatprep.subr.bf16.mxu0 %v18244_v22 }
0x23d5   :  { %8874 = vmatpush2.bf16.msra.mxu0 %v18242_v13  ;;  %v19712_v13 = vld [vmem:[#allocation15] sm:$0x77] }
0x23d6   :  { %8875 = vmatprep.subr.bf16.mxu0 %v18247_v25  ;;  %v18266_v25 = vld [vmem:[#allocation13 + $0x170] ss:$8 sps:$4 sm:$0xff]  }
0x23d9   :  { %8876 = vmatpush2.bf16.msra.mxu0 %v18245_v15  ;;  %v18268_v15 = vld [vmem:[#allocation13 + $0x174] ss:$8 sps:$4 sm:$0xff]  }
0x23da   :  { %8877 = vmatprep.subr.bf16.mxu0 %v18250_v14  ;;  %v18271_v14 = vld [vmem:[#allocation13 + $0x164] ss:$8 sps:$4 sm:$0xff]   ;;  %9196 = vmatprep.subr.bf16.mxu1 %v18268_v15  ;;  %v8961_v15 = vrot.slane %v19712_v13, %v19093_v6 }
0x23db   :  { %9197 = vmatpush1.bf16.msra.mxu1 %v18266_v25 }
0x23dc   :  { %9198 = vmatprep.subr.bf16.mxu1 %v18271_v14 }
0x23dd   :  { %8878 = vmatpush2.bf16.msra.mxu0 %v18248_v9  ;;  %v18269_v9 = vld [vmem:[#allocation13 + $0x160] ss:$8 sps:$4 sm:$0xff]  }
0x23de   :  { %8879 = vmatprep.subr.bf16.mxu0 %v18253_v32  ;;  %v18272_v32 = vld [vmem:[#allocation13 + $0x150] ss:$8 sps:$4 sm:$0xff]  }
0x23df   :  { %9199 = vmatpush1.bf16.msra.mxu1 %v18269_v9  ;;  %v8957_v9 = vrot.slane %v19712_v13, %v19098_v8 }
0x23e1   :  { %8880 = vmatpush2.bf16.msra.mxu0 %v18251_v20  ;;  %v18274_v20 = vld [vmem:[#allocation13 + $0x154] ss:$8 sps:$4 sm:$0xff]  }
0x23e2   :  { %8881 = vmatprep.subr.bf16.mxu0 %v18256_v42  ;;  %9200 = vmatprep.subr.bf16.mxu1 %v18274_v20  ;;  %v18277_v42 = vld [vmem:[#allocation13 + $0x144] ss:$8 sps:$4 sm:$0xff]  }
0x23e3   :  { %9201 = vmatpush1.bf16.msra.mxu1 %v18272_v32 }
0x23e4   :  { %9202 = vmatprep.subr.bf16.mxu1 %v18277_v42 }
0x23e5   :  { %8882 = vmatpush2.bf16.msra.mxu0 %v18254_v41  ;;  %v18275_v41 = vld [vmem:[#allocation13 + $0x140] ss:$8 sps:$4 sm:$0xff]  }
0x23e6   :  { %8883 = vmatprep.subr.bf16.mxu0 %v18259_v28  ;;  %v18280_v28 = vld [vmem:[#allocation13 + $0x134] ss:$8 sps:$4 sm:$0xff]  }
0x23e7   :  { %9203 = vmatpush1.bf16.msra.mxu1 %v18275_v41 }
0x23e8   :  { %9204 = vmatprep.subr.bf16.mxu1 %v18280_v28  ;;  %v8971_v28 = vrot.slane %v8961_v15, %v19098_v8  ;;  %v18335_v15 = vld [vmem:[#allocation13 + $0x200] ss:$8 sps:$4 sm:$0xff]  }
0x23e9   :  { %8884 = vmatpush2.bf16.msra.mxu0 %v18257_v43  ;;  %v18278_v43 = vld [vmem:[#allocation13 + $0x130] ss:$8 sps:$4 sm:$0xff]  }
0x23ea   :  { %8885 = vmatprep.subr.bf16.mxu0 %v18262_v44  ;;  %v18283_v44 = vld [vmem:[#allocation13 + $0x124] ss:$8 sps:$4 sm:$0xff]  }
0x23eb   :  { %9205 = vmatpush1.bf16.msra.mxu1 %v18278_v43 }
0x23ec   :  { %9206 = vmatprep.subr.bf16.mxu1 %v18283_v44  ;;  %v8967_v44 = vrot.slane %v8957_v9, %v19098_v8 }
0x2447   :  { %v8584_v46 = vpop.xlane.xlu0 %8583 }
0x2448   :  { %v8588_v24 = vmul.f32 0.00390625, %v8584_v46  ;;  %v8682_v46 = vrot.slane %v19712_v13, %v19049_v53 }
0x244a   :  { %v8590_v33 = vsub.f32 %v8578_v4, %v8588_v24  ;;  %v8591_v2 = vsub.f32 %v8579_v0, %v8588_v24  ;;  %v18260_v4 = vld [vmem:[#allocation13 + $0x90] ss:$8 sps:$4 sm:$0xff]   ;;  %v18265_v0 = vld [vmem:[#allocation13 + $0x84] ss:$8 sps:$4 sm:$0xff]   ;;  %v8686_v24 = vrot.slane %v19712_v13, %v19046_v52 }
0x244b   :  { %v8587_v51 = vpop.xlane.xlu1 %8586  ;;  %8886 = vmatpush2.bf16.msra.mxu0 %v18260_v4  ;;  %v18281_v4 = vld [vmem:[#allocation13 + $0x120] ss:$8 sps:$4 sm:$0xff]  }
0x244c   :  { %v8589_v26 = vmul.f32 0.00390625, %v8587_v51  ;;  %v8594_v12 = vmul.f32 %v8590_v33, %v8590_v33  ;;  %v8595_v37 = vmul.f32 %v8591_v2, %v8591_v2  ;;  %8887 = vmatprep.subr.bf16.mxu0 %v18265_v0  ;;  %v18286_v0 = vld [vmem:[#allocation13 + $0x114] ss:$8 sps:$4 sm:$0xff]   ;;  %9207 = vmatpush1.bf16.msra.mxu1 %v18281_v4 }
0x244d   :  { %9208 = vmatprep.subr.bf16.mxu1 %v18286_v0 }
0x244e   :  { %v8592_v1 = vsub.f32 %v8580_v36, %v8589_v26  ;;  %v8593_v30 = vsub.f32 %v8581_v3, %v8589_v26  ;;  %v8598_v23 = vadd.f32 %v8595_v37, %v8594_v12 }
0x244f   :  { %8888 = vmatpush2.bf16.msra.mxu0 %v18263_v47  ;;  %v18284_v47 = vld [vmem:[#allocation13 + $0x110] ss:$8 sps:$4 sm:$0xff]  }
0x2450   :  { %8599 = vadd.xlane.f32.xlu0 %v8598_v23  ;;  %v8596_v45 = vmul.f32 %v8592_v1, %v8592_v1  ;;  %v8597_v34 = vmul.f32 %v8593_v30, %v8593_v30  ;;  %9209 = vmatpush1.bf16.msra.mxu1 %v18284_v47 }
0x2452   :  { %v8601_v40 = vadd.f32 %v8597_v34, %v8596_v45 }
0x2454   :  { %8602 = vadd.xlane.f32.xlu1 %v8601_v40 }
0x24d9   :  { %v8600_v56 = vpop.xlane.xlu0 %8599 }
0x24da   :  { %v8604_v57 = vmul.f32 0.00390625, %v8600_v56  ;;  %v18289_v56 = vld [vmem:[#allocation13 + $0x104] ss:$8 sps:$4 sm:$0xff]  }
0x24db   :  { %9210 = vmatprep.subr.bf16.mxu1 %v18289_v56 }
0x24dc   :  { %v8606_v58 = vadd.f32 1e-05, %v8604_v57  ;;  %v18287_v57 = vld [vmem:[#allocation13 + $0x100] ss:$8 sps:$4 sm:$0xff]  }
0x24dd   :  { %v8603_v61 = vpop.xlane.xlu1 %8602  ;;  %9211 = vmatpush1.bf16.msra.mxu1 %v18287_v57 }
0x24de   :  { %18494 = vrsqrt.f32 %v8606_v58  ;;  %v8605_v36 = vmul.f32 0.00390625, %v8603_v61 }
0x24e0   :  { %v8607_v3 = vadd.f32 1e-05, %v8605_v36 }
0x24e2   :  { %18496 = vrsqrt.f32 %v8607_v3 }
0x24eb   :  { %v18495_v7 = vpop.eup %18494 }
0x24ec   :  { %v8611_v48 = vmul.f32 %v18495_v7, %v8591_v2  ;;  %v8610_v27 = vmul.f32 %v18495_v7, %v8590_v33  ;;  %v8692_v33 = vrot.slane %v8682_v46, %v19049_v53  ;;  %v8696_v2 = vrot.slane %v8686_v24, %v19049_v53  ;;  %v18307_v46 = vld [vmem:[#allocation13 + $0x1a4] ss:$8 sps:$4 sm:$0xff]   ;;  %v18305_v24 = vld [vmem:[#allocation13 + $0x1a0] ss:$8 sps:$4 sm:$0xff]  }
0x24ee   :  { %v8623_v5 = vmul.f32 %v8621_v50, %v8611_v48  ;;  %v8622_v59 = vmul.f32 %v8617_v18, %v8610_v27 }
0x24ef   :  { %v18497_v39 = vpop.eup %18496 }
0x24f0   :  { %v8613_v62 = vmul.f32 %v18497_v39, %v8593_v30  ;;  %v8635_v11 = vadd.f32 %v8633_v38, %v8623_v5  ;;  %v8612_v63 = vmul.f32 %v18497_v39, %v8592_v1  ;;  %v8634_v29 = vadd.f32 %v8629_v60, %v8622_v59 }
0x24f2   :  { %v8625_v31 = vmul.f32 %v8621_v50, %v8613_v62  ;;  %8639 = vst [vmem:[%s20009_s15 + $0x8] sm:$0xff] %v8635_v11  ;;  %v8624_v10 = vmul.f32 %v8617_v18, %v8612_v63  ;;  %8638 = vst [vmem:[%s20009_s15] sm:$0xff] %v8634_v29  ;;  %v18292_v62 = vld [vmem:[#allocation13 + $0x1f4] ss:$8 sps:$4 sm:$0xff]   ;;  %v18295_v63 = vld [vmem:[#allocation13 + $0x1e4] ss:$8 sps:$4 sm:$0xff]  }
0x24f3   :  { %9212 = vmatprep.subr.bf16.mxu1 %v18292_v62 }
0x24f4   :  { %v8637_v35 = vadd.f32 %v8633_v38, %v8625_v31  ;;  %v8636_v21 = vadd.f32 %v8629_v60, %v8624_v10  ;;  %v18298_v31 = vld [vmem:[#allocation13 + $0x1d4] ss:$8 sps:$4 sm:$0xff]   ;;  %v18296_v10 = vld [vmem:[#allocation13 + $0x1d0] ss:$8 sps:$4 sm:$0xff]  }
0x24f6   :  { %15983 = vst [vmem:[%s20009_s15 + $0x18] sm:$0xff] %v8637_v35  ;;  %v8645_v19 = vpack.c.bf16 %v8637_v35, %v8635_v11  ;;  %15982 = vst [vmem:[%s20009_s15 + $0x10] sm:$0xff] %v8636_v21  ;;  %v8644_v22 = vpack.c.bf16 %v8636_v21, %v8634_v29  ;;  %v18290_v11 = vld [vmem:[#allocation13 + $0x1f0] ss:$8 sps:$4 sm:$0xff]   ;;  %v18293_v29 = vld [vmem:[#allocation13 + $0x1e0] ss:$8 sps:$4 sm:$0xff]  }
0x24f7   :  { %9213 = vmatpush2.bf16.msra.mxu1 %v18290_v11  ;;  %v18301_v35 = vld [vmem:[#allocation13 + $0x1c4] ss:$8 sps:$4 sm:$0xff]   ;;  %v18299_v21 = vld [vmem:[#allocation13 + $0x1c0] ss:$8 sps:$4 sm:$0xff]  }
0x24f8   :  { %8889 = vmatprep.mubr.bf16.mxu0 %v8645_v19  ;;  %9214 = vmatprep.subr.bf16.mxu1 %v18295_v63  ;;  %v18304_v19 = vld [vmem:[#allocation13 + $0x1b4] ss:$8 sps:$4 sm:$0xff]  }
0x24f9   :  { %8890 = vmatmul.mubr.bf16.vlgmr.msra.gmra.mxu0 %v8644_v22  ;;  %v18302_v22 = vld [vmem:[#allocation13 + $0x1b0] ss:$8 sps:$4 sm:$0xff]  }
0x24fb   :  { %9215 = vmatpush2.bf16.msra.mxu1 %v18293_v29 }
0x24fc   :  { %9216 = vmatprep.subr.bf16.mxu1 %v18298_v31 }
0x24ff   :  { %9217 = vmatpush2.bf16.msra.mxu1 %v18296_v10 }
0x2500   :  { %9218 = vmatprep.subr.bf16.mxu1 %v18301_v35 }
0x2503   :  { %9219 = vmatpush2.bf16.msra.mxu1 %v18299_v21 }
0x2504   :  { %9220 = vmatprep.subr.bf16.mxu1 %v18304_v19 }
0x2507   :  { %9221 = vmatpush2.bf16.msra.mxu1 %v18302_v22 }
0x2508   :  { %9222 = vmatprep.subr.bf16.mxu1 %v18307_v46  ;;  %v18314_v46 = vld [vmem:[#allocation13 + $0x270] ss:$8 sps:$4 sm:$0xff]  }
0x250b   :  { %9223 = vmatpush2.bf16.msra.mxu1 %v18305_v24  ;;  %v18316_v24 = vld [vmem:[#allocation13 + $0x274] ss:$8 sps:$4 sm:$0xff]  }
0x250c   :  { %9535 = vmatprep.subr.bf16.mxu0 %v18316_v24 }
0x250d   :  { %9536 = vmatpush1.bf16.msra.mxu0 %v18314_v46 }
0x25b9   :  { %v8891_v51 = vpop.f32.mrf.mxu0 }
0x25ba   :  { %v8892_v12 = vadd.f32 %v8891_v51, %v8692_v33  ;;  %v18313_v51 = vld [vmem:[#allocation13 + $0x184] ss:$8 sps:$4 sm:$0xff]  }
0x25bb   :  { %v8893_v26 = vpop.f32.mrf.mxu0 }
0x25bc   :  { %v8894_v37 = vadd.f32 %v8893_v26, %v8696_v2  ;;  %v18311_v26 = vld [vmem:[#allocation13 + $0x180] ss:$8 sps:$4 sm:$0xff]  }
0x25bd   :  { %v8895_v1 = vpop.f32.mrf.mxu0 }
0x25be   :  { %v8900_v30 = vadd.f32 %v8894_v37, %v8892_v12  ;;  %v8896_v45 = vadd.f32 %v8895_v1, %v8692_v33  ;;  %v18310_v33 = vld [vmem:[#allocation13 + $0x194] ss:$8 sps:$4 sm:$0xff]  }
0x25bf   :  { %v8897_v23 = vpop.f32.mrf.mxu0  ;;  %9224 = vmatprep.subr.bf16.mxu1 %v18310_v33  ;;  %v18319_v33 = vld [vmem:[#allocation13 + $0x264] ss:$8 sps:$4 sm:$0xff]  }
0x25c0   :  { %v8898_v34 = vadd.f32 %v8897_v23, %v8696_v2  ;;  %8901 = vadd.xlane.f32.xlu0 %v8900_v30  ;;  %v18308_v2 = vld [vmem:[#allocation13 + $0x190] ss:$8 sps:$4 sm:$0xff]   ;;  %9537 = vmatprep.subr.bf16.mxu0 %v18319_v33 }
0x25c1   :  { %9225 = vmatpush2.bf16.msra.mxu1 %v18308_v2  ;;  %v18317_v2 = vld [vmem:[#allocation13 + $0x260] ss:$8 sps:$4 sm:$0xff]  }
0x25c2   :  { %v8903_v40 = vadd.f32 %v8898_v34, %v8896_v45  ;;  %9226 = vmatprep.subr.bf16.mxu1 %v18313_v51  ;;  %v18322_v51 = vld [vmem:[#allocation13 + $0x254] ss:$8 sps:$4 sm:$0xff]   ;;  %9538 = vmatpush1.bf16.msra.mxu0 %v18317_v2 }
0x25c3   :  { %9539 = vmatprep.subr.bf16.mxu0 %v18322_v51 }
0x25c4   :  { %8904 = vadd.xlane.f32.xlu1 %v8903_v40  ;;  %v8935_v40 = vrot.slane %v19712_v13, %v19133_v16 }
0x25c5   :  { %9227 = vmatpush2.bf16.msra.mxu1 %v18311_v26  ;;  %v18320_v26 = vld [vmem:[#allocation13 + $0x250] ss:$8 sps:$4 sm:$0xff]  }
0x25c6   :  { %v8945_v14 = vrot.slane %v8935_v40, %v19133_v16  ;;  %9540 = vmatpush1.bf16.msra.mxu0 %v18320_v26  ;;  %v18332_v40 = vld [vmem:[#allocation13 + $0x210] ss:$8 sps:$4 sm:$0xff]  }
0x2649   :  { %v8902_v58 = vpop.xlane.xlu0 %8901 }
0x264a   :  { %v8906_v61 = vmul.f32 0.00390625, %v8902_v58 }
0x264c   :  { %v8908_v36 = vsub.f32 %v8892_v12, %v8906_v61  ;;  %v8909_v3 = vsub.f32 %v8894_v37, %v8906_v61 }
0x264d   :  { %v8905_v50 = vpop.xlane.xlu1 %8904 }
0x264e   :  { %v8907_v18 = vmul.f32 0.00390625, %v8905_v50  ;;  %v8912_v7 = vmul.f32 %v8908_v36, %v8908_v36  ;;  %v8913_v48 = vmul.f32 %v8909_v3, %v8909_v3 }
0x2650   :  { %v19720_v38 = vsub.f32 %v8896_v45, %v8907_v18  ;;  %v8911_v27 = vsub.f32 %v8898_v34, %v8907_v18  ;;  %v8916_v60 = vadd.f32 %v8913_v48, %v8912_v7  ;;  %v8939_v34 = vrot.slane %v19712_v13, %v19222_v55 }
0x2652   :  { %8917 = vadd.xlane.f32.xlu0 %v8916_v60  ;;  %v8914_v5 = vmul.f32 %v19720_v38, %v19720_v38  ;;  %v8915_v59 = vmul.f32 %v8911_v27, %v8911_v27  ;;  %v8949_v25 = vrot.slane %v8939_v34, %v19133_v16  ;;  %v18334_v34 = vld [vmem:[#allocation13 + $0x214] ss:$8 sps:$4 sm:$0xff]  }
0x2654   :  { %v8919_v39 = vadd.f32 %v8915_v59, %v8914_v5  ;;  %v19737_v5 = vld [vmem:[#allocation15 + $0x8] sm:$0x77] }
0x2655   :  { %v9300_v24 = vrot.slane %v19737_v5, %v19093_v6  ;;  %v9296_v2 = vrot.slane %v19737_v5, %v19098_v8 }
0x2656   :  { %8920 = vadd.xlane.f32.xlu1 %v8919_v39 }
0x26db   :  { %v8918_v12 = vpop.xlane.xlu0 %8917 }
0x26dc   :  { %v8922_v37 = vmul.f32 0.00390625, %v8918_v12  ;;  %v18325_v12 = vld [vmem:[#allocation13 + $0x244] ss:$8 sps:$4 sm:$0xff]  }
0x26dd   :  { %9541 = vmatprep.subr.bf16.mxu0 %v18325_v12 }
0x26de   :  { %v8924_v1 = vadd.f32 1e-05, %v8922_v37  ;;  %v18323_v37 = vld [vmem:[#allocation13 + $0x240] ss:$8 sps:$4 sm:$0xff]  }
0x26df   :  { %v8921_v30 = vpop.xlane.xlu1 %8920  ;;  %9542 = vmatpush1.bf16.msra.mxu0 %v18323_v37 }
0x26e0   :  { %18498 = vrsqrt.f32 %v8924_v1  ;;  %v8923_v23 = vmul.f32 0.00390625, %v8921_v30  ;;  %v18328_v1 = vld [vmem:[#allocation13 + $0x234] ss:$8 sps:$4 sm:$0xff]   ;;  %v18326_v30 = vld [vmem:[#allocation13 + $0x230] ss:$8 sps:$4 sm:$0xff]  }
0x26e1   :  { %9543 = vmatprep.subr.bf16.mxu0 %v18328_v1  ;;  %v9310_v1 = vrot.slane %v9300_v24, %v19098_v8  ;;  %v9704_v24 = vld [vmem:[#allocation16 + $0x160] sm:$0xff] }
0x26e2   :  { %v8925_v45 = vadd.f32 1e-05, %v8923_v23  ;;  %v18331_v23 = vld [vmem:[#allocation13 + $0x224] ss:$8 sps:$4 sm:$0xff]  }
0x26e3   :  { %9544 = vmatpush1.bf16.msra.mxu0 %v18326_v30 }
0x26e4   :  { %18500 = vrsqrt.f32 %v8925_v45  ;;  %v18329_v45 = vld [vmem:[#allocation13 + $0x220] ss:$8 sps:$4 sm:$0xff]   ;;  %9545 = vmatprep.subr.bf16.mxu0 %v18331_v23  ;;  %v9306_v23 = vrot.slane %v9296_v2, %v19098_v8 }
0x26e5   :  { %v9705_v2 = vld [vmem:[#allocation16 + $0x168] sm:$0xff] }
0x26e7   :  { %9546 = vmatpush1.bf16.msra.mxu0 %v18329_v45 }
0x26e8   :  { %9547 = vmatprep.subr.bf16.mxu0 %v18334_v34 }
0x26eb   :  { %9548 = vmatpush1.bf16.msra.mxu0 %v18332_v40 }
0x26ed   :  { %v18499_v20 = vpop.eup %18498 }
0x26ee   :  { %v8929_v32 = vmul.f32 %v18499_v20, %v8909_v3  ;;  %v8928_v42 = vmul.f32 %v18499_v20, %v8908_v36 }
0x26f0   :  { %v8951_v41 = vmul.f32 %v8949_v25, %v8929_v32  ;;  %v8950_v43 = vmul.f32 %v8945_v14, %v8928_v42 }
0x26f1   :  { %v18501_v4 = vpop.eup %18500 }
0x26f2   :  { %v8931_v0 = vmul.f32 %v18501_v4, %v8911_v27  ;;  %v8930_v47 = vmul.f32 %v18501_v4, %v19720_v38  ;;  %v8973_v57 = vadd.f32 %v8971_v28, %v8951_v41  ;;  %v8972_v61 = vadd.f32 %v8967_v44, %v8950_v43 }
0x26f3   :  { %v9021_v27 = vrot.slane %v19737_v5, %v19049_v53  ;;  %v9025_v38 = vrot.slane %v19737_v5, %v19046_v52 }
0x26f4   :  { %v8953_v56 = vmul.f32 %v8949_v25, %v8931_v0  ;;  %v8952_v58 = vmul.f32 %v8945_v14, %v8930_v47  ;;  %v8977_v13 = vmax.f32 %v8973_v57, 0.0  ;;  %v8976_v3 = vmax.f32 %v8972_v61, 0.0  ;;  %v18337_v25 = vld [vmem:[#allocation13 + $0x204] ss:$8 sps:$4 sm:$0xff]   ;;  %v18338_v61 = vld [vmem:[#allocation13 + $0x2f0] ss:$8 sps:$4 sm:$0xff]  }
0x26f5   :  { %v9031_v59 = vrot.slane %v9021_v27, %v19049_v53  ;;  %v9035_v39 = vrot.slane %v9025_v38, %v19049_v53  ;;  %9549 = vmatprep.subr.bf16.mxu0 %v18337_v25  ;;  %v18355_v27 = vld [vmem:[#allocation13 + $0x2a4] ss:$8 sps:$4 sm:$0xff]   ;;  %v18353_v38 = vld [vmem:[#allocation13 + $0x2a0] ss:$8 sps:$4 sm:$0xff]  }
0x26f6   :  { %v8975_v50 = vadd.f32 %v8971_v28, %v8953_v56  ;;  %v8974_v18 = vadd.f32 %v8967_v44, %v8952_v58  ;;  %9550 = vmatpush1.bf16.msra.mxu0 %v18335_v15  ;;  %v18340_v58 = vld [vmem:[#allocation13 + $0x2f4] ss:$8 sps:$4 sm:$0xff]  }
0x26f7   :  { %9551 = vmatprep.subr.bf16.mxu0 %v18340_v58 }
0x26f8   :  { %v8979_v7 = vmax.f32 %v8975_v50, 0.0  ;;  %v8978_v36 = vmax.f32 %v8974_v18, 0.0  ;;  %v18343_v50 = vld [vmem:[#allocation13 + $0x2e4] ss:$8 sps:$4 sm:$0xff]   ;;  %v18341_v18 = vld [vmem:[#allocation13 + $0x2e0] ss:$8 sps:$4 sm:$0xff]  }
0x26fa   :  { %v8983_v48 = vpack.c.bf16 %v8979_v7, %v8977_v13  ;;  %v8982_v60 = vpack.c.bf16 %v8978_v36, %v8976_v3  ;;  %9552 = vmatpush2.bf16.msra.mxu0 %v18338_v61  ;;  %v18346_v13 = vld [vmem:[#allocation13 + $0x2d4] ss:$8 sps:$4 sm:$0xff]   ;;  %v18344_v7 = vld [vmem:[#allocation13 + $0x2d0] ss:$8 sps:$4 sm:$0xff]   ;;  %v18349_v3 = vld [vmem:[#allocation13 + $0x2c4] ss:$8 sps:$4 sm:$0xff]  }
0x26fb   :  { %9553 = vmatprep.subr.bf16.mxu0 %v18343_v50  ;;  %v18347_v36 = vld [vmem:[#allocation13 + $0x2c0] ss:$8 sps:$4 sm:$0xff]  }
0x26fc   :  { %9228 = vmatprep.mubr.bf16.mxu1 %v8983_v48  ;;  %v18352_v48 = vld [vmem:[#allocation13 + $0x2b4] ss:$8 sps:$4 sm:$0xff]  }
0x26fd   :  { %9229 = vmatmul.mubr.bf16.vlgmr.msra.gmra.mxu1 %v8982_v60  ;;  %v18350_v60 = vld [vmem:[#allocation13 + $0x2b0] ss:$8 sps:$4 sm:$0xff]  }
0x26fe   :  { %9554 = vmatpush2.bf16.msra.mxu0 %v18341_v18 }
0x26ff   :  { %9555 = vmatprep.subr.bf16.mxu0 %v18346_v13 }
0x2702   :  { %9556 = vmatpush2.bf16.msra.mxu0 %v18344_v7 }
0x2703   :  { %9557 = vmatprep.subr.bf16.mxu0 %v18349_v3 }
0x2706   :  { %9558 = vmatpush2.bf16.msra.mxu0 %v18347_v36 }
0x2707   :  { %9559 = vmatprep.subr.bf16.mxu0 %v18352_v48 }
0x270a   :  { %9560 = vmatpush2.bf16.msra.mxu0 %v18350_v60 }
0x270b   :  { %9561 = vmatprep.subr.bf16.mxu0 %v18355_v27  ;;  %v9716_v27 = vld [vmem:[#allocation16 + $0x1c0] sm:$0xff] }
0x270e   :  { %9562 = vmatpush2.bf16.msra.mxu0 %v18353_v38  ;;  %v9720_v38 = vld [vmem:[#allocation16 + $0x1e0] sm:$0xff] }
0x27bd   :  { %v9230_v62 = vpop.f32.mrf.mxu1 }
0x27be   :  { %v9231_v63 = vadd.f32 %v9230_v62, %v9031_v59  ;;  %v18361_v62 = vld [vmem:[#allocation13 + $0x284] ss:$8 sps:$4 sm:$0xff]  }
0x27bf   :  { %v9232_v11 = vpop.f32.mrf.mxu1 }
0x27c0   :  { %v9233_v29 = vadd.f32 %v9232_v11, %v9035_v39  ;;  %v18359_v11 = vld [vmem:[#allocation13 + $0x280] ss:$8 sps:$4 sm:$0xff]  }
0x27c1   :  { %v9234_v31 = vpop.f32.mrf.mxu1 }
0x27c2   :  { %v9239_v10 = vadd.f32 %v9233_v29, %v9231_v63  ;;  %v9235_v21 = vadd.f32 %v9234_v31, %v9031_v59  ;;  %v18358_v59 = vld [vmem:[#allocation13 + $0x294] ss:$8 sps:$4 sm:$0xff]  }
0x27c3   :  { %v9236_v35 = vpop.f32.mrf.mxu1  ;;  %9563 = vmatprep.subr.bf16.mxu0 %v18358_v59  ;;  %v9717_v59 = vld [vmem:[#allocation16 + $0x1c8] sm:$0xff] }
0x27c4   :  { %v9237_v19 = vadd.f32 %v9236_v35, %v9035_v39  ;;  %9240 = vadd.xlane.f32.xlu0 %v9239_v10  ;;  %v18356_v39 = vld [vmem:[#allocation13 + $0x290] ss:$8 sps:$4 sm:$0xff]  }
0x27c5   :  { %9564 = vmatpush2.bf16.msra.mxu0 %v18356_v39  ;;  %v16136_v39 = vcombine.low %v9716_v27, %v9720_v38 }
0x27c6   :  { %v9242_v22 = vadd.f32 %v9237_v19, %v9235_v21  ;;  %9565 = vmatprep.subr.bf16.mxu0 %v18361_v62  ;;  %v16137_v62 = vcombine.high %v9716_v27, %v9720_v38 }
0x27c8   :  { %9243 = vadd.xlane.f32.xlu1 %v9242_v22  ;;  %v9274_v22 = vrot.slane %v19737_v5, %v19133_v16  ;;  %10470 = vmatprep.subr.bf16.mxu1 %v16137_v62  ;;  %v9660_v62 = vld [vmem:[#allocation16] sm:$0xff] }
0x27c9   :  { %9566 = vmatpush2.bf16.msra.mxu0 %v18359_v11  ;;  %v9721_v11 = vld [vmem:[#allocation16 + $0x1e8] sm:$0xff]  ;;  %10471 = vmatpush1.bf16.msra.mxu1 %v16136_v39 }
0x27ca   :  { %v9284_v33 = vrot.slane %v9274_v22, %v19133_v16  ;;  %v9700_v22 = vld [vmem:[#allocation16 + $0x140] sm:$0xff] }
0x284d   :  { %v9241_v14 = vpop.xlane.xlu0 %9240 }
0x284e   :  { %v9245_v9 = vmul.f32 0.00390625, %v9241_v14 }
0x2850   :  { %v9247_v20 = vsub.f32 %v9231_v63, %v9245_v9  ;;  %v9248_v32 = vsub.f32 %v9233_v29, %v9245_v9 }
0x2851   :  { %v9244_v42 = vpop.xlane.xlu1 %9243 }
0x2852   :  { %v9246_v41 = vmul.f32 0.00390625, %v9244_v42  ;;  %v9251_v28 = vmul.f32 %v9247_v20, %v9247_v20  ;;  %v9252_v43 = vmul.f32 %v9248_v32, %v9248_v32 }
0x2854   :  { %v19745_v44 = vsub.f32 %v9235_v21, %v9246_v41  ;;  %v9250_v4 = vsub.f32 %v9237_v19, %v9246_v41  ;;  %v9255_v0 = vadd.f32 %v9252_v43, %v9251_v28  ;;  %v9278_v19 = vrot.slane %v19737_v5, %v19222_v55 }
0x2856   :  { %9256 = vadd.xlane.f32.xlu0 %v9255_v0  ;;  %v9253_v47 = vmul.f32 %v19745_v44, %v19745_v44  ;;  %v9254_v56 = vmul.f32 %v9250_v4, %v9250_v4  ;;  %v9288_v46 = vrot.slane %v9278_v19, %v19133_v16  ;;  %v9713_v19 = vld [vmem:[#allocation16 + $0x1a8] sm:$0xff] }
0x2858   :  { %v9258_v57 = vadd.f32 %v9254_v56, %v9253_v47  ;;  %v19762_v47 = vld [vmem:[#allocation15 + $0x10] sm:$0x77] }
0x285a   :  { %9259 = vadd.xlane.f32.xlu1 %v9258_v57 }
0x28df   :  { %v9257_v63 = vpop.xlane.xlu0 %9256 }
0x28e0   :  { %v9261_v29 = vmul.f32 0.00390625, %v9257_v63  ;;  %v9708_v63 = vld [vmem:[#allocation16 + $0x180] sm:$0xff] }
0x28e2   :  { %v9263_v31 = vadd.f32 1e-05, %v9261_v29  ;;  %v9712_v29 = vld [vmem:[#allocation16 + $0x1a0] sm:$0xff] }
0x28e3   :  { %v9260_v10 = vpop.xlane.xlu1 %9259 }
0x28e4   :  { %18502 = vrsqrt.f32 %v9263_v31  ;;  %v9262_v35 = vmul.f32 0.00390625, %v9260_v10  ;;  %v16138_v31 = vcombine.low %v9717_v59, %v9721_v11  ;;  %v16139_v10 = vcombine.high %v9717_v59, %v9721_v11  ;;  %v9664_v11 = vld [vmem:[#allocation16 + $0x20] sm:$0xff] }
0x28e6   :  { %v9264_v21 = vadd.f32 1e-05, %v9262_v35  ;;  %v16129_v35 = vcombine.high %v9708_v63, %v9712_v29  ;;  %10513 = vmatprep.subr.bf16.mxu0 %v16139_v10 }
0x28e8   :  { %18504 = vrsqrt.f32 %v9264_v21  ;;  %v9709_v21 = vld [vmem:[#allocation16 + $0x188] sm:$0xff]  ;;  %10472 = vmatprep.subr.bf16.mxu1 %v16129_v35  ;;  %v16081_v35 = vcombine.high %v9660_v62, %v9664_v11 }
0x28f1   :  { %v18503_v51 = vpop.eup %18502 }
0x28f2   :  { %v9268_v26 = vmul.f32 %v18503_v51, %v9248_v32  ;;  %v9267_v12 = vmul.f32 %v18503_v51, %v9247_v20  ;;  %v16128_v51 = vcombine.low %v9708_v63, %v9712_v29  ;;  %v9661_v63 = vld [vmem:[#allocation16 + $0x8] sm:$0xff] }
0x28f3   :  { %v9665_v29 = vld [vmem:[#allocation16 + $0x28] sm:$0xff] }
0x28f4   :  { %v9290_v37 = vmul.f32 %v9288_v46, %v9268_v26  ;;  %v9289_v30 = vmul.f32 %v9284_v33, %v9267_v12  ;;  %v16130_v26 = vcombine.low %v9709_v21, %v9713_v19  ;;  %v16121_v12 = vcombine.high %v9700_v22, %v9704_v24  ;;  %10473 = vmatpush1.bf16.msra.mxu1 %v16128_v51 }
0x28f5   :  { %v18505_v45 = vpop.eup %18504 }
0x28f6   :  { %v9270_v34 = vmul.f32 %v18505_v45, %v9250_v4  ;;  %v9269_v40 = vmul.f32 %v18505_v45, %v19745_v44  ;;  %v9312_v15 = vadd.f32 %v9310_v1, %v9290_v37  ;;  %v9311_v9 = vadd.f32 %v9306_v23, %v9289_v30  ;;  %v9696_v30 = vld [vmem:[#allocation16 + $0x120] sm:$0xff]  ;;  %v9697_v45 = vld [vmem:[#allocation16 + $0x128] sm:$0xff]  ;;  %10474 = vmatprep.subr.bf16.mxu1 %v16121_v12 }
0x28f7   :  { %v9360_v4 = vrot.slane %v19762_v47, %v19049_v53  ;;  %v9364_v44 = vrot.slane %v19762_v47, %v19046_v52 }
0x28f8   :  { %v9292_v25 = vmul.f32 %v9288_v46, %v9270_v34  ;;  %v9291_v14 = vmul.f32 %v9284_v33, %v9269_v40  ;;  %v9316_v5 = vmax.f32 %v9312_v15, 0.0  ;;  %v9315_v32 = vmax.f32 %v9311_v9, 0.0  ;;  %v9701_v33 = vld [vmem:[#allocation16 + $0x148] sm:$0xff]  ;;  %v9688_v9 = vld [vmem:[#allocation16 + $0xe0] sm:$0xff] }
0x28f9   :  { %v9370_v56 = vrot.slane %v9360_v4, %v19049_v53  ;;  %v9374_v57 = vrot.slane %v9364_v44, %v19049_v53  ;;  %v16131_v46 = vcombine.high %v9709_v21, %v9713_v19  ;;  %v16123_v37 = vcombine.high %v9701_v33, %v9705_v2  ;;  %v9677_v4 = vld [vmem:[#allocation16 + $0x88] sm:$0xff] }
0x28fa   :  { %v9314_v42 = vadd.f32 %v9310_v1, %v9292_v25  ;;  %v9313_v41 = vadd.f32 %v9306_v23, %v9291_v14  ;;  %v9692_v1 = vld [vmem:[#allocation16 + $0x100] sm:$0xff]  ;;  %v9693_v23 = vld [vmem:[#allocation16 + $0x108] sm:$0xff]  ;;  %v16120_v34 = vcombine.low %v9700_v22, %v9704_v24  ;;  %v16122_v40 = vcombine.low %v9701_v33, %v9705_v2 }
0x28fb   :  { %v16113_v25 = vcombine.high %v9692_v1, %v9696_v30  ;;  %v16115_v15 = vcombine.high %v9693_v23, %v9697_v45  ;;  %v9684_v14 = vld [vmem:[#allocation16 + $0xc0] sm:$0xff]  ;;  %v9681_v44 = vld [vmem:[#allocation16 + $0xa8] sm:$0xff]  ;;  %v16083_v21 = vcombine.high %v9661_v63, %v9665_v29  ;;  %v16080_v19 = vcombine.low %v9660_v62, %v9664_v11 }
0x28fc   :  { %v9318_v28 = vmax.f32 %v9314_v42, 0.0  ;;  %v9317_v20 = vmax.f32 %v9313_v41, 0.0  ;;  %v9685_v42 = vld [vmem:[#allocation16 + $0xc8] sm:$0xff]  ;;  %10475 = vmatpush1.bf16.msra.mxu1 %v16120_v34  ;;  %v16098_v38 = vcombine.low %v9677_v4, %v9681_v44  ;;  %v16082_v22 = vcombine.low %v9661_v63, %v9665_v29  ;;  %v9780_v34 = vld [vmem:[#allocation16 + $0x3c0] sm:$0xff] }
0x28fd   :  { %v9689_v41 = vld [vmem:[#allocation16 + $0xe8] sm:$0xff]  ;;  %10476 = vmatprep.subr.bf16.mxu1 %v16113_v25  ;;  %v9748_v62 = vld [vmem:[#allocation16 + $0x2c0] sm:$0xff] }
0x28fe   :  { %v9322_v43 = vpack.c.bf16 %v9318_v28, %v9316_v5  ;;  %v9321_v0 = vpack.c.bf16 %v9317_v20, %v9315_v32  ;;  %v16112_v5 = vcombine.low %v9692_v1, %v9696_v30  ;;  %v16114_v28 = vcombine.low %v9693_v23, %v9697_v45  ;;  %v9781_v25 = vld [vmem:[#allocation16 + $0x3c8] sm:$0xff]  ;;  %v9752_v11 = vld [vmem:[#allocation16 + $0x2e0] sm:$0xff] }
0x28ff   :  { %v16105_v32 = vcombine.high %v9684_v14, %v9688_v9  ;;  %v16107_v20 = vcombine.high %v9685_v42, %v9689_v41 }
0x2900   :  { %9567 = vmatprep.mubr.bf16.mxu0 %v9322_v43  ;;  %v9676_v43 = vld [vmem:[#allocation16 + $0x80] sm:$0xff]  ;;  %10477 = vmatpush1.bf16.msra.mxu1 %v16112_v5  ;;  %v9773_v5 = vld [vmem:[#allocation16 + $0x388] sm:$0xff] }
0x2901   :  { %9568 = vmatmul.mubr.bf16.vlgmr.msra.gmra.mxu0 %v9321_v0  ;;  %v9680_v0 = vld [vmem:[#allocation16 + $0xa0] sm:$0xff]  ;;  %10478 = vmatprep.subr.bf16.mxu1 %v16105_v32  ;;  %v9777_v32 = vld [vmem:[#allocation16 + $0x3a8] sm:$0xff] }
0x2902   :  { %10514 = vmatpush1.bf16.msra.mxu0 %v16138_v31  ;;  %v16096_v27 = vcombine.low %v9676_v43, %v9680_v0 }
0x2903   :  { %10515 = vmatprep.subr.bf16.mxu0 %v16131_v46 }
0x2906   :  { %10516 = vmatpush1.bf16.msra.mxu0 %v16130_v26 }
0x2907   :  { %10517 = vmatprep.subr.bf16.mxu0 %v16123_v37 }
0x290a   :  { %10518 = vmatpush1.bf16.msra.mxu0 %v16122_v40  ;;  %v9784_v40 = vld [vmem:[#allocation16 + $0x3e0] sm:$0xff] }
0x290b   :  { %10519 = vmatprep.subr.bf16.mxu0 %v16115_v15  ;;  %v16201_v15 = vcombine.high %v9780_v34, %v9784_v40 }
0x290e   :  { %10520 = vmatpush1.bf16.msra.mxu0 %v16114_v28 }
0x290f   :  { %10521 = vmatprep.subr.bf16.mxu0 %v16107_v20 }
0x29c1   :  { %v9569_v58 = vpop.f32.mrf.mxu0 }
0x29c2   :  { %v19770_v50 = vadd.f32 %v9569_v58, %v9370_v56  ;;  %v16097_v58 = vcombine.high %v9676_v43, %v9680_v0  ;;  %v16194_v43 = vcombine.low %v9773_v5, %v9777_v32  ;;  %v16195_v0 = vcombine.high %v9773_v5, %v9777_v32 }
0x29c3   :  { %v9571_v61 = vpop.f32.mrf.mxu0 }
0x29c4   :  { %v19772_v18 = vadd.f32 %v9571_v61, %v9374_v57  ;;  %v16099_v61 = vcombine.high %v9677_v4, %v9681_v44  ;;  %v9764_v4 = vld [vmem:[#allocation16 + $0x340] sm:$0xff] }
0x29c5   :  { %v9573_v13 = vpop.f32.mrf.mxu0  ;;  %v9768_v44 = vld [vmem:[#allocation16 + $0x360] sm:$0xff] }
0x29c6   :  { %v9578_v7 = vadd.f32 %v19772_v18, %v19770_v50  ;;  %v19776_v36 = vadd.f32 %v9573_v13, %v9370_v56  ;;  %v16104_v56 = vcombine.low %v9684_v14, %v9688_v9  ;;  %v9668_v13 = vld [vmem:[#allocation16 + $0x40] sm:$0xff]  ;;  %v9785_v14 = vld [vmem:[#allocation16 + $0x3e8] sm:$0xff] }
0x29c7   :  { %v9575_v3 = vpop.f32.mrf.mxu0  ;;  %v16202_v9 = vcombine.low %v9781_v25, %v9785_v14 }
0x29c8   :  { %v19778_v48 = vadd.f32 %v9575_v3, %v9374_v57  ;;  %9579 = vadd.xlane.f32.xlu0 %v9578_v7  ;;  %v16106_v57 = vcombine.low %v9685_v42, %v9689_v41  ;;  %v9672_v7 = vld [vmem:[#allocation16 + $0x60] sm:$0xff]  ;;  %v9669_v3 = vld [vmem:[#allocation16 + $0x48] sm:$0xff]  ;;  %10479 = vmatpush1.bf16.msra.mxu1 %v16104_v56  ;;  %v16203_v42 = vcombine.high %v9781_v25, %v9785_v14 }
0x29c9   :  { %10480 = vmatprep.subr.bf16.mxu1 %v16097_v58  ;;  %v16089_v59 = vcombine.high %v9668_v13, %v9672_v7  ;;  %v16088_v31 = vcombine.low %v9668_v13, %v9672_v7  ;;  %v9776_v41 = vld [vmem:[#allocation16 + $0x3a0] sm:$0xff]  ;;  %v9765_v56 = vld [vmem:[#allocation16 + $0x348] sm:$0xff] }
0x29ca   :  { %v9581_v60 = vadd.f32 %v19778_v48, %v19776_v36  ;;  %10522 = vmatpush1.bf16.msra.mxu0 %v16106_v57  ;;  %v16185_v57 = vcombine.high %v9764_v4, %v9768_v44  ;;  %v9769_v58 = vld [vmem:[#allocation16 + $0x368] sm:$0xff]  ;;  %v9724_v14 = vld [vmem:[#allocation16 + $0x200] sm:$0xff] }
0x29cb   :  { %10523 = vmatprep.subr.bf16.mxu0 %v16099_v61  ;;  %v16184_v61 = vcombine.low %v9764_v4, %v9768_v44  ;;  %v16186_v13 = vcombine.low %v9765_v56, %v9769_v58  ;;  %v16187_v7 = vcombine.high %v9765_v56, %v9769_v58  ;;  %v9719_v4 = vld [vmem:[#allocation16 + $0x1d8] sm:$0xff] }
0x29cc   :  { %9582 = vadd.xlane.f32.xlu1 %v9581_v60  ;;  %v9673_v60 = vld [vmem:[#allocation16 + $0x68] sm:$0xff]  ;;  %10481 = vmatpush1.bf16.msra.mxu1 %v16096_v27  ;;  %v9723_v56 = vld [vmem:[#allocation16 + $0x1f8] sm:$0xff] }
0x29cd   :  { %v16091_v39 = vcombine.high %v9669_v3, %v9673_v60  ;;  %10482 = vmatprep.subr.bf16.mxu1 %v16089_v59  ;;  %v16090_v10 = vcombine.low %v9669_v3, %v9673_v60  ;;  %v9756_v3 = vld [vmem:[#allocation16 + $0x300] sm:$0xff]  ;;  %v9757_v27 = vld [vmem:[#allocation16 + $0x308] sm:$0xff]  ;;  %v16142_v58 = vcombine.low %v9719_v4, %v9723_v56 }
0x29ce   :  { %10524 = vmatpush1.bf16.msra.mxu0 %v16098_v38  ;;  %v9760_v60 = vld [vmem:[#allocation16 + $0x320] sm:$0xff] }
0x29cf   :  { %10525 = vmatprep.subr.bf16.mxu0 %v16091_v39  ;;  %v16176_v38 = vcombine.low %v9756_v3, %v9760_v60  ;;  %v16177_v59 = vcombine.high %v9756_v3, %v9760_v60  ;;  %v9761_v39 = vld [vmem:[#allocation16 + $0x328] sm:$0xff] }
0x29d0   :  { %10483 = vmatpush1.bf16.msra.mxu1 %v16088_v31  ;;  %v16178_v63 = vcombine.low %v9757_v27, %v9761_v39  ;;  %v16179_v29 = vcombine.high %v9757_v27, %v9761_v39  ;;  %v16169_v31 = vcombine.high %v9748_v62, %v9752_v11  ;;  %v9613_v39 = vrot.slane %v19762_v47, %v19133_v16 }
0x29d1   :  { %10484 = vmatprep.subr.bf16.mxu1 %v16081_v35  ;;  %v9753_v35 = vld [vmem:[#allocation16 + $0x2e8] sm:$0xff] }
0x29d2   :  { %10526 = vmatpush1.bf16.msra.mxu0 %v16090_v10  ;;  %v9749_v10 = vld [vmem:[#allocation16 + $0x2c8] sm:$0xff] }
0x29d3   :  { %10527 = vmatprep.subr.bf16.mxu0 %v16083_v21  ;;  %v16171_v21 = vcombine.high %v9749_v10, %v9753_v35 }
0x29d4   :  { %10485 = vmatpush1.bf16.msra.mxu1 %v16080_v19  ;;  %v9740_v19 = vld [vmem:[#allocation16 + $0x280] sm:$0xff] }
0x29d5   :  { %10486 = vmatprep.subr.bf16.mxu1 %v16201_v15 }
0x29d6   :  { %10528 = vmatpush1.bf16.msra.mxu0 %v16082_v22  ;;  %v9744_v22 = vld [vmem:[#allocation16 + $0x2a0] sm:$0xff] }
0x29d7   :  { %10529 = vmatprep.subr.bf16.mxu0 %v16203_v42  ;;  %v9729_v42 = vld [vmem:[#allocation16 + $0x228] sm:$0xff] }
0x29da   :  { %10530 = vmatpush2.bf16.msra.mxu0 %v16202_v9  ;;  %v9725_v9 = vld [vmem:[#allocation16 + $0x208] sm:$0xff] }
0x29db   :  { %10531 = vmatprep.subr.bf16.mxu0 %v16195_v0  ;;  %v9722_v0 = vld [vmem:[#allocation16 + $0x1f0] sm:$0xff] }
0x29de   :  { %10532 = vmatpush2.bf16.msra.mxu0 %v16194_v43  ;;  %v9718_v43 = vld [vmem:[#allocation16 + $0x1d0] sm:$0xff] }
0x29df   :  { %10533 = vmatprep.subr.bf16.mxu0 %v16187_v7  ;;  %v16141_v44 = vcombine.high %v9718_v43, %v9722_v0 }
0x29e2   :  { %10534 = vmatpush2.bf16.msra.mxu0 %v16186_v13 }
0x29e3   :  { %10535 = vmatprep.subr.bf16.mxu0 %v16179_v29  ;;  %v9635_v29 = vrot.slane %v19762_v47, %v19098_v8 }
0x29e6   :  { %10536 = vmatpush2.bf16.msra.mxu0 %v16178_v63  ;;  %v9623_v63 = vrot.slane %v9613_v39, %v19133_v16 }
0x29e7   :  { %10537 = vmatprep.subr.bf16.mxu0 %v16171_v21 }
0x2a51   :  { %v9580_v46 = vpop.xlane.xlu0 %9579 }
0x2a52   :  { %v9584_v24 = vmul.f32 0.00390625, %v9580_v46  ;;  %v9741_v46 = vld [vmem:[#allocation16 + $0x288] sm:$0xff] }
0x2a54   :  { %v19783_v33 = vsub.f32 %v19770_v50, %v9584_v24  ;;  %v19786_v2 = vsub.f32 %v19772_v18, %v9584_v24  ;;  %v9745_v24 = vld [vmem:[#allocation16 + $0x2a8] sm:$0xff] }
0x2a55   :  { %v9583_v51 = vpop.xlane.xlu1 %9582 }
0x2a56   :  { %v9585_v26 = vmul.f32 0.00390625, %v9583_v51  ;;  %v9590_v12 = vmul.f32 %v19783_v33, %v19783_v33  ;;  %v9591_v37 = vmul.f32 %v19786_v2, %v19786_v2  ;;  %v16168_v51 = vcombine.low %v9748_v62, %v9752_v11 }
0x2a57   :  { %v9639_v11 = vrot.slane %v19762_v47, %v19093_v6 }
0x2a58   :  { %v19793_v1 = vsub.f32 %v19776_v36, %v9585_v26  ;;  %v19796_v30 = vsub.f32 %v19778_v48, %v9585_v26  ;;  %v9594_v23 = vadd.f32 %v9591_v37, %v9590_v12  ;;  %v16200_v36 = vcombine.low %v9780_v34, %v9784_v40  ;;  %v9772_v48 = vld [vmem:[#allocation16 + $0x380] sm:$0xff] }
0x2a59   :  { %v16193_v28 = vcombine.high %v9772_v48, %v9776_v41  ;;  %v16192_v20 = vcombine.low %v9772_v48, %v9776_v41  ;;  %v16170_v26 = vcombine.low %v9749_v10, %v9753_v35  ;;  %v16161_v12 = vcombine.high %v9740_v19, %v9744_v22 }
0x2a5a   :  { %9595 = vadd.xlane.f32.xlu0 %v9594_v23  ;;  %v9592_v50 = vmul.f32 %v19793_v1, %v19793_v1  ;;  %v9593_v18 = vmul.f32 %v19796_v30, %v19796_v30  ;;  %10487 = vmatpush2.bf16.msra.mxu1 %v16200_v36  ;;  %v16163_v37 = vcombine.high %v9741_v46, %v9745_v24  ;;  %v9732_v23 = vld [vmem:[#allocation16 + $0x240] sm:$0xff] }
0x2a5b   :  { %10488 = vmatprep.subr.bf16.mxu1 %v16193_v28  ;;  %v16160_v34 = vcombine.low %v9740_v19, %v9744_v22  ;;  %10538 = vmatpush2.bf16.msra.mxu0 %v16170_v26  ;;  %v16162_v40 = vcombine.low %v9741_v46, %v9745_v24  ;;  %v9728_v36 = vld [vmem:[#allocation16 + $0x220] sm:$0xff]  ;;  %v16147_v28 = vcombine.high %v9725_v9, %v9729_v42 }
0x2a5c   :  { %v9597_v45 = vadd.f32 %v9593_v18, %v9592_v50  ;;  %v9736_v50 = vld [vmem:[#allocation16 + $0x260] sm:$0xff]  ;;  %v9733_v18 = vld [vmem:[#allocation16 + $0x248] sm:$0xff]  ;;  %10539 = vmatprep.subr.bf16.mxu0 %v16163_v37  ;;  %v16145_v5 = vcombine.high %v9724_v14, %v9728_v36  ;;  %v16144_v32 = vcombine.low %v9724_v14, %v9728_v36  ;;  %v9649_v19 = vrot.slane %v9639_v11, %v19098_v8  ;;  %v9715_v14 = vld [vmem:[#allocation16 + $0x1b8] sm:$0xff] }
0x2a5d   :  { %v16153_v25 = vcombine.high %v9732_v23, %v9736_v50  ;;  %v16152_v48 = vcombine.low %v9732_v23, %v9736_v50  ;;  %v9645_v46 = vrot.slane %v9635_v29, %v19098_v8  ;;  %v9678_v11 = vld [vmem:[#allocation16 + $0x90] sm:$0xff]  ;;  %v9679_v29 = vld [vmem:[#allocation16 + $0x98] sm:$0xff] }
0x2a5e   :  { %9598 = vadd.xlane.f32.xlu1 %v9597_v45  ;;  %10489 = vmatpush2.bf16.msra.mxu1 %v16192_v20  ;;  %v9737_v45 = vld [vmem:[#allocation16 + $0x268] sm:$0xff]  ;;  %v16146_v20 = vcombine.low %v9725_v9, %v9729_v42 }
0x2a5f   :  { %10490 = vmatprep.subr.bf16.mxu1 %v16185_v57  ;;  %v16155_v15 = vcombine.high %v9733_v18, %v9737_v45  ;;  %10540 = vmatpush2.bf16.msra.mxu0 %v16162_v40  ;;  %v16154_v41 = vcombine.low %v9733_v18, %v9737_v45  ;;  %v16140_v57 = vcombine.low %v9718_v43, %v9722_v0  ;;  %v9710_v40 = vld [vmem:[#allocation16 + $0x190] sm:$0xff] }
0x2a60   :  { %v9694_v0 = vld [vmem:[#allocation16 + $0x110] sm:$0xff] }
0x2a61   :  { %10541 = vmatprep.subr.bf16.mxu0 %v16155_v15  ;;  %v9711_v15 = vld [vmem:[#allocation16 + $0x198] sm:$0xff] }
0x2a62   :  { %10491 = vmatpush2.bf16.msra.mxu1 %v16184_v61  ;;  %v16143_v61 = vcombine.high %v9719_v4, %v9723_v56  ;;  %v16135_v42 = vcombine.high %v9711_v15, %v9715_v14  ;;  %v9698_v4 = vld [vmem:[#allocation16 + $0x130] sm:$0xff]  ;;  %v9699_v56 = vld [vmem:[#allocation16 + $0x138] sm:$0xff] }
0x2a63   :  { %10492 = vmatprep.subr.bf16.mxu1 %v16177_v59  ;;  %10542 = vmatpush2.bf16.msra.mxu0 %v16154_v41  ;;  %v9617_v59 = vrot.slane %v19762_v47, %v19222_v55  ;;  %v9703_v41 = vld [vmem:[#allocation16 + $0x158] sm:$0xff] }
0x2a64   :  { %10543 = vmatprep.subr.bf16.mxu0 %v16147_v28 }
0x2a65   :  { %v9627_v62 = vrot.slane %v9617_v59, %v19133_v16 }
0x2a66   :  { %10493 = vmatpush2.bf16.msra.mxu1 %v16176_v38 }
0x2a67   :  { %10494 = vmatprep.subr.bf16.mxu1 %v16169_v31  ;;  %10544 = vmatpush2.bf16.msra.mxu0 %v16146_v20 }
0x2a68   :  { %10599 = vmatprep.subr.bf16.mxu0 %v16143_v61 }
0x2a6a   :  { %10495 = vmatpush2.bf16.msra.mxu1 %v16168_v51 }
0x2a6b   :  { %10496 = vmatprep.subr.bf16.mxu1 %v16161_v12 }
0x2a6e   :  { %10497 = vmatpush2.bf16.msra.mxu1 %v16160_v34 }
0x2a6f   :  { %10498 = vmatprep.subr.bf16.mxu1 %v16153_v25  ;;  %v9714_v25 = vld [vmem:[#allocation16 + $0x1b0] sm:$0xff] }
0x2a70   :  { %v16132_v28 = vcombine.low %v9710_v40, %v9714_v25 }
0x2a72   :  { %10499 = vmatpush2.bf16.msra.mxu1 %v16152_v48  ;;  %v9706_v48 = vld [vmem:[#allocation16 + $0x170] sm:$0xff] }
0x2a73   :  { %10500 = vmatprep.subr.bf16.mxu1 %v16145_v5  ;;  %v9707_v5 = vld [vmem:[#allocation16 + $0x178] sm:$0xff] }
0x2a74   :  { %v16127_v43 = vcombine.high %v9703_v41, %v9707_v5 }
0x2a76   :  { %10501 = vmatpush2.bf16.msra.mxu1 %v16144_v32  ;;  %v16134_v32 = vcombine.low %v9711_v15, %v9715_v14  ;;  %v9786_v15 = vld [vmem:[#allocation16 + $0x3f0] sm:$0xff]  ;;  %v9783_v14 = vld [vmem:[#allocation16 + $0x3d8] sm:$0xff] }
0x2a77   :  { %10556 = vmatprep.subr.bf16.mxu1 %v16141_v44  ;;  %v9695_v44 = vld [vmem:[#allocation16 + $0x118] sm:$0xff] }
0x2a78   :  { %v16118_v59 = vcombine.low %v9695_v44, %v9699_v56 }
0x2ae3   :  { %v9596_v13 = vpop.xlane.xlu0 %9595 }
0x2ae4   :  { %v9600_v7 = vmul.f32 0.00390625, %v9596_v13  ;;  %v16126_v13 = vcombine.low %v9703_v41, %v9707_v5  ;;  %v9774_v41 = vld [vmem:[#allocation16 + $0x390] sm:$0xff] }
0x2ae5   :  { %v9778_v5 = vld [vmem:[#allocation16 + $0x3b0] sm:$0xff] }
0x2ae6   :  { %v9602_v3 = vadd.f32 1e-05, %v9600_v7  ;;  %v9686_v7 = vld [vmem:[#allocation16 + $0xd0] sm:$0xff] }
0x2ae7   :  { %v9599_v60 = vpop.xlane.xlu1 %9598 }
0x2ae8   :  { %18506 = vrsqrt.f32 %v9602_v3  ;;  %v9601_v27 = vmul.f32 0.00390625, %v9599_v60  ;;  %v9690_v3 = vld [vmem:[#allocation16 + $0xf0] sm:$0xff]  ;;  %v9687_v60 = vld [vmem:[#allocation16 + $0xd8] sm:$0xff] }
0x2ae9   :  { %v16109_v39 = vcombine.high %v9686_v7, %v9690_v3 }
0x2aea   :  { %v9603_v38 = vadd.f32 1e-05, %v9601_v27  ;;  %v9691_v27 = vld [vmem:[#allocation16 + $0xf8] sm:$0xff] }
0x2aec   :  { %18508 = vrsqrt.f32 %v9603_v38  ;;  %v16116_v38 = vcombine.low %v9694_v0, %v9698_v4 }
0x2af5   :  { %v18507_v31 = vpop.eup %18506 }
0x2af6   :  { %v9607_v10 = vmul.f32 %v18507_v31, %v19786_v2  ;;  %v9606_v35 = vmul.f32 %v18507_v31, %v19783_v33  ;;  %v9683_v31 = vld [vmem:[#allocation16 + $0xb8] sm:$0xff] }
0x2af8   :  { %v9629_v21 = vmul.f32 %v9627_v62, %v9607_v10  ;;  %v9628_v22 = vmul.f32 %v9623_v63, %v9606_v35  ;;  %v16108_v10 = vcombine.low %v9686_v7, %v9690_v3  ;;  %v16110_v35 = vcombine.low %v9687_v60, %v9691_v27 }
0x2af9   :  { %v18509_v24 = vpop.eup %18508 }
0x2afa   :  { %v9609_v51 = vmul.f32 %v18509_v24, %v19796_v30  ;;  %v9608_v26 = vmul.f32 %v18509_v24, %v19793_v1  ;;  %v9651_v37 = vadd.f32 %v9649_v19, %v9629_v21  ;;  %v9650_v47 = vadd.f32 %v9645_v46, %v9628_v22  ;;  %v9702_v30 = vld [vmem:[#allocation16 + $0x150] sm:$0xff]  ;;  %v9671_v24 = vld [vmem:[#allocation16 + $0x58] sm:$0xff] }
0x2afb   :  { %v16133_v1 = vcombine.high %v9710_v40, %v9714_v25  ;;  %v16125_v20 = vcombine.high %v9702_v30, %v9706_v48  ;;  %v16124_v61 = vcombine.low %v9702_v30, %v9706_v48  ;;  %v9670_v22 = vld [vmem:[#allocation16 + $0x50] sm:$0xff] }
0x2afc   :  { %v9631_v12 = vmul.f32 %v9627_v62, %v9609_v51  ;;  %v9630_v23 = vmul.f32 %v9623_v63, %v9608_v26  ;;  %v9655_v2 = vmax.f32 %v9651_v37, 0.0  ;;  %v9654_v33 = vmax.f32 %v9650_v47, 0.0  ;;  %v9682_v63 = vld [vmem:[#allocation16 + $0xb0] sm:$0xff]  ;;  %v9675_v51 = vld [vmem:[#allocation16 + $0x78] sm:$0xff] }
0x2afd   :  { %v16111_v62 = vcombine.high %v9687_v60, %v9691_v27  ;;  %v16101_v21 = vcombine.high %v9678_v11, %v9682_v63  ;;  %v16100_v26 = vcombine.low %v9678_v11, %v9682_v63  ;;  %v9662_v47 = vld [vmem:[#allocation16 + $0x10] sm:$0xff] }
0x2afe   :  { %v9653_v50 = vadd.f32 %v9649_v19, %v9631_v12  ;;  %v9652_v18 = vadd.f32 %v9645_v46, %v9630_v23  ;;  %v16103_v19 = vcombine.high %v9679_v29, %v9683_v31  ;;  %v9674_v46 = vld [vmem:[#allocation16 + $0x70] sm:$0xff]  ;;  %v16102_v12 = vcombine.low %v9679_v29, %v9683_v31 }
0x2aff   :  { %v16093_v37 = vcombine.high %v9670_v22, %v9674_v46  ;;  %v16095_v23 = vcombine.high %v9671_v24, %v9675_v51  ;;  %v9782_v25 = vld [vmem:[#allocation16 + $0x3d0] sm:$0xff] }
0x2b00   :  { %v9657_v45 = vmax.f32 %v9653_v50, 0.0  ;;  %v9656_v34 = vmax.f32 %v9652_v18, 0.0  ;;  %v9666_v50 = vld [vmem:[#allocation16 + $0x30] sm:$0xff]  ;;  %v9663_v18 = vld [vmem:[#allocation16 + $0x18] sm:$0xff] }
0x2b01   :  { %v16084_v30 = vcombine.low %v9662_v47, %v9666_v50  ;;  %v9758_v60 = vld [vmem:[#allocation16 + $0x310] sm:$0xff] }
0x2b02   :  { %v9659_v36 = vpack.c.bf16 %v9657_v45, %v9655_v2  ;;  %v19818_v9 = vpack.c.bf16 %v9656_v34, %v9654_v33  ;;  %v9667_v2 = vld [vmem:[#allocation16 + $0x38] sm:$0xff]  ;;  %v16092_v45 = vcombine.low %v9670_v22, %v9674_v46  ;;  %v16094_v33 = vcombine.low %v9671_v24, %v9675_v51  ;;  %v9762_v27 = vld [vmem:[#allocation16 + $0x330] sm:$0xff] }
0x2b03   :  { %v16085_v34 = vcombine.high %v9662_v47, %v9666_v50  ;;  %v16087_v40 = vcombine.high %v9663_v18, %v9667_v2  ;;  %v16181_v11 = vcombine.high %v9758_v60, %v9762_v27  ;;  %v9750_v29 = vld [vmem:[#allocation16 + $0x2d0] sm:$0xff] }
0x2b04   :  { %10502 = vmatprep.mubr.bf16.mxu1 %v9659_v36  ;;  %10545 = vmatprep.mubr.bf16.mxu0 %v9659_v36  ;;  %v9754_v31 = vld [vmem:[#allocation16 + $0x2f0] sm:$0xff] }
0x2b05   :  { %10503 = vmatmul.mubr.bf16.vlgmr.msra.gmra.mxu1 %v19818_v9  ;;  %10546 = vmatmul.mubr.bf16.vlgmr.msra.gmra.mxu0 %v19818_v9  ;;  %v16173_v22 = vcombine.high %v9750_v29, %v9754_v31  ;;  %v9742_v24 = vld [vmem:[#allocation16 + $0x290] sm:$0xff] }
0x2b06   :  { %10557 = vmatpush1.bf16.msra.mxu1 %v16140_v57  ;;  %10600 = vmatpush1.bf16.msra.mxu0 %v16142_v58  ;;  %v16117_v57 = vcombine.high %v9694_v0, %v9698_v4  ;;  %v16119_v58 = vcombine.high %v9695_v44, %v9699_v56  ;;  %v16197_v0 = vcombine.high %v9774_v41, %v9778_v5  ;;  %v9766_v44 = vld [vmem:[#allocation16 + $0x350] sm:$0xff] }
0x2b07   :  { %10588 = vmatprep.mubr.bf16.mxu1 %v9659_v36  ;;  %10631 = vmatprep.mubr.bf16.mxu0 %v9659_v36  ;;  %v9787_v36 = vld [vmem:[#allocation16 + $0x3f8] sm:$0xff]  ;;  %v9770_v56 = vld [vmem:[#allocation16 + $0x370] sm:$0xff] }
0x2b08   :  { %10558 = vmatprep.subr.bf16.mxu1 %v16133_v1  ;;  %10601 = vmatprep.subr.bf16.mxu0 %v16135_v42  ;;  %v16086_v1 = vcombine.low %v9663_v18, %v9667_v2  ;;  %v16205_v42 = vcombine.high %v9782_v25, %v9786_v15  ;;  %v16207_v48 = vcombine.high %v9783_v14, %v9787_v36  ;;  %v9746_v51 = vld [vmem:[#allocation16 + $0x2b0] sm:$0xff] }
0x2b09   :  { %v16189_v7 = vcombine.high %v9766_v44, %v9770_v56  ;;  %v16165_v47 = vcombine.high %v9742_v24, %v9746_v51  ;;  %v9734_v18 = vld [vmem:[#allocation16 + $0x250] sm:$0xff] }
0x2b0a   :  { %10559 = vmatpush1.bf16.msra.mxu1 %v16132_v28  ;;  %10602 = vmatpush1.bf16.msra.mxu0 %v16134_v32  ;;  %v9775_v28 = vld [vmem:[#allocation16 + $0x398] sm:$0xff]  ;;  %v9738_v2 = vld [vmem:[#allocation16 + $0x270] sm:$0xff] }
0x2b0b   :  { %10560 = vmatprep.subr.bf16.mxu1 %v16125_v20  ;;  %10603 = vmatprep.subr.bf16.mxu0 %v16127_v43  ;;  %v9779_v32 = vld [vmem:[#allocation16 + $0x3b8] sm:$0xff]  ;;  %v16204_v20 = vcombine.low %v9782_v25, %v9786_v15  ;;  %v16206_v43 = vcombine.low %v9783_v14, %v9787_v36  ;;  %v16157_v25 = vcombine.high %v9734_v18, %v9738_v2  ;;  %v9726_v14 = vld [vmem:[#allocation16 + $0x210] sm:$0xff] }
0x2b0c   :  { %v16199_v4 = vcombine.high %v9775_v28, %v9779_v32  ;;  %v9730_v36 = vld [vmem:[#allocation16 + $0x230] sm:$0xff] }
0x2b0e   :  { %10561 = vmatpush1.bf16.msra.mxu1 %v16124_v61  ;;  %10604 = vmatpush1.bf16.msra.mxu0 %v16126_v13  ;;  %v9767_v61 = vld [vmem:[#allocation16 + $0x358] sm:$0xff] }
0x2b0f   :  { %10562 = vmatprep.subr.bf16.mxu1 %v16117_v57  ;;  %10605 = vmatprep.subr.bf16.mxu0 %v16119_v58  ;;  %v9771_v13 = vld [vmem:[#allocation16 + $0x378] sm:$0xff]  ;;  %v16196_v57 = vcombine.low %v9774_v41, %v9778_v5  ;;  %v16198_v58 = vcombine.low %v9775_v28, %v9779_v32  ;;  %v16149_v41 = vcombine.high %v9726_v14, %v9730_v36  ;;  %v10722_v28 = vld [vmem:[#allocation18 + $0x1c0] sm:$0xff] }
0x2b10   :  { %v16191_v3 = vcombine.high %v9767_v61, %v9771_v13  ;;  %v10726_v32 = vld [vmem:[#allocation18 + $0x1e0] sm:$0xff] }
0x2b12   :  { %10563 = vmatpush1.bf16.msra.mxu1 %v16116_v38  ;;  %10606 = vmatpush1.bf16.msra.mxu0 %v16118_v59  ;;  %v9759_v38 = vld [vmem:[#allocation16 + $0x318] sm:$0xff] }
0x2b13   :  { %10564 = vmatprep.subr.bf16.mxu1 %v16109_v39  ;;  %10607 = vmatprep.subr.bf16.mxu0 %v16111_v62  ;;  %v9763_v59 = vld [vmem:[#allocation16 + $0x338] sm:$0xff]  ;;  %v16188_v39 = vcombine.low %v9766_v44, %v9770_v56  ;;  %v16190_v62 = vcombine.low %v9767_v61, %v9771_v13  ;;  %v16265_v44 = vcombine.high %v10722_v28, %v10726_v32  ;;  %v10714_v61 = vld [vmem:[#allocation18 + $0x180] sm:$0xff] }
0x2b14   :  { %v16183_v63 = vcombine.high %v9759_v38, %v9763_v59  ;;  %v10718_v13 = vld [vmem:[#allocation18 + $0x1a0] sm:$0xff] }
0x2b16   :  { %10565 = vmatpush1.bf16.msra.mxu1 %v16108_v10  ;;  %10608 = vmatpush1.bf16.msra.mxu0 %v16110_v35  ;;  %v9751_v10 = vld [vmem:[#allocation16 + $0x2d8] sm:$0xff] }
0x2b17   :  { %10566 = vmatprep.subr.bf16.mxu1 %v16101_v21  ;;  %10609 = vmatprep.subr.bf16.mxu0 %v16103_v19  ;;  %v9755_v35 = vld [vmem:[#allocation16 + $0x2f8] sm:$0xff]  ;;  %v16180_v21 = vcombine.low %v9758_v60, %v9762_v27  ;;  %v16182_v19 = vcombine.low %v9759_v38, %v9763_v59  ;;  %v16257_v60 = vcombine.high %v10714_v61, %v10718_v13  ;;  %v10706_v38 = vld [vmem:[#allocation18 + $0x140] sm:$0xff] }
0x2b18   :  { %v16175_v46 = vcombine.high %v9751_v10, %v9755_v35  ;;  %v10710_v59 = vld [vmem:[#allocation18 + $0x160] sm:$0xff] }
0x2b1a   :  { %10567 = vmatpush1.bf16.msra.mxu1 %v16100_v26  ;;  %10610 = vmatpush1.bf16.msra.mxu0 %v16102_v12  ;;  %v9743_v26 = vld [vmem:[#allocation16 + $0x298] sm:$0xff] }
0x2b1b   :  { %10568 = vmatprep.subr.bf16.mxu1 %v16093_v37  ;;  %10611 = vmatprep.subr.bf16.mxu0 %v16095_v23  ;;  %v9747_v12 = vld [vmem:[#allocation16 + $0x2b8] sm:$0xff]  ;;  %v16172_v37 = vcombine.low %v9750_v29, %v9754_v31  ;;  %v16174_v23 = vcombine.low %v9751_v10, %v9755_v35  ;;  %v16249_v29 = vcombine.high %v10706_v38, %v10710_v59  ;;  %v10698_v10 = vld [vmem:[#allocation18 + $0x100] sm:$0xff] }
0x2b1c   :  { %v16167_v50 = vcombine.high %v9743_v26, %v9747_v12  ;;  %v10702_v35 = vld [vmem:[#allocation18 + $0x120] sm:$0xff] }
0x2b1e   :  { %10569 = vmatpush1.bf16.msra.mxu1 %v16092_v45  ;;  %10612 = vmatpush1.bf16.msra.mxu0 %v16094_v33  ;;  %v9735_v45 = vld [vmem:[#allocation16 + $0x258] sm:$0xff] }
0x2b1f   :  { %10570 = vmatprep.subr.bf16.mxu1 %v16085_v34  ;;  %10613 = vmatprep.subr.bf16.mxu0 %v16087_v40  ;;  %v9739_v33 = vld [vmem:[#allocation16 + $0x278] sm:$0xff]  ;;  %v16164_v34 = vcombine.low %v9742_v24, %v9746_v51  ;;  %v16166_v40 = vcombine.low %v9743_v26, %v9747_v12  ;;  %v16241_v24 = vcombine.high %v10698_v10, %v10702_v35  ;;  %v10690_v51 = vld [vmem:[#allocation18 + $0xc0] sm:$0xff] }
0x2b20   :  { %v16159_v15 = vcombine.high %v9735_v45, %v9739_v33  ;;  %v10694_v26 = vld [vmem:[#allocation18 + $0xe0] sm:$0xff] }
0x2b21   :  { %v10818_v12 = vld [vmem:[#allocation18 + $0x4c0] sm:$0xff] }
0x2b22   :  { %10571 = vmatpush1.bf16.msra.mxu1 %v16084_v30  ;;  %10614 = vmatpush1.bf16.msra.mxu0 %v16086_v1  ;;  %v9727_v30 = vld [vmem:[#allocation16 + $0x218] sm:$0xff] }
0x2b23   :  { %10572 = vmatprep.subr.bf16.mxu1 %v16205_v42  ;;  %10615 = vmatprep.subr.bf16.mxu0 %v16207_v48  ;;  %v9731_v1 = vld [vmem:[#allocation16 + $0x238] sm:$0xff]  ;;  %v16156_v42 = vcombine.low %v9734_v18, %v9738_v2  ;;  %v16158_v48 = vcombine.low %v9735_v45, %v9739_v33  ;;  %v16233_v18 = vcombine.high %v10690_v51, %v10694_v26  ;;  %v10686_v45 = vld [vmem:[#allocation18 + $0xa0] sm:$0xff] }
0x2b24   :  { %v16151_v5 = vcombine.high %v9727_v30, %v9731_v1  ;;  %v10810_v33 = vld [vmem:[#allocation18 + $0x480] sm:$0xff] }
0x2b26   :  { %10573 = vmatpush2.bf16.msra.mxu1 %v16204_v20  ;;  %10616 = vmatpush2.bf16.msra.mxu0 %v16206_v43  ;;  %v10850_v20 = vld [vmem:[#allocation18 + $0x5c0] sm:$0xff] }
0x2b27   :  { %10574 = vmatprep.subr.bf16.mxu1 %v16197_v0  ;;  %10617 = vmatprep.subr.bf16.mxu0 %v16199_v4  ;;  %v10854_v43 = vld [vmem:[#allocation18 + $0x5e0] sm:$0xff]  ;;  %v16148_v0 = vcombine.low %v9726_v14, %v9730_v36  ;;  %v16150_v4 = vcombine.low %v9727_v30, %v9731_v1  ;;  %v16232_v14 = vcombine.low %v10690_v51, %v10694_v26 }
0x2b28   :  { %v16393_v56 = vcombine.high %v10850_v20, %v10854_v43  ;;  %v19830_v36 = vld [vmem:[#allocation18 + $0xde0] sm:$0xff] }
0x2b29   :  { %v10774_v51 = vld [vmem:[#allocation18 + $0x360] sm:$0xff] }
0x2b2a   :  { %10575 = vmatpush2.bf16.msra.mxu1 %v16196_v57  ;;  %10618 = vmatpush2.bf16.msra.mxu0 %v16198_v58  ;;  %v10842_v57 = vld [vmem:[#allocation18 + $0x580] sm:$0xff] }
0x2b2b   :  { %10576 = vmatprep.subr.bf16.mxu1 %v16189_v7  ;;  %10619 = vmatprep.subr.bf16.mxu0 %v16191_v3  ;;  %v10846_v58 = vld [vmem:[#allocation18 + $0x5a0] sm:$0xff]  ;;  %v16264_v7 = vcombine.low %v10722_v28, %v10726_v32  ;;  %v16392_v3 = vcombine.low %v10850_v20, %v10854_v43 }
0x2b2c   :  { %v16385_v27 = vcombine.high %v10842_v57, %v10846_v58  ;;  %v10678_v28 = vld [vmem:[#allocation18 + $0x60] sm:$0xff] }
0x2b2d   :  { %v10802_v32 = vld [vmem:[#allocation18 + $0x440] sm:$0xff] }
0x2b2e   :  { %10577 = vmatpush2.bf16.msra.mxu1 %v16188_v39  ;;  %10620 = vmatpush2.bf16.msra.mxu0 %v16190_v62  ;;  %v10834_v39 = vld [vmem:[#allocation18 + $0x540] sm:$0xff] }
0x2b2f   :  { %10578 = vmatprep.subr.bf16.mxu1 %v16181_v11  ;;  %10621 = vmatprep.subr.bf16.mxu0 %v16183_v63  ;;  %v10838_v62 = vld [vmem:[#allocation18 + $0x560] sm:$0xff]  ;;  %v16256_v11 = vcombine.low %v10714_v61, %v10718_v13  ;;  %v16384_v63 = vcombine.low %v10842_v57, %v10846_v58 }
0x2b30   :  { %v16377_v31 = vcombine.high %v10834_v39, %v10838_v62  ;;  %v10806_v20 = vld [vmem:[#allocation18 + $0x460] sm:$0xff] }
0x2b31   :  { %v10670_v61 = vld [vmem:[#allocation18 + $0x20] sm:$0xff] }
0x2b32   :  { %10579 = vmatpush2.bf16.msra.mxu1 %v16180_v21  ;;  %10622 = vmatpush2.bf16.msra.mxu0 %v16182_v19  ;;  %v10826_v21 = vld [vmem:[#allocation18 + $0x500] sm:$0xff] }
0x2b33   :  { %10580 = vmatprep.subr.bf16.mxu1 %v16173_v22  ;;  %10623 = vmatprep.subr.bf16.mxu0 %v16175_v46  ;;  %v10830_v19 = vld [vmem:[#allocation18 + $0x520] sm:$0xff]  ;;  %v16248_v22 = vcombine.low %v10706_v38, %v10710_v59  ;;  %v16376_v46 = vcombine.low %v10834_v39, %v10838_v62 }
0x2b34   :  { %v10794_v13 = vld [vmem:[#allocation18 + $0x400] sm:$0xff] }
0x2b35   :  { %v10798_v57 = vld [vmem:[#allocation18 + $0x420] sm:$0xff] }
0x2b36   :  { %10581 = vmatpush2.bf16.msra.mxu1 %v16172_v37  ;;  %10624 = vmatpush2.bf16.msra.mxu0 %v16174_v23  ;;  %v10822_v37 = vld [vmem:[#allocation18 + $0x4e0] sm:$0xff]  ;;  %v16240_v23 = vcombine.low %v10698_v10, %v10702_v35 }
0x2b37   :  { %10582 = vmatprep.subr.bf16.mxu1 %v16165_v47  ;;  %10625 = vmatprep.subr.bf16.mxu0 %v16167_v50  ;;  %v16368_v47 = vcombine.low %v10826_v21, %v10830_v19  ;;  %v10682_v50 = vld [vmem:[#allocation18 + $0x80] sm:$0xff]  ;;  %v16361_v2 = vcombine.high %v10818_v12, %v10822_v37  ;;  %v16360_v30 = vcombine.low %v10818_v12, %v10822_v37 }
0x2b38   :  { %v16224_v43 = vcombine.low %v10682_v50, %v10686_v45  ;;  %v10790_v38 = vld [vmem:[#allocation18 + $0x3e0] sm:$0xff] }
0x2b39   :  { %v10914_v59 = vld [vmem:[#allocation18 + $0x7c0] sm:$0xff] }
0x2b3a   :  { %10583 = vmatpush2.bf16.msra.mxu1 %v16164_v34  ;;  %10626 = vmatpush2.bf16.msra.mxu0 %v16166_v40  ;;  %v10814_v34 = vld [vmem:[#allocation18 + $0x4a0] sm:$0xff] }
0x2b3b   :  { %10584 = vmatprep.subr.bf16.mxu1 %v16157_v25  ;;  %10627 = vmatprep.subr.bf16.mxu0 %v16159_v15  ;;  %v19824_v40 = vld [vmem:[#allocation18 + $0x9c0] sm:$0xff] }
0x2b3c   :  { %v19826_v25 = vld [vmem:[#allocation18 + $0x9e0] sm:$0xff] }
0x2b3d   :  { %v19828_v15 = vld [vmem:[#allocation18 + $0xdc0] sm:$0xff]  ;;  %v16520_v1 = vcombine.low %v19824_v40, %v19826_v25 }
0x2b3e   :  { %10585 = vmatpush2.bf16.msra.mxu1 %v16156_v42  ;;  %10628 = vmatpush2.bf16.msra.mxu0 %v16158_v48  ;;  %v16648_v42 = vcombine.low %v19828_v15, %v19830_v36  ;;  %v16225_v48 = vcombine.high %v10682_v50, %v10686_v45  ;;  %v10918_v39 = vld [vmem:[#allocation18 + $0x7e0] sm:$0xff] }
0x2b3f   :  { %10586 = vmatprep.subr.bf16.mxu1 %v16149_v41  ;;  %10629 = vmatprep.subr.bf16.mxu0 %v16151_v5  ;;  %v16353_v41 = vcombine.high %v10810_v33, %v10814_v34  ;;  %v10674_v5 = vld [vmem:[#allocation18 + $0x40] sm:$0xff] }
0x2b40   :  { %v16216_v58 = vcombine.low %v10674_v5, %v10678_v28  ;;  %v10782_v10 = vld [vmem:[#allocation18 + $0x3a0] sm:$0xff] }
0x2b41   :  { %v10906_v35 = vld [vmem:[#allocation18 + $0x780] sm:$0xff] }
0x2b42   :  { %10587 = vmatpush2.bf16.msra.mxu1 %v16148_v0  ;;  %10630 = vmatpush2.bf16.msra.mxu0 %v16150_v4  ;;  %v16352_v0 = vcombine.low %v10810_v33, %v10814_v34  ;;  %v16217_v4 = vcombine.high %v10674_v5, %v10678_v28  ;;  %v10898_v26 = vld [vmem:[#allocation18 + $0x740] sm:$0xff] }
0x2b43   :  { %13781 = vmatprep.subr.bf16.mxu1 %v16265_v44  ;;  %13824 = vmatprep.subr.bf16.mxu0 %v16393_v56  ;;  %v16345_v44 = vcombine.high %v10802_v32, %v10806_v20  ;;  %v10666_v56 = vld [vmem:[#allocation18] sm:$0xff] }
0x2b44   :  { %v16208_v62 = vcombine.low %v10666_v56, %v10670_v61  ;;  %v10902_v12 = vld [vmem:[#allocation18 + $0x760] sm:$0xff] }
0x2b45   :  { %10589 = vmatmul.mubr.bf16.vlgmr.msra.gmra.mxu1 %v19818_v9  ;;  %10632 = vmatmul.mubr.bf16.vlgmr.msra.gmra.mxu0 %v19818_v9  ;;  %v16369_v9 = vcombine.high %v10826_v21, %v10830_v19  ;;  %v10910_v21 = vld [vmem:[#allocation18 + $0x7a0] sm:$0xff]  ;;  %v16441_v50 = vcombine.high %v10898_v26, %v10902_v12 }
0x2b46   :  { %13782 = vmatpush1.bf16.msra.mxu1 %v16264_v7  ;;  %13825 = vmatpush1.bf16.msra.mxu0 %v16392_v3  ;;  %v16344_v7 = vcombine.low %v10802_v32, %v10806_v20  ;;  %v16209_v3 = vcombine.high %v10666_v56, %v10670_v61  ;;  %v10890_v45 = vld [vmem:[#allocation18 + $0x700] sm:$0xff] }
0x2b47   :  { %13783 = vmatprep.subr.bf16.mxu1 %v16257_v60  ;;  %13826 = vmatprep.subr.bf16.mxu0 %v16385_v27  ;;  %v16337_v60 = vcombine.high %v10794_v13, %v10798_v57  ;;  %v10786_v27 = vld [vmem:[#allocation18 + $0x3c0] sm:$0xff] }
0x2b48   :  { %v16328_v19 = vcombine.low %v10786_v27, %v10790_v38  ;;  %v10894_v33 = vld [vmem:[#allocation18 + $0x720] sm:$0xff] }
0x2b49   :  { %v10758_v5 = vld [vmem:[#allocation18 + $0x2e0] sm:$0xff] }
0x2b4a   :  { %13784 = vmatpush1.bf16.msra.mxu1 %v16256_v11  ;;  %13827 = vmatpush1.bf16.msra.mxu0 %v16384_v63  ;;  %v16336_v11 = vcombine.low %v10794_v13, %v10798_v57  ;;  %v16329_v63 = vcombine.high %v10786_v27, %v10790_v38  ;;  %v10882_v28 = vld [vmem:[#allocation18 + $0x6c0] sm:$0xff] }
0x2b4b   :  { %13785 = vmatprep.subr.bf16.mxu1 %v16249_v29  ;;  %13828 = vmatprep.subr.bf16.mxu0 %v16377_v31  ;;  %v16457_v29 = vcombine.high %v10914_v59, %v10918_v39  ;;  %v10778_v31 = vld [vmem:[#allocation18 + $0x380] sm:$0xff] }
0x2b4c   :  { %v16320_v37 = vcombine.low %v10778_v31, %v10782_v10  ;;  %v10886_v32 = vld [vmem:[#allocation18 + $0x6e0] sm:$0xff] }
0x2b4d   :  { %v10750_v56 = vld [vmem:[#allocation18 + $0x2a0] sm:$0xff] }
0x2b4e   :  { %13786 = vmatpush1.bf16.msra.mxu1 %v16248_v22  ;;  %13829 = vmatpush1.bf16.msra.mxu0 %v16376_v46  ;;  %v16456_v22 = vcombine.low %v10914_v59, %v10918_v39  ;;  %v16321_v46 = vcombine.high %v10778_v31, %v10782_v10  ;;  %v10874_v61 = vld [vmem:[#allocation18 + $0x680] sm:$0xff] }
0x2b4f   :  { %13787 = vmatprep.subr.bf16.mxu1 %v16241_v24  ;;  %13830 = vmatprep.subr.bf16.mxu0 %v16369_v9  ;;  %v16449_v24 = vcombine.high %v10906_v35, %v10910_v21  ;;  %v10770_v9 = vld [vmem:[#allocation18 + $0x340] sm:$0xff] }
0x2b50   :  { %v16312_v34 = vcombine.low %v10770_v9, %v10774_v51  ;;  %v10878_v13 = vld [vmem:[#allocation18 + $0x6a0] sm:$0xff] }
0x2b51   :  { %v10742_v27 = vld [vmem:[#allocation18 + $0x260] sm:$0xff] }
0x2b52   :  { %13788 = vmatpush1.bf16.msra.mxu1 %v16240_v23  ;;  %13831 = vmatpush1.bf16.msra.mxu0 %v16368_v47  ;;  %v16448_v23 = vcombine.low %v10906_v35, %v10910_v21  ;;  %v16313_v47 = vcombine.high %v10770_v9, %v10774_v51  ;;  %v10866_v38 = vld [vmem:[#allocation18 + $0x640] sm:$0xff]  ;;  %v16521_v51 = vcombine.high %v19824_v40, %v19826_v25 }
0x2b53   :  { %13789 = vmatprep.subr.bf16.mxu1 %v16233_v18  ;;  %13832 = vmatprep.subr.bf16.mxu0 %v16361_v2  ;;  %v10762_v18 = vld [vmem:[#allocation18 + $0x300] sm:$0xff] }
0x2b54   :  { %v10766_v2 = vld [vmem:[#allocation18 + $0x320] sm:$0xff] }
0x2b55   :  { %v16304_v20 = vcombine.low %v10762_v18, %v10766_v2  ;;  %v10870_v59 = vld [vmem:[#allocation18 + $0x660] sm:$0xff] }
0x2b56   :  { %13790 = vmatpush1.bf16.msra.mxu1 %v16232_v14  ;;  %13833 = vmatpush1.bf16.msra.mxu0 %v16360_v30  ;;  %v16440_v14 = vcombine.low %v10898_v26, %v10902_v12  ;;  %v16305_v30 = vcombine.high %v10762_v18, %v10766_v2  ;;  %v10734_v31 = vld [vmem:[#allocation18 + $0x220] sm:$0xff]  ;;  %v16649_v26 = vcombine.high %v19828_v15, %v19830_v36 }
0x2b57   :  { %13791 = vmatprep.subr.bf16.mxu1 %v16225_v48  ;;  %13834 = vmatprep.subr.bf16.mxu0 %v16353_v41  ;;  %v16433_v48 = vcombine.high %v10890_v45, %v10894_v33  ;;  %v10754_v41 = vld [vmem:[#allocation18 + $0x2c0] sm:$0xff] }
0x2b58   :  { %v16296_v57 = vcombine.low %v10754_v41, %v10758_v5  ;;  %v10858_v10 = vld [vmem:[#allocation18 + $0x600] sm:$0xff] }
0x2b59   :  { %v10862_v35 = vld [vmem:[#allocation18 + $0x620] sm:$0xff] }
0x2b5a   :  { %13792 = vmatpush1.bf16.msra.mxu1 %v16224_v43  ;;  %13835 = vmatpush1.bf16.msra.mxu0 %v16352_v0  ;;  %v16432_v43 = vcombine.low %v10890_v45, %v10894_v33  ;;  %v16297_v0 = vcombine.high %v10754_v41, %v10758_v5  ;;  %v16400_v9 = vcombine.low %v10858_v10, %v10862_v35  ;;  %v19840_v12 = vld [vmem:[#allocation21] ss:$4 sm:$0xff] }
0x2b5b   :  { %13793 = vmatprep.subr.bf16.mxu1 %v16217_v4  ;;  %13836 = vmatprep.subr.bf16.mxu0 %v16345_v44  ;;  %v16425_v4 = vcombine.high %v10882_v28, %v10886_v32  ;;  %v10746_v44 = vld [vmem:[#allocation18 + $0x280] sm:$0xff]  ;;  %v9793_v18 = vrot.slane %v19840_v12, %v19049_v53  ;;  %v9801_v2 = vrot.slane %v19840_v12, %v19098_v8 }
0x2b5c   :  { %v16288_v39 = vcombine.low %v10746_v44, %v10750_v56  ;;  %v10946_v15 = vld [vmem:[#allocation18 + $0x8c0] sm:$0xff] }
0x2b5d   :  { %v10950_v36 = vld [vmem:[#allocation18 + $0x8e0] sm:$0xff] }
0x2b5e   :  { %13794 = vmatpush1.bf16.msra.mxu1 %v16216_v58  ;;  %13837 = vmatpush1.bf16.msra.mxu0 %v16344_v7  ;;  %v16424_v58 = vcombine.low %v10882_v28, %v10886_v32  ;;  %v16289_v7 = vcombine.high %v10746_v44, %v10750_v56 }
0x2b5f   :  { %13795 = vmatprep.subr.bf16.mxu1 %v16209_v3  ;;  %13838 = vmatprep.subr.bf16.mxu0 %v16337_v60  ;;  %v16417_v3 = vcombine.high %v10874_v61, %v10878_v13  ;;  %v10738_v60 = vld [vmem:[#allocation18 + $0x240] sm:$0xff] }
0x2b60   :  { %v16280_v21 = vcombine.low %v10738_v60, %v10742_v27 }
0x2b62   :  { %13796 = vmatpush1.bf16.msra.mxu1 %v16208_v62  ;;  %13839 = vmatpush1.bf16.msra.mxu0 %v16336_v11  ;;  %v16416_v62 = vcombine.low %v10874_v61, %v10878_v13  ;;  %v16281_v11 = vcombine.high %v10738_v60, %v10742_v27  ;;  %v10970_v61 = vld [vmem:[#allocation18 + $0x980] sm:$0xff] }
0x2b63   :  { %13797 = vmatprep.subr.bf16.mxu1 %v16329_v63  ;;  %13840 = vmatprep.subr.bf16.mxu0 %v16457_v29  ;;  %v16409_v63 = vcombine.high %v10866_v38, %v10870_v59  ;;  %v10730_v29 = vld [vmem:[#allocation18 + $0x200] sm:$0xff] }
0x2b64   :  { %v10974_v13 = vld [vmem:[#allocation18 + $0x9a0] sm:$0xff] }
0x2b65   :  { %v11098_v60 = vld [vmem:[#allocation18 + $0xd80] sm:$0xff] }
0x2b66   :  { %13798 = vmatpush2.bf16.msra.mxu1 %v16328_v19  ;;  %13841 = vmatpush2.bf16.msra.mxu0 %v16456_v22  ;;  %v16408_v19 = vcombine.low %v10866_v38, %v10870_v59  ;;  %v16273_v22 = vcombine.high %v10730_v29, %v10734_v31  ;;  %v11102_v27 = vld [vmem:[#allocation18 + $0xda0] sm:$0xff] }
0x2b67   :  { %13799 = vmatprep.subr.bf16.mxu1 %v16321_v46  ;;  %13842 = vmatprep.subr.bf16.mxu0 %v16449_v24  ;;  %v16401_v46 = vcombine.high %v10858_v10, %v10862_v35  ;;  %v16272_v24 = vcombine.low %v10730_v29, %v10734_v31  ;;  %v16513_v29 = vcombine.high %v10970_v61, %v10974_v13  ;;  %v10962_v10 = vld [vmem:[#allocation18 + $0x940] sm:$0xff] }
0x2b68   :  { %v16641_v31 = vcombine.high %v11098_v60, %v11102_v27  ;;  %v10966_v35 = vld [vmem:[#allocation18 + $0x960] sm:$0xff] }
0x2b6a   :  { %13800 = vmatpush2.bf16.msra.mxu1 %v16320_v37  ;;  %13843 = vmatpush2.bf16.msra.mxu0 %v16448_v23 }
0x2b6b   :  { %13801 = vmatprep.subr.bf16.mxu1 %v16313_v47  ;;  %13844 = vmatprep.subr.bf16.mxu0 %v16441_v50  ;;  %v9797_v47 = vrot.slane %v19840_v12, %v19133_v16  ;;  %v9805_v50 = vrot.slane %v19840_v12, %v19188_v17 }
0x2b6e   :  { %13802 = vmatpush2.bf16.msra.mxu1 %v16312_v34  ;;  %13845 = vmatpush2.bf16.msra.mxu0 %v16440_v14 }
0x2b6f   :  { %13803 = vmatprep.subr.bf16.mxu1 %v16305_v30  ;;  %13846 = vmatprep.subr.bf16.mxu0 %v16433_v48 }
0x2b72   :  { %13804 = vmatpush2.bf16.msra.mxu1 %v16304_v20  ;;  %13847 = vmatpush2.bf16.msra.mxu0 %v16432_v43 }
0x2b73   :  { %13805 = vmatprep.subr.bf16.mxu1 %v16297_v0  ;;  %13848 = vmatprep.subr.bf16.mxu0 %v16425_v4 }
0x2b76   :  { %13806 = vmatpush2.bf16.msra.mxu1 %v16296_v57  ;;  %13849 = vmatpush2.bf16.msra.mxu0 %v16424_v58 }
0x2b77   :  { %13807 = vmatprep.subr.bf16.mxu1 %v16289_v7  ;;  %13850 = vmatprep.subr.bf16.mxu0 %v16417_v3 }
0x2b7a   :  { %13808 = vmatpush2.bf16.msra.mxu1 %v16288_v39  ;;  %13851 = vmatpush2.bf16.msra.mxu0 %v16416_v62 }
0x2b7b   :  { %13809 = vmatprep.subr.bf16.mxu1 %v16281_v11  ;;  %13852 = vmatprep.subr.bf16.mxu0 %v16409_v63 }
0x2b7e   :  { %13810 = vmatpush2.bf16.msra.mxu1 %v16280_v21  ;;  %13853 = vmatpush2.bf16.msra.mxu0 %v16408_v19  ;;  %v11090_v21 = vld [vmem:[#allocation18 + $0xd40] sm:$0xff] }
0x2b7f   :  { %13811 = vmatprep.subr.bf16.mxu1 %v16273_v22  ;;  %13854 = vmatprep.subr.bf16.mxu0 %v16401_v46  ;;  %v11094_v19 = vld [vmem:[#allocation18 + $0xd60] sm:$0xff]  ;;  %v16512_v22 = vcombine.low %v10970_v61, %v10974_v13  ;;  %v16640_v46 = vcombine.low %v11098_v60, %v11102_v27 }
0x2b82   :  { %13812 = vmatpush2.bf16.msra.mxu1 %v16272_v24  ;;  %13855 = vmatpush2.bf16.msra.mxu0 %v16400_v9  ;;  %v16505_v24 = vcombine.high %v10962_v10, %v10966_v35  ;;  %v16633_v9 = vcombine.high %v11090_v21, %v11094_v19 }
0x2b83   :  { %13867 = vmatprep.subr.bf16.mxu1 %v16521_v51  ;;  %13910 = vmatprep.subr.bf16.mxu0 %v16649_v26  ;;  %v10954_v51 = vld [vmem:[#allocation18 + $0x900] sm:$0xff] }
0x2b84   :  { %v10958_v26 = vld [vmem:[#allocation18 + $0x920] sm:$0xff] }
0x2b85   :  { %v16497_v40 = vcombine.high %v10954_v51, %v10958_v26 }
0x2bc5   :  { %v10504_v37 = vpop.f32.mrf.mxu1  ;;  %v10547_v23 = vpop.f32.mrf.mxu0 }
0x2bc6   :  { %v10505_v28 = vadd.f32 %v10504_v37, %v9793_v18  ;;  %v10548_v32 = vadd.f32 %v10547_v23, %v9801_v2  ;;  %v11082_v37 = vld [vmem:[#allocation18 + $0xd00] sm:$0xff] }
0x2bc7   :  { %v10506_v45 = vpop.f32.mrf.mxu1  ;;  %v10549_v33 = vpop.f32.mrf.mxu0  ;;  %v11086_v23 = vld [vmem:[#allocation18 + $0xd20] sm:$0xff] }
0x2bc8   :  { %v10507_v30 = vadd.f32 %v10506_v45, %v9797_v47  ;;  %v10550_v48 = vadd.f32 %v10549_v33, %v9805_v50  ;;  %v10642_v38 = vmax.f32 %v10505_v28, 0.0  ;;  %v10644_v59 = vmax.f32 %v10548_v32, 0.0 }
0x2bc9   :  { %v10508_v34 = vpop.f32.mrf.mxu1  ;;  %v10551_v14 = vpop.f32.mrf.mxu0  ;;  %v16625_v25 = vcombine.high %v11082_v37, %v11086_v23  ;;  %v16489_v45 = vcombine.high %v10946_v15, %v10950_v36 }
0x2bca   :  { %v10509_v41 = vadd.f32 %v10508_v34, %v9793_v18  ;;  %v10552_v5 = vadd.f32 %v10551_v14, %v9801_v2  ;;  %v10643_v57 = vmax.f32 %v10507_v30, 0.0  ;;  %v10645_v58 = vmax.f32 %v10550_v48, 0.0  ;;  %v10938_v34 = vld [vmem:[#allocation18 + $0x880] sm:$0xff] }
0x2bcb   :  { %v10510_v20 = vpop.f32.mrf.mxu1  ;;  %v10553_v43 = vpop.f32.mrf.mxu0  ;;  %v16496_v18 = vcombine.low %v10954_v51, %v10958_v26  ;;  %v16624_v2 = vcombine.low %v11082_v37, %v11086_v23  ;;  %v10942_v14 = vld [vmem:[#allocation18 + $0x8a0] sm:$0xff] }
0x2bcc   :  { %v10511_v0 = vadd.f32 %v10510_v20, %v9797_v47  ;;  %v10554_v4 = vadd.f32 %v10553_v43, %v9805_v50  ;;  %v10650_v44 = vmax.f32 %v10509_v41, 0.0  ;;  %v10652_v56 = vmax.f32 %v10552_v5, 0.0  ;;  %v11066_v30 = vld [vmem:[#allocation18 + $0xc80] sm:$0xff] }
0x2bcd   :  { %v16504_v47 = vcombine.low %v10962_v10, %v10966_v35  ;;  %v16632_v50 = vcombine.low %v11090_v21, %v11094_v19  ;;  %v11070_v48 = vld [vmem:[#allocation18 + $0xca0] sm:$0xff]  ;;  %v16488_v41 = vcombine.low %v10946_v15, %v10950_v36  ;;  %v16481_v28 = vcombine.high %v10938_v34, %v10942_v14 }
0x2bce   :  { %v10651_v7 = vmax.f32 %v10511_v0, 0.0  ;;  %v10653_v3 = vmax.f32 %v10554_v4, 0.0  ;;  %v19854_v11 = vpack.c.bf16 %v10650_v44, %v10642_v38  ;;  %v19856_v63 = vpack.c.bf16 %v10652_v56, %v10644_v59  ;;  %v10930_v20 = vld [vmem:[#allocation18 + $0x840] sm:$0xff] }
0x2bcf   :  { %v16609_v32 = vcombine.high %v11066_v30, %v11070_v48  ;;  %v10934_v43 = vld [vmem:[#allocation18 + $0x860] sm:$0xff]  ;;  %v16480_v44 = vcombine.low %v10938_v34, %v10942_v14  ;;  %v16608_v56 = vcombine.low %v11066_v30, %v11070_v48 }
0x2bd0   :  { %v19850_v39 = vpack.c.bf16 %v10651_v7, %v10643_v57  ;;  %v19852_v62 = vpack.c.bf16 %v10653_v3, %v10645_v58  ;;  %v11058_v0 = vld [vmem:[#allocation18 + $0xc40] sm:$0xff]  ;;  %v16473_v61 = vcombine.high %v10930_v20, %v10934_v43  ;;  %v16472_v60 = vcombine.low %v10930_v20, %v10934_v43 }
0x2bd1   :  { %v11062_v4 = vld [vmem:[#allocation18 + $0xc60] sm:$0xff] }
0x2bd2   :  { %13813 = vmatprep.mubr.bf16.mxu1 %v19850_v39  ;;  %13856 = vmatprep.mubr.bf16.mxu0 %v19852_v62  ;;  %v16601_v13 = vcombine.high %v11058_v0, %v11062_v4  ;;  %v10922_v57 = vld [vmem:[#allocation18 + $0x800] sm:$0xff]  ;;  %v16600_v27 = vcombine.low %v11058_v0, %v11062_v4 }
0x2bd3   :  { %13814 = vmatmul.mubr.bf16.vlgmr.msra.gmra.mxu1 %v19854_v11  ;;  %13857 = vmatmul.mubr.bf16.vlgmr.msra.gmra.mxu0 %v19856_v63  ;;  %v10926_v58 = vld [vmem:[#allocation18 + $0x820] sm:$0xff] }
0x2bd4   :  { %13868 = vmatpush1.bf16.msra.mxu1 %v16520_v1  ;;  %13911 = vmatpush1.bf16.msra.mxu0 %v16648_v42  ;;  %v11074_v1 = vld [vmem:[#allocation18 + $0xcc0] sm:$0xff]  ;;  %v16465_v38 = vcombine.high %v10922_v57, %v10926_v58  ;;  %v16464_v21 = vcombine.low %v10922_v57, %v10926_v58 }
0x2bd5   :  { %13869 = vmatprep.subr.bf16.mxu1 %v16513_v29  ;;  %13912 = vmatprep.subr.bf16.mxu0 %v16641_v31  ;;  %v11078_v42 = vld [vmem:[#allocation18 + $0xce0] sm:$0xff] }
0x2bd6   :  { %v16617_v33 = vcombine.high %v11074_v1, %v11078_v42  ;;  %v16616_v5 = vcombine.low %v11074_v1, %v11078_v42  ;;  %v11050_v7 = vld [vmem:[#allocation18 + $0xc00] sm:$0xff] }
0x2bd7   :  { %v11054_v3 = vld [vmem:[#allocation18 + $0xc20] sm:$0xff] }
0x2bd8   :  { %13870 = vmatpush1.bf16.msra.mxu1 %v16512_v22  ;;  %13913 = vmatpush1.bf16.msra.mxu0 %v16640_v46  ;;  %v16593_v59 = vcombine.high %v11050_v7, %v11054_v3  ;;  %v11042_v29 = vld [vmem:[#allocation18 + $0xbc0] sm:$0xff]  ;;  %v16592_v19 = vcombine.low %v11050_v7, %v11054_v3 }
0x2bd9   :  { %13871 = vmatprep.subr.bf16.mxu1 %v16505_v24  ;;  %13914 = vmatprep.subr.bf16.mxu0 %v16633_v9  ;;  %v11046_v31 = vld [vmem:[#allocation18 + $0xbe0] sm:$0xff] }
0x2bda   :  { %v11170_v10 = vld [vmem:[#allocation18 + $0xfc0] sm:$0xff]  ;;  %v16585_v22 = vcombine.high %v11042_v29, %v11046_v31  ;;  %v16584_v37 = vcombine.low %v11042_v29, %v11046_v31 }
0x2bdb   :  { %v11174_v35 = vld [vmem:[#allocation18 + $0xfe0] sm:$0xff] }
0x2bdc   :  { %13872 = vmatpush1.bf16.msra.mxu1 %v16504_v47  ;;  %13915 = vmatpush1.bf16.msra.mxu0 %v16632_v50  ;;  %v16713_v46 = vcombine.high %v11170_v10, %v11174_v35  ;;  %v11034_v24 = vld [vmem:[#allocation18 + $0xb80] sm:$0xff]  ;;  %v16712_v23 = vcombine.low %v11170_v10, %v11174_v35 }
0x2bdd   :  { %13873 = vmatprep.subr.bf16.mxu1 %v16497_v40  ;;  %13916 = vmatprep.subr.bf16.mxu0 %v16625_v25  ;;  %v11038_v9 = vld [vmem:[#allocation18 + $0xba0] sm:$0xff] }
0x2bde   :  { %v11162_v51 = vld [vmem:[#allocation18 + $0xf80] sm:$0xff]  ;;  %v16577_v47 = vcombine.high %v11034_v24, %v11038_v9  ;;  %v16576_v1 = vcombine.low %v11034_v24, %v11038_v9  ;;  %v9813_v9 = vrot.slane %v19840_v12, %v19222_v55 }
0x2bdf   :  { %v11166_v26 = vld [vmem:[#allocation18 + $0xfa0] sm:$0xff] }
0x2be0   :  { %13874 = vmatpush1.bf16.msra.mxu1 %v16496_v18  ;;  %13917 = vmatpush1.bf16.msra.mxu0 %v16624_v2  ;;  %v16705_v50 = vcombine.high %v11162_v51, %v11166_v26  ;;  %v11026_v40 = vld [vmem:[#allocation18 + $0xb40] sm:$0xff]  ;;  %v16704_v42 = vcombine.low %v11162_v51, %v11166_v26  ;;  %v9821_v51 = vrot.slane %v19840_v12, %v19219_v54 }
0x2be1   :  { %13875 = vmatprep.subr.bf16.mxu1 %v16489_v45  ;;  %13918 = vmatprep.subr.bf16.mxu0 %v16617_v33  ;;  %v11030_v25 = vld [vmem:[#allocation18 + $0xb60] sm:$0xff] }
0x2be2   :  { %v11154_v15 = vld [vmem:[#allocation18 + $0xf40] sm:$0xff]  ;;  %v16569_v18 = vcombine.high %v11026_v40, %v11030_v25  ;;  %v16568_v30 = vcombine.low %v11026_v40, %v11030_v25 }
0x2be3   :  { %v11158_v36 = vld [vmem:[#allocation18 + $0xf60] sm:$0xff] }
0x2be4   :  { %13876 = vmatpush1.bf16.msra.mxu1 %v16488_v41  ;;  %13919 = vmatpush1.bf16.msra.mxu0 %v16616_v5  ;;  %v16697_v2 = vcombine.high %v11154_v15, %v11158_v36  ;;  %v11018_v45 = vld [vmem:[#allocation18 + $0xb00] sm:$0xff]  ;;  %v16696_v48 = vcombine.low %v11154_v15, %v11158_v36 }
0x2be5   :  { %13877 = vmatprep.subr.bf16.mxu1 %v16481_v28  ;;  %13920 = vmatprep.subr.bf16.mxu0 %v16609_v32  ;;  %v11022_v33 = vld [vmem:[#allocation18 + $0xb20] sm:$0xff] }
0x2be6   :  { %v11146_v34 = vld [vmem:[#allocation18 + $0xf00] sm:$0xff]  ;;  %v16561_v41 = vcombine.high %v11018_v45, %v11022_v33  ;;  %v16560_v0 = vcombine.low %v11018_v45, %v11022_v33  ;;  %v10723_v45 = vld [vmem:[#allocation18 + $0x1c8] sm:$0xff] }
0x2be7   :  { %v11150_v14 = vld [vmem:[#allocation18 + $0xf20] sm:$0xff] }
0x2be8   :  { %13878 = vmatpush1.bf16.msra.mxu1 %v16480_v44  ;;  %13921 = vmatpush1.bf16.msra.mxu0 %v16608_v56  ;;  %v16689_v5 = vcombine.high %v11146_v34, %v11150_v14  ;;  %v11010_v28 = vld [vmem:[#allocation18 + $0xac0] sm:$0xff]  ;;  %v16688_v4 = vcombine.low %v11146_v34, %v11150_v14 }
0x2be9   :  { %13879 = vmatprep.subr.bf16.mxu1 %v16473_v61  ;;  %13922 = vmatprep.subr.bf16.mxu0 %v16601_v13  ;;  %v11014_v32 = vld [vmem:[#allocation18 + $0xae0] sm:$0xff] }
0x2bea   :  { %v11138_v20 = vld [vmem:[#allocation18 + $0xec0] sm:$0xff]  ;;  %v16553_v44 = vcombine.high %v11010_v28, %v11014_v32  ;;  %v16552_v7 = vcombine.low %v11010_v28, %v11014_v32 }
0x2beb   :  { %v11142_v43 = vld [vmem:[#allocation18 + $0xee0] sm:$0xff] }
0x2bec   :  { %13880 = vmatpush1.bf16.msra.mxu1 %v16472_v60  ;;  %13923 = vmatpush1.bf16.msra.mxu0 %v16600_v27  ;;  %v16681_v56 = vcombine.high %v11138_v20, %v11142_v43  ;;  %v11002_v61 = vld [vmem:[#allocation18 + $0xa80] sm:$0xff]  ;;  %v16680_v3 = vcombine.low %v11138_v20, %v11142_v43 }
0x2bed   :  { %13881 = vmatprep.subr.bf16.mxu1 %v16465_v38  ;;  %13924 = vmatprep.subr.bf16.mxu0 %v16593_v59  ;;  %v11006_v13 = vld [vmem:[#allocation18 + $0xaa0] sm:$0xff] }
0x2bee   :  { %v11130_v57 = vld [vmem:[#allocation18 + $0xe80] sm:$0xff]  ;;  %v16545_v60 = vcombine.high %v11002_v61, %v11006_v13  ;;  %v16544_v10 = vcombine.low %v11002_v61, %v11006_v13 }
0x2bef   :  { %v11134_v58 = vld [vmem:[#allocation18 + $0xea0] sm:$0xff] }
0x2bf0   :  { %13882 = vmatpush1.bf16.msra.mxu1 %v16464_v21  ;;  %13925 = vmatpush1.bf16.msra.mxu0 %v16592_v19  ;;  %v16673_v27 = vcombine.high %v11130_v57, %v11134_v58  ;;  %v10994_v38 = vld [vmem:[#allocation18 + $0xa40] sm:$0xff]  ;;  %v16672_v35 = vcombine.low %v11130_v57, %v11134_v58 }
0x2bf1   :  { %13883 = vmatprep.subr.bf16.mxu1 %v16585_v22  ;;  %13926 = vmatprep.subr.bf16.mxu0 %v16713_v46  ;;  %v10998_v59 = vld [vmem:[#allocation18 + $0xa60] sm:$0xff] }
0x2bf2   :  { %v11122_v29 = vld [vmem:[#allocation18 + $0xe40] sm:$0xff]  ;;  %v16537_v22 = vcombine.high %v10994_v38, %v10998_v59  ;;  %v16536_v15 = vcombine.low %v10994_v38, %v10998_v59 }
0x2bf3   :  { %v11126_v31 = vld [vmem:[#allocation18 + $0xe60] sm:$0xff] }
0x2bf4   :  { %13884 = vmatpush2.bf16.msra.mxu1 %v16584_v37  ;;  %13927 = vmatpush2.bf16.msra.mxu0 %v16712_v23  ;;  %v16665_v46 = vcombine.high %v11122_v29, %v11126_v31  ;;  %v10986_v24 = vld [vmem:[#allocation18 + $0xa00] sm:$0xff]  ;;  %v16664_v36 = vcombine.low %v11122_v29, %v11126_v31  ;;  %v10719_v29 = vld [vmem:[#allocation18 + $0x1a8] sm:$0xff] }
0x2bf5   :  { %13885 = vmatprep.subr.bf16.mxu1 %v16577_v47  ;;  %13928 = vmatprep.subr.bf16.mxu0 %v16705_v50  ;;  %v10990_v26 = vld [vmem:[#allocation18 + $0xa20] sm:$0xff]  ;;  %v9809_v47 = vrot.slane %v19840_v12, %v19046_v52  ;;  %v9817_v50 = vrot.slane %v19840_v12, %v19093_v6  ;;  %v10855_v12 = vld [vmem:[#allocation18 + $0x5e8] sm:$0xff] }
0x2bf6   :  { %v11114_v37 = vld [vmem:[#allocation18 + $0xe00] sm:$0xff]  ;;  %v16528_v43 = vcombine.low %v10986_v24, %v10990_v26  ;;  %v10843_v31 = vld [vmem:[#allocation18 + $0x588] sm:$0xff] }
0x2bf7   :  { %v11118_v23 = vld [vmem:[#allocation18 + $0xe20] sm:$0xff] }
0x2bf8   :  { %13886 = vmatpush2.bf16.msra.mxu1 %v16576_v1  ;;  %13929 = vmatpush2.bf16.msra.mxu0 %v16704_v42 }
0x2bf9   :  { %13887 = vmatprep.subr.bf16.mxu1 %v16569_v18  ;;  %13930 = vmatprep.subr.bf16.mxu0 %v16697_v2  ;;  %v16529_v18 = vcombine.high %v10986_v24, %v10990_v26  ;;  %v16657_v2 = vcombine.high %v11114_v37, %v11118_v23  ;;  %v10707_v26 = vld [vmem:[#allocation18 + $0x148] sm:$0xff] }
0x2bfc   :  { %13888 = vmatpush2.bf16.msra.mxu1 %v16568_v30  ;;  %13931 = vmatpush2.bf16.msra.mxu0 %v16696_v48  ;;  %v10727_v48 = vld [vmem:[#allocation18 + $0x1e8] sm:$0xff] }
0x2bfd   :  { %13889 = vmatprep.subr.bf16.mxu1 %v16561_v41  ;;  %13932 = vmatprep.subr.bf16.mxu0 %v16689_v5  ;;  %v10851_v41 = vld [vmem:[#allocation18 + $0x5c8] sm:$0xff]  ;;  %v16267_v13 = vcombine.high %v10723_v45, %v10727_v48 }
0x2bfe   :  { %v16395_v57 = vcombine.high %v10851_v41, %v10855_v12  ;;  %v16394_v24 = vcombine.low %v10851_v41, %v10855_v12  ;;  %v10823_v41 = vld [vmem:[#allocation18 + $0x4e8] sm:$0xff] }
0x2c00   :  { %13890 = vmatpush2.bf16.msra.mxu1 %v16560_v0  ;;  %13933 = vmatpush2.bf16.msra.mxu0 %v16688_v4 }
0x2c01   :  { %13891 = vmatprep.subr.bf16.mxu1 %v16553_v44  ;;  %13934 = vmatprep.subr.bf16.mxu0 %v16681_v56  ;;  %v16656_v44 = vcombine.low %v11114_v37, %v11118_v23  ;;  %v10711_v37 = vld [vmem:[#allocation18 + $0x168] sm:$0xff] }
0x2c02   :  { %v10835_v23 = vld [vmem:[#allocation18 + $0x548] sm:$0xff] }
0x2c04   :  { %13892 = vmatpush2.bf16.msra.mxu1 %v16552_v7  ;;  %13935 = vmatpush2.bf16.msra.mxu0 %v16680_v3 }
0x2c05   :  { %v10590_v21 = vpop.f32.mrf.mxu1  ;;  %v10633_v19 = vpop.f32.mrf.mxu0  ;;  %13893 = vmatprep.subr.bf16.mxu1 %v16545_v60  ;;  %13936 = vmatprep.subr.bf16.mxu0 %v16673_v27  ;;  %v10715_v27 = vld [vmem:[#allocation18 + $0x188] sm:$0xff] }
0x2c06   :  { %v10591_v5 = vadd.f32 %v10590_v21, %v9809_v47  ;;  %v10634_v28 = vadd.f32 %v10633_v19, %v9817_v50  ;;  %v16266_v19 = vcombine.low %v10723_v45, %v10727_v48  ;;  %v10819_v48 = vld [vmem:[#allocation18 + $0x4c8] sm:$0xff] }
0x2c07   :  { %v10592_v40 = vpop.f32.mrf.mxu1  ;;  %v10635_v25 = vpop.f32.mrf.mxu0 }
0x2c08   :  { %13894 = vmatpush2.bf16.msra.mxu1 %v16544_v10  ;;  %13937 = vmatpush2.bf16.msra.mxu0 %v16672_v35  ;;  %v10593_v33 = vadd.f32 %v10592_v40, %v9813_v9  ;;  %v10636_v34 = vadd.f32 %v10635_v25, %v9821_v51  ;;  %v10646_v38 = vmax.f32 %v10591_v5, 0.0  ;;  %v10648_v59 = vmax.f32 %v10634_v28, 0.0  ;;  %v10847_v10 = vld [vmem:[#allocation18 + $0x5a8] sm:$0xff] }
0x2c09   :  { %v10594_v1 = vpop.f32.mrf.mxu1  ;;  %v10637_v42 = vpop.f32.mrf.mxu0  ;;  %13895 = vmatprep.subr.bf16.mxu1 %v16537_v22  ;;  %13938 = vmatprep.subr.bf16.mxu0 %v16665_v46  ;;  %v16386_v40 = vcombine.low %v10843_v31, %v10847_v10  ;;  %v16251_v25 = vcombine.high %v10707_v26, %v10711_v37 }
0x2c0a   :  { %v10595_v14 = vadd.f32 %v10594_v1, %v9809_v47  ;;  %v10638_v30 = vadd.f32 %v10637_v42, %v9817_v50  ;;  %v10647_v58 = vmax.f32 %v10593_v33, 0.0  ;;  %v10649_v7 = vmax.f32 %v10636_v34, 0.0  ;;  %v10839_v47 = vld [vmem:[#allocation18 + $0x568] sm:$0xff] }
0x2c0b   :  { %v10596_v32 = vpop.f32.mrf.mxu1  ;;  %v10639_v20 = vpop.f32.mrf.mxu0  ;;  %v16258_v50 = vcombine.low %v10715_v27, %v10719_v29  ;;  %v10703_v1 = vld [vmem:[#allocation18 + $0x128] sm:$0xff]  ;;  %v16378_v45 = vcombine.low %v10835_v23, %v10839_v47 }
0x2c0c   :  { %v10597_v0 = vadd.f32 %v10596_v32, %v9813_v9  ;;  %v10640_v4 = vadd.f32 %v10639_v20, %v9821_v51  ;;  %13896 = vmatpush2.bf16.msra.mxu1 %v16536_v15  ;;  %13939 = vmatpush2.bf16.msra.mxu0 %v16664_v36  ;;  %v10654_v56 = vmax.f32 %v10595_v14, 0.0  ;;  %v10656_v61 = vmax.f32 %v10638_v30, 0.0  ;;  %v10699_v36 = vld [vmem:[#allocation18 + $0x108] sm:$0xff] }
0x2c0d   :  { %13897 = vmatprep.subr.bf16.mxu1 %v16529_v18  ;;  %13940 = vmatprep.subr.bf16.mxu0 %v16657_v2  ;;  %v16259_v9 = vcombine.high %v10715_v27, %v10719_v29  ;;  %v16387_v51 = vcombine.high %v10843_v31, %v10847_v10  ;;  %v16379_v15 = vcombine.high %v10835_v23, %v10839_v47  ;;  %v10827_v42 = vld [vmem:[#allocation18 + $0x508] sm:$0xff] }
0x2c0e   :  { %v10655_v3 = vmax.f32 %v10597_v0, 0.0  ;;  %v10657_v60 = vmax.f32 %v10640_v4, 0.0  ;;  %v19880_v22 = vpack.c.bf16 %v10654_v56, %v10646_v38  ;;  %v19882_v46 = vpack.c.bf16 %v10656_v61, %v10648_v59  ;;  %v10831_v18 = vld [vmem:[#allocation18 + $0x528] sm:$0xff] }
0x2c0f   :  { %v16250_v2 = vcombine.low %v10707_v26, %v10711_v37  ;;  %v16243_v33 = vcombine.high %v10699_v36, %v10703_v1  ;;  %v16371_v34 = vcombine.high %v10827_v42, %v10831_v18  ;;  %v10691_v14 = vld [vmem:[#allocation18 + $0xc8] sm:$0xff]  ;;  %v16242_v12 = vcombine.low %v10699_v36, %v10703_v1 }
0x2c10   :  { %v19876_v35 = vpack.c.bf16 %v10655_v3, %v10647_v58  ;;  %v19878_v21 = vpack.c.bf16 %v10657_v60, %v10649_v7  ;;  %13898 = vmatpush2.bf16.msra.mxu1 %v16528_v43  ;;  %13941 = vmatpush2.bf16.msra.mxu0 %v16656_v44  ;;  %v10695_v30 = vld [vmem:[#allocation18 + $0xe8] sm:$0xff]  ;;  %v16370_v5 = vcombine.low %v10827_v42, %v10831_v18 }
0x2c11   :  { %13953 = vmatprep.subr.bf16.mxu1 %v16267_v13  ;;  %13996 = vmatprep.subr.bf16.mxu0 %v16395_v57  ;;  %v16235_v28 = vcombine.high %v10691_v14, %v10695_v30  ;;  %v16363_v32 = vcombine.high %v10819_v48, %v10823_v41  ;;  %v10683_v20 = vld [vmem:[#allocation18 + $0x88] sm:$0xff]  ;;  %v16234_v44 = vcombine.low %v10691_v14, %v10695_v30 }
0x2c12   :  { %13899 = vmatprep.mubr.bf16.mxu1 %v19876_v35  ;;  %13942 = vmatprep.mubr.bf16.mxu0 %v19878_v21  ;;  %v10687_v43 = vld [vmem:[#allocation18 + $0xa8] sm:$0xff]  ;;  %v16362_v56 = vcombine.low %v10819_v48, %v10823_v41 }
0x2c13   :  { %13900 = vmatmul.mubr.bf16.vlgmr.msra.gmra.mxu1 %v19880_v22  ;;  %13943 = vmatmul.mubr.bf16.vlgmr.msra.gmra.mxu0 %v19882_v46  ;;  %v10811_v0 = vld [vmem:[#allocation18 + $0x488] sm:$0xff]  ;;  %v16227_v61 = vcombine.high %v10683_v20, %v10687_v43  ;;  %v16226_v60 = vcombine.low %v10683_v20, %v10687_v43 }
0x2c14   :  { %13954 = vmatpush1.bf16.msra.mxu1 %v16266_v19  ;;  %13985 = vmatprep.mubr.bf16.mxu1 %v19850_v39  ;;  %v10815_v4 = vld [vmem:[#allocation18 + $0x4a8] sm:$0xff] }
0x2c15   :  { %13997 = vmatpush1.bf16.msra.mxu0 %v16394_v24  ;;  %14028 = vmatprep.mubr.bf16.mxu0 %v19852_v62  ;;  %v16355_v13 = vcombine.high %v10811_v0, %v10815_v4  ;;  %v10675_v57 = vld [vmem:[#allocation18 + $0x48] sm:$0xff]  ;;  %v16354_v27 = vcombine.low %v10811_v0, %v10815_v4 }
0x2c16   :  { %13955 = vmatprep.subr.bf16.mxu1 %v16259_v9  ;;  %13998 = vmatprep.subr.bf16.mxu0 %v16387_v51  ;;  %v10679_v58 = vld [vmem:[#allocation18 + $0x68] sm:$0xff] }
0x2c17   :  { %v10803_v7 = vld [vmem:[#allocation18 + $0x448] sm:$0xff]  ;;  %v16219_v38 = vcombine.high %v10675_v57, %v10679_v58  ;;  %v16218_v24 = vcombine.low %v10675_v57, %v10679_v58 }
0x2c18   :  { %13956 = vmatpush1.bf16.msra.mxu1 %v16258_v50  ;;  %v10807_v3 = vld [vmem:[#allocation18 + $0x468] sm:$0xff] }
0x2c19   :  { %13999 = vmatpush1.bf16.msra.mxu0 %v16386_v40  ;;  %13957 = vmatprep.subr.bf16.mxu1 %v16251_v25  ;;  %v16347_v59 = vcombine.high %v10803_v7, %v10807_v3  ;;  %v10667_v29 = vld [vmem:[#allocation18 + $0x8] sm:$0xff]  ;;  %v16346_v9 = vcombine.low %v10803_v7, %v10807_v3 }
0x2c1a   :  { %14000 = vmatprep.subr.bf16.mxu0 %v16379_v15  ;;  %v10671_v31 = vld [vmem:[#allocation18 + $0x28] sm:$0xff] }
0x2c1b   :  { %v10795_v10 = vld [vmem:[#allocation18 + $0x408] sm:$0xff]  ;;  %v16211_v51 = vcombine.high %v10667_v29, %v10671_v31  ;;  %v16210_v40 = vcombine.low %v10667_v29, %v10671_v31 }
0x2c1c   :  { %13958 = vmatpush1.bf16.msra.mxu1 %v16250_v2  ;;  %v10799_v19 = vld [vmem:[#allocation18 + $0x428] sm:$0xff] }
0x2c1d   :  { %14001 = vmatpush1.bf16.msra.mxu0 %v16378_v45  ;;  %13959 = vmatprep.subr.bf16.mxu1 %v16243_v33  ;;  %v16339_v26 = vcombine.high %v10795_v10, %v10799_v19  ;;  %v10787_v37 = vld [vmem:[#allocation18 + $0x3c8] sm:$0xff]  ;;  %v16338_v25 = vcombine.low %v10795_v10, %v10799_v19 }
0x2c1e   :  { %14002 = vmatprep.subr.bf16.mxu0 %v16371_v34  ;;  %v10791_v23 = vld [vmem:[#allocation18 + $0x3e8] sm:$0xff] }
0x2c1f   :  { %v10915_v47 = vld [vmem:[#allocation18 + $0x7c8] sm:$0xff]  ;;  %v16331_v15 = vcombine.high %v10787_v37, %v10791_v23  ;;  %v16330_v45 = vcombine.low %v10787_v37, %v10791_v23 }
0x2c20   :  { %13960 = vmatpush1.bf16.msra.mxu1 %v16242_v12  ;;  %v10919_v50 = vld [vmem:[#allocation18 + $0x7e8] sm:$0xff] }
0x2c21   :  { %14003 = vmatpush1.bf16.msra.mxu0 %v16370_v5  ;;  %13961 = vmatprep.subr.bf16.mxu1 %v16235_v28  ;;  %v16459_v36 = vcombine.high %v10915_v47, %v10919_v50  ;;  %v10779_v1 = vld [vmem:[#allocation18 + $0x388] sm:$0xff]  ;;  %v16458_v33 = vcombine.low %v10915_v47, %v10919_v50 }
0x2c22   :  { %14004 = vmatprep.subr.bf16.mxu0 %v16363_v32  ;;  %v10783_v42 = vld [vmem:[#allocation18 + $0x3a8] sm:$0xff] }
0x2c23   :  { %v10907_v18 = vld [vmem:[#allocation18 + $0x788] sm:$0xff]  ;;  %v16323_v34 = vcombine.high %v10779_v1, %v10783_v42  ;;  %v16322_v5 = vcombine.low %v10779_v1, %v10783_v42 }
0x2c24   :  { %13962 = vmatpush1.bf16.msra.mxu1 %v16234_v44  ;;  %v10911_v2 = vld [vmem:[#allocation18 + $0x7a8] sm:$0xff] }
0x2c25   :  { %14005 = vmatpush1.bf16.msra.mxu0 %v16362_v56  ;;  %13963 = vmatprep.subr.bf16.mxu1 %v16227_v61  ;;  %v16451_v14 = vcombine.high %v10907_v18, %v10911_v2  ;;  %v10771_v30 = vld [vmem:[#allocation18 + $0x348] sm:$0xff]  ;;  %v16450_v28 = vcombine.low %v10907_v18, %v10911_v2 }
0x2c26   :  { %14006 = vmatprep.subr.bf16.mxu0 %v16355_v13  ;;  %v10775_v48 = vld [vmem:[#allocation18 + $0x368] sm:$0xff] }
0x2c27   :  { %v10899_v41 = vld [vmem:[#allocation18 + $0x748] sm:$0xff]  ;;  %v16315_v32 = vcombine.high %v10771_v30, %v10775_v48  ;;  %v16314_v56 = vcombine.low %v10771_v30, %v10775_v48 }
0x2c28   :  { %13964 = vmatpush1.bf16.msra.mxu1 %v16226_v60  ;;  %v10903_v12 = vld [vmem:[#allocation18 + $0x768] sm:$0xff] }
0x2c29   :  { %14007 = vmatpush1.bf16.msra.mxu0 %v16354_v27  ;;  %13965 = vmatprep.subr.bf16.mxu1 %v16219_v38  ;;  %v16443_v20 = vcombine.high %v10899_v41, %v10903_v12  ;;  %v10763_v43 = vld [vmem:[#allocation18 + $0x308] sm:$0xff]  ;;  %v16442_v61 = vcombine.low %v10899_v41, %v10903_v12 }
0x2c2a   :  { %14008 = vmatprep.subr.bf16.mxu0 %v16347_v59  ;;  %v10767_v0 = vld [vmem:[#allocation18 + $0x328] sm:$0xff] }
0x2c2b   :  { %v10891_v4 = vld [vmem:[#allocation18 + $0x708] sm:$0xff]  ;;  %v16307_v13 = vcombine.high %v10763_v43, %v10767_v0  ;;  %v16306_v27 = vcombine.low %v10763_v43, %v10767_v0 }
0x2c2c   :  { %13966 = vmatpush1.bf16.msra.mxu1 %v16218_v24  ;;  %v10895_v44 = vld [vmem:[#allocation18 + $0x728] sm:$0xff] }
0x2c2d   :  { %14009 = vmatpush1.bf16.msra.mxu0 %v16346_v9  ;;  %13967 = vmatprep.subr.bf16.mxu1 %v16211_v51  ;;  %v16435_v57 = vcombine.high %v10891_v4, %v10895_v44  ;;  %v10755_v58 = vld [vmem:[#allocation18 + $0x2c8] sm:$0xff]  ;;  %v16434_v38 = vcombine.low %v10891_v4, %v10895_v44 }
0x2c2e   :  { %14010 = vmatprep.subr.bf16.mxu0 %v16339_v26  ;;  %v10759_v7 = vld [vmem:[#allocation18 + $0x2e8] sm:$0xff] }
0x2c2f   :  { %v10883_v3 = vld [vmem:[#allocation18 + $0x6c8] sm:$0xff]  ;;  %v16299_v59 = vcombine.high %v10755_v58, %v10759_v7  ;;  %v16298_v9 = vcombine.low %v10755_v58, %v10759_v7 }
0x2c30   :  { %13968 = vmatpush1.bf16.msra.mxu1 %v16210_v40  ;;  %v10887_v60 = vld [vmem:[#allocation18 + $0x6e8] sm:$0xff] }
0x2c31   :  { %14011 = vmatpush1.bf16.msra.mxu0 %v16338_v25  ;;  %13969 = vmatprep.subr.bf16.mxu1 %v16331_v15  ;;  %v16427_v29 = vcombine.high %v10883_v3, %v10887_v60  ;;  %v10747_v31 = vld [vmem:[#allocation18 + $0x288] sm:$0xff]  ;;  %v16426_v51 = vcombine.low %v10883_v3, %v10887_v60 }
0x2c32   :  { %14012 = vmatprep.subr.bf16.mxu0 %v16459_v36  ;;  %v10751_v10 = vld [vmem:[#allocation18 + $0x2a8] sm:$0xff] }
0x2c33   :  { %v10875_v19 = vld [vmem:[#allocation18 + $0x688] sm:$0xff]  ;;  %v16291_v26 = vcombine.high %v10747_v31, %v10751_v10  ;;  %v16290_v25 = vcombine.low %v10747_v31, %v10751_v10 }
0x2c34   :  { %13970 = vmatpush2.bf16.msra.mxu1 %v16330_v45  ;;  %v10879_v24 = vld [vmem:[#allocation18 + $0x6a8] sm:$0xff] }
0x2c35   :  { %14013 = vmatpush2.bf16.msra.mxu0 %v16458_v33  ;;  %13971 = vmatprep.subr.bf16.mxu1 %v16323_v34  ;;  %v16419_v37 = vcombine.high %v10875_v19, %v10879_v24  ;;  %v10739_v23 = vld [vmem:[#allocation18 + $0x248] sm:$0xff]  ;;  %v16418_v15 = vcombine.low %v10875_v19, %v10879_v24 }
0x2c36   :  { %14014 = vmatprep.subr.bf16.mxu0 %v16451_v14  ;;  %v10743_v47 = vld [vmem:[#allocation18 + $0x268] sm:$0xff] }
0x2c37   :  { %v10867_v50 = vld [vmem:[#allocation18 + $0x648] sm:$0xff]  ;;  %v16283_v36 = vcombine.high %v10739_v23, %v10743_v47  ;;  %v16282_v33 = vcombine.low %v10739_v23, %v10743_v47 }
0x2c38   :  { %13972 = vmatpush2.bf16.msra.mxu1 %v16322_v5  ;;  %v10871_v40 = vld [vmem:[#allocation18 + $0x668] sm:$0xff] }
0x2c39   :  { %14015 = vmatpush2.bf16.msra.mxu0 %v16450_v28  ;;  %13973 = vmatprep.subr.bf16.mxu1 %v16315_v32  ;;  %v16411_v1 = vcombine.high %v10867_v50, %v10871_v40  ;;  %v10731_v42 = vld [vmem:[#allocation18 + $0x208] sm:$0xff]  ;;  %v16410_v34 = vcombine.low %v10867_v50, %v10871_v40 }
0x2c3a   :  { %14016 = vmatprep.subr.bf16.mxu0 %v16443_v20  ;;  %v10735_v18 = vld [vmem:[#allocation18 + $0x228] sm:$0xff] }
0x2c3b   :  { %v10859_v2 = vld [vmem:[#allocation18 + $0x608] sm:$0xff]  ;;  %v16275_v14 = vcombine.high %v10731_v42, %v10735_v18  ;;  %v16274_v28 = vcombine.low %v10731_v42, %v10735_v18 }
0x2c3c   :  { %13974 = vmatpush2.bf16.msra.mxu1 %v16314_v56  ;;  %v10863_v45 = vld [vmem:[#allocation18 + $0x628] sm:$0xff] }
0x2c3d   :  { %14017 = vmatpush2.bf16.msra.mxu0 %v16442_v61  ;;  %13975 = vmatprep.subr.bf16.mxu1 %v16307_v13  ;;  %v16403_v30 = vcombine.high %v10859_v2, %v10863_v45  ;;  %v10979_v48 = vld [vmem:[#allocation18 + $0x9c8] sm:$0xff]  ;;  %v16402_v32 = vcombine.low %v10859_v2, %v10863_v45 }
0x2c3e   :  { %14018 = vmatprep.subr.bf16.mxu0 %v16435_v57  ;;  %v10983_v41 = vld [vmem:[#allocation18 + $0x9e8] sm:$0xff] }
0x2c3f   :  { %v11107_v12 = vld [vmem:[#allocation18 + $0xdc8] sm:$0xff]  ;;  %v16523_v20 = vcombine.high %v10979_v48, %v10983_v41  ;;  %v16522_v44 = vcombine.low %v10979_v48, %v10983_v41 }
0x2c40   :  { %13976 = vmatpush2.bf16.msra.mxu1 %v16306_v27  ;;  %v11111_v5 = vld [vmem:[#allocation18 + $0xde8] sm:$0xff] }
0x2c41   :  { %14019 = vmatpush2.bf16.msra.mxu0 %v16434_v38  ;;  %13977 = vmatprep.subr.bf16.mxu1 %v16299_v59  ;;  %v16651_v43 = vcombine.high %v11107_v12, %v11111_v5  ;;  %v10971_v0 = vld [vmem:[#allocation18 + $0x988] sm:$0xff]  ;;  %v16650_v13 = vcombine.low %v11107_v12, %v11111_v5 }
0x2c42   :  { %14020 = vmatprep.subr.bf16.mxu0 %v16427_v29  ;;  %v10975_v4 = vld [vmem:[#allocation18 + $0x9a8] sm:$0xff] }
0x2c43   :  { %v11099_v56 = vld [vmem:[#allocation18 + $0xd88] sm:$0xff]  ;;  %v16515_v57 = vcombine.high %v10971_v0, %v10975_v4  ;;  %v16514_v38 = vcombine.low %v10971_v0, %v10975_v4 }
0x2c44   :  { %13978 = vmatpush2.bf16.msra.mxu1 %v16298_v9  ;;  %v11103_v61 = vld [vmem:[#allocation18 + $0xda8] sm:$0xff] }
0x2c45   :  { %14021 = vmatpush2.bf16.msra.mxu0 %v16426_v51  ;;  %13979 = vmatprep.subr.bf16.mxu1 %v16291_v26  ;;  %v10963_v58 = vld [vmem:[#allocation18 + $0x948] sm:$0xff]  ;;  %v16643_v3 = vcombine.high %v11099_v56, %v11103_v61  ;;  %v16642_v59 = vcombine.low %v11099_v56, %v11103_v61 }
0x2c46   :  { %14022 = vmatprep.subr.bf16.mxu0 %v16419_v37  ;;  %v10967_v7 = vld [vmem:[#allocation18 + $0x968] sm:$0xff] }
0x2c47   :  { %v11091_v60 = vld [vmem:[#allocation18 + $0xd48] sm:$0xff]  ;;  %v16507_v29 = vcombine.high %v10963_v58, %v10967_v7  ;;  %v16506_v51 = vcombine.low %v10963_v58, %v10967_v7 }
0x2c48   :  { %13980 = vmatpush2.bf16.msra.mxu1 %v16290_v25  ;;  %v11095_v27 = vld [vmem:[#allocation18 + $0xd68] sm:$0xff] }
0x2c49   :  { %14023 = vmatpush2.bf16.msra.mxu0 %v16418_v15  ;;  %13981 = vmatprep.subr.bf16.mxu1 %v16283_v36  ;;  %v16635_v31 = vcombine.high %v11091_v60, %v11095_v27  ;;  %v10955_v10 = vld [vmem:[#allocation18 + $0x908] sm:$0xff]  ;;  %v16634_v26 = vcombine.low %v11091_v60, %v11095_v27 }
0x2c4a   :  { %14024 = vmatprep.subr.bf16.mxu0 %v16411_v1  ;;  %v10959_v19 = vld [vmem:[#allocation18 + $0x928] sm:$0xff] }
0x2c4b   :  { %v11083_v24 = vld [vmem:[#allocation18 + $0xd08] sm:$0xff]  ;;  %v16499_v37 = vcombine.high %v10955_v10, %v10959_v19  ;;  %v16498_v15 = vcombine.low %v10955_v10, %v10959_v19 }
0x2c4c   :  { %13982 = vmatpush2.bf16.msra.mxu1 %v16282_v33  ;;  %v11087_v9 = vld [vmem:[#allocation18 + $0xd28] sm:$0xff] }
0x2c4d   :  { %14025 = vmatpush2.bf16.msra.mxu0 %v16410_v34  ;;  %13983 = vmatprep.subr.bf16.mxu1 %v16275_v14  ;;  %v16627_v23 = vcombine.high %v11083_v24, %v11087_v9  ;;  %v10947_v47 = vld [vmem:[#allocation18 + $0x8c8] sm:$0xff]  ;;  %v16626_v36 = vcombine.low %v11083_v24, %v11087_v9 }
0x2c4e   :  { %14026 = vmatprep.subr.bf16.mxu0 %v16403_v30  ;;  %v10951_v50 = vld [vmem:[#allocation18 + $0x8e8] sm:$0xff] }
0x2c4f   :  { %v11075_v40 = vld [vmem:[#allocation18 + $0xcc8] sm:$0xff]  ;;  %v16491_v1 = vcombine.high %v10947_v47, %v10951_v50  ;;  %v16490_v34 = vcombine.low %v10947_v47, %v10951_v50 }
0x2c50   :  { %13984 = vmatpush2.bf16.msra.mxu1 %v16274_v28  ;;  %v11079_v25 = vld [vmem:[#allocation18 + $0xce8] sm:$0xff] }
0x2c51   :  { %14027 = vmatpush2.bf16.msra.mxu0 %v16402_v32  ;;  %14039 = vmatprep.subr.bf16.mxu1 %v16523_v20  ;;  %v16619_v42 = vcombine.high %v11075_v40, %v11079_v25  ;;  %v10939_v18 = vld [vmem:[#allocation18 + $0x888] sm:$0xff]  ;;  %v16618_v14 = vcombine.low %v11075_v40, %v11079_v25 }
0x2c52   :  { %14082 = vmatprep.subr.bf16.mxu0 %v16651_v43  ;;  %v10943_v2 = vld [vmem:[#allocation18 + $0x8a8] sm:$0xff] }
0x2c53   :  { %13986 = vmatmul.mubr.bf16.vlgmr.msra.gmra.mxu1 %v19854_v11  ;;  %v11067_v45 = vld [vmem:[#allocation18 + $0xc88] sm:$0xff]  ;;  %v16483_v30 = vcombine.high %v10939_v18, %v10943_v2  ;;  %v16482_v32 = vcombine.low %v10939_v18, %v10943_v2 }
0x2c54   :  { %14029 = vmatmul.mubr.bf16.vlgmr.msra.gmra.mxu0 %v19856_v63  ;;  %14040 = vmatpush1.bf16.msra.mxu1 %v16522_v44  ;;  %v11071_v33 = vld [vmem:[#allocation18 + $0xca8] sm:$0xff] }
0x2c55   :  { %14071 = vmatprep.mubr.bf16.mxu1 %v19876_v35  ;;  %14083 = vmatpush1.bf16.msra.mxu0 %v16650_v13  ;;  %v16611_v48 = vcombine.high %v11067_v45, %v11071_v33  ;;  %v10931_v41 = vld [vmem:[#allocation18 + $0x848] sm:$0xff]  ;;  %v16610_v20 = vcombine.low %v11067_v45, %v11071_v33 }
0x2c56   :  { %14114 = vmatprep.mubr.bf16.mxu0 %v19878_v21  ;;  %14041 = vmatprep.subr.bf16.mxu1 %v16515_v57  ;;  %v10935_v12 = vld [vmem:[#allocation18 + $0x868] sm:$0xff] }
0x2c57   :  { %14084 = vmatprep.subr.bf16.mxu0 %v16643_v3  ;;  %v11059_v5 = vld [vmem:[#allocation18 + $0xc48] sm:$0xff]  ;;  %v16475_v43 = vcombine.high %v10931_v41, %v10935_v12  ;;  %v16474_v13 = vcombine.low %v10931_v41, %v10935_v12 }
0x2c58   :  { %14042 = vmatpush1.bf16.msra.mxu1 %v16514_v38  ;;  %v11063_v28 = vld [vmem:[#allocation18 + $0xc68] sm:$0xff] }
0x2c59   :  { %14085 = vmatpush1.bf16.msra.mxu0 %v16642_v59  ;;  %14043 = vmatprep.subr.bf16.mxu1 %v16507_v29  ;;  %v16603_v0 = vcombine.high %v11059_v5, %v11063_v28  ;;  %v10923_v4 = vld [vmem:[#allocation18 + $0x808] sm:$0xff]  ;;  %v16602_v57 = vcombine.low %v11059_v5, %v11063_v28 }
0x2c5a   :  { %14086 = vmatprep.subr.bf16.mxu0 %v16635_v31  ;;  %v10927_v44 = vld [vmem:[#allocation18 + $0x828] sm:$0xff] }
0x2c5b   :  { %v11051_v56 = vld [vmem:[#allocation18 + $0xc08] sm:$0xff]  ;;  %v16467_v58 = vcombine.high %v10923_v4, %v10927_v44  ;;  %v16466_v59 = vcombine.low %v10923_v4, %v10927_v44 }
0x2c5c   :  { %14044 = vmatpush1.bf16.msra.mxu1 %v16506_v51  ;;  %v11055_v61 = vld [vmem:[#allocation18 + $0xc28] sm:$0xff] }
0x2c5d   :  { %14087 = vmatpush1.bf16.msra.mxu0 %v16634_v26  ;;  %14045 = vmatprep.subr.bf16.mxu1 %v16499_v37  ;;  %v16595_v7 = vcombine.high %v11051_v56, %v11055_v61  ;;  %v11043_v3 = vld [vmem:[#allocation18 + $0xbc8] sm:$0xff]  ;;  %v16594_v29 = vcombine.low %v11051_v56, %v11055_v61 }
0x2c5e   :  { %14088 = vmatprep.subr.bf16.mxu0 %v16627_v23  ;;  %v11047_v60 = vld [vmem:[#allocation18 + $0xbe8] sm:$0xff] }
0x2c5f   :  { %v11171_v27 = vld [vmem:[#allocation18 + $0xfc8] sm:$0xff]  ;;  %v16587_v31 = vcombine.high %v11043_v3, %v11047_v60  ;;  %v16586_v26 = vcombine.low %v11043_v3, %v11047_v60 }
0x2c60   :  { %14046 = vmatpush1.bf16.msra.mxu1 %v16498_v15  ;;  %v11175_v38 = vld [vmem:[#allocation18 + $0xfe8] sm:$0xff] }
0x2c61   :  { %14089 = vmatpush1.bf16.msra.mxu0 %v16626_v36  ;;  %14047 = vmatprep.subr.bf16.mxu1 %v16491_v1  ;;  %v16715_v10 = vcombine.high %v11171_v27, %v11175_v38  ;;  %v11035_v19 = vld [vmem:[#allocation18 + $0xb88] sm:$0xff]  ;;  %v16714_v37 = vcombine.low %v11171_v27, %v11175_v38 }
0x2c62   :  { %14090 = vmatprep.subr.bf16.mxu0 %v16619_v42  ;;  %v11039_v24 = vld [vmem:[#allocation18 + $0xba8] sm:$0xff] }
0x2c63   :  { %v11163_v9 = vld [vmem:[#allocation18 + $0xf88] sm:$0xff]  ;;  %v16579_v23 = vcombine.high %v11035_v19, %v11039_v24  ;;  %v16578_v36 = vcombine.low %v11035_v19, %v11039_v24 }
0x2c64   :  { %14048 = vmatpush1.bf16.msra.mxu1 %v16490_v34  ;;  %v11167_v51 = vld [vmem:[#allocation18 + $0xfa8] sm:$0xff] }
0x2c65   :  { %14091 = vmatpush1.bf16.msra.mxu0 %v16618_v14  ;;  %14049 = vmatprep.subr.bf16.mxu1 %v16483_v30  ;;  %v16707_v47 = vcombine.high %v11163_v9, %v11167_v51  ;;  %v11027_v50 = vld [vmem:[#allocation18 + $0xb48] sm:$0xff]  ;;  %v16706_v1 = vcombine.low %v11163_v9, %v11167_v51 }
0x2c66   :  { %14092 = vmatprep.subr.bf16.mxu0 %v16611_v48  ;;  %v11031_v40 = vld [vmem:[#allocation18 + $0xb68] sm:$0xff] }
0x2c67   :  { %v11155_v25 = vld [vmem:[#allocation18 + $0xf48] sm:$0xff]  ;;  %v16571_v42 = vcombine.high %v11027_v50, %v11031_v40  ;;  %v16570_v14 = vcombine.low %v11027_v50, %v11031_v40  ;;  %v10724_v40 = vld [vmem:[#allocation18 + $0x1d0] sm:$0xff] }
0x2c68   :  { %14050 = vmatpush1.bf16.msra.mxu1 %v16482_v32  ;;  %v11159_v15 = vld [vmem:[#allocation18 + $0xf68] sm:$0xff] }
0x2c69   :  { %14093 = vmatpush1.bf16.msra.mxu0 %v16610_v20  ;;  %14051 = vmatprep.subr.bf16.mxu1 %v16475_v43  ;;  %v16699_v18 = vcombine.high %v11155_v25, %v11159_v15  ;;  %v11019_v2 = vld [vmem:[#allocation18 + $0xb08] sm:$0xff]  ;;  %v16698_v30 = vcombine.low %v11155_v25, %v11159_v15  ;;  %v10728_v25 = vld [vmem:[#allocation18 + $0x1f0] sm:$0xff] }
0x2c6a   :  { %14094 = vmatprep.subr.bf16.mxu0 %v16603_v0  ;;  %v11023_v45 = vld [vmem:[#allocation18 + $0xb28] sm:$0xff]  ;;  %v10852_v15 = vld [vmem:[#allocation18 + $0x5d0] sm:$0xff] }
0x2c6b   :  { %v11147_v33 = vld [vmem:[#allocation18 + $0xf08] sm:$0xff]  ;;  %v16563_v48 = vcombine.high %v11019_v2, %v11023_v45  ;;  %v16562_v20 = vcombine.low %v11019_v2, %v11023_v45  ;;  %v10716_v45 = vld [vmem:[#allocation18 + $0x190] sm:$0xff] }
0x2c6c   :  { %14052 = vmatpush1.bf16.msra.mxu1 %v16474_v13  ;;  %v11151_v34 = vld [vmem:[#allocation18 + $0xf28] sm:$0xff] }
0x2c6d   :  { %14095 = vmatpush1.bf16.msra.mxu0 %v16602_v57  ;;  %14053 = vmatprep.subr.bf16.mxu1 %v16467_v58  ;;  %v16691_v41 = vcombine.high %v11147_v33, %v11151_v34  ;;  %v11011_v12 = vld [vmem:[#allocation18 + $0xac8] sm:$0xff]  ;;  %v16690_v43 = vcombine.low %v11147_v33, %v11151_v34  ;;  %v10720_v33 = vld [vmem:[#allocation18 + $0x1b0] sm:$0xff]  ;;  %v16268_v34 = vcombine.low %v10724_v40, %v10728_v25 }
0x2c6e   :  { %14096 = vmatprep.subr.bf16.mxu0 %v16595_v7  ;;  %v11015_v5 = vld [vmem:[#allocation18 + $0xae8] sm:$0xff] }
0x2c6f   :  { %v11139_v28 = vld [vmem:[#allocation18 + $0xec8] sm:$0xff]  ;;  %v16555_v0 = vcombine.high %v11011_v12, %v11015_v5  ;;  %v16554_v57 = vcombine.low %v11011_v12, %v11015_v5  ;;  %v10708_v12 = vld [vmem:[#allocation18 + $0x150] sm:$0xff] }
0x2c70   :  { %14054 = vmatpush1.bf16.msra.mxu1 %v16466_v59  ;;  %v11143_v32 = vld [vmem:[#allocation18 + $0xee8] sm:$0xff]  ;;  %v10712_v5 = vld [vmem:[#allocation18 + $0x170] sm:$0xff] }
0x2c71   :  { %14097 = vmatpush1.bf16.msra.mxu0 %v16594_v29  ;;  %14055 = vmatprep.subr.bf16.mxu1 %v16587_v31  ;;  %v16683_v4 = vcombine.high %v11139_v28, %v11143_v32  ;;  %v11003_v44 = vld [vmem:[#allocation18 + $0xa88] sm:$0xff]  ;;  %v16682_v58 = vcombine.low %v11139_v28, %v11143_v32  ;;  %v10836_v32 = vld [vmem:[#allocation18 + $0x550] sm:$0xff] }
0x2c72   :  { %14098 = vmatprep.subr.bf16.mxu0 %v16715_v10  ;;  %v11007_v56 = vld [vmem:[#allocation18 + $0xaa8] sm:$0xff] }
0x2c73   :  { %v11131_v61 = vld [vmem:[#allocation18 + $0xe88] sm:$0xff]  ;;  %v16547_v7 = vcombine.high %v11003_v44, %v11007_v56  ;;  %v16546_v29 = vcombine.low %v11003_v44, %v11007_v56  ;;  %v10700_v56 = vld [vmem:[#allocation18 + $0x110] sm:$0xff] }
0x2c74   :  { %14056 = vmatpush2.bf16.msra.mxu1 %v16586_v26  ;;  %v11135_v13 = vld [vmem:[#allocation18 + $0xea8] sm:$0xff] }
0x2c75   :  { %14099 = vmatpush2.bf16.msra.mxu0 %v16714_v37  ;;  %14057 = vmatprep.subr.bf16.mxu1 %v16579_v23  ;;  %v16675_v3 = vcombine.high %v11131_v61, %v11135_v13  ;;  %v10995_v60 = vld [vmem:[#allocation18 + $0xa48] sm:$0xff]  ;;  %v16674_v31 = vcombine.low %v11131_v61, %v11135_v13  ;;  %v10704_v61 = vld [vmem:[#allocation18 + $0x130] sm:$0xff] }
0x2c76   :  { %14100 = vmatprep.subr.bf16.mxu0 %v16707_v47  ;;  %v10999_v27 = vld [vmem:[#allocation18 + $0xa68] sm:$0xff]  ;;  %v10828_v13 = vld [vmem:[#allocation18 + $0x510] sm:$0xff] }
0x2c77   :  { %v11123_v38 = vld [vmem:[#allocation18 + $0xe48] sm:$0xff]  ;;  %v16539_v10 = vcombine.high %v10995_v60, %v10999_v27  ;;  %v16538_v37 = vcombine.low %v10995_v60, %v10999_v27  ;;  %v10692_v27 = vld [vmem:[#allocation18 + $0xd0] sm:$0xff] }
0x2c78   :  { %14058 = vmatpush2.bf16.msra.mxu1 %v16578_v36  ;;  %v11127_v59 = vld [vmem:[#allocation18 + $0xe68] sm:$0xff]  ;;  %v10856_v36 = vld [vmem:[#allocation18 + $0x5f0] sm:$0xff] }
0x2c79   :  { %14101 = vmatpush2.bf16.msra.mxu0 %v16706_v1  ;;  %14059 = vmatprep.subr.bf16.mxu1 %v16571_v42  ;;  %v16667_v19 = vcombine.high %v11123_v38, %v11127_v59  ;;  %v10987_v24 = vld [vmem:[#allocation18 + $0xa08] sm:$0xff]  ;;  %v16666_v23 = vcombine.low %v11123_v38, %v11127_v59  ;;  %v16397_v2 = vcombine.high %v10852_v15, %v10856_v36  ;;  %v10696_v38 = vld [vmem:[#allocation18 + $0xf0] sm:$0xff] }
0x2c7a   :  { %14102 = vmatprep.subr.bf16.mxu0 %v16699_v18  ;;  %v10991_v9 = vld [vmem:[#allocation18 + $0xa28] sm:$0xff]  ;;  %v16269_v18 = vcombine.high %v10724_v40, %v10728_v25  ;;  %v10820_v59 = vld [vmem:[#allocation18 + $0x4d0] sm:$0xff] }
0x2c7b   :  { %v11115_v51 = vld [vmem:[#allocation18 + $0xe08] sm:$0xff]  ;;  %v16531_v47 = vcombine.high %v10987_v24, %v10991_v9  ;;  %v16530_v1 = vcombine.low %v10987_v24, %v10991_v9  ;;  %v10684_v9 = vld [vmem:[#allocation18 + $0x90] sm:$0xff] }
0x2c7c   :  { %14060 = vmatpush2.bf16.msra.mxu1 %v16570_v14  ;;  %v11119_v26 = vld [vmem:[#allocation18 + $0xe28] sm:$0xff]  ;;  %v10844_v14 = vld [vmem:[#allocation18 + $0x590] sm:$0xff] }
0x2c7d   :  { %14103 = vmatpush2.bf16.msra.mxu0 %v16698_v30  ;;  %14061 = vmatprep.subr.bf16.mxu1 %v16563_v48  ;;  %v16659_v50 = vcombine.high %v11115_v51, %v11119_v26  ;;  %v16658_v42 = vcombine.low %v11115_v51, %v11119_v26  ;;  %v10848_v30 = vld [vmem:[#allocation18 + $0x5b0] sm:$0xff]  ;;  %v16396_v48 = vcombine.low %v10852_v15, %v10856_v36 }
0x2c7e   :  { %14104 = vmatprep.subr.bf16.mxu0 %v16691_v41  ;;  %v16261_v41 = vcombine.high %v10716_v45, %v10720_v33  ;;  %v16389_v28 = vcombine.high %v10844_v14, %v10848_v30  ;;  %v10688_v51 = vld [vmem:[#allocation18 + $0xb0] sm:$0xff] }
0x2c7f   :  { %v10812_v26 = vld [vmem:[#allocation18 + $0x490] sm:$0xff] }
0x2c80   :  { %14062 = vmatpush2.bf16.msra.mxu1 %v16562_v20  ;;  %v10840_v20 = vld [vmem:[#allocation18 + $0x570] sm:$0xff] }
0x2c81   :  { %14105 = vmatpush2.bf16.msra.mxu0 %v16690_v43  ;;  %14063 = vmatprep.subr.bf16.mxu1 %v16555_v0  ;;  %v16260_v43 = vcombine.low %v10716_v45, %v10720_v33  ;;  %v16388_v0 = vcombine.low %v10844_v14, %v10848_v30  ;;  %v16381_v44 = vcombine.high %v10836_v32, %v10840_v20  ;;  %v10676_v25 = vld [vmem:[#allocation18 + $0x50] sm:$0xff] }
0x2c82   :  { %14106 = vmatprep.subr.bf16.mxu0 %v16683_v4  ;;  %v16253_v4 = vcombine.high %v10708_v12, %v10712_v5  ;;  %v10680_v15 = vld [vmem:[#allocation18 + $0x70] sm:$0xff] }
0x2c83   :  { %v10804_v36 = vld [vmem:[#allocation18 + $0x450] sm:$0xff] }
0x2c84   :  { %14064 = vmatpush2.bf16.msra.mxu1 %v16554_v57  ;;  %v10832_v57 = vld [vmem:[#allocation18 + $0x530] sm:$0xff] }
0x2c85   :  { %14107 = vmatpush2.bf16.msra.mxu0 %v16682_v58  ;;  %14065 = vmatprep.subr.bf16.mxu1 %v16547_v7  ;;  %v16252_v58 = vcombine.low %v10708_v12, %v10712_v5  ;;  %v16380_v7 = vcombine.low %v10836_v32, %v10840_v20  ;;  %v16373_v60 = vcombine.high %v10828_v13, %v10832_v57  ;;  %v10668_v33 = vld [vmem:[#allocation18 + $0x10] sm:$0xff] }
0x2c86   :  { %14108 = vmatprep.subr.bf16.mxu0 %v16675_v3  ;;  %v16245_v3 = vcombine.high %v10700_v56, %v10704_v61  ;;  %v10796_v14 = vld [vmem:[#allocation18 + $0x410] sm:$0xff] }
0x2c87   :  { %v10800_v30 = vld [vmem:[#allocation18 + $0x430] sm:$0xff] }
0x2c88   :  { %14066 = vmatpush2.bf16.msra.mxu1 %v16546_v29  ;;  %v10824_v29 = vld [vmem:[#allocation18 + $0x4f0] sm:$0xff]  ;;  %v16341_v5 = vcombine.high %v10796_v14, %v10800_v30 }
0x2c89   :  { %14109 = vmatpush2.bf16.msra.mxu0 %v16674_v31  ;;  %14067 = vmatprep.subr.bf16.mxu1 %v16539_v10  ;;  %v16244_v31 = vcombine.low %v10700_v56, %v10704_v61  ;;  %v16372_v10 = vcombine.low %v10828_v13, %v10832_v57  ;;  %v16365_v24 = vcombine.high %v10820_v59, %v10824_v29  ;;  %v10792_v32 = vld [vmem:[#allocation18 + $0x3f0] sm:$0xff] }
0x2c8a   :  { %14110 = vmatprep.subr.bf16.mxu0 %v16667_v19  ;;  %v16237_v19 = vcombine.high %v10692_v27, %v10696_v38  ;;  %v10916_v20 = vld [vmem:[#allocation18 + $0x7d0] sm:$0xff] }
0x2c8b   :  { %v10780_v61 = vld [vmem:[#allocation18 + $0x390] sm:$0xff] }
0x2c8c   :  { %14068 = vmatpush2.bf16.msra.mxu1 %v16538_v37  ;;  %v10816_v37 = vld [vmem:[#allocation18 + $0x4b0] sm:$0xff] }
0x2c8d   :  { %14111 = vmatpush2.bf16.msra.mxu0 %v16666_v23  ;;  %14069 = vmatprep.subr.bf16.mxu1 %v16531_v47  ;;  %v16236_v23 = vcombine.low %v10692_v27, %v10696_v38  ;;  %v16364_v47 = vcombine.low %v10820_v59, %v10824_v29  ;;  %v16357_v40 = vcombine.high %v10812_v26, %v10816_v37  ;;  %v10784_v13 = vld [vmem:[#allocation18 + $0x3b0] sm:$0xff] }
0x2c8e   :  { %14112 = vmatprep.subr.bf16.mxu0 %v16659_v50  ;;  %v16229_v50 = vcombine.high %v10684_v9, %v10688_v51  ;;  %v10908_v57 = vld [vmem:[#allocation18 + $0x790] sm:$0xff] }
0x2c8f   :  { %v10772_v38 = vld [vmem:[#allocation18 + $0x350] sm:$0xff] }
0x2c90   :  { %14070 = vmatpush2.bf16.msra.mxu1 %v16530_v1  ;;  %v10808_v1 = vld [vmem:[#allocation18 + $0x470] sm:$0xff] }
0x2c91   :  { %14113 = vmatpush2.bf16.msra.mxu0 %v16658_v42  ;;  %14125 = vmatprep.subr.bf16.mxu1 %v16269_v18  ;;  %v16228_v42 = vcombine.low %v10684_v9, %v10688_v51  ;;  %v16356_v18 = vcombine.low %v10812_v26, %v10816_v37  ;;  %v16349_v45 = vcombine.high %v10804_v36, %v10808_v1  ;;  %v10776_v59 = vld [vmem:[#allocation18 + $0x370] sm:$0xff] }
0x2c92   :  { %14168 = vmatprep.subr.bf16.mxu0 %v16397_v2  ;;  %v16221_v2 = vcombine.high %v10676_v25, %v10680_v15  ;;  %v10900_v29 = vld [vmem:[#allocation18 + $0x750] sm:$0xff] }
0x2c93   :  { %14072 = vmatmul.mubr.bf16.vlgmr.msra.gmra.mxu1 %v19880_v22  ;;  %v10764_v51 = vld [vmem:[#allocation18 + $0x310] sm:$0xff] }
0x2c94   :  { %14115 = vmatmul.mubr.bf16.vlgmr.msra.gmra.mxu0 %v19882_v46  ;;  %14126 = vmatpush1.bf16.msra.mxu1 %v16268_v34  ;;  %v10672_v34 = vld [vmem:[#allocation18 + $0x30] sm:$0xff] }
0x2c95   :  { %14157 = vmatprep.mubr.bf16.mxu1 %v19850_v39  ;;  %14169 = vmatpush1.bf16.msra.mxu0 %v16396_v48  ;;  %v16220_v48 = vcombine.low %v10676_v25, %v10680_v15  ;;  %v16213_v12 = vcombine.high %v10668_v33, %v10672_v34  ;;  %v10768_v26 = vld [vmem:[#allocation18 + $0x330] sm:$0xff] }
0x2c96   :  { %14200 = vmatprep.mubr.bf16.mxu0 %v19852_v62  ;;  %14127 = vmatprep.subr.bf16.mxu1 %v16261_v41  ;;  %v16348_v41 = vcombine.low %v10804_v36, %v10808_v1  ;;  %v10892_v37 = vld [vmem:[#allocation18 + $0x710] sm:$0xff] }
0x2c97   :  { %14170 = vmatprep.subr.bf16.mxu0 %v16389_v28  ;;  %v10788_v28 = vld [vmem:[#allocation18 + $0x3d0] sm:$0xff] }
0x2c98   :  { %14128 = vmatpush1.bf16.msra.mxu1 %v16260_v43  ;;  %v10920_v43 = vld [vmem:[#allocation18 + $0x7f0] sm:$0xff] }
0x2c99   :  { %14171 = vmatpush1.bf16.msra.mxu0 %v16388_v0  ;;  %14129 = vmatprep.subr.bf16.mxu1 %v16253_v4  ;;  %v16212_v0 = vcombine.low %v10668_v33, %v10672_v34  ;;  %v16340_v4 = vcombine.low %v10796_v14, %v10800_v30  ;;  %v16461_v56 = vcombine.high %v10916_v20, %v10920_v43  ;;  %v10756_v15 = vld [vmem:[#allocation18 + $0x2d0] sm:$0xff] }
0x2c9a   :  { %14172 = vmatprep.subr.bf16.mxu0 %v16381_v44  ;;  %v16333_v44 = vcombine.high %v10788_v28, %v10792_v32  ;;  %v10760_v36 = vld [vmem:[#allocation18 + $0x2f0] sm:$0xff] }
0x2c9b   :  { %v10884_v1 = vld [vmem:[#allocation18 + $0x6d0] sm:$0xff] }
0x2c9c   :  { %14130 = vmatpush1.bf16.msra.mxu1 %v16252_v58  ;;  %v10912_v58 = vld [vmem:[#allocation18 + $0x7b0] sm:$0xff] }
0x2c9d   :  { %14173 = vmatpush1.bf16.msra.mxu0 %v16380_v7  ;;  %14131 = vmatprep.subr.bf16.mxu1 %v16245_v3  ;;  %v16332_v7 = vcombine.low %v10788_v28, %v10792_v32  ;;  %v16460_v3 = vcombine.low %v10916_v20, %v10920_v43  ;;  %v16453_v27 = vcombine.high %v10908_v57, %v10912_v58  ;;  %v10748_v34 = vld [vmem:[#allocation18 + $0x290] sm:$0xff] }
0x2c9e   :  { %14174 = vmatprep.subr.bf16.mxu0 %v16373_v60  ;;  %v16325_v60 = vcombine.high %v10780_v61, %v10784_v13  ;;  %v10752_v14 = vld [vmem:[#allocation18 + $0x2b0] sm:$0xff] }
0x2c9f   :  { %v10876_v30 = vld [vmem:[#allocation18 + $0x690] sm:$0xff] }
0x2ca0   :  { %14132 = vmatpush1.bf16.msra.mxu1 %v16244_v31  ;;  %v10904_v31 = vld [vmem:[#allocation18 + $0x770] sm:$0xff] }
0x2ca1   :  { %14175 = vmatpush1.bf16.msra.mxu0 %v16372_v10  ;;  %14133 = vmatprep.subr.bf16.mxu1 %v16237_v19  ;;  %v16324_v10 = vcombine.low %v10780_v61, %v10784_v13  ;;  %v16452_v19 = vcombine.low %v10908_v57, %v10912_v58  ;;  %v16445_v9 = vcombine.high %v10900_v29, %v10904_v31  ;;  %v10740_v32 = vld [vmem:[#allocation18 + $0x250] sm:$0xff] }
0x2ca2   :  { %14176 = vmatprep.subr.bf16.mxu0 %v16365_v24  ;;  %v16317_v24 = vcombine.high %v10772_v38, %v10776_v59  ;;  %v10744_v20 = vld [vmem:[#allocation18 + $0x270] sm:$0xff] }
0x2ca3   :  { %v10868_v43 = vld [vmem:[#allocation18 + $0x650] sm:$0xff] }
0x2ca4   :  { %14134 = vmatpush1.bf16.msra.mxu1 %v16236_v23  ;;  %v10896_v23 = vld [vmem:[#allocation18 + $0x730] sm:$0xff] }
0x2ca5   :  { %14177 = vmatpush1.bf16.msra.mxu0 %v16364_v47  ;;  %14135 = vmatprep.subr.bf16.mxu1 %v16229_v50  ;;  %v16316_v47 = vcombine.low %v10772_v38, %v10776_v59  ;;  %v16444_v50 = vcombine.low %v10900_v29, %v10904_v31  ;;  %v16437_v25 = vcombine.high %v10892_v37, %v10896_v23  ;;  %v10732_v13 = vld [vmem:[#allocation18 + $0x210] sm:$0xff] }
0x2ca6   :  { %14178 = vmatprep.subr.bf16.mxu0 %v16357_v40  ;;  %v16309_v40 = vcombine.high %v10764_v51, %v10768_v26  ;;  %v10736_v57 = vld [vmem:[#allocation18 + $0x230] sm:$0xff] }
0x2ca7   :  { %v10860_v58 = vld [vmem:[#allocation18 + $0x610] sm:$0xff] }
0x2ca8   :  { %14136 = vmatpush1.bf16.msra.mxu1 %v16228_v42  ;;  %v10888_v42 = vld [vmem:[#allocation18 + $0x6f0] sm:$0xff] }
0x2ca9   :  { %14179 = vmatpush1.bf16.msra.mxu0 %v16356_v18  ;;  %14137 = vmatprep.subr.bf16.mxu1 %v16221_v2  ;;  %v16308_v18 = vcombine.low %v10764_v51, %v10768_v26  ;;  %v16436_v2 = vcombine.low %v10892_v37, %v10896_v23  ;;  %v16429_v33 = vcombine.high %v10884_v1, %v10888_v42  ;;  %v10980_v59 = vld [vmem:[#allocation18 + $0x9d0] sm:$0xff] }
0x2caa   :  { %14180 = vmatprep.subr.bf16.mxu0 %v16349_v45  ;;  %v16301_v45 = vcombine.high %v10756_v15, %v10760_v36  ;;  %v10984_v29 = vld [vmem:[#allocation18 + $0x9f0] sm:$0xff] }
0x2cab   :  { %v11108_v31 = vld [vmem:[#allocation18 + $0xdd0] sm:$0xff]  ;;  %v16524_v23 = vcombine.low %v10980_v59, %v10984_v29 }
0x2cac   :  { %14138 = vmatpush1.bf16.msra.mxu1 %v16220_v48  ;;  %v10880_v48 = vld [vmem:[#allocation18 + $0x6b0] sm:$0xff] }
0x2cad   :  { %14181 = vmatpush1.bf16.msra.mxu0 %v16348_v41  ;;  %14139 = vmatprep.subr.bf16.mxu1 %v16213_v12  ;;  %v16300_v41 = vcombine.low %v10756_v15, %v10760_v36  ;;  %v16428_v12 = vcombine.low %v10884_v1, %v10888_v42  ;;  %v16421_v28 = vcombine.high %v10876_v30, %v10880_v48  ;;  %v10972_v26 = vld [vmem:[#allocation18 + $0x990] sm:$0xff] }
0x2cae   :  { %14182 = vmatprep.subr.bf16.mxu0 %v16341_v5  ;;  %v16293_v5 = vcombine.high %v10748_v34, %v10752_v14  ;;  %v10976_v37 = vld [vmem:[#allocation18 + $0x9b0] sm:$0xff] }
0x2caf   :  { %v10964_v15 = vld [vmem:[#allocation18 + $0x950] sm:$0xff] }
0x2cb0   :  { %14140 = vmatpush1.bf16.msra.mxu1 %v16212_v0  ;;  %v10872_v0 = vld [vmem:[#allocation18 + $0x670] sm:$0xff] }
0x2cb1   :  { %14183 = vmatpush1.bf16.msra.mxu0 %v16340_v4  ;;  %14141 = vmatprep.subr.bf16.mxu1 %v16333_v44  ;;  %v16292_v4 = vcombine.low %v10748_v34, %v10752_v14  ;;  %v16420_v44 = vcombine.low %v10876_v30, %v10880_v48  ;;  %v16413_v61 = vcombine.high %v10868_v43, %v10872_v0  ;;  %v10968_v36 = vld [vmem:[#allocation18 + $0x970] sm:$0xff] }
0x2cb2   :  { %14184 = vmatprep.subr.bf16.mxu0 %v16461_v56  ;;  %v16285_v56 = vcombine.high %v10740_v32, %v10744_v20  ;;  %v11092_v42 = vld [vmem:[#allocation18 + $0xd50] sm:$0xff] }
0x2cb3   :  { %v10956_v14 = vld [vmem:[#allocation18 + $0x910] sm:$0xff] }
0x2cb4   :  { %14142 = vmatpush2.bf16.msra.mxu1 %v16332_v7  ;;  %v10864_v7 = vld [vmem:[#allocation18 + $0x630] sm:$0xff] }
0x2cb5   :  { %14185 = vmatpush2.bf16.msra.mxu0 %v16460_v3  ;;  %14143 = vmatprep.subr.bf16.mxu1 %v16325_v60  ;;  %v16284_v3 = vcombine.low %v10740_v32, %v10744_v20  ;;  %v16412_v60 = vcombine.low %v10868_v43, %v10872_v0  ;;  %v16405_v38 = vcombine.high %v10860_v58, %v10864_v7  ;;  %v10960_v30 = vld [vmem:[#allocation18 + $0x930] sm:$0xff] }
0x2cb6   :  { %14186 = vmatprep.subr.bf16.mxu0 %v16453_v27  ;;  %v16277_v27 = vcombine.high %v10732_v13, %v10736_v57  ;;  %v11084_v48 = vld [vmem:[#allocation18 + $0xd10] sm:$0xff] }
0x2cb7   :  { %v10948_v20 = vld [vmem:[#allocation18 + $0x8d0] sm:$0xff] }
0x2cb8   :  { %14144 = vmatpush2.bf16.msra.mxu1 %v16324_v10  ;;  %v11112_v10 = vld [vmem:[#allocation18 + $0xdf0] sm:$0xff] }
0x2cb9   :  { %14187 = vmatpush2.bf16.msra.mxu0 %v16452_v19  ;;  %14145 = vmatprep.subr.bf16.mxu1 %v16317_v24  ;;  %v16276_v19 = vcombine.low %v10732_v13, %v10736_v57  ;;  %v16404_v24 = vcombine.low %v10860_v58, %v10864_v7  ;;  %v16653_v51 = vcombine.high %v11108_v31, %v11112_v10  ;;  %v10952_v43 = vld [vmem:[#allocation18 + $0x8f0] sm:$0xff] }
0x2cba   :  { %14188 = vmatprep.subr.bf16.mxu0 %v16445_v9  ;;  %v16525_v9 = vcombine.high %v10980_v59, %v10984_v29  ;;  %v11076_v0 = vld [vmem:[#allocation18 + $0xcd0] sm:$0xff] }
0x2cbb   :  { %v10940_v57 = vld [vmem:[#allocation18 + $0x890] sm:$0xff] }
0x2cbc   :  { %14146 = vmatpush2.bf16.msra.mxu1 %v16316_v47  ;;  %v11100_v47 = vld [vmem:[#allocation18 + $0xd90] sm:$0xff] }
0x2cbd   :  { %14189 = vmatpush2.bf16.msra.mxu0 %v16444_v50  ;;  %14147 = vmatprep.subr.bf16.mxu1 %v16309_v40  ;;  %v11104_v50 = vld [vmem:[#allocation18 + $0xdb0] sm:$0xff]  ;;  %v16652_v40 = vcombine.low %v11108_v31, %v11112_v10 }
0x2cbe   :  { %14190 = vmatprep.subr.bf16.mxu0 %v16437_v25  ;;  %v16517_v25 = vcombine.high %v10972_v26, %v10976_v37  ;;  %v16645_v1 = vcombine.high %v11100_v47, %v11104_v50  ;;  %v10944_v58 = vld [vmem:[#allocation18 + $0x8b0] sm:$0xff] }
0x2cbf   :  { %v11068_v7 = vld [vmem:[#allocation18 + $0xc90] sm:$0xff] }
0x2cc0   :  { %14148 = vmatpush2.bf16.msra.mxu1 %v16308_v18  ;;  %v11096_v18 = vld [vmem:[#allocation18 + $0xd70] sm:$0xff] }
0x2cc1   :  { %14191 = vmatpush2.bf16.msra.mxu0 %v16436_v2  ;;  %14149 = vmatprep.subr.bf16.mxu1 %v16301_v45  ;;  %v16516_v2 = vcombine.low %v10972_v26, %v10976_v37  ;;  %v16644_v45 = vcombine.low %v11100_v47, %v11104_v50  ;;  %v16637_v34 = vcombine.high %v11092_v42, %v11096_v18  ;;  %v10932_v29 = vld [vmem:[#allocation18 + $0x850] sm:$0xff] }
0x2cc2   :  { %14192 = vmatprep.subr.bf16.mxu0 %v16429_v33  ;;  %v16509_v33 = vcombine.high %v10964_v15, %v10968_v36  ;;  %v10936_v31 = vld [vmem:[#allocation18 + $0x870] sm:$0xff] }
0x2cc3   :  { %v11060_v10 = vld [vmem:[#allocation18 + $0xc50] sm:$0xff] }
0x2cc4   :  { %14150 = vmatpush2.bf16.msra.mxu1 %v16300_v41  ;;  %v11088_v41 = vld [vmem:[#allocation18 + $0xd30] sm:$0xff] }
0x2cc5   :  { %14193 = vmatpush2.bf16.msra.mxu0 %v16428_v12  ;;  %14151 = vmatprep.subr.bf16.mxu1 %v16293_v5  ;;  %v16508_v12 = vcombine.low %v10964_v15, %v10968_v36  ;;  %v16636_v5 = vcombine.low %v11092_v42, %v11096_v18  ;;  %v16629_v32 = vcombine.high %v11084_v48, %v11088_v41  ;;  %v10924_v37 = vld [vmem:[#allocation18 + $0x810] sm:$0xff] }
0x2cc6   :  { %14194 = vmatprep.subr.bf16.mxu0 %v16421_v28  ;;  %v16501_v28 = vcombine.high %v10956_v14, %v10960_v30  ;;  %v11052_v47 = vld [vmem:[#allocation18 + $0xc10] sm:$0xff] }
0x2cc7   :  { %v11056_v50 = vld [vmem:[#allocation18 + $0xc30] sm:$0xff] }
0x2cc8   :  { %14152 = vmatpush2.bf16.msra.mxu1 %v16292_v4  ;;  %v11080_v4 = vld [vmem:[#allocation18 + $0xcf0] sm:$0xff]  ;;  %v16597_v36 = vcombine.high %v11052_v47, %v11056_v50 }
0x2cc9   :  { %14195 = vmatpush2.bf16.msra.mxu0 %v16420_v44  ;;  %14153 = vmatprep.subr.bf16.mxu1 %v16285_v56  ;;  %v16500_v44 = vcombine.low %v10956_v14, %v10960_v30  ;;  %v16628_v56 = vcombine.low %v11084_v48, %v11088_v41  ;;  %v16621_v13 = vcombine.high %v11076_v0, %v11080_v4  ;;  %v11048_v42 = vld [vmem:[#allocation18 + $0xbf0] sm:$0xff] }
0x2cca   :  { %14196 = vmatprep.subr.bf16.mxu0 %v16413_v61  ;;  %v16493_v61 = vcombine.high %v10948_v20, %v10952_v43  ;;  %v11172_v18 = vld [vmem:[#allocation18 + $0xfd0] sm:$0xff] }
0x2ccb   :  { %v11036_v30 = vld [vmem:[#allocation18 + $0xb90] sm:$0xff] }
0x2ccc   :  { %14154 = vmatpush2.bf16.msra.mxu1 %v16284_v3  ;;  %v11072_v3 = vld [vmem:[#allocation18 + $0xcb0] sm:$0xff] }
0x2ccd   :  { %14197 = vmatpush2.bf16.msra.mxu0 %v16412_v60  ;;  %14155 = vmatprep.subr.bf16.mxu1 %v16277_v27  ;;  %v16492_v60 = vcombine.low %v10948_v20, %v10952_v43  ;;  %v16620_v27 = vcombine.low %v11076_v0, %v11080_v4  ;;  %v16613_v59 = vcombine.high %v11068_v7, %v11072_v3  ;;  %v11040_v48 = vld [vmem:[#allocation18 + $0xbb0] sm:$0xff] }
0x2cce   :  { %14198 = vmatprep.subr.bf16.mxu0 %v16405_v38  ;;  %v16485_v38 = vcombine.high %v10940_v57, %v10944_v58  ;;  %v11164_v41 = vld [vmem:[#allocation18 + $0xf90] sm:$0xff] }
0x2ccf   :  { %v11028_v43 = vld [vmem:[#allocation18 + $0xb50] sm:$0xff] }
0x2cd0   :  { %14156 = vmatpush2.bf16.msra.mxu1 %v16276_v19  ;;  %v11064_v19 = vld [vmem:[#allocation18 + $0xc70] sm:$0xff] }
0x2cd1   :  { %14199 = vmatpush2.bf16.msra.mxu0 %v16404_v24  ;;  %14211 = vmatprep.subr.bf16.mxu1 %v16525_v9  ;;  %v16484_v24 = vcombine.low %v10940_v57, %v10944_v58  ;;  %v16612_v9 = vcombine.low %v11068_v7, %v11072_v3  ;;  %v16605_v26 = vcombine.high %v11060_v10, %v11064_v19  ;;  %v11032_v0 = vld [vmem:[#allocation18 + $0xb70] sm:$0xff] }
0x2cd2   :  { %14254 = vmatprep.subr.bf16.mxu0 %v16653_v51  ;;  %v16477_v51 = vcombine.high %v10932_v29, %v10936_v31  ;;  %v11156_v4 = vld [vmem:[#allocation18 + $0xf50] sm:$0xff] }
0x2cd3   :  { %14158 = vmatmul.mubr.bf16.vlgmr.msra.gmra.mxu1 %v19854_v11  ;;  %v11020_v58 = vld [vmem:[#allocation18 + $0xb10] sm:$0xff] }
0x2cd4   :  { %14201 = vmatmul.mubr.bf16.vlgmr.msra.gmra.mxu0 %v19856_v63  ;;  %14212 = vmatpush1.bf16.msra.mxu1 %v16524_v23  ;;  %v10928_v23 = vld [vmem:[#allocation18 + $0x830] sm:$0xff] }
0x2cd5   :  { %14243 = vmatprep.mubr.bf16.mxu1 %v19876_v35  ;;  %14255 = vmatpush1.bf16.msra.mxu0 %v16652_v40  ;;  %v16476_v40 = vcombine.low %v10932_v29, %v10936_v31  ;;  %v16469_v15 = vcombine.high %v10924_v37, %v10928_v23  ;;  %v11024_v7 = vld [vmem:[#allocation18 + $0xb30] sm:$0xff] }
0x2cd6   :  { %14286 = vmatprep.mubr.bf16.mxu0 %v19878_v21  ;;  %14213 = vmatprep.subr.bf16.mxu1 %v16517_v25  ;;  %v16604_v25 = vcombine.low %v11060_v10, %v11064_v19  ;;  %v11148_v3 = vld [vmem:[#allocation18 + $0xf10] sm:$0xff] }
0x2cd7   :  { %14256 = vmatprep.subr.bf16.mxu0 %v16645_v1  ;;  %v11044_v1 = vld [vmem:[#allocation18 + $0xbd0] sm:$0xff] }
0x2cd8   :  { %14214 = vmatpush1.bf16.msra.mxu1 %v16516_v2  ;;  %v11176_v2 = vld [vmem:[#allocation18 + $0xff0] sm:$0xff] }
0x2cd9   :  { %14257 = vmatpush1.bf16.msra.mxu0 %v16644_v45  ;;  %14215 = vmatprep.subr.bf16.mxu1 %v16509_v33  ;;  %v16468_v45 = vcombine.low %v10924_v37, %v10928_v23  ;;  %v16596_v33 = vcombine.low %v11052_v47, %v11056_v50  ;;  %v16717_v14 = vcombine.high %v11172_v18, %v11176_v2  ;;  %v11012_v31 = vld [vmem:[#allocation18 + $0xad0] sm:$0xff] }
0x2cda   :  { %14258 = vmatprep.subr.bf16.mxu0 %v16637_v34  ;;  %v16589_v34 = vcombine.high %v11044_v1, %v11048_v42  ;;  %v11016_v10 = vld [vmem:[#allocation18 + $0xaf0] sm:$0xff] }
0x2cdb   :  { %v11140_v19 = vld [vmem:[#allocation18 + $0xed0] sm:$0xff] }
0x2cdc   :  { %14216 = vmatpush1.bf16.msra.mxu1 %v16508_v12  ;;  %v11168_v12 = vld [vmem:[#allocation18 + $0xfb0] sm:$0xff] }
0x2cdd   :  { %14259 = vmatpush1.bf16.msra.mxu0 %v16636_v5  ;;  %14217 = vmatprep.subr.bf16.mxu1 %v16501_v28  ;;  %v16588_v5 = vcombine.low %v11044_v1, %v11048_v42  ;;  %v16716_v28 = vcombine.low %v11172_v18, %v11176_v2  ;;  %v16709_v20 = vcombine.high %v11164_v41, %v11168_v12  ;;  %v11004_v23 = vld [vmem:[#allocation18 + $0xa90] sm:$0xff] }
0x2cde   :  { %14260 = vmatprep.subr.bf16.mxu0 %v16629_v32  ;;  %v16581_v32 = vcombine.high %v11036_v30, %v11040_v48  ;;  %v11008_v47 = vld [vmem:[#allocation18 + $0xab0] sm:$0xff] }
0x2cdf   :  { %v11132_v50 = vld [vmem:[#allocation18 + $0xe90] sm:$0xff] }
0x2ce0   :  { %14218 = vmatpush1.bf16.msra.mxu1 %v16500_v44  ;;  %v11160_v44 = vld [vmem:[#allocation18 + $0xf70] sm:$0xff] }
0x2ce1   :  { %14261 = vmatpush1.bf16.msra.mxu0 %v16628_v56  ;;  %14219 = vmatprep.subr.bf16.mxu1 %v16493_v61  ;;  %v16580_v56 = vcombine.low %v11036_v30, %v11040_v48  ;;  %v16708_v61 = vcombine.low %v11164_v41, %v11168_v12  ;;  %v16701_v57 = vcombine.high %v11156_v4, %v11160_v44  ;;  %v10996_v42 = vld [vmem:[#allocation18 + $0xa50] sm:$0xff] }
0x2ce2   :  { %14262 = vmatprep.subr.bf16.mxu0 %v16621_v13  ;;  %v16573_v13 = vcombine.high %v11028_v43, %v11032_v0  ;;  %v11000_v18 = vld [vmem:[#allocation18 + $0xa70] sm:$0xff] }
0x2ce3   :  { %v11124_v2 = vld [vmem:[#allocation18 + $0xe50] sm:$0xff] }
0x2ce4   :  { %14220 = vmatpush1.bf16.msra.mxu1 %v16492_v60  ;;  %v11152_v60 = vld [vmem:[#allocation18 + $0xf30] sm:$0xff] }
0x2ce5   :  { %14263 = vmatpush1.bf16.msra.mxu0 %v16620_v27  ;;  %14221 = vmatprep.subr.bf16.mxu1 %v16485_v38  ;;  %v16572_v27 = vcombine.low %v11028_v43, %v11032_v0  ;;  %v16700_v38 = vcombine.low %v11156_v4, %v11160_v44  ;;  %v16693_v29 = vcombine.high %v11148_v3, %v11152_v60  ;;  %v10988_v48 = vld [vmem:[#allocation18 + $0xa10] sm:$0xff]  ;;  %v10725_v0 = vld [vmem:[#allocation18 + $0x1d8] sm:$0xff] }
0x2ce6   :  { %14264 = vmatprep.subr.bf16.mxu0 %v16613_v59  ;;  %v16565_v59 = vcombine.high %v11020_v58, %v11024_v7  ;;  %v10992_v41 = vld [vmem:[#allocation18 + $0xa30] sm:$0xff]  ;;  %v10729_v4 = vld [vmem:[#allocation18 + $0x1f8] sm:$0xff] }
0x2ce7   :  { %v11116_v12 = vld [vmem:[#allocation18 + $0xe10] sm:$0xff]  ;;  %v10853_v44 = vld [vmem:[#allocation18 + $0x5d8] sm:$0xff] }
0x2ce8   :  { %14222 = vmatpush1.bf16.msra.mxu1 %v16484_v24  ;;  %v11144_v24 = vld [vmem:[#allocation18 + $0xef0] sm:$0xff] }
0x2ce9   :  { %14265 = vmatpush1.bf16.msra.mxu0 %v16612_v9  ;;  %14223 = vmatprep.subr.bf16.mxu1 %v16477_v51  ;;  %v16564_v9 = vcombine.low %v11020_v58, %v11024_v7  ;;  %v16692_v51 = vcombine.low %v11148_v3, %v11152_v60  ;;  %v16685_v37 = vcombine.high %v11140_v19, %v11144_v24  ;;  %v10717_v7 = vld [vmem:[#allocation18 + $0x198] sm:$0xff] }
0x2cea   :  { %14266 = vmatprep.subr.bf16.mxu0 %v16605_v26  ;;  %v16557_v26 = vcombine.high %v11012_v31, %v11016_v10  ;;  %v10721_v3 = vld [vmem:[#allocation18 + $0x1b8] sm:$0xff]  ;;  %v16270_v60 = vcombine.low %v10725_v0, %v10729_v4 }
0x2cec   :  { %14224 = vmatpush1.bf16.msra.mxu1 %v16476_v40  ;;  %v11136_v40 = vld [vmem:[#allocation18 + $0xeb0] sm:$0xff] }
0x2ced   :  { %14267 = vmatpush1.bf16.msra.mxu0 %v16604_v25  ;;  %14225 = vmatprep.subr.bf16.mxu1 %v16469_v15  ;;  %v16556_v25 = vcombine.low %v11012_v31, %v11016_v10  ;;  %v16684_v15 = vcombine.low %v11140_v19, %v11144_v24  ;;  %v16677_v1 = vcombine.high %v11132_v50, %v11136_v40  ;;  %v10709_v31 = vld [vmem:[#allocation18 + $0x158] sm:$0xff] }
0x2cee   :  { %14268 = vmatprep.subr.bf16.mxu0 %v16597_v36  ;;  %v16549_v36 = vcombine.high %v11004_v23, %v11008_v47  ;;  %v10713_v10 = vld [vmem:[#allocation18 + $0x178] sm:$0xff] }
0x2cef   :  { %v10837_v24 = vld [vmem:[#allocation18 + $0x558] sm:$0xff] }
0x2cf0   :  { %14226 = vmatpush1.bf16.msra.mxu1 %v16468_v45  ;;  %v11128_v45 = vld [vmem:[#allocation18 + $0xe70] sm:$0xff] }
0x2cf1   :  { %14269 = vmatpush1.bf16.msra.mxu0 %v16596_v33  ;;  %14227 = vmatprep.subr.bf16.mxu1 %v16589_v34  ;;  %v16548_v33 = vcombine.low %v11004_v23, %v11008_v47  ;;  %v16676_v34 = vcombine.low %v11132_v50, %v11136_v40  ;;  %v16669_v30 = vcombine.high %v11124_v2, %v11128_v45  ;;  %v10701_v47 = vld [vmem:[#allocation18 + $0x118] sm:$0xff] }
0x2cf2   :  { %14270 = vmatprep.subr.bf16.mxu0 %v16717_v14  ;;  %v16541_v14 = vcombine.high %v10996_v42, %v11000_v18  ;;  %v10705_v50 = vld [vmem:[#allocation18 + $0x138] sm:$0xff] }
0x2cf3   :  { %v10829_v40 = vld [vmem:[#allocation18 + $0x518] sm:$0xff] }
0x2cf4   :  { %14228 = vmatpush2.bf16.msra.mxu1 %v16588_v5  ;;  %v11120_v5 = vld [vmem:[#allocation18 + $0xe30] sm:$0xff] }
0x2cf5   :  { %14271 = vmatpush2.bf16.msra.mxu0 %v16716_v28  ;;  %14229 = vmatprep.subr.bf16.mxu1 %v16581_v32  ;;  %v16540_v28 = vcombine.low %v10996_v42, %v11000_v18  ;;  %v16668_v32 = vcombine.low %v11124_v2, %v11128_v45  ;;  %v16661_v43 = vcombine.high %v11116_v12, %v11120_v5  ;;  %v10693_v42 = vld [vmem:[#allocation18 + $0xd8] sm:$0xff] }
0x2cf6   :  { %14272 = vmatprep.subr.bf16.mxu0 %v16709_v20  ;;  %v16533_v20 = vcombine.high %v10988_v48, %v10992_v41  ;;  %v10697_v18 = vld [vmem:[#allocation18 + $0xf8] sm:$0xff] }
0x2cf7   :  { %v10821_v2 = vld [vmem:[#allocation18 + $0x4d8] sm:$0xff] }
0x2cf8   :  { %14230 = vmatpush2.bf16.msra.mxu1 %v16580_v56  ;;  %v10857_v56 = vld [vmem:[#allocation18 + $0x5f8] sm:$0xff] }
0x2cf9   :  { %14273 = vmatpush2.bf16.msra.mxu0 %v16708_v61  ;;  %14231 = vmatprep.subr.bf16.mxu1 %v16573_v13  ;;  %v16532_v61 = vcombine.low %v10988_v48, %v10992_v41  ;;  %v16660_v13 = vcombine.low %v11116_v12, %v11120_v5  ;;  %v16399_v58 = vcombine.high %v10853_v44, %v10857_v56  ;;  %v10825_v45 = vld [vmem:[#allocation18 + $0x4f8] sm:$0xff] }
0x2cfa   :  { %14274 = vmatprep.subr.bf16.mxu0 %v16701_v57  ;;  %v16271_v57 = vcombine.high %v10725_v0, %v10729_v4  ;;  %v10689_v48 = vld [vmem:[#allocation18 + $0xb8] sm:$0xff]  ;;  %v16238_v5 = vcombine.low %v10693_v42, %v10697_v18 }
0x2cfb   :  { %v10813_v41 = vld [vmem:[#allocation18 + $0x498] sm:$0xff] }
0x2cfc   :  { %14232 = vmatpush2.bf16.msra.mxu1 %v16572_v27  ;;  %v10845_v27 = vld [vmem:[#allocation18 + $0x598] sm:$0xff] }
0x2cfd   :  { %14275 = vmatpush2.bf16.msra.mxu0 %v16700_v38  ;;  %14233 = vmatprep.subr.bf16.mxu1 %v16565_v59  ;;  %v10849_v38 = vld [vmem:[#allocation18 + $0x5b8] sm:$0xff]  ;;  %v16398_v59 = vcombine.low %v10853_v44, %v10857_v56 }
0x2cfe   :  { %14276 = vmatprep.subr.bf16.mxu0 %v16693_v29  ;;  %v16263_v29 = vcombine.high %v10717_v7, %v10721_v3  ;;  %v16391_v19 = vcombine.high %v10845_v27, %v10849_v38  ;;  %v10817_v12 = vld [vmem:[#allocation18 + $0x4b8] sm:$0xff] }
0x2cff   :  { %v10681_v0 = vld [vmem:[#allocation18 + $0x78] sm:$0xff] }
0x2d00   :  { %14234 = vmatpush2.bf16.msra.mxu1 %v16564_v9  ;;  %v10841_v9 = vld [vmem:[#allocation18 + $0x578] sm:$0xff] }
0x2d01   :  { %14277 = vmatpush2.bf16.msra.mxu0 %v16692_v51  ;;  %14235 = vmatprep.subr.bf16.mxu1 %v16557_v26  ;;  %v16262_v51 = vcombine.low %v10717_v7, %v10721_v3  ;;  %v16390_v26 = vcombine.low %v10845_v27, %v10849_v38  ;;  %v16383_v23 = vcombine.high %v10837_v24, %v10841_v9  ;;  %v10805_v4 = vld [vmem:[#allocation18 + $0x458] sm:$0xff] }
0x2d02   :  { %14278 = vmatprep.subr.bf16.mxu0 %v16685_v37  ;;  %v16255_v37 = vcombine.high %v10709_v31, %v10713_v10  ;;  %v10809_v44 = vld [vmem:[#allocation18 + $0x478] sm:$0xff] }
0x2d03   :  { %v10673_v7 = vld [vmem:[#allocation18 + $0x38] sm:$0xff]  ;;  %v16350_v38 = vcombine.low %v10805_v4, %v10809_v44 }
0x2d04   :  { %14236 = vmatpush2.bf16.msra.mxu1 %v16556_v25  ;;  %v10833_v25 = vld [vmem:[#allocation18 + $0x538] sm:$0xff] }
0x2d05   :  { %14279 = vmatpush2.bf16.msra.mxu0 %v16684_v15  ;;  %14237 = vmatprep.subr.bf16.mxu1 %v16549_v36  ;;  %v16254_v15 = vcombine.low %v10709_v31, %v10713_v10  ;;  %v16382_v36 = vcombine.low %v10837_v24, %v10841_v9  ;;  %v10797_v3 = vld [vmem:[#allocation18 + $0x418] sm:$0xff] }
0x2d06   :  { %14280 = vmatprep.subr.bf16.mxu0 %v16677_v1  ;;  %v16247_v1 = vcombine.high %v10701_v47, %v10705_v50  ;;  %v10789_v31 = vld [vmem:[#allocation18 + $0x3d8] sm:$0xff] }
0x2d07   :  { %v10793_v10 = vld [vmem:[#allocation18 + $0x3f8] sm:$0xff] }
0x2d08   :  { %14238 = vmatpush2.bf16.msra.mxu1 %v16548_v33  ;;  %v16374_v33 = vcombine.low %v10829_v40, %v10833_v25  ;;  %v10921_v24 = vld [vmem:[#allocation18 + $0x7f8] sm:$0xff] }
0x2d09   :  { %14281 = vmatpush2.bf16.msra.mxu0 %v16676_v34  ;;  %14239 = vmatprep.subr.bf16.mxu1 %v16541_v14  ;;  %v16239_v34 = vcombine.high %v10693_v42, %v10697_v18  ;;  %v16367_v14 = vcombine.high %v10821_v2, %v10825_v45  ;;  %v10777_v42 = vld [vmem:[#allocation18 + $0x378] sm:$0xff] }
0x2d0a   :  { %14282 = vmatprep.subr.bf16.mxu0 %v16669_v30  ;;  %v10685_v30 = vld [vmem:[#allocation18 + $0x98] sm:$0xff] }
0x2d0b   :  { %v16230_v56 = vcombine.low %v10685_v30, %v10689_v48  ;;  %v10901_v18 = vld [vmem:[#allocation18 + $0x758] sm:$0xff] }
0x2d0c   :  { %14240 = vmatpush2.bf16.msra.mxu1 %v16540_v28  ;;  %v16366_v28 = vcombine.low %v10821_v2, %v10825_v45  ;;  %v10905_v2 = vld [vmem:[#allocation18 + $0x778] sm:$0xff] }
0x2d0d   :  { %14283 = vmatpush2.bf16.msra.mxu0 %v16668_v32  ;;  %14241 = vmatprep.subr.bf16.mxu1 %v16533_v20  ;;  %v16231_v32 = vcombine.high %v10685_v30, %v10689_v48  ;;  %v16359_v20 = vcombine.high %v10813_v41, %v10817_v12  ;;  %v10769_v30 = vld [vmem:[#allocation18 + $0x338] sm:$0xff] }
0x2d0e   :  { %14284 = vmatprep.subr.bf16.mxu0 %v16661_v43  ;;  %v10677_v43 = vld [vmem:[#allocation18 + $0x58] sm:$0xff] }
0x2d0f   :  { %v16222_v27 = vcombine.low %v10677_v43, %v10681_v0  ;;  %v10893_v48 = vld [vmem:[#allocation18 + $0x718] sm:$0xff] }
0x2d10   :  { %14242 = vmatpush2.bf16.msra.mxu1 %v16532_v61  ;;  %v16358_v61 = vcombine.low %v10813_v41, %v10817_v12  ;;  %v10897_v41 = vld [vmem:[#allocation18 + $0x738] sm:$0xff] }
0x2d11   :  { %14285 = vmatpush2.bf16.msra.mxu0 %v16660_v13  ;;  %14297 = vmatprep.subr.bf16.mxu1 %v16271_v57  ;;  %v16223_v13 = vcombine.high %v10677_v43, %v10681_v0  ;;  %v16351_v57 = vcombine.high %v10805_v4, %v10809_v44  ;;  %v10761_v43 = vld [vmem:[#allocation18 + $0x2f8] sm:$0xff] }
0x2d12   :  { %14340 = vmatprep.subr.bf16.mxu0 %v16399_v58  ;;  %v10669_v58 = vld [vmem:[#allocation18 + $0x18] sm:$0xff] }
0x2d13   :  { %14244 = vmatmul.mubr.bf16.vlgmr.msra.gmra.mxu1 %v19880_v22  ;;  %v16214_v9 = vcombine.low %v10669_v58, %v10673_v7  ;;  %v10885_v0 = vld [vmem:[#allocation18 + $0x6d8] sm:$0xff] }
0x2d14   :  { %14287 = vmatmul.mubr.bf16.vlgmr.msra.gmra.mxu0 %v19882_v46  ;;  %14298 = vmatpush1.bf16.msra.mxu1 %v16270_v60  ;;  %v10801_v60 = vld [vmem:[#allocation18 + $0x438] sm:$0xff] }
0x2d15   :  { %14329 = vmatprep.mubr.bf16.mxu1 %v19850_v39  ;;  %14341 = vmatpush1.bf16.msra.mxu0 %v16398_v59  ;;  %v16375_v39 = vcombine.high %v10829_v40, %v10833_v25  ;;  %v16215_v59 = vcombine.high %v10669_v58, %v10673_v7  ;;  %v10913_v40 = vld [vmem:[#allocation18 + $0x7b8] sm:$0xff]  ;;  %v16334_v25 = vcombine.low %v10789_v31, %v10793_v10 }
0x2d16   :  { %14372 = vmatprep.mubr.bf16.mxu0 %v19852_v62  ;;  %14299 = vmatprep.subr.bf16.mxu1 %v16263_v29  ;;  %v16246_v62 = vcombine.low %v10701_v47, %v10705_v50  ;;  %v16343_v29 = vcombine.high %v10797_v3, %v10801_v60  ;;  %v10785_v47 = vld [vmem:[#allocation18 + $0x3b8] sm:$0xff] }
0x2d17   :  { %14342 = vmatprep.subr.bf16.mxu0 %v16391_v19  ;;  %v10917_v19 = vld [vmem:[#allocation18 + $0x7d8] sm:$0xff] }
0x2d18   :  { %14300 = vmatpush1.bf16.msra.mxu1 %v16262_v51  ;;  %v16342_v51 = vcombine.low %v10797_v3, %v10801_v60  ;;  %v10909_v50 = vld [vmem:[#allocation18 + $0x798] sm:$0xff] }
0x2d19   :  { %14343 = vmatpush1.bf16.msra.mxu0 %v16390_v26  ;;  %14301 = vmatprep.subr.bf16.mxu1 %v16255_v37  ;;  %v16335_v26 = vcombine.high %v10789_v31, %v10793_v10  ;;  %v16463_v37 = vcombine.high %v10917_v19, %v10921_v24  ;;  %v10889_v4 = vld [vmem:[#allocation18 + $0x6f8] sm:$0xff] }
0x2d1a   :  { %14344 = vmatprep.subr.bf16.mxu0 %v16383_v23  ;;  %v10781_v23 = vld [vmem:[#allocation18 + $0x398] sm:$0xff] }
0x2d1b   :  { %v16326_v45 = vcombine.low %v10781_v23, %v10785_v47  ;;  %v10753_v58 = vld [vmem:[#allocation18 + $0x2b8] sm:$0xff] }
0x2d1c   :  { %14302 = vmatpush1.bf16.msra.mxu1 %v16254_v15  ;;  %v16462_v15 = vcombine.low %v10917_v19, %v10921_v24  ;;  %v10877_v7 = vld [vmem:[#allocation18 + $0x698] sm:$0xff] }
0x2d1d   :  { %14345 = vmatpush1.bf16.msra.mxu0 %v16382_v36  ;;  %14303 = vmatprep.subr.bf16.mxu1 %v16247_v1  ;;  %v16327_v36 = vcombine.high %v10781_v23, %v10785_v47  ;;  %v16455_v1 = vcombine.high %v10909_v50, %v10913_v40  ;;  %v10881_v3 = vld [vmem:[#allocation18 + $0x6b8] sm:$0xff] }
0x2d1e   :  { %14346 = vmatprep.subr.bf16.mxu0 %v16375_v39  ;;  %v10773_v39 = vld [vmem:[#allocation18 + $0x358] sm:$0xff] }
0x2d1f   :  { %v16318_v12 = vcombine.low %v10773_v39, %v10777_v42  ;;  %v10745_v31 = vld [vmem:[#allocation18 + $0x278] sm:$0xff] }
0x2d20   :  { %14304 = vmatpush1.bf16.msra.mxu1 %v16246_v62  ;;  %v16454_v62 = vcombine.low %v10909_v50, %v10913_v40  ;;  %v10869_v10 = vld [vmem:[#allocation18 + $0x658] sm:$0xff] }
0x2d21   :  { %14347 = vmatpush1.bf16.msra.mxu0 %v16374_v33  ;;  %14305 = vmatprep.subr.bf16.mxu1 %v16239_v34  ;;  %v16319_v33 = vcombine.high %v10773_v39, %v10777_v42  ;;  %v16447_v34 = vcombine.high %v10901_v18, %v10905_v2  ;;  %v10873_v19 = vld [vmem:[#allocation18 + $0x678] sm:$0xff] }
0x2d22   :  { %14348 = vmatprep.subr.bf16.mxu0 %v16367_v14  ;;  %v10765_v14 = vld [vmem:[#allocation18 + $0x318] sm:$0xff] }
0x2d23   :  { %v16310_v44 = vcombine.low %v10765_v14, %v10769_v30  ;;  %v10737_v23 = vld [vmem:[#allocation18 + $0x238] sm:$0xff] }
0x2d24   :  { %14306 = vmatpush1.bf16.msra.mxu1 %v16238_v5  ;;  %v16446_v5 = vcombine.low %v10901_v18, %v10905_v2  ;;  %v10861_v47 = vld [vmem:[#allocation18 + $0x618] sm:$0xff] }
0x2d25   :  { %14349 = vmatpush1.bf16.msra.mxu0 %v16366_v28  ;;  %14307 = vmatprep.subr.bf16.mxu1 %v16231_v32  ;;  %v16311_v28 = vcombine.high %v10765_v14, %v10769_v30  ;;  %v16439_v32 = vcombine.high %v10893_v48, %v10897_v41  ;;  %v10865_v50 = vld [vmem:[#allocation18 + $0x638] sm:$0xff] }
0x2d26   :  { %14350 = vmatprep.subr.bf16.mxu0 %v16359_v20  ;;  %v10757_v20 = vld [vmem:[#allocation18 + $0x2d8] sm:$0xff] }
0x2d27   :  { %v16302_v60 = vcombine.low %v10757_v20, %v10761_v43  ;;  %v10985_v39 = vld [vmem:[#allocation18 + $0x9f8] sm:$0xff] }
0x2d28   :  { %14308 = vmatpush1.bf16.msra.mxu1 %v16230_v56  ;;  %v16438_v56 = vcombine.low %v10893_v48, %v10897_v41  ;;  %v11109_v42 = vld [vmem:[#allocation18 + $0xdd8] sm:$0xff] }
0x2d29   :  { %14351 = vmatpush1.bf16.msra.mxu0 %v16358_v61  ;;  %14309 = vmatprep.subr.bf16.mxu1 %v16223_v13  ;;  %v16303_v61 = vcombine.high %v10757_v20, %v10761_v43  ;;  %v16431_v13 = vcombine.high %v10885_v0, %v10889_v4  ;;  %v11113_v18 = vld [vmem:[#allocation18 + $0xdf8] sm:$0xff] }
0x2d2a   :  { %14352 = vmatprep.subr.bf16.mxu0 %v16351_v57  ;;  %v10749_v57 = vld [vmem:[#allocation18 + $0x298] sm:$0xff] }
0x2d2b   :  { %v16294_v24 = vcombine.low %v10749_v57, %v10753_v58  ;;  %v10977_v14 = vld [vmem:[#allocation18 + $0x9b8] sm:$0xff] }
0x2d2c   :  { %14310 = vmatpush1.bf16.msra.mxu1 %v16222_v27  ;;  %v16430_v27 = vcombine.low %v10885_v0, %v10889_v4  ;;  %v11101_v48 = vld [vmem:[#allocation18 + $0xd98] sm:$0xff] }
0x2d2d   :  { %14353 = vmatpush1.bf16.msra.mxu0 %v16350_v38  ;;  %14311 = vmatprep.subr.bf16.mxu1 %v16215_v59  ;;  %v16295_v38 = vcombine.high %v10749_v57, %v10753_v58  ;;  %v16423_v59 = vcombine.high %v10877_v7, %v10881_v3  ;;  %v11105_v41 = vld [vmem:[#allocation18 + $0xdb8] sm:$0xff] }
0x2d2e   :  { %14354 = vmatprep.subr.bf16.mxu0 %v16343_v29  ;;  %v10741_v29 = vld [vmem:[#allocation18 + $0x258] sm:$0xff]  ;;  %v16647_v20 = vcombine.high %v11101_v48, %v11105_v41 }
0x2d2f   :  { %v16286_v40 = vcombine.low %v10741_v29, %v10745_v31  ;;  %v11093_v43 = vld [vmem:[#allocation18 + $0xd58] sm:$0xff] }
0x2d30   :  { %14312 = vmatpush1.bf16.msra.mxu1 %v16214_v9  ;;  %v16422_v9 = vcombine.low %v10877_v7, %v10881_v3  ;;  %v11097_v0 = vld [vmem:[#allocation18 + $0xd78] sm:$0xff] }
0x2d31   :  { %14355 = vmatpush1.bf16.msra.mxu0 %v16342_v51  ;;  %14313 = vmatprep.subr.bf16.mxu1 %v16335_v26  ;;  %v16287_v51 = vcombine.high %v10741_v29, %v10745_v31  ;;  %v16415_v26 = vcombine.high %v10869_v10, %v10873_v19  ;;  %v10961_v57 = vld [vmem:[#allocation18 + $0x938] sm:$0xff] }
0x2d32   :  { %14356 = vmatprep.subr.bf16.mxu0 %v16463_v37  ;;  %v10733_v37 = vld [vmem:[#allocation18 + $0x218] sm:$0xff] }
0x2d33   :  { %v16278_v2 = vcombine.low %v10733_v37, %v10737_v23  ;;  %v11089_v58 = vld [vmem:[#allocation18 + $0xd38] sm:$0xff] }
0x2d34   :  { %14314 = vmatpush2.bf16.msra.mxu1 %v16334_v25  ;;  %v16414_v25 = vcombine.low %v10869_v10, %v10873_v19  ;;  %v10941_v19 = vld [vmem:[#allocation18 + $0x898] sm:$0xff] }
0x2d35   :  { %14357 = vmatpush2.bf16.msra.mxu0 %v16462_v15  ;;  %14315 = vmatprep.subr.bf16.mxu1 %v16327_v36  ;;  %v16279_v15 = vcombine.high %v10733_v37, %v10737_v23  ;;  %v16407_v36 = vcombine.high %v10861_v47, %v10865_v50 }
0x2d36   :  { %14358 = vmatprep.subr.bf16.mxu0 %v16455_v1  ;;  %v10981_v1 = vld [vmem:[#allocation18 + $0x9d8] sm:$0xff] }
0x2d37   :  { %v16526_v30 = vcombine.low %v10981_v1, %v10985_v39 }
0x2d38   :  { %14316 = vmatpush2.bf16.msra.mxu1 %v16326_v45  ;;  %v16406_v45 = vcombine.low %v10861_v47, %v10865_v50  ;;  %v10933_v50 = vld [vmem:[#allocation18 + $0x858] sm:$0xff] }
0x2d39   :  { %14359 = vmatpush2.bf16.msra.mxu0 %v16454_v62  ;;  %14317 = vmatprep.subr.bf16.mxu1 %v16319_v33  ;;  %v16527_v62 = vcombine.high %v10981_v1, %v10985_v39  ;;  %v16655_v33 = vcombine.high %v11109_v42, %v11113_v18 }
0x2d3a   :  { %14360 = vmatprep.subr.bf16.mxu0 %v16447_v34  ;;  %v10973_v34 = vld [vmem:[#allocation18 + $0x998] sm:$0xff] }
0x2d3b   :  { %v16518_v4 = vcombine.low %v10973_v34, %v10977_v14 }
0x2d3c   :  { %14318 = vmatpush2.bf16.msra.mxu1 %v16318_v12  ;;  %v16654_v12 = vcombine.low %v11109_v42, %v11113_v18  ;;  %v10925_v18 = vld [vmem:[#allocation18 + $0x818] sm:$0xff] }
0x2d3d   :  { %14361 = vmatpush2.bf16.msra.mxu0 %v16446_v5  ;;  %14319 = vmatprep.subr.bf16.mxu1 %v16311_v28  ;;  %v16519_v5 = vcombine.high %v10973_v34, %v10977_v14  ;;  %v10965_v28 = vld [vmem:[#allocation18 + $0x958] sm:$0xff] }
0x2d3e   :  { %14362 = vmatprep.subr.bf16.mxu0 %v16439_v32  ;;  %v10969_v32 = vld [vmem:[#allocation18 + $0x978] sm:$0xff] }
0x2d3f   :  { %v16510_v7 = vcombine.low %v10965_v28, %v10969_v32 }
0x2d40   :  { %14320 = vmatpush2.bf16.msra.mxu1 %v16310_v44  ;;  %v16646_v44 = vcombine.low %v11101_v48, %v11105_v41  ;;  %v11045_v48 = vld [vmem:[#allocation18 + $0xbd8] sm:$0xff] }
0x2d41   :  { %14363 = vmatpush2.bf16.msra.mxu0 %v16438_v56  ;;  %14321 = vmatprep.subr.bf16.mxu1 %v16303_v61  ;;  %v16511_v56 = vcombine.high %v10965_v28, %v10969_v32  ;;  %v16639_v61 = vcombine.high %v11093_v43, %v11097_v0  ;;  %v11049_v41 = vld [vmem:[#allocation18 + $0xbf8] sm:$0xff] }
0x2d42   :  { %14364 = vmatprep.subr.bf16.mxu0 %v16431_v13  ;;  %v10957_v13 = vld [vmem:[#allocation18 + $0x918] sm:$0xff] }
0x2d43   :  { %v16503_v3 = vcombine.high %v10957_v13, %v10961_v57 }
0x2d44   :  { %14322 = vmatpush2.bf16.msra.mxu1 %v16302_v60  ;;  %v10949_v60 = vld [vmem:[#allocation18 + $0x8d8] sm:$0xff] }
0x2d45   :  { %14365 = vmatpush2.bf16.msra.mxu0 %v16430_v27  ;;  %14323 = vmatprep.subr.bf16.mxu1 %v16295_v38  ;;  %v10953_v27 = vld [vmem:[#allocation18 + $0x8f8] sm:$0xff] }
0x2d46   :  { %14366 = vmatprep.subr.bf16.mxu0 %v16423_v59  ;;  %v11077_v38 = vld [vmem:[#allocation18 + $0xcd8] sm:$0xff]  ;;  %v16495_v31 = vcombine.high %v10949_v60, %v10953_v27 }
0x2d47   :  { %v11081_v59 = vld [vmem:[#allocation18 + $0xcf8] sm:$0xff] }
0x2d48   :  { %14324 = vmatpush2.bf16.msra.mxu1 %v16294_v24  ;;  %v16623_v10 = vcombine.high %v11077_v38, %v11081_v59  ;;  %v10945_v24 = vld [vmem:[#allocation18 + $0x8b8] sm:$0xff]  ;;  %v16622_v37 = vcombine.low %v11077_v38, %v11081_v59 }
0x2d49   :  { %14367 = vmatpush2.bf16.msra.mxu0 %v16422_v9  ;;  %14325 = vmatprep.subr.bf16.mxu1 %v16287_v51  ;;  %v11069_v9 = vld [vmem:[#allocation18 + $0xc98] sm:$0xff]  ;;  %v16487_v23 = vcombine.high %v10941_v19, %v10945_v24 }
0x2d4a   :  { %14368 = vmatprep.subr.bf16.mxu0 %v16415_v26  ;;  %v11073_v51 = vld [vmem:[#allocation18 + $0xcb8] sm:$0xff]  ;;  %v16494_v26 = vcombine.low %v10949_v60, %v10953_v27  ;;  %v19914_v27 = vpop.f32.mrf.mxu0 }
0x2d4b   :  { %v16615_v47 = vcombine.high %v11069_v9, %v11073_v51  ;;  %v16614_v1 = vcombine.low %v11069_v9, %v11073_v51  ;;  %v11161_v60 = vld [vmem:[#allocation18 + $0xf78] sm:$0xff] }
0x2d4c   :  { %14326 = vmatpush2.bf16.msra.mxu1 %v16286_v40  ;;  %v10937_v40 = vld [vmem:[#allocation18 + $0x878] sm:$0xff]  ;;  %v19918_v51 = vpop.f32.mrf.mxu0 }
0x2d4d   :  { %14369 = vmatpush2.bf16.msra.mxu0 %v16414_v25  ;;  %14327 = vmatprep.subr.bf16.mxu1 %v16279_v15  ;;  %v11061_v25 = vld [vmem:[#allocation18 + $0xc58] sm:$0xff]  ;;  %v16479_v39 = vcombine.high %v10933_v50, %v10937_v40 }
0x2d4e   :  { %14370 = vmatprep.subr.bf16.mxu0 %v16407_v36  ;;  %v11065_v15 = vld [vmem:[#allocation18 + $0xc78] sm:$0xff]  ;;  %v16486_v36 = vcombine.low %v10941_v19, %v10945_v24 }
0x2d4f   :  { %v16607_v42 = vcombine.high %v11061_v25, %v11065_v15  ;;  %v16606_v34 = vcombine.low %v11061_v25, %v11065_v15  ;;  %v11025_v19 = vld [vmem:[#allocation18 + $0xb38] sm:$0xff] }
0x2d50   :  { %14328 = vmatpush2.bf16.msra.mxu1 %v16278_v2  ;;  %v10929_v2 = vld [vmem:[#allocation18 + $0x838] sm:$0xff] }
0x2d51   :  { %14371 = vmatpush2.bf16.msra.mxu0 %v16406_v45  ;;  %14383 = vmatprep.subr.bf16.mxu1 %v16527_v62  ;;  %v11053_v45 = vld [vmem:[#allocation18 + $0xc18] sm:$0xff]  ;;  %v16471_v14 = vcombine.high %v10925_v18, %v10929_v2  ;;  %v16470_v28 = vcombine.low %v10925_v18, %v10929_v2 }
0x2d52   :  { %14426 = vmatprep.subr.bf16.mxu0 %v16655_v33  ;;  %v11057_v62 = vld [vmem:[#allocation18 + $0xc38] sm:$0xff]  ;;  %v16478_v33 = vcombine.low %v10933_v50, %v10937_v40 }
0x2d53   :  { %14330 = vmatmul.mubr.bf16.vlgmr.msra.gmra.mxu1 %v19854_v11  ;;  %v11085_v11 = vld [vmem:[#allocation18 + $0xd18] sm:$0xff]  ;;  %v16598_v32 = vcombine.low %v11053_v45, %v11057_v62 }
0x2d54   :  { %14373 = vmatmul.mubr.bf16.vlgmr.msra.gmra.mxu0 %v19856_v63  ;;  %14384 = vmatpush1.bf16.msra.mxu1 %v16526_v30  ;;  %v16638_v63 = vcombine.low %v11093_v43, %v11097_v0  ;;  %v16630_v29 = vcombine.low %v11085_v11, %v11089_v58  ;;  %v16599_v30 = vcombine.high %v11053_v45, %v11057_v62  ;;  %v19910_v43 = vpop.f32.mrf.mxu1  ;;  %v11149_v24 = vld [vmem:[#allocation18 + $0xf18] sm:$0xff] }
0x2d55   :  { %14415 = vmatprep.mubr.bf16.mxu1 %v19876_v35  ;;  %14427 = vmatpush1.bf16.msra.mxu0 %v16654_v12  ;;  %v16631_v35 = vcombine.high %v11085_v11, %v11089_v58  ;;  %v11173_v12 = vld [vmem:[#allocation18 + $0xfd8] sm:$0xff] }
0x2d56   :  { %14458 = vmatprep.mubr.bf16.mxu0 %v19878_v21  ;;  %14385 = vmatprep.subr.bf16.mxu1 %v16519_v5  ;;  %v16502_v21 = vcombine.low %v10957_v13, %v10961_v57  ;;  %v11177_v5 = vld [vmem:[#allocation18 + $0xff8] sm:$0xff]  ;;  %v16590_v13 = vcombine.low %v11045_v48, %v11049_v41  ;;  %v19912_v58 = vpop.f32.mrf.mxu1 }
0x2d57   :  { %14428 = vmatprep.subr.bf16.mxu0 %v16647_v20  ;;  %v16591_v20 = vcombine.high %v11045_v48, %v11049_v41  ;;  %v16719_v0 = vcombine.high %v11173_v12, %v11177_v5  ;;  %v16718_v57 = vcombine.low %v11173_v12, %v11177_v5  ;;  %v11153_v9 = vld [vmem:[#allocation18 + $0xf38] sm:$0xff] }
0x2d58   :  { %14386 = vmatpush1.bf16.msra.mxu1 %v16518_v4  ;;  %v11037_v4 = vld [vmem:[#allocation18 + $0xb98] sm:$0xff]  ;;  %v16695_v50 = vcombine.high %v11149_v24, %v11153_v9  ;;  %v16694_v18 = vcombine.low %v11149_v24, %v11153_v9 }
0x2d59   :  { %14429 = vmatpush1.bf16.msra.mxu0 %v16646_v44  ;;  %14387 = vmatprep.subr.bf16.mxu1 %v16511_v56  ;;  %v11041_v44 = vld [vmem:[#allocation18 + $0xbb8] sm:$0xff] }
0x2d5a   :  { %14430 = vmatprep.subr.bf16.mxu0 %v16639_v61  ;;  %v11165_v56 = vld [vmem:[#allocation18 + $0xf98] sm:$0xff]  ;;  %v16583_v11 = vcombine.high %v11037_v4, %v11041_v44  ;;  %v16582_v38 = vcombine.low %v11037_v4, %v11041_v44 }
0x2d5b   :  { %v11169_v61 = vld [vmem:[#allocation18 + $0xfb8] sm:$0xff] }
0x2d5c   :  { %14388 = vmatpush1.bf16.msra.mxu1 %v16510_v7  ;;  %v16711_v7 = vcombine.high %v11165_v56, %v11169_v61  ;;  %v16710_v59 = vcombine.low %v11165_v56, %v11169_v61  ;;  %v11013_v40 = vld [vmem:[#allocation18 + $0xad8] sm:$0xff] }
0x2d5d   :  { %14431 = vmatpush1.bf16.msra.mxu0 %v16638_v63  ;;  %14389 = vmatprep.subr.bf16.mxu1 %v16503_v3  ;;  %v11029_v63 = vld [vmem:[#allocation18 + $0xb58] sm:$0xff] }
0x2d5e   :  { %14432 = vmatprep.subr.bf16.mxu0 %v16631_v35  ;;  %v11033_v3 = vld [vmem:[#allocation18 + $0xb78] sm:$0xff] }
0x2d5f   :  { %v11157_v35 = vld [vmem:[#allocation18 + $0xf58] sm:$0xff] }
0x2d60   :  { %14390 = vmatpush1.bf16.msra.mxu1 %v16502_v21  ;;  %v16575_v21 = vcombine.high %v11029_v63, %v11033_v3  ;;  %v11017_v25 = vld [vmem:[#allocation18 + $0xaf8] sm:$0xff] }
0x2d61   :  { %14433 = vmatpush1.bf16.msra.mxu0 %v16630_v29  ;;  %14391 = vmatprep.subr.bf16.mxu1 %v16495_v31  ;;  %v19916_v29 = vpop.f32.mrf.mxu1  ;;  %v16703_v31 = vcombine.high %v11157_v35, %v11161_v60  ;;  %v11141_v15 = vld [vmem:[#allocation18 + $0xed8] sm:$0xff]  ;;  %v16559_v2 = vcombine.high %v11013_v40, %v11017_v25  ;;  %v16558_v41 = vcombine.low %v11013_v40, %v11017_v25 }
0x2d62   :  { %14434 = vmatprep.subr.bf16.mxu0 %v16623_v10  ;;  %v11021_v10 = vld [vmem:[#allocation18 + $0xb18] sm:$0xff] }
0x2d63   :  { %v11005_v62 = vld [vmem:[#allocation18 + $0xa98] sm:$0xff] }
0x2d64   :  { %14392 = vmatpush1.bf16.msra.mxu1 %v16494_v26  ;;  %v16574_v26 = vcombine.low %v11029_v63, %v11033_v3  ;;  %v11001_v4 = vld [vmem:[#allocation18 + $0xa78] sm:$0xff] }
0x2d65   :  { %14435 = vmatpush1.bf16.msra.mxu0 %v16622_v37  ;;  %14393 = vmatprep.subr.bf16.mxu1 %v16487_v23  ;;  %v16702_v37 = vcombine.low %v11157_v35, %v11161_v60  ;;  %v16567_v23 = vcombine.high %v11021_v10, %v11025_v19  ;;  %v11125_v56 = vld [vmem:[#allocation18 + $0xe58] sm:$0xff] }
0x2d66   :  { %14436 = vmatprep.subr.bf16.mxu0 %v16615_v47  ;;  %v13821_v47 = vpop.f32.mrf.mxu1  ;;  %v11129_v61 = vld [vmem:[#allocation18 + $0xe78] sm:$0xff] }
0x2d67   :  { %v16671_v35 = vcombine.high %v11125_v56, %v11129_v61  ;;  %v10989_v60 = vld [vmem:[#allocation18 + $0xa18] sm:$0xff]  ;;  %v16670_v24 = vcombine.low %v11125_v56, %v11129_v61  ;;  %v18395_v56 = vld [vmem:[#allocation19 + $0x128] sm:$0xff]  }
0x2d68   :  { %14394 = vmatpush1.bf16.msra.mxu1 %v16486_v36  ;;  %v11145_v36 = vld [vmem:[#allocation18 + $0xef8] sm:$0xff] }
0x2d69   :  { %14437 = vmatpush1.bf16.msra.mxu0 %v16614_v1  ;;  %14395 = vmatprep.subr.bf16.mxu1 %v16479_v39  ;;  %v19920_v1 = vpop.f32.mrf.mxu0  ;;  %v19922_v39 = vpop.f32.mrf.mxu1  ;;  %v16687_v45 = vcombine.high %v11141_v15, %v11145_v36  ;;  %v16686_v12 = vcombine.low %v11141_v15, %v11145_v36  ;;  %v18362_v15 = vld [vmem:[#allocation19 + $0x78] sm:$0xff]  }
0x2d6a   :  { %14438 = vmatprep.subr.bf16.mxu0 %v16607_v42  ;;  %v16566_v42 = vcombine.low %v11021_v10, %v11025_v19 }
0x2d6b   :  { %v13903_v48 = vpop.f32.mrf.mxu1 }
0x2d6c   :  { %14396 = vmatpush1.bf16.msra.mxu1 %v16478_v33  ;;  %v11009_v33 = vld [vmem:[#allocation18 + $0xab8] sm:$0xff] }
0x2d6d   :  { %14439 = vmatpush1.bf16.msra.mxu0 %v16606_v34  ;;  %14397 = vmatprep.subr.bf16.mxu1 %v16471_v14  ;;  %v11133_v34 = vld [vmem:[#allocation18 + $0xe98] sm:$0xff]  ;;  %v16551_v5 = vcombine.high %v11005_v62, %v11009_v33 }
0x2d6e   :  { %14440 = vmatprep.subr.bf16.mxu0 %v16599_v30  ;;  %v11137_v14 = vld [vmem:[#allocation18 + $0xeb8] sm:$0xff]  ;;  %v13864_v30 = vpop.f32.mrf.mxu0 }
0x2d70   :  { %14398 = vmatpush1.bf16.msra.mxu1 %v16470_v28  ;;  %v19924_v28 = vld [vmem:[#allocation21 + $0x1] ss:$4 sm:$0xff] }
0x2d71   :  { %14441 = vmatpush1.bf16.msra.mxu0 %v16598_v32  ;;  %14399 = vmatprep.subr.bf16.mxu1 %v16591_v20  ;;  %v19926_v32 = vpop.f32.mrf.mxu0  ;;  %v16679_v20 = vcombine.high %v11133_v34, %v11137_v14  ;;  %v11188_v44 = vrot.slane %v19924_v28, %v19133_v16  ;;  %v11121_v16 = vld [vmem:[#allocation18 + $0xe38] sm:$0xff] }
0x2d72   :  { %14442 = vmatprep.subr.bf16.mxu0 %v16719_v0  ;;  %v10997_v0 = vld [vmem:[#allocation18 + $0xa58] sm:$0xff] }
0x2d73   :  { %v16543_v63 = vcombine.high %v10997_v0, %v11001_v4  ;;  %v13946_v3 = vpop.f32.mrf.mxu0  ;;  %v16542_v10 = vcombine.low %v10997_v0, %v11001_v4  ;;  %v18394_v0 = vld [vmem:[#allocation19 + $0x168] sm:$0xff]  }
0x2d74   :  { %14400 = vmatpush2.bf16.msra.mxu1 %v16590_v13  ;;  %v19930_v13 = vpop.f32.mrf.mxu1  ;;  %v18367_v4 = vld [vmem:[#allocation19 + $0x28] sm:$0xff]  }
0x2d75   :  { %14443 = vmatpush2.bf16.msra.mxu0 %v16718_v57  ;;  %14401 = vmatprep.subr.bf16.mxu1 %v16583_v11  ;;  %v16550_v57 = vcombine.low %v11005_v62, %v11009_v33  ;;  %v13822_v11 = vadd.f32 %v13821_v47, %v11188_v44  ;;  %v18387_v33 = vld [vmem:[#allocation19 + $0x138] sm:$0xff]  }
0x2d76   :  { %14444 = vmatprep.subr.bf16.mxu0 %v16711_v7  ;;  %v16678_v7 = vcombine.low %v11133_v34, %v11137_v14 }
0x2d77   :  { %v13865_v19 = vadd.f32 %v13864_v30, %v13822_v11  ;;  %v18390_v30 = vld [vmem:[#allocation19 + $0x170] sm:$0xff]   ;;  %v18369_v11 = vld [vmem:[#allocation19 + $0x20] sm:$0xff]  }
0x2d78   :  { %14402 = vmatpush2.bf16.msra.mxu1 %v16582_v38  ;;  %v10993_v38 = vld [vmem:[#allocation18 + $0xa38] sm:$0xff] }
0x2d79   :  { %14445 = vmatpush2.bf16.msra.mxu0 %v16710_v59  ;;  %14403 = vmatprep.subr.bf16.mxu1 %v16575_v21  ;;  %v13818_v59 = vadd.f32 %v19912_v58, %v11188_v44  ;;  %v11117_v21 = vld [vmem:[#allocation18 + $0xe18] sm:$0xff]  ;;  %v16535_v9 = vcombine.high %v10989_v60, %v10993_v38 }
0x2d7a   :  { %14446 = vmatprep.subr.bf16.mxu0 %v16703_v31  ;;  %v13907_v31 = vpop.f32.mrf.mxu1  ;;  %v16662_v25 = vcombine.low %v11117_v21, %v11121_v16 }
0x2d7b   :  { %v13908_v47 = vadd.f32 %v13907_v31, %v13865_v19  ;;  %v11196_v31 = vrot.slane %v19924_v28, %v19188_v17  ;;  %v18405_v17 = vld [vmem:[#allocation19 + $0x110] sm:$0xff]  }
0x2d7c   :  { %14404 = vmatpush2.bf16.msra.mxu1 %v16574_v26  ;;  %v19933_v26 = vpop.f32.mrf.mxu0  ;;  %v19936_v40 = vpop.f32.mrf.mxu1 }
0x2d7d   :  { %14447 = vmatpush2.bf16.msra.mxu0 %v16702_v37  ;;  %14405 = vmatprep.subr.bf16.mxu1 %v16567_v23  ;;  %v16663_v37 = vcombine.high %v11117_v21, %v11121_v16  ;;  %v13861_v23 = vadd.f32 %v19918_v51, %v13818_v59  ;;  %v18364_v51 = vld [vmem:[#allocation19 + $0x70] sm:$0xff]   ;;  %v11184_v59 = vrot.slane %v19924_v28, %v19049_v53 }
0x2d7e   :  { %14448 = vmatprep.subr.bf16.mxu0 %v16695_v50  ;;  %v16534_v50 = vcombine.low %v10989_v60, %v10993_v38  ;;  %v13950_v36 = vpop.f32.mrf.mxu0  ;;  %v19938_v62 = vpop.f32.mrf.mxu1  ;;  %v18402_v60 = vld [vmem:[#allocation19 + $0x158] sm:$0xff]   ;;  %v18372_v16 = vld [vmem:[#allocation19 + $0x50] sm:$0xff]  }
0x2d7f   :  { %v13904_v58 = vadd.f32 %v13903_v48, %v13861_v23  ;;  %v18365_v48 = vld [vmem:[#allocation19 + $0x30] sm:$0xff]   ;;  %v18371_v38 = vld [vmem:[#allocation19 + $0x18] sm:$0xff]   ;;  %v13820_v19 = vadd.f32 %v19916_v29, %v11184_v59  ;;  %v13816_v53 = vadd.f32 %v19910_v43, %v11184_v59  ;;  %v18406_v29 = vld [vmem:[#allocation19 + $0x148] sm:$0xff]  }
0x2d80   :  { %14406 = vmatpush2.bf16.msra.mxu1 %v16566_v42  ;;  %v18386_v42 = vld [vmem:[#allocation19 + $0x178] sm:$0xff]   ;;  %v19940_v14 = vpop.f32.mrf.mxu0  ;;  %v18373_v23 = vld [vmem:[#allocation19 + $0x10] sm:$0xff]  }
0x2d81   :  { %14449 = vmatpush2.bf16.msra.mxu0 %v16694_v18  ;;  %14407 = vmatprep.subr.bf16.mxu1 %v16559_v2  ;;  %v13951_v18 = vadd.f32 %v13950_v36, %v13908_v47  ;;  %v18363_v2 = vld [vmem:[#allocation19 + $0x38] sm:$0xff]   ;;  %v18393_v59 = vld [vmem:[#allocation19 + $0x90] sm:$0xff]  }
0x2d82   :  { %14450 = vmatprep.subr.bf16.mxu0 %v16687_v45  ;;  %v13947_v45 = vadd.f32 %v13946_v3, %v13904_v58  ;;  %v13990_v58 = vadd.f32 %v19938_v62, %v11196_v31 }
0x2d84   :  { %14408 = vmatpush2.bf16.msra.mxu1 %v16558_v41  ;;  %v14470_v34 = vpack.c.bf16 %v13951_v18, %v13947_v45  ;;  %v19944_v41 = vpop.f32.mrf.mxu1  ;;  %v13859_v18 = vadd.f32 %v19914_v27, %v13816_v53  ;;  %v18376_v45 = vld [vmem:[#allocation19 + $0x40] sm:$0xff]  }
0x2d85   :  { %14451 = vmatpush2.bf16.msra.mxu0 %v16686_v12  ;;  %14409 = vmatprep.subr.bf16.mxu1 %v16551_v5  ;;  %v18366_v12 = vld [vmem:[#allocation19 + $0x68] sm:$0xff]   ;;  %v18391_v5 = vld [vmem:[#allocation19 + $0x130] sm:$0xff]  }
0x2d86   :  { %14452 = vmatprep.subr.bf16.mxu0 %v16679_v20  ;;  %v14032_v20 = vpop.f32.mrf.mxu0  ;;  %v13993_v44 = vpop.f32.mrf.mxu1 }
0x2d88   :  { %14410 = vmatpush2.bf16.msra.mxu1 %v16550_v57  ;;  %v19948_v61 = vpop.f32.mrf.mxu1  ;;  %v18398_v57 = vld [vmem:[#allocation19 + $0x160] sm:$0xff]  }
0x2d89   :  { %14453 = vmatpush2.bf16.msra.mxu0 %v16678_v7  ;;  %14411 = vmatprep.subr.bf16.mxu1 %v16543_v63  ;;  %v18370_v7 = vld [vmem:[#allocation19 + $0x58] sm:$0xff]   ;;  %v18399_v63 = vld [vmem:[#allocation19 + $0x120] sm:$0xff]  }
0x2d8a   :  { %14454 = vmatprep.subr.bf16.mxu0 %v16671_v35  ;;  %v14075_v35 = vpop.f32.mrf.mxu1 }
0x2d8c   :  { %14412 = vmatpush2.bf16.msra.mxu1 %v16542_v10  ;;  %v18403_v10 = vld [vmem:[#allocation19 + $0x118] sm:$0xff]  }
0x2d8d   :  { %14455 = vmatpush2.bf16.msra.mxu0 %v16670_v24  ;;  %14413 = vmatprep.subr.bf16.mxu1 %v16535_v9  ;;  %v19957_v24 = vpop.f32.mrf.mxu1  ;;  %v18404_v9 = vld [vmem:[#allocation19 + $0x150] sm:$0xff]  }
0x2d8e   :  { %14456 = vmatprep.subr.bf16.mxu0 %v16663_v37  ;;  %v13994_v37 = vadd.f32 %v13993_v44, %v11196_v31  ;;  %v18379_v44 = vld [vmem:[#allocation19 + $0xb8] sm:$0xff]  }
0x2d90   :  { %14414 = vmatpush2.bf16.msra.mxu1 %v16534_v50  ;;  %v18374_v50 = vld [vmem:[#allocation19 + $0x48] sm:$0xff]  }
0x2d91   :  { %14457 = vmatpush2.bf16.msra.mxu0 %v16662_v25  ;;  %16834 = vmatprep.subr.bf16.mxu1 %v18362_v15  ;;  %v13863_v25 = vadd.f32 %v19920_v1, %v13820_v19  ;;  %v14079_v15 = vpop.f32.mrf.mxu1  ;;  %v13902_v1 = vadd.f32 %v19922_v39, %v13859_v18 }
0x2d92   :  { %16878 = vmatprep.subr.bf16.mxu0 %v18386_v42  ;;  %v18375_v42 = vld [vmem:[#allocation19 + $0x8] sm:$0xff]  }
0x2d93   :  { %14416 = vmatmul.mubr.bf16.vlgmr.msra.gmra.mxu1 %v19880_v22  ;;  %v18368_v22 = vld [vmem:[#allocation19 + $0x60] sm:$0xff]   ;;  %v14159_v31 = vpop.f32.mrf.mxu1 }
0x2d94   :  { %14459 = vmatmul.mubr.bf16.vlgmr.msra.gmra.mxu0 %v19882_v46  ;;  %16835 = vmatpush3.bf16.msra.mxu1 %v18363_v2  ;;  %v19946_v46 = vpop.f32.mrf.mxu0  ;;  %v13906_v2 = vadd.f32 %v19930_v13, %v13863_v25  ;;  %v18378_v13 = vld [vmem:[#allocation19 + $0xf8] sm:$0xff]  }
0x2d95   :  { %15026 = vmatprep.mubr.bf16.mxu1 %v14470_v34  ;;  %16836 = vmatprep.subr.bf16.mxu1 %v18364_v51  ;;  %v14033_v51 = vadd.f32 %v14032_v20, %v13990_v58  ;;  %v18408_v34 = vld [vmem:[#allocation19 + $0x140] sm:$0xff]   ;;  %v13945_v20 = vadd.f32 %v19926_v32, %v13902_v1  ;;  %v14161_v53 = vpop.f32.mrf.mxu1  ;;  %v18410_v25 = vld [vmem:[#allocation19 + $0x1f8] sm:$0xff]   ;;  %v18414_v1 = vld [vmem:[#allocation19 + $0x1e8] sm:$0xff]  }
0x2d96   :  { %16879 = vmatpush3.bf16.msra.mxu0 %v18387_v33  ;;  %v14036_v3 = vpop.f32.mrf.mxu0  ;;  %v18407_v33 = vld [vmem:[#allocation19 + $0x108] sm:$0xff]   ;;  %v18385_v32 = vld [vmem:[#allocation19 + $0xa0] sm:$0xff]  }
0x2d97   :  { %16880 = vmatprep.subr.bf16.mxu0 %v18390_v30  ;;  %v14037_v36 = vadd.f32 %v14036_v3, %v13994_v37  ;;  %v14076_v30 = vadd.f32 %v14075_v35, %v14033_v51  ;;  %v18389_v3 = vld [vmem:[#allocation19 + $0x98] sm:$0xff]   ;;  %v11192_v35 = vrot.slane %v19924_v28, %v19098_v8  ;;  %v18397_v37 = vld [vmem:[#allocation19 + $0x88] sm:$0xff]  }
0x2d98   :  { %16837 = vmatpush3.bf16.msra.mxu1 %v18365_v48  ;;  %v19952_v21 = vpop.f32.mrf.mxu0  ;;  %v18377_v48 = vld [vmem:[#allocation19] sm:$0xff]  }
0x2d99   :  { %16838 = vmatprep.subr.bf16.mxu1 %v18366_v12  ;;  %v14080_v62 = vadd.f32 %v14079_v15, %v14037_v36  ;;  %v13949_v12 = vadd.f32 %v19933_v26, %v13906_v2  ;;  %v18381_v26 = vld [vmem:[#allocation19 + $0xb0] sm:$0xff]  }
0x2d9a   :  { %16881 = vmatpush3.bf16.msra.mxu0 %v18391_v5  ;;  %v14118_v47 = vpop.f32.mrf.mxu0 }
0x2d9b   :  { %16882 = vmatprep.subr.bf16.mxu0 %v18394_v0  ;;  %v18409_v0 = vld [vmem:[#allocation19 + $0x100] sm:$0xff]   ;;  %v14469_v39 = vpack.c.bf16 %v13949_v12, %v13945_v20  ;;  %v18415_v20 = vld [vmem:[#allocation19 + $0x1a8] sm:$0xff]  }
0x2d9c   :  { %16839 = vmatpush3.bf16.msra.mxu1 %v18367_v4  ;;  %v19964_v43 = vpop.f32.mrf.mxu0  ;;  %v14119_v4 = vadd.f32 %v14118_v47, %v14076_v30  ;;  %v18400_v47 = vld [vmem:[#allocation19 + $0xc0] sm:$0xff]  }
0x2d9d   :  { %16840 = vmatprep.subr.bf16.mxu1 %v18368_v22  ;;  %v18380_v22 = vld [vmem:[#allocation19 + $0xf0] sm:$0xff]  }
0x2d9e   :  { %16883 = vmatpush3.bf16.msra.mxu0 %v18395_v56  ;;  %v14122_v27 = vpop.f32.mrf.mxu0 }
0x2d9f   :  { %16884 = vmatprep.subr.bf16.mxu0 %v18398_v57  ;;  %v14123_v5 = vadd.f32 %v14122_v27, %v14080_v62  ;;  %v18382_v57 = vld [vmem:[#allocation19 + $0xe8] sm:$0xff]  }
0x2da0   :  { %16841 = vmatpush3.bf16.msra.mxu1 %v18369_v11  ;;  %v18383_v11 = vld [vmem:[#allocation19 + $0xa8] sm:$0xff]   ;;  %v14202_v19 = vpop.f32.mrf.mxu0 }
0x2da1   :  { %16842 = vmatprep.subr.bf16.mxu1 %v18370_v7  ;;  %v14472_v56 = vpack.c.bf16 %v14123_v5, %v14119_v4  ;;  %v18384_v7 = vld [vmem:[#allocation19 + $0xe0] sm:$0xff]  }
0x2da2   :  { %16885 = vmatpush3.bf16.msra.mxu0 %v18399_v63  ;;  %v18388_v63 = vld [vmem:[#allocation19 + $0xd8] sm:$0xff]  }
0x2da3   :  { %16886 = vmatprep.subr.bf16.mxu0 %v18402_v60  ;;  %v18392_v60 = vld [vmem:[#allocation19 + $0xd0] sm:$0xff]  }
0x2da4   :  { %16843 = vmatpush3.bf16.msra.mxu1 %v18371_v38  ;;  %v13992_v38 = vadd.f32 %v19944_v41, %v11192_v35  ;;  %v14204_v41 = vpop.f32.mrf.mxu0 }
0x2da5   :  { %16844 = vmatprep.subr.bf16.mxu1 %v18372_v16  ;;  %v13988_v16 = vadd.f32 %v19936_v40, %v11192_v35  ;;  %v18401_v40 = vld [vmem:[#allocation19 + $0x80] sm:$0xff]  }
0x2da6   :  { %16887 = vmatpush3.bf16.msra.mxu0 %v18403_v10  ;;  %v18396_v10 = vld [vmem:[#allocation19 + $0xc8] sm:$0xff]   ;;  %v14206_v15 = vpop.f32.mrf.mxu0 }
0x2da7   :  { %16888 = vmatprep.subr.bf16.mxu0 %v18404_v9  ;;  %v14035_v9 = vadd.f32 %v19946_v46, %v13992_v38  ;;  %v11204_v46 = vrot.slane %v19924_v28, %v19222_v55  ;;  %v18420_v38 = vld [vmem:[#allocation19 + $0x1d0] sm:$0xff]  }
0x2da8   :  { %16845 = vmatpush3.bf16.msra.mxu1 %v18373_v23  ;;  %v14031_v23 = vadd.f32 %v19940_v14, %v13988_v16  ;;  %v18422_v16 = vld [vmem:[#allocation19 + $0x1c8] sm:$0xff]  }
0x2da9   :  { %16846 = vmatprep.subr.bf16.mxu1 %v18374_v50  ;;  %v14078_v8 = vadd.f32 %v19957_v24, %v14035_v9  ;;  %v11200_v24 = vrot.slane %v19924_v28, %v19046_v52  ;;  %v14162_v18 = vadd.f32 %v14161_v53, %v11204_v46 }
0x2daa   :  { %16889 = vmatpush3.bf16.msra.mxu0 %v18405_v17  ;;  %v14074_v50 = vadd.f32 %v19948_v61, %v14031_v23  ;;  %v14163_v17 = vpop.f32.mrf.mxu1 }
0x2dab   :  { %16890 = vmatprep.subr.bf16.mxu0 %v18406_v29  ;;  %v14121_v58 = vadd.f32 %v19964_v43, %v14078_v8  ;;  %v18411_v29 = vld [vmem:[#allocation19 + $0x1b8] sm:$0xff]   ;;  %v14164_v2 = vadd.f32 %v14163_v17, %v11200_v24  ;;  %v14208_v43 = vpop.f32.mrf.mxu0  ;;  %v14205_v52 = vadd.f32 %v14204_v41, %v14162_v18 }
0x2dac   :  { %16847 = vmatpush3.bf16.msra.mxu1 %v18375_v42  ;;  %v14117_v14 = vadd.f32 %v19952_v21, %v14074_v50  ;;  %v14165_v61 = vpop.f32.mrf.mxu1  ;;  %v18412_v42 = vld [vmem:[#allocation19 + $0x1f0] sm:$0xff]   ;;  %v11208_v50 = vrot.slane %v19924_v28, %v19093_v6 }
0x2dad   :  { %16848 = vmatprep.subr.bf16.mxu1 %v18376_v45  ;;  %v14160_v45 = vadd.f32 %v14159_v31, %v11200_v24  ;;  %v14166_v62 = vadd.f32 %v14165_v61, %v11204_v46  ;;  %v18423_v31 = vld [vmem:[#allocation19 + $0x188] sm:$0xff]  }
0x2dae   :  { %16891 = vmatpush3.bf16.msra.mxu0 %v18407_v33  ;;  %v14471_v36 = vpack.c.bf16 %v14121_v58, %v14117_v14  ;;  %v18413_v33 = vld [vmem:[#allocation19 + $0x1b0] sm:$0xff]  }
0x2daf   :  { %16892 = vmatprep.subr.bf16.mxu0 %v18408_v34  ;;  %v14207_v34 = vadd.f32 %v14206_v15, %v14164_v2  ;;  %v14209_v27 = vadd.f32 %v14208_v43, %v14166_v62 }
0x2db0   :  { %16849 = vmatpush3.bf16.msra.mxu1 %v18377_v48  ;;  %v14203_v48 = vadd.f32 %v14202_v19, %v14160_v45  ;;  %v18425_v19 = vld [vmem:[#allocation19 + $0x180] sm:$0xff]  }
0x2db1   :  { %16856 = vmatprep.subr.bf16.mxu1 %v18378_v13 }
0x2db2   :  { %16893 = vmatpush3.bf16.msra.mxu0 %v18409_v0 }
0x2db3   :  { %15027 = vmatmul.mubr.bf16.vlgmr.msra.gmra.mxu1 %v14469_v39  ;;  %v18416_v39 = vld [vmem:[#allocation19 + $0x1e0] sm:$0xff]  }
0x2db4   :  { %16857 = vmatpush3.bf16.msra.mxu1 %v18379_v44  ;;  %15067 = vmatprep.mubr.bf16.mxu1 %v14472_v56 }
0x2db5   :  { %16858 = vmatprep.subr.bf16.mxu1 %v18380_v22 }
0x2db8   :  { %16859 = vmatpush3.bf16.msra.mxu1 %v18381_v26 }
0x2db9   :  { %16860 = vmatprep.subr.bf16.mxu1 %v18382_v57 }
0x2dbc   :  { %16861 = vmatpush3.bf16.msra.mxu1 %v18383_v11 }
0x2dbd   :  { %16862 = vmatprep.subr.bf16.mxu1 %v18384_v7  ;;  %v18417_v7 = vld [vmem:[#allocation19 + $0x1a0] sm:$0xff]  }
0x2dc0   :  { %16863 = vmatpush3.bf16.msra.mxu1 %v18385_v32 }
0x2dc1   :  { %16864 = vmatprep.subr.bf16.mxu1 %v18388_v63  ;;  %v18418_v63 = vld [vmem:[#allocation19 + $0x1d8] sm:$0xff]  }
0x2dc4   :  { %16865 = vmatpush3.bf16.msra.mxu1 %v18389_v3 }
0x2dc5   :  { %16866 = vmatprep.subr.bf16.mxu1 %v18392_v60  ;;  %v18419_v60 = vld [vmem:[#allocation19 + $0x198] sm:$0xff]  }
0x2dc8   :  { %16867 = vmatpush3.bf16.msra.mxu1 %v18393_v59  ;;  %v18421_v59 = vld [vmem:[#allocation19 + $0x190] sm:$0xff]  }
0x2dc9   :  { %16868 = vmatprep.subr.bf16.mxu1 %v18396_v10  ;;  %v18424_v10 = vld [vmem:[#allocation19 + $0x1c0] sm:$0xff]  }
0x2dcc   :  { %16869 = vmatpush3.bf16.msra.mxu1 %v18397_v37 }
0x2dcd   :  { %16870 = vmatprep.subr.bf16.mxu1 %v18400_v47  ;;  %v11212_v47 = vrot.slane %v19924_v28, %v19219_v54 }
0x2dd0   :  { %16871 = vmatpush3.bf16.msra.mxu1 %v18401_v40 }
0x2dd1   :  { %16900 = vmatprep.subr.bf16.mxu1 %v18410_v25 }
0x2dd3   :  { %v14245_v51 = vpop.f32.mrf.mxu1  ;;  %15068 = vmatmul.mubr.bf16.vlgmr.msra.gmra.mxu1 %v14471_v36 }
0x2dd4   :  { %v14288_v55 = vpop.f32.mrf.mxu0  ;;  %16901 = vmatpush3.bf16.msra.mxu1 %v18411_v29  ;;  %v14246_v4 = vadd.f32 %v14245_v51, %v14203_v48 }
0x2dd5   :  { %v14247_v21 = vpop.f32.mrf.mxu1  ;;  %16902 = vmatprep.subr.bf16.mxu1 %v18412_v42 }
0x2dd6   :  { %v14290_v30 = vpop.f32.mrf.mxu0  ;;  %v14248_v13 = vadd.f32 %v14247_v21, %v14205_v52  ;;  %v14289_v32 = vadd.f32 %v14288_v55, %v14246_v4 }
0x2dd7   :  { %v14249_v12 = vpop.f32.mrf.mxu1 }
0x2dd8   :  { %v14250_v5 = vadd.f32 %v14249_v12, %v14207_v34  ;;  %v14292_v0 = vpop.f32.mrf.mxu0  ;;  %16903 = vmatpush3.bf16.msra.mxu1 %v18413_v33  ;;  %v14291_v57 = vadd.f32 %v14290_v30, %v14248_v13 }
0x2dd9   :  { %v14251_v44 = vpop.f32.mrf.mxu1  ;;  %16904 = vmatprep.subr.bf16.mxu1 %v18414_v1 }
0x2dda   :  { %v14252_v22 = vadd.f32 %v14251_v44, %v14209_v27  ;;  %v14293_v56 = vadd.f32 %v14292_v0, %v14250_v5  ;;  %v14294_v26 = vpop.f32.mrf.mxu0 }
0x2ddc   :  { %v14295_v11 = vadd.f32 %v14294_v26, %v14252_v22  ;;  %16905 = vmatpush3.bf16.msra.mxu1 %v18415_v20  ;;  %v14473_v35 = vpack.c.bf16 %v14293_v56, %v14289_v32  ;;  %v16720_v22 = vld [vmem:[#allocation21 + $0x2] ss:$0 sm:$0xff] }
0x2ddd   :  { %16906 = vmatprep.subr.bf16.mxu1 %v18416_v39 }
0x2dde   :  { %v14474_v3 = vpack.c.bf16 %v14295_v11, %v14291_v57 }
0x2de0   :  { %15108 = vmatprep.mubr.bf16.mxu0 %v14474_v3  ;;  %16907 = vmatpush3.bf16.msra.mxu1 %v18417_v7 }
0x2de1   :  { %15109 = vmatmul.mubr.bf16.vlgmr.msra.gmra.mxu0 %v14473_v35  ;;  %16908 = vmatprep.subr.bf16.mxu1 %v18418_v63  ;;  %v15159_v35 = vand.u32 127, %v311_v49 }
0x2de3   :  { %vm15160_vm2 = vcmp.ge.s32.totalorder %v15159_v35, 3  ;;  %vm15173_vm3 = vcmp.lt.s32.totalorder %v15159_v35, 3 }
0x2de4   :  { %16909 = vmatpush3.bf16.msra.mxu1 %v18419_v60 }
0x2de5   :  { %16910 = vmatprep.subr.bf16.mxu1 %v18420_v38 }
0x2de8   :  { %16911 = vmatpush3.bf16.msra.mxu1 %v18421_v59 }
0x2de9   :  { %16912 = vmatprep.subr.bf16.mxu1 %v18422_v16 }
0x2dec   :  { %16913 = vmatpush3.bf16.msra.mxu1 %v18423_v31 }
0x2ded   :  { %16914 = vmatprep.subr.bf16.mxu1 %v18424_v10 }
0x2df0   :  { %16915 = vmatpush3.bf16.msra.mxu1 %v18425_v19 }
0x2e13   :  { %v14331_v9 = vpop.f32.mrf.mxu1 }
0x2e14   :  { %v14374_v37 = vpop.f32.mrf.mxu0  ;;  %v14332_v46 = vadd.f32 %v14331_v9, %v11208_v50 }
0x2e15   :  { %v14333_v23 = vpop.f32.mrf.mxu1 }
0x2e16   :  { %v14376_v8 = vpop.f32.mrf.mxu0  ;;  %v14334_v58 = vadd.f32 %v14333_v23, %v11212_v47  ;;  %v14375_v18 = vadd.f32 %v14374_v37, %v14332_v46 }
0x2e17   :  { %v14335_v53 = vpop.f32.mrf.mxu1 }
0x2e18   :  { %v14378_v41 = vpop.f32.mrf.mxu0  ;;  %v14336_v17 = vadd.f32 %v14335_v53, %v11208_v50  ;;  %v14377_v36 = vadd.f32 %v14376_v8, %v14334_v58 }
0x2e19   :  { %v14337_v40 = vpop.f32.mrf.mxu1 }
0x2e1a   :  { %v14380_v25 = vpop.f32.mrf.mxu0  ;;  %v14338_v14 = vadd.f32 %v14337_v40, %v11212_v47  ;;  %v14379_v61 = vadd.f32 %v14378_v41, %v14336_v17 }
0x2e1c   :  { %v14381_v43 = vadd.f32 %v14380_v25, %v14338_v14 }
0x2e53   :  { %v14417_v15 = vpop.f32.mrf.mxu1 }
0x2e54   :  { %v14460_v24 = vpop.f32.mrf.mxu0  ;;  %v14418_v62 = vadd.f32 %v14417_v15, %v14375_v18 }
0x2e55   :  { %v14419_v29 = vpop.f32.mrf.mxu1 }
0x2e56   :  { %v14462_v42 = vpop.f32.mrf.mxu0  ;;  %v14420_v54 = vadd.f32 %v14419_v29, %v14377_v36  ;;  %v14461_v52 = vadd.f32 %v14460_v24, %v14418_v62 }
0x2e57   :  { %v14421_v2 = vpop.f32.mrf.mxu1 }
0x2e58   :  { %v14422_v45 = vadd.f32 %v14421_v2, %v14379_v61  ;;  %v14464_v51 = vpop.f32.mrf.mxu0  ;;  %v14463_v21 = vadd.f32 %v14462_v42, %v14420_v54 }
0x2e59   :  { %v14423_v6 = vpop.f32.mrf.mxu1 }
0x2e5a   :  { %v14424_v28 = vadd.f32 %v14423_v6, %v14381_v43  ;;  %v14465_v55 = vadd.f32 %v14464_v51, %v14422_v45  ;;  %v14466_v33 = vpop.f32.mrf.mxu0 }
0x2e5c   :  { %v14467_v1 = vadd.f32 %v14466_v33, %v14424_v28  ;;  %v14475_v30 = vpack.c.bf16 %v14465_v55, %v14461_v52 }
0x2e5e   :  { %v14476_v34 = vpack.c.bf16 %v14467_v1, %v14463_v21 }
0x2e60   :  { %15149 = vmatprep.mubr.bf16.mxu1 %v14476_v34 }
0x2e61   :  { %15150 = vmatmul.mubr.bf16.vlgmr.msra.gmra.mxu1 %v14475_v30 }
0x2e73   :  { %v16850_v48 = vpop.f32.mrf.mxu1 }
0x2e75   :  { %v16851_v12 = vpop.f32.mrf.mxu1 }
0x2e76   :  { %v16852_v39 = vadd.f32 %v16851_v12, %v16850_v48 }
0x2e77   :  { %v16853_v27 = vpop.f32.mrf.mxu1 }
0x2e78   :  { %v15029_v11 = vadd.f32 %v16852_v39, %v16720_v22 }
0x2e79   :  { %v16854_v13 = vpop.f32.mrf.mxu1 }
0x2e7a   :  { %v16855_v7 = vadd.f32 %v16854_v13, %v16853_v27 }
0x2e7c   :  { %v15032_v16 = vadd.f32 %v16855_v7, %v16720_v22 }
0x2e93   :  { %v16872_v5 = vpop.f32.mrf.mxu1 }
0x2e95   :  { %v16873_v20 = vpop.f32.mrf.mxu1 }
0x2e96   :  { %v16874_v26 = vadd.f32 %v16873_v20, %v16872_v5 }
0x2e97   :  { %v16875_v44 = vpop.f32.mrf.mxu1 }
0x2e98   :  { %v15070_v60 = vadd.f32 %v16874_v26, %v15029_v11 }
0x2e99   :  { %v16876_v57 = vpop.f32.mrf.mxu1 }
0x2e9a   :  { %v16877_v38 = vadd.f32 %v16876_v57, %v16875_v44 }
0x2e9c   :  { %v15073_v37 = vadd.f32 %v16877_v38, %v15032_v16 }
0x2ea1   :  { %v16894_v0 = vpop.f32.mrf.mxu0 }
0x2ea3   :  { %v16895_v4 = vpop.f32.mrf.mxu0 }
0x2ea4   :  { %v16896_v32 = vadd.f32 %v16895_v4, %v16894_v0 }
0x2ea5   :  { %v16897_v56 = vpop.f32.mrf.mxu0 }
0x2ea6   :  { %v15111_v31 = vadd.f32 %v16896_v32, %v15070_v60 }
0x2ea7   :  { %v16898_v63 = vpop.f32.mrf.mxu0 }
0x2ea8   :  { %v16899_v10 = vadd.f32 %v16898_v63, %v16897_v56 }
0x2eaa   :  { %v15114_v53 = vadd.f32 %v16899_v10, %v15073_v37 }
0x2f21   :  { %v16916_v3 = vpop.f32.mrf.mxu1 }
0x2f23   :  { %v16917_v59 = vpop.f32.mrf.mxu1 }
0x2f24   :  { %v16918_v19 = vadd.f32 %v16917_v59, %v16916_v3 }
0x2f25   :  { %v16919_v9 = vpop.f32.mrf.mxu1 }
0x2f26   :  { %v15152_v23 = vadd.f32 %v16918_v19, %v15111_v31 }
0x2f27   :  { %v16920_v8 = vpop.f32.mrf.mxu1 }
0x2f28   :  { %v16921_v47 = vadd.f32 %v16920_v8, %v16919_v9  ;;  %v15161_v41 = vsel %vm15160_vm2, %v15152_v23, 0.0 }
0x2f29   :  { %v15163_v50 = vmul.f32 %v15161_v41, %v15161_v41 }
0x2f2a   :  { %v15155_v40 = vadd.f32 %v16921_v47, %v15114_v53 }
0x2f2b   :  { %15165 = vadd.xlane.f32.xlu0 %v15163_v50 }
0x2f2c   :  { %v15162_v58 = vsel %vm15160_vm2, %v15155_v40, 0.0 }
0x2f2d   :  { %v15164_v49 = vmul.f32 %v15162_v58, %v15162_v58 }
0x2f2f   :  { %15167 = vadd.xlane.f32.xlu1 %v15164_v49 }
0x2fb4   :  { %v15166_v17 = vpop.xlane.xlu0 %15165 }
0x2fb5   :  { %v15169_v25 = vadd.f32 1e-12, %v15166_v17 }
0x2fb7   :  { %18510 = vrsqrt.f32 %v15169_v25 }
0x2fb8   :  { %v15168_v46 = vpop.xlane.xlu1 %15167  ;;  %18512 = vtanh.f32 %v15152_v23 }
0x2fb9   :  { %v15170_v15 = vadd.f32 1e-12, %v15168_v46 }
0x2fbb   :  { %18514 = vrsqrt.f32 %v15170_v15 }
0x2fbc   :  { %18516 = vtanh.f32 %v15155_v40 }
0x2fc4   :  { %v18511_v14 = vpop.eup %18510 }
0x2fc5   :  { %v15176_v24 = vmul.f32 %v18511_v14, %v15152_v23  ;;  %v18513_v29 = vpop.eup %18512 }
0x2fc7   :  { %v15178_v36 = vsel %vm15173_vm3, %v18513_v29, %v15176_v24 }
0x2fc8   :  { %v18515_v61 = vpop.eup %18514  ;;  %15180 = vst [vmem:[%s20010_s16] sm:$0xff] %v15178_v36 }
0x2fc9   :  { %v15177_v42 = vmul.f32 %v18515_v61, %v15155_v40  ;;  %v18517_v18 = vpop.eup %18516 }
0x2fcb   :  { %v15179_v2 = vsel %vm15173_vm3, %v18517_v18, %v15177_v42 }
0x2fcc   :  { %16785 = vst [vmem:[%s20010_s16 + $0x8] sm:$0xff] %v15179_v2 }
0x2fcd   :  { %15191 = vsyncpa [#allocation3], 1 }
0x2fce   :  { %15192 = vsyncpa [#allocation5], 1 }
0x2fcf   :  { %15193 = vsyncpa [#allocation8], 1 }
0x2fd0   :  { %15194 = vsyncpa [#allocation11], 1 }
0x2fd1   :  { %15195 = vsyncpa [#allocation14], 1 }
0x2fd2   :  { %15196 = vsyncpa [#allocation17], 1 }
0x2fd3   :  { %15197 = vsyncpa [#allocation20], 1 }

</bundles_post_ra>
